<compile_context>
chip_gen: v6e
topology: v6e:2x2x1
jax: 0.10.0
libtpu: 0.0.40
codegen_flags: <defaults>
</compile_context>

<pallas_src>
import jax
import jax.numpy as jnp
from jax.experimental import pallas as pl
from jax.experimental.pallas import tpu as pltpu


def _encoder_kernel(x_ref, w1_ref, b1_ref, w2_ref, b2_ref, w3_ref, b3_ref,
                    wih_ref, whh_ref, bl_ref, out_ref):
    B, T, N, E = x_ref.shape
    H = whh_ref.shape[0]
    f32 = jnp.float32

    # Small operands, loaded once.
    w1 = w1_ref[...]        # (2H, T)   fused att1 weight ([h; c] order)
    b1 = b1_ref[...]        # (1, T)
    w3 = w3_ref[...]        # (1, T)
    b3 = b3_ref[...]        # (1, 1)
    whh = whh_ref[...]      # (H, 4H)
    bl = bl_ref[...]        # (1, 4H)

    # ---- hoisted x-only projections (off the sequential critical path) ----
    # (B,T,N,E) -> (B*T, N, E): collapses outer dims only (no relayout), then
    # two batched matmuls over all B*T*N rows instead of T tiny ones per step.
    xbt = x_ref[...].reshape(B * T, N, E)
    z2_all = (jnp.einsum('mne,ek->mnk', xbt, w2_ref[...],
                         preferred_element_type=f32)
              + b2_ref[...][None]).reshape(B, T, N, T)            # att2(x)+b2
    xp_all = jnp.einsum('mne,eg->mng', xbt, wih_ref[...],
                        preferred_element_type=f32).reshape(B, T, N, 4 * H)

    h = jnp.zeros((B, H), f32)
    c = jnp.zeros((B, H), f32)

    # T is small and static -> fully unroll the recurrence: no per-step grid /
    # pipeline bookkeeping, full scheduler visibility, all indices static.
    for t in range(T):
        # Input attention. z1 is identical across the N repeated rows of the
        # hidden/cell state, so it reduces to one fused (B,2H)@(2H,T) matmul.
        z1 = jnp.dot(jnp.concatenate([h, c], axis=-1), w1,
                     preferred_element_type=f32) + b1             # (B, T)
        z = jnp.tanh(z1[:, None, :] + z2_all[:, t])               # (B, N, T)
        logits = jnp.sum(z * w3[None], axis=-1) + b3              # (B, N)

        # Softmax over the driving-series axis N (numerically stabilized).
        m = jnp.max(logits, axis=-1, keepdims=True)
        e = jnp.exp(logits - m)
        attn = e * pl.reciprocal(jnp.sum(e, axis=-1, keepdims=True),
                                 approx=False)                    # (B, N)

        # LSTM gates (PyTorch order i, f, g, o).  The x @ W_ih projection was
        # hoisted, so only the attention-weighted reduction over N and the
        # h @ W_hh recurrence matmul remain inside the loop.
        gates = (jnp.sum(attn[:, :, None] * xp_all[:, t], axis=1)
                 + jnp.dot(h, whh, preferred_element_type=f32)
                 + bl)                                            # (B, 4H)
        i_g = jax.nn.sigmoid(gates[:, 0 * H:1 * H])
        f_g = jax.nn.sigmoid(gates[:, 1 * H:2 * H])
        g_g = jnp.tanh(gates[:, 2 * H:3 * H])
        o_g = jax.nn.sigmoid(gates[:, 3 * H:4 * H])
        c = f_g * c + i_g * g_g
        h = o_g * jnp.tanh(c)

        out_ref[:, t, :] = h        # static t -> plain VMEM store; the (B,T,H)
                                    # block is written back to HBM once.


def encoder_forward(input_data, params):
    """input_data: (B, T, N, E) float32 -> (B, T, H) float32."""
    B, T, N, E = input_data.shape
    H = params['whh'].shape[0]
    vmem = pl.BlockSpec(memory_space=pltpu.MemorySpace.VMEM)   # whole array in VMEM

    return pl.pallas_call(
        _encoder_kernel,
        out_shape=jax.ShapeDtypeStruct((B, T, H), jnp.float32),
        in_specs=[vmem] * 10,
        out_specs=vmem,
    )(input_data,
      params['w1'], params['b1'],
      params['w2'], params['b2'],
      params['w3'], params['b3'],
      params['wih'], params['whh'], params['bl'])


def encoder_reference(input_data, params):
    """Pure-JAX reference mirroring the PyTorch forward()."""
    B, T, N, E = input_data.shape
    H = params['whh'].shape[0]
    h = jnp.zeros((B, H), jnp.float32)
    c = jnp.zeros((B, H), jnp.float32)
    outs = []
    for t in range(T):
        x2 = input_data[:, t]                                         # (B, N, E)
        z1 = jnp.concatenate([h, c], axis=-1) @ params['w1'] + params['b1']
        z2 = jnp.einsum('bne,ek->bnk', x2, params['w2']) + params['b2'][None]
        z = jnp.tanh(z1[:, None, :] + z2)
        logits = jnp.sum(z * params['w3'][None], axis=-1) + params['b3']
        attn = jax.nn.softmax(logits, axis=-1)
        xw = jnp.sum(attn[:, :, None] * x2, axis=1)                   # (B, E)
        gates = xw @ params['wih'] + h @ params['whh'] + params['bl']
        i_g = jax.nn.sigmoid(gates[:, :H])
        f_g = jax.nn.sigmoid(gates[:, H:2 * H])
        g_g = jnp.tanh(gates[:, 2 * H:3 * H])
        o_g = jax.nn.sigmoid(gates[:, 3 * H:])
        c = f_g * c + i_g * g_g
        h = o_g * jnp.tanh(c)
        outs.append(h)
    return jnp.stack(outs, axis=1)                                    # (B, T, H)


def make_params(key, input_size, hidden_size, embedding_size, T):
    """Deterministic parameter init matching the module's shapes.

    att1: Linear(2H, T); att2: Linear(E, T); attn3: Linear(T, 1);
    lstm: LSTM(E, H)  (weights ~ N(0, 0.5), biases 0 per init_weight()).
    """
    H, E = hidden_size, embedding_size
    ks = jax.random.split(key, 8)
    att1_w = 0.2 * jax.random.normal(ks[0], (T, 2 * H), jnp.float32)
    att1_b = 0.1 * jax.random.normal(ks[1], (T,), jnp.float32)
    att2_w = 0.2 * jax.random.normal(ks[2], (T, E), jnp.float32)
    att2_b = 0.1 * jax.random.normal(ks[3], (T,), jnp.float32)
    attn3_w = 0.2 * jax.random.normal(ks[4], (1, T), jnp.float32)
    attn3_b = 0.1 * jax.random.normal(ks[5], (1,), jnp.float32)
    w_ih = 0.5 * jax.random.normal(ks[6], (4 * H, E), jnp.float32)    # N(0, 0.5)
    w_hh = 0.5 * jax.random.normal(ks[7], (4 * H, H), jnp.float32)    # N(0, 0.5)
    b_lstm = jnp.zeros((4 * H,), jnp.float32)                         # b_ih + b_hh = 0

    return {
        'w1': att1_w.T,            # (2H, T) — rows [0:H] hidden, [H:2H] cell
        'b1': att1_b[None, :],     # (1, T)
        'w2': att2_w.T,            # (E, T)
        'b2': att2_b[None, :],     # (1, T)
        'w3': attn3_w,             # (1, T)
        'b3': attn3_b[None, :],    # (1, 1)
        'wih': w_ih.T,             # (E, 4H)
        'whh': w_hh.T,             # (H, 4H)
        'bl': b_lstm[None, :],     # (1, 4H)
    }


if __name__ == "__main__":
    # Small, module-consistent shapes:
    # input_data: (batch, T, input_size, embedding_size)
    B, T, N, E, H = 4, 8, 10, 16, 32

    key = jax.random.PRNGKey(0)
    k_x, k_p = jax.random.split(key)
    input_data = jax.random.normal(k_x, (B, T, N, E), jnp.float32)
    params = make_params(k_p, input_size=N, hidden_size=H,
                         embedding_size=E, T=T)

    out = jax.block_until_ready(encoder_forward(input_data, params))
    ref = jax.block_until_ready(encoder_reference(input_data, params))

    assert out.shape == (B, T, H)
    assert jnp.allclose(out, ref, atol=1e-4, rtol=1e-4), "mismatch vs JAX reference"

    print("KERNEL_OK")
</pallas_src>

<mosaic_0001>
module attributes {stable_mosaic.version = 11 : i64} {
  func.func @_encoder_kernel(%arg0: memref<4x8x10x16xf32, #tpu.memory_space<vmem>>, %arg1: memref<64x8xf32, #tpu.memory_space<vmem>>, %arg2: memref<1x8xf32, #tpu.memory_space<vmem>>, %arg3: memref<16x8xf32, #tpu.memory_space<vmem>>, %arg4: memref<1x8xf32, #tpu.memory_space<vmem>>, %arg5: memref<1x8xf32, #tpu.memory_space<vmem>>, %arg6: memref<1x1xf32, #tpu.memory_space<vmem>>, %arg7: memref<16x128xf32, #tpu.memory_space<vmem>>, %arg8: memref<32x128xf32, #tpu.memory_space<vmem>>, %arg9: memref<1x128xf32, #tpu.memory_space<vmem>>, %arg10: memref<4x8x32xf32, #tpu.memory_space<vmem>>) attributes {dimension_semantics = [], scalar_prefetch = 0 : i64, scratch_operands = 0 : i64, tpu.core_type = #tpu.core_type<tc>} {
    %c0 = arith.constant 0 : index
    %c0_0 = arith.constant 0 : index
    %0 = vector.load %arg1[%c0, %c0_0] : memref<64x8xf32, #tpu.memory_space<vmem>>, vector<64x8xf32>
    %c0_1 = arith.constant 0 : index
    %c0_2 = arith.constant 0 : index
    %1 = vector.load %arg2[%c0_1, %c0_2] : memref<1x8xf32, #tpu.memory_space<vmem>>, vector<1x8xf32>
    %c0_3 = arith.constant 0 : index
    %c0_4 = arith.constant 0 : index
    %2 = vector.load %arg5[%c0_3, %c0_4] : memref<1x8xf32, #tpu.memory_space<vmem>>, vector<1x8xf32>
    %c0_5 = arith.constant 0 : index
    %c0_6 = arith.constant 0 : index
    %3 = vector.load %arg6[%c0_5, %c0_6] : memref<1x1xf32, #tpu.memory_space<vmem>>, vector<1x1xf32>
    %c0_7 = arith.constant 0 : index
    %c0_8 = arith.constant 0 : index
    %4 = vector.load %arg8[%c0_7, %c0_8] : memref<32x128xf32, #tpu.memory_space<vmem>>, vector<32x128xf32>
    %c0_9 = arith.constant 0 : index
    %c0_10 = arith.constant 0 : index
    %5 = vector.load %arg9[%c0_9, %c0_10] : memref<1x128xf32, #tpu.memory_space<vmem>>, vector<1x128xf32>
    %c0_11 = arith.constant 0 : index
    %c0_12 = arith.constant 0 : index
    %c0_13 = arith.constant 0 : index
    %c0_14 = arith.constant 0 : index
    %6 = vector.load %arg0[%c0_11, %c0_12, %c0_13, %c0_14] : memref<4x8x10x16xf32, #tpu.memory_space<vmem>>, vector<4x8x10x16xf32>
    %7 = vector.shape_cast %6 : vector<4x8x10x16xf32> to vector<32x10x16xf32>
    %c0_15 = arith.constant 0 : index
    %c0_16 = arith.constant 0 : index
    %8 = vector.load %arg3[%c0_15, %c0_16] : memref<16x8xf32, #tpu.memory_space<vmem>>, vector<16x8xf32>
    "tpu.trace_start"() <{level = 10 : i32, message = "mne,ek->mnk"}> : () -> ()
    %cst = arith.constant dense<0.000000e+00> : vector<32x10x8xf32>
    %9 = tpu.matmul %7, %8, %cst {dimension_numbers = #tpu.dot_dimension_numbers<[2], [0], [0, 1], [1], [0, 0, 0, 1, 1, 1], [], []>} : vector<32x10x16xf32>, vector<16x8xf32>, vector<32x10x8xf32> -> vector<32x10x8xf32>
    "tpu.trace_stop"() : () -> ()
    %c0_17 = arith.constant 0 : index
    %c0_18 = arith.constant 0 : index
    %10 = vector.load %arg4[%c0_17, %c0_18] : memref<1x8xf32, #tpu.memory_space<vmem>>, vector<1x8xf32>
    %11 = vector.shape_cast %10 : vector<1x8xf32> to vector<1x1x8xf32>
    %12 = vector.broadcast %11 : vector<1x1x8xf32> to vector<32x10x8xf32>
    %13 = arith.addf %9, %12 : vector<32x10x8xf32>
    %14 = vector.shape_cast %13 : vector<32x10x8xf32> to vector<4x8x10x8xf32>
    %c0_19 = arith.constant 0 : index
    %c0_20 = arith.constant 0 : index
    %15 = vector.load %arg7[%c0_19, %c0_20] : memref<16x128xf32, #tpu.memory_space<vmem>>, vector<16x128xf32>
    "tpu.trace_start"() <{level = 10 : i32, message = "mne,eg->mng"}> : () -> ()
    %cst_21 = arith.constant dense<0.000000e+00> : vector<32x10x128xf32>
    %16 = tpu.matmul %7, %15, %cst_21 {dimension_numbers = #tpu.dot_dimension_numbers<[2], [0], [0, 1], [1], [0, 0, 0, 1, 1, 1], [], []>} : vector<32x10x16xf32>, vector<16x128xf32>, vector<32x10x128xf32> -> vector<32x10x128xf32>
    "tpu.trace_stop"() : () -> ()
    %17 = vector.shape_cast %16 : vector<32x10x128xf32> to vector<4x8x10x128xf32>
    %cst_22 = arith.constant 0.000000e+00 : f32
    %18 = vector.broadcast %cst_22 : f32 to vector<4x32xf32>
    %cst_23 = arith.constant 0.000000e+00 : f32
    %19 = vector.broadcast %cst_23 : f32 to vector<4x32xf32>
    %20 = tpu.concatenate %18, %19 in 1 : vector<4x32xf32>, vector<4x32xf32> -> vector<4x64xf32>
    %cst_24 = arith.constant dense<0.000000e+00> : vector<4x8xf32>
    %21 = tpu.matmul %20, %0, %cst_24 {dimension_numbers = #tpu.dot_dimension_numbers<[1], [0], [0], [1], [0, 0, 1, 1], [], []>} : vector<4x64xf32>, vector<64x8xf32>, vector<4x8xf32> -> vector<4x8xf32>
    %22 = vector.broadcast %1 : vector<1x8xf32> to vector<4x8xf32>
    %23 = arith.addf %21, %22 : vector<4x8xf32>
    %24 = vector.shape_cast %23 : vector<4x8xf32> to vector<4x1x8xf32>
    %25 = vector.extract_strided_slice %14 {offsets = [0, 0, 0, 0], sizes = [4, 1, 10, 8], strides = [1, 1, 1, 1]} : vector<4x8x10x8xf32> to vector<4x1x10x8xf32>
    %26 = vector.shape_cast %25 : vector<4x1x10x8xf32> to vector<4x10x8xf32>
    %27 = vector.broadcast %24 : vector<4x1x8xf32> to vector<4x10x8xf32>
    %28 = arith.addf %27, %26 : vector<4x10x8xf32>
    %29 = math.tanh %28 : vector<4x10x8xf32>
    %30 = vector.shape_cast %2 : vector<1x8xf32> to vector<1x1x8xf32>
    %31 = vector.broadcast %30 : vector<1x1x8xf32> to vector<4x10x8xf32>
    %32 = arith.mulf %29, %31 : vector<4x10x8xf32>
    %cst_25 = arith.constant dense<0.000000e+00> : vector<4x10xf32>
    %33 = vector.multi_reduction <add>, %32, %cst_25 [2] : vector<4x10x8xf32> to vector<4x10xf32>
    %34 = vector.broadcast %3 : vector<1x1xf32> to vector<4x10xf32>
    %35 = arith.addf %33, %34 : vector<4x10xf32>
    %cst_26 = arith.constant dense<0xFF800000> : vector<4xf32>
    %36 = vector.multi_reduction <maximumf>, %35, %cst_26 [1] : vector<4x10xf32> to vector<4xf32>
    %37 = vector.shape_cast %36 : vector<4xf32> to vector<4x1xf32>
    %38 = vector.broadcast %37 : vector<4x1xf32> to vector<4x10xf32>
    %39 = arith.subf %35, %38 : vector<4x10xf32>
    %40 = math.exp %39 : vector<4x10xf32>
    %cst_27 = arith.constant dense<0.000000e+00> : vector<4xf32>
    %41 = vector.multi_reduction <add>, %40, %cst_27 [1] : vector<4x10xf32> to vector<4xf32>
    %42 = vector.shape_cast %41 : vector<4xf32> to vector<4x1xf32>
    %43 = tpu.reciprocal %42 : vector<4x1xf32> -> vector<4x1xf32>
    %44 = vector.broadcast %43 : vector<4x1xf32> to vector<4x10xf32>
    %45 = arith.mulf %40, %44 : vector<4x10xf32>
    %46 = vector.shape_cast %45 : vector<4x10xf32> to vector<4x10x1xf32>
    %47 = vector.extract_strided_slice %17 {offsets = [0, 0, 0, 0], sizes = [4, 1, 10, 128], strides = [1, 1, 1, 1]} : vector<4x8x10x128xf32> to vector<4x1x10x128xf32>
    %48 = vector.shape_cast %47 : vector<4x1x10x128xf32> to vector<4x10x128xf32>
    %49 = vector.broadcast %46 : vector<4x10x1xf32> to vector<4x10x128xf32>
    %50 = arith.mulf %49, %48 : vector<4x10x128xf32>
    %cst_28 = arith.constant dense<0.000000e+00> : vector<4x128xf32>
    %51 = vector.multi_reduction <add>, %50, %cst_28 [1] : vector<4x10x128xf32> to vector<4x128xf32>
    %cst_29 = arith.constant dense<0.000000e+00> : vector<4x128xf32>
    %52 = tpu.matmul %18, %4, %cst_29 {dimension_numbers = #tpu.dot_dimension_numbers<[1], [0], [0], [1], [0, 0, 1, 1], [], []>} : vector<4x32xf32>, vector<32x128xf32>, vector<4x128xf32> -> vector<4x128xf32>
    %53 = arith.addf %51, %52 : vector<4x128xf32>
    %54 = vector.broadcast %5 : vector<1x128xf32> to vector<4x128xf32>
    %55 = arith.addf %53, %54 : vector<4x128xf32>
    %56 = vector.extract_strided_slice %55 {offsets = [0, 0], sizes = [4, 32], strides = [1, 1]} : vector<4x128xf32> to vector<4x32xf32>
    %57 = arith.negf %56 : vector<4x32xf32>
    %58 = math.exp %57 : vector<4x32xf32>
    %cst_30 = arith.constant 1.000000e+00 : f32
    %59 = vector.broadcast %cst_30 : f32 to vector<4x32xf32>
    %60 = arith.addf %59, %58 : vector<4x32xf32>
    %61 = arith.divf %59, %60 : vector<4x32xf32>
    %62 = vector.extract_strided_slice %55 {offsets = [0, 32], sizes = [4, 32], strides = [1, 1]} : vector<4x128xf32> to vector<4x32xf32>
    %63 = arith.negf %62 : vector<4x32xf32>
    %64 = math.exp %63 : vector<4x32xf32>
    %cst_31 = arith.constant 1.000000e+00 : f32
    %65 = vector.broadcast %cst_31 : f32 to vector<4x32xf32>
    %66 = arith.addf %65, %64 : vector<4x32xf32>
    %67 = arith.divf %65, %66 : vector<4x32xf32>
    %68 = vector.extract_strided_slice %55 {offsets = [0, 64], sizes = [4, 32], strides = [1, 1]} : vector<4x128xf32> to vector<4x32xf32>
    %69 = math.tanh %68 : vector<4x32xf32>
    %70 = vector.extract_strided_slice %55 {offsets = [0, 96], sizes = [4, 32], strides = [1, 1]} : vector<4x128xf32> to vector<4x32xf32>
    %71 = arith.negf %70 : vector<4x32xf32>
    %72 = math.exp %71 : vector<4x32xf32>
    %cst_32 = arith.constant 1.000000e+00 : f32
    %73 = vector.broadcast %cst_32 : f32 to vector<4x32xf32>
    %74 = arith.addf %73, %72 : vector<4x32xf32>
    %75 = arith.divf %73, %74 : vector<4x32xf32>
    %76 = arith.mulf %67, %19 : vector<4x32xf32>
    %77 = arith.mulf %61, %69 : vector<4x32xf32>
    %78 = arith.addf %76, %77 : vector<4x32xf32>
    %79 = math.tanh %78 : vector<4x32xf32>
    %80 = arith.mulf %75, %79 : vector<4x32xf32>
    %c0_33 = arith.constant 0 : index
    %c0_34 = arith.constant 0 : index
    %c0_35 = arith.constant 0 : index
    %81 = vector.load %arg10[%c0_33, %c0_34, %c0_35] : memref<4x8x32xf32, #tpu.memory_space<vmem>>, vector<4x1x32xf32>
    %82 = vector.shape_cast %81 : vector<4x1x32xf32> to vector<4x32xf32>
    %83 = vector.shape_cast %80 : vector<4x32xf32> to vector<4x1x32xf32>
    tpu.vector_store %arg10[%c0_33, %c0_34, %c0_35], %83 {strides = array<i32>} : memref<4x8x32xf32, #tpu.memory_space<vmem>>, vector<4x1x32xf32>,
    %84 = tpu.concatenate %80, %78 in 1 : vector<4x32xf32>, vector<4x32xf32> -> vector<4x64xf32>
    %cst_36 = arith.constant dense<0.000000e+00> : vector<4x8xf32>
    %85 = tpu.matmul %84, %0, %cst_36 {dimension_numbers = #tpu.dot_dimension_numbers<[1], [0], [0], [1], [0, 0, 1, 1], [], []>} : vector<4x64xf32>, vector<64x8xf32>, vector<4x8xf32> -> vector<4x8xf32>
    %86 = vector.broadcast %1 : vector<1x8xf32> to vector<4x8xf32>
    %87 = arith.addf %85, %86 : vector<4x8xf32>
    %88 = vector.shape_cast %87 : vector<4x8xf32> to vector<4x1x8xf32>
    %89 = vector.extract_strided_slice %14 {offsets = [0, 1, 0, 0], sizes = [4, 1, 10, 8], strides = [1, 1, 1, 1]} : vector<4x8x10x8xf32> to vector<4x1x10x8xf32>
    %90 = vector.shape_cast %89 : vector<4x1x10x8xf32> to vector<4x10x8xf32>
    %91 = vector.broadcast %88 : vector<4x1x8xf32> to vector<4x10x8xf32>
    %92 = arith.addf %91, %90 : vector<4x10x8xf32>
    %93 = math.tanh %92 : vector<4x10x8xf32>
    %94 = vector.shape_cast %2 : vector<1x8xf32> to vector<1x1x8xf32>
    %95 = vector.broadcast %94 : vector<1x1x8xf32> to vector<4x10x8xf32>
    %96 = arith.mulf %93, %95 : vector<4x10x8xf32>
    %cst_37 = arith.constant dense<0.000000e+00> : vector<4x10xf32>
    %97 = vector.multi_reduction <add>, %96, %cst_37 [2] : vector<4x10x8xf32> to vector<4x10xf32>
    %98 = vector.broadcast %3 : vector<1x1xf32> to vector<4x10xf32>
    %99 = arith.addf %97, %98 : vector<4x10xf32>
    %cst_38 = arith.constant dense<0xFF800000> : vector<4xf32>
    %100 = vector.multi_reduction <maximumf>, %99, %cst_38 [1] : vector<4x10xf32> to vector<4xf32>
    %101 = vector.shape_cast %100 : vector<4xf32> to vector<4x1xf32>
    %102 = vector.broadcast %101 : vector<4x1xf32> to vector<4x10xf32>
    %103 = arith.subf %99, %102 : vector<4x10xf32>
    %104 = math.exp %103 : vector<4x10xf32>
    %cst_39 = arith.constant dense<0.000000e+00> : vector<4xf32>
    %105 = vector.multi_reduction <add>, %104, %cst_39 [1] : vector<4x10xf32> to vector<4xf32>
    %106 = vector.shape_cast %105 : vector<4xf32> to vector<4x1xf32>
    %107 = tpu.reciprocal %106 : vector<4x1xf32> -> vector<4x1xf32>
    %108 = vector.broadcast %107 : vector<4x1xf32> to vector<4x10xf32>
    %109 = arith.mulf %104, %108 : vector<4x10xf32>
    %110 = vector.shape_cast %109 : vector<4x10xf32> to vector<4x10x1xf32>
    %111 = vector.extract_strided_slice %17 {offsets = [0, 1, 0, 0], sizes = [4, 1, 10, 128], strides = [1, 1, 1, 1]} : vector<4x8x10x128xf32> to vector<4x1x10x128xf32>
    %112 = vector.shape_cast %111 : vector<4x1x10x128xf32> to vector<4x10x128xf32>
    %113 = vector.broadcast %110 : vector<4x10x1xf32> to vector<4x10x128xf32>
    %114 = arith.mulf %113, %112 : vector<4x10x128xf32>
    %cst_40 = arith.constant dense<0.000000e+00> : vector<4x128xf32>
    %115 = vector.multi_reduction <add>, %114, %cst_40 [1] : vector<4x10x128xf32> to vector<4x128xf32>
    %cst_41 = arith.constant dense<0.000000e+00> : vector<4x128xf32>
    %116 = tpu.matmul %80, %4, %cst_41 {dimension_numbers = #tpu.dot_dimension_numbers<[1], [0], [0], [1], [0, 0, 1, 1], [], []>} : vector<4x32xf32>, vector<32x128xf32>, vector<4x128xf32> -> vector<4x128xf32>
    %117 = arith.addf %115, %116 : vector<4x128xf32>
    %118 = vector.broadcast %5 : vector<1x128xf32> to vector<4x128xf32>
    %119 = arith.addf %117, %118 : vector<4x128xf32>
    %120 = vector.extract_strided_slice %119 {offsets = [0, 0], sizes = [4, 32], strides = [1, 1]} : vector<4x128xf32> to vector<4x32xf32>
    %121 = arith.negf %120 : vector<4x32xf32>
    %122 = math.exp %121 : vector<4x32xf32>
    %cst_42 = arith.constant 1.000000e+00 : f32
    %123 = vector.broadcast %cst_42 : f32 to vector<4x32xf32>
    %124 = arith.addf %123, %122 : vector<4x32xf32>
    %125 = arith.divf %123, %124 : vector<4x32xf32>
    %126 = vector.extract_strided_slice %119 {offsets = [0, 32], sizes = [4, 32], strides = [1, 1]} : vector<4x128xf32> to vector<4x32xf32>
    %127 = arith.negf %126 : vector<4x32xf32>
    %128 = math.exp %127 : vector<4x32xf32>
    %cst_43 = arith.constant 1.000000e+00 : f32
    %129 = vector.broadcast %cst_43 : f32 to vector<4x32xf32>
    %130 = arith.addf %129, %128 : vector<4x32xf32>
    %131 = arith.divf %129, %130 : vector<4x32xf32>
    %132 = vector.extract_strided_slice %119 {offsets = [0, 64], sizes = [4, 32], strides = [1, 1]} : vector<4x128xf32> to vector<4x32xf32>
    %133 = math.tanh %132 : vector<4x32xf32>
    %134 = vector.extract_strided_slice %119 {offsets = [0, 96], sizes = [4, 32], strides = [1, 1]} : vector<4x128xf32> to vector<4x32xf32>
    %135 = arith.negf %134 : vector<4x32xf32>
    %136 = math.exp %135 : vector<4x32xf32>
    %cst_44 = arith.constant 1.000000e+00 : f32
    %137 = vector.broadcast %cst_44 : f32 to vector<4x32xf32>
    %138 = arith.addf %137, %136 : vector<4x32xf32>
    %139 = arith.divf %137, %138 : vector<4x32xf32>
    %140 = arith.mulf %131, %78 : vector<4x32xf32>
    %141 = arith.mulf %125, %133 : vector<4x32xf32>
    %142 = arith.addf %140, %141 : vector<4x32xf32>
    %143 = math.tanh %142 : vector<4x32xf32>
    %144 = arith.mulf %139, %143 : vector<4x32xf32>
    %c0_45 = arith.constant 0 : index
    %c1 = arith.constant 1 : index
    %c0_46 = arith.constant 0 : index
    %145 = vector.load %arg10[%c0_45, %c1, %c0_46] : memref<4x8x32xf32, #tpu.memory_space<vmem>>, vector<4x1x32xf32>
    %146 = vector.shape_cast %145 : vector<4x1x32xf32> to vector<4x32xf32>
    %147 = vector.shape_cast %144 : vector<4x32xf32> to vector<4x1x32xf32>
    tpu.vector_store %arg10[%c0_45, %c1, %c0_46], %147 {strides = array<i32>} : memref<4x8x32xf32, #tpu.memory_space<vmem>>, vector<4x1x32xf32>,
    %148 = tpu.concatenate %144, %142 in 1 : vector<4x32xf32>, vector<4x32xf32> -> vector<4x64xf32>
    %cst_47 = arith.constant dense<0.000000e+00> : vector<4x8xf32>
    %149 = tpu.matmul %148, %0, %cst_47 {dimension_numbers = #tpu.dot_dimension_numbers<[1], [0], [0], [1], [0, 0, 1, 1], [], []>} : vector<4x64xf32>, vector<64x8xf32>, vector<4x8xf32> -> vector<4x8xf32>
    %150 = vector.broadcast %1 : vector<1x8xf32> to vector<4x8xf32>
    %151 = arith.addf %149, %150 : vector<4x8xf32>
    %152 = vector.shape_cast %151 : vector<4x8xf32> to vector<4x1x8xf32>
    %153 = vector.extract_strided_slice %14 {offsets = [0, 2, 0, 0], sizes = [4, 1, 10, 8], strides = [1, 1, 1, 1]} : vector<4x8x10x8xf32> to vector<4x1x10x8xf32>
    %154 = vector.shape_cast %153 : vector<4x1x10x8xf32> to vector<4x10x8xf32>
    %155 = vector.broadcast %152 : vector<4x1x8xf32> to vector<4x10x8xf32>
    %156 = arith.addf %155, %154 : vector<4x10x8xf32>
    %157 = math.tanh %156 : vector<4x10x8xf32>
    %158 = vector.shape_cast %2 : vector<1x8xf32> to vector<1x1x8xf32>
    %159 = vector.broadcast %158 : vector<1x1x8xf32> to vector<4x10x8xf32>
    %160 = arith.mulf %157, %159 : vector<4x10x8xf32>
    %cst_48 = arith.constant dense<0.000000e+00> : vector<4x10xf32>
    %161 = vector.multi_reduction <add>, %160, %cst_48 [2] : vector<4x10x8xf32> to vector<4x10xf32>
    %162 = vector.broadcast %3 : vector<1x1xf32> to vector<4x10xf32>
    %163 = arith.addf %161, %162 : vector<4x10xf32>
    %cst_49 = arith.constant dense<0xFF800000> : vector<4xf32>
    %164 = vector.multi_reduction <maximumf>, %163, %cst_49 [1] : vector<4x10xf32> to vector<4xf32>
    %165 = vector.shape_cast %164 : vector<4xf32> to vector<4x1xf32>
    %166 = vector.broadcast %165 : vector<4x1xf32> to vector<4x10xf32>
    %167 = arith.subf %163, %166 : vector<4x10xf32>
    %168 = math.exp %167 : vector<4x10xf32>
    %cst_50 = arith.constant dense<0.000000e+00> : vector<4xf32>
    %169 = vector.multi_reduction <add>, %168, %cst_50 [1] : vector<4x10xf32> to vector<4xf32>
    %170 = vector.shape_cast %169 : vector<4xf32> to vector<4x1xf32>
    %171 = tpu.reciprocal %170 : vector<4x1xf32> -> vector<4x1xf32>
    %172 = vector.broadcast %171 : vector<4x1xf32> to vector<4x10xf32>
    %173 = arith.mulf %168, %172 : vector<4x10xf32>
    %174 = vector.shape_cast %173 : vector<4x10xf32> to vector<4x10x1xf32>
    %175 = vector.extract_strided_slice %17 {offsets = [0, 2, 0, 0], sizes = [4, 1, 10, 128], strides = [1, 1, 1, 1]} : vector<4x8x10x128xf32> to vector<4x1x10x128xf32>
    %176 = vector.shape_cast %175 : vector<4x1x10x128xf32> to vector<4x10x128xf32>
    %177 = vector.broadcast %174 : vector<4x10x1xf32> to vector<4x10x128xf32>
    %178 = arith.mulf %177, %176 : vector<4x10x128xf32>
    %cst_51 = arith.constant dense<0.000000e+00> : vector<4x128xf32>
    %179 = vector.multi_reduction <add>, %178, %cst_51 [1] : vector<4x10x128xf32> to vector<4x128xf32>
    %cst_52 = arith.constant dense<0.000000e+00> : vector<4x128xf32>
    %180 = tpu.matmul %144, %4, %cst_52 {dimension_numbers = #tpu.dot_dimension_numbers<[1], [0], [0], [1], [0, 0, 1, 1], [], []>} : vector<4x32xf32>, vector<32x128xf32>, vector<4x128xf32> -> vector<4x128xf32>
    %181 = arith.addf %179, %180 : vector<4x128xf32>
    %182 = vector.broadcast %5 : vector<1x128xf32> to vector<4x128xf32>
    %183 = arith.addf %181, %182 : vector<4x128xf32>
    %184 = vector.extract_strided_slice %183 {offsets = [0, 0], sizes = [4, 32], strides = [1, 1]} : vector<4x128xf32> to vector<4x32xf32>
    %185 = arith.negf %184 : vector<4x32xf32>
    %186 = math.exp %185 : vector<4x32xf32>
    %cst_53 = arith.constant 1.000000e+00 : f32
    %187 = vector.broadcast %cst_53 : f32 to vector<4x32xf32>
    %188 = arith.addf %187, %186 : vector<4x32xf32>
    %189 = arith.divf %187, %188 : vector<4x32xf32>
    %190 = vector.extract_strided_slice %183 {offsets = [0, 32], sizes = [4, 32], strides = [1, 1]} : vector<4x128xf32> to vector<4x32xf32>
    %191 = arith.negf %190 : vector<4x32xf32>
    %192 = math.exp %191 : vector<4x32xf32>
    %cst_54 = arith.constant 1.000000e+00 : f32
    %193 = vector.broadcast %cst_54 : f32 to vector<4x32xf32>
    %194 = arith.addf %193, %192 : vector<4x32xf32>
    %195 = arith.divf %193, %194 : vector<4x32xf32>
    %196 = vector.extract_strided_slice %183 {offsets = [0, 64], sizes = [4, 32], strides = [1, 1]} : vector<4x128xf32> to vector<4x32xf32>
    %197 = math.tanh %196 : vector<4x32xf32>
    %198 = vector.extract_strided_slice %183 {offsets = [0, 96], sizes = [4, 32], strides = [1, 1]} : vector<4x128xf32> to vector<4x32xf32>
    %199 = arith.negf %198 : vector<4x32xf32>
    %200 = math.exp %199 : vector<4x32xf32>
    %cst_55 = arith.constant 1.000000e+00 : f32
    %201 = vector.broadcast %cst_55 : f32 to vector<4x32xf32>
    %202 = arith.addf %201, %200 : vector<4x32xf32>
    %203 = arith.divf %201, %202 : vector<4x32xf32>
    %204 = arith.mulf %195, %142 : vector<4x32xf32>
    %205 = arith.mulf %189, %197 : vector<4x32xf32>
    %206 = arith.addf %204, %205 : vector<4x32xf32>
    %207 = math.tanh %206 : vector<4x32xf32>
    %208 = arith.mulf %203, %207 : vector<4x32xf32>
    %c0_56 = arith.constant 0 : index
    %c2 = arith.constant 2 : index
    %c0_57 = arith.constant 0 : index
    %209 = vector.load %arg10[%c0_56, %c2, %c0_57] : memref<4x8x32xf32, #tpu.memory_space<vmem>>, vector<4x1x32xf32>
    %210 = vector.shape_cast %209 : vector<4x1x32xf32> to vector<4x32xf32>
    %211 = vector.shape_cast %208 : vector<4x32xf32> to vector<4x1x32xf32>
    tpu.vector_store %arg10[%c0_56, %c2, %c0_57], %211 {strides = array<i32>} : memref<4x8x32xf32, #tpu.memory_space<vmem>>, vector<4x1x32xf32>,
    %212 = tpu.concatenate %208, %206 in 1 : vector<4x32xf32>, vector<4x32xf32> -> vector<4x64xf32>
    %cst_58 = arith.constant dense<0.000000e+00> : vector<4x8xf32>
    %213 = tpu.matmul %212, %0, %cst_58 {dimension_numbers = #tpu.dot_dimension_numbers<[1], [0], [0], [1], [0, 0, 1, 1], [], []>} : vector<4x64xf32>, vector<64x8xf32>, vector<4x8xf32> -> vector<4x8xf32>
    %214 = vector.broadcast %1 : vector<1x8xf32> to vector<4x8xf32>
    %215 = arith.addf %213, %214 : vector<4x8xf32>
    %216 = vector.shape_cast %215 : vector<4x8xf32> to vector<4x1x8xf32>
    %217 = vector.extract_strided_slice %14 {offsets = [0, 3, 0, 0], sizes = [4, 1, 10, 8], strides = [1, 1, 1, 1]} : vector<4x8x10x8xf32> to vector<4x1x10x8xf32>
    %218 = vector.shape_cast %217 : vector<4x1x10x8xf32> to vector<4x10x8xf32>
    %219 = vector.broadcast %216 : vector<4x1x8xf32> to vector<4x10x8xf32>
    %220 = arith.addf %219, %218 : vector<4x10x8xf32>
    %221 = math.tanh %220 : vector<4x10x8xf32>
    %222 = vector.shape_cast %2 : vector<1x8xf32> to vector<1x1x8xf32>
    %223 = vector.broadcast %222 : vector<1x1x8xf32> to vector<4x10x8xf32>
    %224 = arith.mulf %221, %223 : vector<4x10x8xf32>
    %cst_59 = arith.constant dense<0.000000e+00> : vector<4x10xf32>
    %225 = vector.multi_reduction <add>, %224, %cst_59 [2] : vector<4x10x8xf32> to vector<4x10xf32>
    %226 = vector.broadcast %3 : vector<1x1xf32> to vector<4x10xf32>
    %227 = arith.addf %225, %226 : vector<4x10xf32>
    %cst_60 = arith.constant dense<0xFF800000> : vector<4xf32>
    %228 = vector.multi_reduction <maximumf>, %227, %cst_60 [1] : vector<4x10xf32> to vector<4xf32>
    %229 = vector.shape_cast %228 : vector<4xf32> to vector<4x1xf32>
    %230 = vector.broadcast %229 : vector<4x1xf32> to vector<4x10xf32>
    %231 = arith.subf %227, %230 : vector<4x10xf32>
    %232 = math.exp %231 : vector<4x10xf32>
    %cst_61 = arith.constant dense<0.000000e+00> : vector<4xf32>
    %233 = vector.multi_reduction <add>, %232, %cst_61 [1] : vector<4x10xf32> to vector<4xf32>
    %234 = vector.shape_cast %233 : vector<4xf32> to vector<4x1xf32>
    %235 = tpu.reciprocal %234 : vector<4x1xf32> -> vector<4x1xf32>
    %236 = vector.broadcast %235 : vector<4x1xf32> to vector<4x10xf32>
    %237 = arith.mulf %232, %236 : vector<4x10xf32>
    %238 = vector.shape_cast %237 : vector<4x10xf32> to vector<4x10x1xf32>
    %239 = vector.extract_strided_slice %17 {offsets = [0, 3, 0, 0], sizes = [4, 1, 10, 128], strides = [1, 1, 1, 1]} : vector<4x8x10x128xf32> to vector<4x1x10x128xf32>
    %240 = vector.shape_cast %239 : vector<4x1x10x128xf32> to vector<4x10x128xf32>
    %241 = vector.broadcast %238 : vector<4x10x1xf32> to vector<4x10x128xf32>
    %242 = arith.mulf %241, %240 : vector<4x10x128xf32>
    %cst_62 = arith.constant dense<0.000000e+00> : vector<4x128xf32>
    %243 = vector.multi_reduction <add>, %242, %cst_62 [1] : vector<4x10x128xf32> to vector<4x128xf32>
    %cst_63 = arith.constant dense<0.000000e+00> : vector<4x128xf32>
    %244 = tpu.matmul %208, %4, %cst_63 {dimension_numbers = #tpu.dot_dimension_numbers<[1], [0], [0], [1], [0, 0, 1, 1], [], []>} : vector<4x32xf32>, vector<32x128xf32>, vector<4x128xf32> -> vector<4x128xf32>
    %245 = arith.addf %243, %244 : vector<4x128xf32>
    %246 = vector.broadcast %5 : vector<1x128xf32> to vector<4x128xf32>
    %247 = arith.addf %245, %246 : vector<4x128xf32>
    %248 = vector.extract_strided_slice %247 {offsets = [0, 0], sizes = [4, 32], strides = [1, 1]} : vector<4x128xf32> to vector<4x32xf32>
    %249 = arith.negf %248 : vector<4x32xf32>
    %250 = math.exp %249 : vector<4x32xf32>
    %cst_64 = arith.constant 1.000000e+00 : f32
    %251 = vector.broadcast %cst_64 : f32 to vector<4x32xf32>
    %252 = arith.addf %251, %250 : vector<4x32xf32>
    %253 = arith.divf %251, %252 : vector<4x32xf32>
    %254 = vector.extract_strided_slice %247 {offsets = [0, 32], sizes = [4, 32], strides = [1, 1]} : vector<4x128xf32> to vector<4x32xf32>
    %255 = arith.negf %254 : vector<4x32xf32>
    %256 = math.exp %255 : vector<4x32xf32>
    %cst_65 = arith.constant 1.000000e+00 : f32
    %257 = vector.broadcast %cst_65 : f32 to vector<4x32xf32>
    %258 = arith.addf %257, %256 : vector<4x32xf32>
    %259 = arith.divf %257, %258 : vector<4x32xf32>
    %260 = vector.extract_strided_slice %247 {offsets = [0, 64], sizes = [4, 32], strides = [1, 1]} : vector<4x128xf32> to vector<4x32xf32>
    %261 = math.tanh %260 : vector<4x32xf32>
    %262 = vector.extract_strided_slice %247 {offsets = [0, 96], sizes = [4, 32], strides = [1, 1]} : vector<4x128xf32> to vector<4x32xf32>
    %263 = arith.negf %262 : vector<4x32xf32>
    %264 = math.exp %263 : vector<4x32xf32>
    %cst_66 = arith.constant 1.000000e+00 : f32
    %265 = vector.broadcast %cst_66 : f32 to vector<4x32xf32>
    %266 = arith.addf %265, %264 : vector<4x32xf32>
    %267 = arith.divf %265, %266 : vector<4x32xf32>
    %268 = arith.mulf %259, %206 : vector<4x32xf32>
    %269 = arith.mulf %253, %261 : vector<4x32xf32>
    %270 = arith.addf %268, %269 : vector<4x32xf32>
    %271 = math.tanh %270 : vector<4x32xf32>
    %272 = arith.mulf %267, %271 : vector<4x32xf32>
    %c0_67 = arith.constant 0 : index
    %c3 = arith.constant 3 : index
    %c0_68 = arith.constant 0 : index
    %273 = vector.load %arg10[%c0_67, %c3, %c0_68] : memref<4x8x32xf32, #tpu.memory_space<vmem>>, vector<4x1x32xf32>
    %274 = vector.shape_cast %273 : vector<4x1x32xf32> to vector<4x32xf32>
    %275 = vector.shape_cast %272 : vector<4x32xf32> to vector<4x1x32xf32>
    tpu.vector_store %arg10[%c0_67, %c3, %c0_68], %275 {strides = array<i32>} : memref<4x8x32xf32, #tpu.memory_space<vmem>>, vector<4x1x32xf32>,
    %276 = tpu.concatenate %272, %270 in 1 : vector<4x32xf32>, vector<4x32xf32> -> vector<4x64xf32>
    %cst_69 = arith.constant dense<0.000000e+00> : vector<4x8xf32>
    %277 = tpu.matmul %276, %0, %cst_69 {dimension_numbers = #tpu.dot_dimension_numbers<[1], [0], [0], [1], [0, 0, 1, 1], [], []>} : vector<4x64xf32>, vector<64x8xf32>, vector<4x8xf32> -> vector<4x8xf32>
    %278 = vector.broadcast %1 : vector<1x8xf32> to vector<4x8xf32>
    %279 = arith.addf %277, %278 : vector<4x8xf32>
    %280 = vector.shape_cast %279 : vector<4x8xf32> to vector<4x1x8xf32>
    %281 = vector.extract_strided_slice %14 {offsets = [0, 4, 0, 0], sizes = [4, 1, 10, 8], strides = [1, 1, 1, 1]} : vector<4x8x10x8xf32> to vector<4x1x10x8xf32>
    %282 = vector.shape_cast %281 : vector<4x1x10x8xf32> to vector<4x10x8xf32>
    %283 = vector.broadcast %280 : vector<4x1x8xf32> to vector<4x10x8xf32>
    %284 = arith.addf %283, %282 : vector<4x10x8xf32>
    %285 = math.tanh %284 : vector<4x10x8xf32>
    %286 = vector.shape_cast %2 : vector<1x8xf32> to vector<1x1x8xf32>
    %287 = vector.broadcast %286 : vector<1x1x8xf32> to vector<4x10x8xf32>
    %288 = arith.mulf %285, %287 : vector<4x10x8xf32>
    %cst_70 = arith.constant dense<0.000000e+00> : vector<4x10xf32>
    %289 = vector.multi_reduction <add>, %288, %cst_70 [2] : vector<4x10x8xf32> to vector<4x10xf32>
    %290 = vector.broadcast %3 : vector<1x1xf32> to vector<4x10xf32>
    %291 = arith.addf %289, %290 : vector<4x10xf32>
    %cst_71 = arith.constant dense<0xFF800000> : vector<4xf32>
    %292 = vector.multi_reduction <maximumf>, %291, %cst_71 [1] : vector<4x10xf32> to vector<4xf32>
    %293 = vector.shape_cast %292 : vector<4xf32> to vector<4x1xf32>
    %294 = vector.broadcast %293 : vector<4x1xf32> to vector<4x10xf32>
    %295 = arith.subf %291, %294 : vector<4x10xf32>
    %296 = math.exp %295 : vector<4x10xf32>
    %cst_72 = arith.constant dense<0.000000e+00> : vector<4xf32>
    %297 = vector.multi_reduction <add>, %296, %cst_72 [1] : vector<4x10xf32> to vector<4xf32>
    %298 = vector.shape_cast %297 : vector<4xf32> to vector<4x1xf32>
    %299 = tpu.reciprocal %298 : vector<4x1xf32> -> vector<4x1xf32>
    %300 = vector.broadcast %299 : vector<4x1xf32> to vector<4x10xf32>
    %301 = arith.mulf %296, %300 : vector<4x10xf32>
    %302 = vector.shape_cast %301 : vector<4x10xf32> to vector<4x10x1xf32>
    %303 = vector.extract_strided_slice %17 {offsets = [0, 4, 0, 0], sizes = [4, 1, 10, 128], strides = [1, 1, 1, 1]} : vector<4x8x10x128xf32> to vector<4x1x10x128xf32>
    %304 = vector.shape_cast %303 : vector<4x1x10x128xf32> to vector<4x10x128xf32>
    %305 = vector.broadcast %302 : vector<4x10x1xf32> to vector<4x10x128xf32>
    %306 = arith.mulf %305, %304 : vector<4x10x128xf32>
    %cst_73 = arith.constant dense<0.000000e+00> : vector<4x128xf32>
    %307 = vector.multi_reduction <add>, %306, %cst_73 [1] : vector<4x10x128xf32> to vector<4x128xf32>
    %cst_74 = arith.constant dense<0.000000e+00> : vector<4x128xf32>
    %308 = tpu.matmul %272, %4, %cst_74 {dimension_numbers = #tpu.dot_dimension_numbers<[1], [0], [0], [1], [0, 0, 1, 1], [], []>} : vector<4x32xf32>, vector<32x128xf32>, vector<4x128xf32> -> vector<4x128xf32>
    %309 = arith.addf %307, %308 : vector<4x128xf32>
    %310 = vector.broadcast %5 : vector<1x128xf32> to vector<4x128xf32>
    %311 = arith.addf %309, %310 : vector<4x128xf32>
    %312 = vector.extract_strided_slice %311 {offsets = [0, 0], sizes = [4, 32], strides = [1, 1]} : vector<4x128xf32> to vector<4x32xf32>
    %313 = arith.negf %312 : vector<4x32xf32>
    %314 = math.exp %313 : vector<4x32xf32>
    %cst_75 = arith.constant 1.000000e+00 : f32
    %315 = vector.broadcast %cst_75 : f32 to vector<4x32xf32>
    %316 = arith.addf %315, %314 : vector<4x32xf32>
    %317 = arith.divf %315, %316 : vector<4x32xf32>
    %318 = vector.extract_strided_slice %311 {offsets = [0, 32], sizes = [4, 32], strides = [1, 1]} : vector<4x128xf32> to vector<4x32xf32>
    %319 = arith.negf %318 : vector<4x32xf32>
    %320 = math.exp %319 : vector<4x32xf32>
    %cst_76 = arith.constant 1.000000e+00 : f32
    %321 = vector.broadcast %cst_76 : f32 to vector<4x32xf32>
    %322 = arith.addf %321, %320 : vector<4x32xf32>
    %323 = arith.divf %321, %322 : vector<4x32xf32>
    %324 = vector.extract_strided_slice %311 {offsets = [0, 64], sizes = [4, 32], strides = [1, 1]} : vector<4x128xf32> to vector<4x32xf32>
    %325 = math.tanh %324 : vector<4x32xf32>
    %326 = vector.extract_strided_slice %311 {offsets = [0, 96], sizes = [4, 32], strides = [1, 1]} : vector<4x128xf32> to vector<4x32xf32>
    %327 = arith.negf %326 : vector<4x32xf32>
    %328 = math.exp %327 : vector<4x32xf32>
    %cst_77 = arith.constant 1.000000e+00 : f32
    %329 = vector.broadcast %cst_77 : f32 to vector<4x32xf32>
    %330 = arith.addf %329, %328 : vector<4x32xf32>
    %331 = arith.divf %329, %330 : vector<4x32xf32>
    %332 = arith.mulf %323, %270 : vector<4x32xf32>
    %333 = arith.mulf %317, %325 : vector<4x32xf32>
    %334 = arith.addf %332, %333 : vector<4x32xf32>
    %335 = math.tanh %334 : vector<4x32xf32>
    %336 = arith.mulf %331, %335 : vector<4x32xf32>
    %c0_78 = arith.constant 0 : index
    %c4 = arith.constant 4 : index
    %c0_79 = arith.constant 0 : index
    %337 = vector.load %arg10[%c0_78, %c4, %c0_79] : memref<4x8x32xf32, #tpu.memory_space<vmem>>, vector<4x1x32xf32>
    %338 = vector.shape_cast %337 : vector<4x1x32xf32> to vector<4x32xf32>
    %339 = vector.shape_cast %336 : vector<4x32xf32> to vector<4x1x32xf32>
    tpu.vector_store %arg10[%c0_78, %c4, %c0_79], %339 {strides = array<i32>} : memref<4x8x32xf32, #tpu.memory_space<vmem>>, vector<4x1x32xf32>,
    %340 = tpu.concatenate %336, %334 in 1 : vector<4x32xf32>, vector<4x32xf32> -> vector<4x64xf32>
    %cst_80 = arith.constant dense<0.000000e+00> : vector<4x8xf32>
    %341 = tpu.matmul %340, %0, %cst_80 {dimension_numbers = #tpu.dot_dimension_numbers<[1], [0], [0], [1], [0, 0, 1, 1], [], []>} : vector<4x64xf32>, vector<64x8xf32>, vector<4x8xf32> -> vector<4x8xf32>
    %342 = vector.broadcast %1 : vector<1x8xf32> to vector<4x8xf32>
    %343 = arith.addf %341, %342 : vector<4x8xf32>
    %344 = vector.shape_cast %343 : vector<4x8xf32> to vector<4x1x8xf32>
    %345 = vector.extract_strided_slice %14 {offsets = [0, 5, 0, 0], sizes = [4, 1, 10, 8], strides = [1, 1, 1, 1]} : vector<4x8x10x8xf32> to vector<4x1x10x8xf32>
    %346 = vector.shape_cast %345 : vector<4x1x10x8xf32> to vector<4x10x8xf32>
    %347 = vector.broadcast %344 : vector<4x1x8xf32> to vector<4x10x8xf32>
    %348 = arith.addf %347, %346 : vector<4x10x8xf32>
    %349 = math.tanh %348 : vector<4x10x8xf32>
    %350 = vector.shape_cast %2 : vector<1x8xf32> to vector<1x1x8xf32>
    %351 = vector.broadcast %350 : vector<1x1x8xf32> to vector<4x10x8xf32>
    %352 = arith.mulf %349, %351 : vector<4x10x8xf32>
    %cst_81 = arith.constant dense<0.000000e+00> : vector<4x10xf32>
    %353 = vector.multi_reduction <add>, %352, %cst_81 [2] : vector<4x10x8xf32> to vector<4x10xf32>
    %354 = vector.broadcast %3 : vector<1x1xf32> to vector<4x10xf32>
    %355 = arith.addf %353, %354 : vector<4x10xf32>
    %cst_82 = arith.constant dense<0xFF800000> : vector<4xf32>
    %356 = vector.multi_reduction <maximumf>, %355, %cst_82 [1] : vector<4x10xf32> to vector<4xf32>
    %357 = vector.shape_cast %356 : vector<4xf32> to vector<4x1xf32>
    %358 = vector.broadcast %357 : vector<4x1xf32> to vector<4x10xf32>
    %359 = arith.subf %355, %358 : vector<4x10xf32>
    %360 = math.exp %359 : vector<4x10xf32>
    %cst_83 = arith.constant dense<0.000000e+00> : vector<4xf32>
    %361 = vector.multi_reduction <add>, %360, %cst_83 [1] : vector<4x10xf32> to vector<4xf32>
    %362 = vector.shape_cast %361 : vector<4xf32> to vector<4x1xf32>
    %363 = tpu.reciprocal %362 : vector<4x1xf32> -> vector<4x1xf32>
    %364 = vector.broadcast %363 : vector<4x1xf32> to vector<4x10xf32>
    %365 = arith.mulf %360, %364 : vector<4x10xf32>
    %366 = vector.shape_cast %365 : vector<4x10xf32> to vector<4x10x1xf32>
    %367 = vector.extract_strided_slice %17 {offsets = [0, 5, 0, 0], sizes = [4, 1, 10, 128], strides = [1, 1, 1, 1]} : vector<4x8x10x128xf32> to vector<4x1x10x128xf32>
    %368 = vector.shape_cast %367 : vector<4x1x10x128xf32> to vector<4x10x128xf32>
    %369 = vector.broadcast %366 : vector<4x10x1xf32> to vector<4x10x128xf32>
    %370 = arith.mulf %369, %368 : vector<4x10x128xf32>
    %cst_84 = arith.constant dense<0.000000e+00> : vector<4x128xf32>
    %371 = vector.multi_reduction <add>, %370, %cst_84 [1] : vector<4x10x128xf32> to vector<4x128xf32>
    %cst_85 = arith.constant dense<0.000000e+00> : vector<4x128xf32>
    %372 = tpu.matmul %336, %4, %cst_85 {dimension_numbers = #tpu.dot_dimension_numbers<[1], [0], [0], [1], [0, 0, 1, 1], [], []>} : vector<4x32xf32>, vector<32x128xf32>, vector<4x128xf32> -> vector<4x128xf32>
    %373 = arith.addf %371, %372 : vector<4x128xf32>
    %374 = vector.broadcast %5 : vector<1x128xf32> to vector<4x128xf32>
    %375 = arith.addf %373, %374 : vector<4x128xf32>
    %376 = vector.extract_strided_slice %375 {offsets = [0, 0], sizes = [4, 32], strides = [1, 1]} : vector<4x128xf32> to vector<4x32xf32>
    %377 = arith.negf %376 : vector<4x32xf32>
    %378 = math.exp %377 : vector<4x32xf32>
    %cst_86 = arith.constant 1.000000e+00 : f32
    %379 = vector.broadcast %cst_86 : f32 to vector<4x32xf32>
    %380 = arith.addf %379, %378 : vector<4x32xf32>
    %381 = arith.divf %379, %380 : vector<4x32xf32>
    %382 = vector.extract_strided_slice %375 {offsets = [0, 32], sizes = [4, 32], strides = [1, 1]} : vector<4x128xf32> to vector<4x32xf32>
    %383 = arith.negf %382 : vector<4x32xf32>
    %384 = math.exp %383 : vector<4x32xf32>
    %cst_87 = arith.constant 1.000000e+00 : f32
    %385 = vector.broadcast %cst_87 : f32 to vector<4x32xf32>
    %386 = arith.addf %385, %384 : vector<4x32xf32>
    %387 = arith.divf %385, %386 : vector<4x32xf32>
    %388 = vector.extract_strided_slice %375 {offsets = [0, 64], sizes = [4, 32], strides = [1, 1]} : vector<4x128xf32> to vector<4x32xf32>
    %389 = math.tanh %388 : vector<4x32xf32>
    %390 = vector.extract_strided_slice %375 {offsets = [0, 96], sizes = [4, 32], strides = [1, 1]} : vector<4x128xf32> to vector<4x32xf32>
    %391 = arith.negf %390 : vector<4x32xf32>
    %392 = math.exp %391 : vector<4x32xf32>
    %cst_88 = arith.constant 1.000000e+00 : f32
    %393 = vector.broadcast %cst_88 : f32 to vector<4x32xf32>
    %394 = arith.addf %393, %392 : vector<4x32xf32>
    %395 = arith.divf %393, %394 : vector<4x32xf32>
    %396 = arith.mulf %387, %334 : vector<4x32xf32>
    %397 = arith.mulf %381, %389 : vector<4x32xf32>
    %398 = arith.addf %396, %397 : vector<4x32xf32>
    %399 = math.tanh %398 : vector<4x32xf32>
    %400 = arith.mulf %395, %399 : vector<4x32xf32>
    %c0_89 = arith.constant 0 : index
    %c5 = arith.constant 5 : index
    %c0_90 = arith.constant 0 : index
    %401 = vector.load %arg10[%c0_89, %c5, %c0_90] : memref<4x8x32xf32, #tpu.memory_space<vmem>>, vector<4x1x32xf32>
    %402 = vector.shape_cast %401 : vector<4x1x32xf32> to vector<4x32xf32>
    %403 = vector.shape_cast %400 : vector<4x32xf32> to vector<4x1x32xf32>
    tpu.vector_store %arg10[%c0_89, %c5, %c0_90], %403 {strides = array<i32>} : memref<4x8x32xf32, #tpu.memory_space<vmem>>, vector<4x1x32xf32>,
    %404 = tpu.concatenate %400, %398 in 1 : vector<4x32xf32>, vector<4x32xf32> -> vector<4x64xf32>
    %cst_91 = arith.constant dense<0.000000e+00> : vector<4x8xf32>
    %405 = tpu.matmul %404, %0, %cst_91 {dimension_numbers = #tpu.dot_dimension_numbers<[1], [0], [0], [1], [0, 0, 1, 1], [], []>} : vector<4x64xf32>, vector<64x8xf32>, vector<4x8xf32> -> vector<4x8xf32>
    %406 = vector.broadcast %1 : vector<1x8xf32> to vector<4x8xf32>
    %407 = arith.addf %405, %406 : vector<4x8xf32>
    %408 = vector.shape_cast %407 : vector<4x8xf32> to vector<4x1x8xf32>
    %409 = vector.extract_strided_slice %14 {offsets = [0, 6, 0, 0], sizes = [4, 1, 10, 8], strides = [1, 1, 1, 1]} : vector<4x8x10x8xf32> to vector<4x1x10x8xf32>
    %410 = vector.shape_cast %409 : vector<4x1x10x8xf32> to vector<4x10x8xf32>
    %411 = vector.broadcast %408 : vector<4x1x8xf32> to vector<4x10x8xf32>
    %412 = arith.addf %411, %410 : vector<4x10x8xf32>
    %413 = math.tanh %412 : vector<4x10x8xf32>
    %414 = vector.shape_cast %2 : vector<1x8xf32> to vector<1x1x8xf32>
    %415 = vector.broadcast %414 : vector<1x1x8xf32> to vector<4x10x8xf32>
    %416 = arith.mulf %413, %415 : vector<4x10x8xf32>
    %cst_92 = arith.constant dense<0.000000e+00> : vector<4x10xf32>
    %417 = vector.multi_reduction <add>, %416, %cst_92 [2] : vector<4x10x8xf32> to vector<4x10xf32>
    %418 = vector.broadcast %3 : vector<1x1xf32> to vector<4x10xf32>
    %419 = arith.addf %417, %418 : vector<4x10xf32>
    %cst_93 = arith.constant dense<0xFF800000> : vector<4xf32>
    %420 = vector.multi_reduction <maximumf>, %419, %cst_93 [1] : vector<4x10xf32> to vector<4xf32>
    %421 = vector.shape_cast %420 : vector<4xf32> to vector<4x1xf32>
    %422 = vector.broadcast %421 : vector<4x1xf32> to vector<4x10xf32>
    %423 = arith.subf %419, %422 : vector<4x10xf32>
    %424 = math.exp %423 : vector<4x10xf32>
    %cst_94 = arith.constant dense<0.000000e+00> : vector<4xf32>
    %425 = vector.multi_reduction <add>, %424, %cst_94 [1] : vector<4x10xf32> to vector<4xf32>
    %426 = vector.shape_cast %425 : vector<4xf32> to vector<4x1xf32>
    %427 = tpu.reciprocal %426 : vector<4x1xf32> -> vector<4x1xf32>
    %428 = vector.broadcast %427 : vector<4x1xf32> to vector<4x10xf32>
    %429 = arith.mulf %424, %428 : vector<4x10xf32>
    %430 = vector.shape_cast %429 : vector<4x10xf32> to vector<4x10x1xf32>
    %431 = vector.extract_strided_slice %17 {offsets = [0, 6, 0, 0], sizes = [4, 1, 10, 128], strides = [1, 1, 1, 1]} : vector<4x8x10x128xf32> to vector<4x1x10x128xf32>
    %432 = vector.shape_cast %431 : vector<4x1x10x128xf32> to vector<4x10x128xf32>
    %433 = vector.broadcast %430 : vector<4x10x1xf32> to vector<4x10x128xf32>
    %434 = arith.mulf %433, %432 : vector<4x10x128xf32>
    %cst_95 = arith.constant dense<0.000000e+00> : vector<4x128xf32>
    %435 = vector.multi_reduction <add>, %434, %cst_95 [1] : vector<4x10x128xf32> to vector<4x128xf32>
    %cst_96 = arith.constant dense<0.000000e+00> : vector<4x128xf32>
    %436 = tpu.matmul %400, %4, %cst_96 {dimension_numbers = #tpu.dot_dimension_numbers<[1], [0], [0], [1], [0, 0, 1, 1], [], []>} : vector<4x32xf32>, vector<32x128xf32>, vector<4x128xf32> -> vector<4x128xf32>
    %437 = arith.addf %435, %436 : vector<4x128xf32>
    %438 = vector.broadcast %5 : vector<1x128xf32> to vector<4x128xf32>
    %439 = arith.addf %437, %438 : vector<4x128xf32>
    %440 = vector.extract_strided_slice %439 {offsets = [0, 0], sizes = [4, 32], strides = [1, 1]} : vector<4x128xf32> to vector<4x32xf32>
    %441 = arith.negf %440 : vector<4x32xf32>
    %442 = math.exp %441 : vector<4x32xf32>
    %cst_97 = arith.constant 1.000000e+00 : f32
    %443 = vector.broadcast %cst_97 : f32 to vector<4x32xf32>
    %444 = arith.addf %443, %442 : vector<4x32xf32>
    %445 = arith.divf %443, %444 : vector<4x32xf32>
    %446 = vector.extract_strided_slice %439 {offsets = [0, 32], sizes = [4, 32], strides = [1, 1]} : vector<4x128xf32> to vector<4x32xf32>
    %447 = arith.negf %446 : vector<4x32xf32>
    %448 = math.exp %447 : vector<4x32xf32>
    %cst_98 = arith.constant 1.000000e+00 : f32
    %449 = vector.broadcast %cst_98 : f32 to vector<4x32xf32>
    %450 = arith.addf %449, %448 : vector<4x32xf32>
    %451 = arith.divf %449, %450 : vector<4x32xf32>
    %452 = vector.extract_strided_slice %439 {offsets = [0, 64], sizes = [4, 32], strides = [1, 1]} : vector<4x128xf32> to vector<4x32xf32>
    %453 = math.tanh %452 : vector<4x32xf32>
    %454 = vector.extract_strided_slice %439 {offsets = [0, 96], sizes = [4, 32], strides = [1, 1]} : vector<4x128xf32> to vector<4x32xf32>
    %455 = arith.negf %454 : vector<4x32xf32>
    %456 = math.exp %455 : vector<4x32xf32>
    %cst_99 = arith.constant 1.000000e+00 : f32
    %457 = vector.broadcast %cst_99 : f32 to vector<4x32xf32>
    %458 = arith.addf %457, %456 : vector<4x32xf32>
    %459 = arith.divf %457, %458 : vector<4x32xf32>
    %460 = arith.mulf %451, %398 : vector<4x32xf32>
    %461 = arith.mulf %445, %453 : vector<4x32xf32>
    %462 = arith.addf %460, %461 : vector<4x32xf32>
    %463 = math.tanh %462 : vector<4x32xf32>
    %464 = arith.mulf %459, %463 : vector<4x32xf32>
    %c0_100 = arith.constant 0 : index
    %c6 = arith.constant 6 : index
    %c0_101 = arith.constant 0 : index
    %465 = vector.load %arg10[%c0_100, %c6, %c0_101] : memref<4x8x32xf32, #tpu.memory_space<vmem>>, vector<4x1x32xf32>
    %466 = vector.shape_cast %465 : vector<4x1x32xf32> to vector<4x32xf32>
    %467 = vector.shape_cast %464 : vector<4x32xf32> to vector<4x1x32xf32>
    tpu.vector_store %arg10[%c0_100, %c6, %c0_101], %467 {strides = array<i32>} : memref<4x8x32xf32, #tpu.memory_space<vmem>>, vector<4x1x32xf32>,
    %468 = tpu.concatenate %464, %462 in 1 : vector<4x32xf32>, vector<4x32xf32> -> vector<4x64xf32>
    %cst_102 = arith.constant dense<0.000000e+00> : vector<4x8xf32>
    %469 = tpu.matmul %468, %0, %cst_102 {dimension_numbers = #tpu.dot_dimension_numbers<[1], [0], [0], [1], [0, 0, 1, 1], [], []>} : vector<4x64xf32>, vector<64x8xf32>, vector<4x8xf32> -> vector<4x8xf32>
    %470 = vector.broadcast %1 : vector<1x8xf32> to vector<4x8xf32>
    %471 = arith.addf %469, %470 : vector<4x8xf32>
    %472 = vector.shape_cast %471 : vector<4x8xf32> to vector<4x1x8xf32>
    %473 = vector.extract_strided_slice %14 {offsets = [0, 7, 0, 0], sizes = [4, 1, 10, 8], strides = [1, 1, 1, 1]} : vector<4x8x10x8xf32> to vector<4x1x10x8xf32>
    %474 = vector.shape_cast %473 : vector<4x1x10x8xf32> to vector<4x10x8xf32>
    %475 = vector.broadcast %472 : vector<4x1x8xf32> to vector<4x10x8xf32>
    %476 = arith.addf %475, %474 : vector<4x10x8xf32>
    %477 = math.tanh %476 : vector<4x10x8xf32>
    %478 = vector.shape_cast %2 : vector<1x8xf32> to vector<1x1x8xf32>
    %479 = vector.broadcast %478 : vector<1x1x8xf32> to vector<4x10x8xf32>
    %480 = arith.mulf %477, %479 : vector<4x10x8xf32>
    %cst_103 = arith.constant dense<0.000000e+00> : vector<4x10xf32>
    %481 = vector.multi_reduction <add>, %480, %cst_103 [2] : vector<4x10x8xf32> to vector<4x10xf32>
    %482 = vector.broadcast %3 : vector<1x1xf32> to vector<4x10xf32>
    %483 = arith.addf %481, %482 : vector<4x10xf32>
    %cst_104 = arith.constant dense<0xFF800000> : vector<4xf32>
    %484 = vector.multi_reduction <maximumf>, %483, %cst_104 [1] : vector<4x10xf32> to vector<4xf32>
    %485 = vector.shape_cast %484 : vector<4xf32> to vector<4x1xf32>
    %486 = vector.broadcast %485 : vector<4x1xf32> to vector<4x10xf32>
    %487 = arith.subf %483, %486 : vector<4x10xf32>
    %488 = math.exp %487 : vector<4x10xf32>
    %cst_105 = arith.constant dense<0.000000e+00> : vector<4xf32>
    %489 = vector.multi_reduction <add>, %488, %cst_105 [1] : vector<4x10xf32> to vector<4xf32>
    %490 = vector.shape_cast %489 : vector<4xf32> to vector<4x1xf32>
    %491 = tpu.reciprocal %490 : vector<4x1xf32> -> vector<4x1xf32>
    %492 = vector.broadcast %491 : vector<4x1xf32> to vector<4x10xf32>
    %493 = arith.mulf %488, %492 : vector<4x10xf32>
    %494 = vector.shape_cast %493 : vector<4x10xf32> to vector<4x10x1xf32>
    %495 = vector.extract_strided_slice %17 {offsets = [0, 7, 0, 0], sizes = [4, 1, 10, 128], strides = [1, 1, 1, 1]} : vector<4x8x10x128xf32> to vector<4x1x10x128xf32>
    %496 = vector.shape_cast %495 : vector<4x1x10x128xf32> to vector<4x10x128xf32>
    %497 = vector.broadcast %494 : vector<4x10x1xf32> to vector<4x10x128xf32>
    %498 = arith.mulf %497, %496 : vector<4x10x128xf32>
    %cst_106 = arith.constant dense<0.000000e+00> : vector<4x128xf32>
    %499 = vector.multi_reduction <add>, %498, %cst_106 [1] : vector<4x10x128xf32> to vector<4x128xf32>
    %cst_107 = arith.constant dense<0.000000e+00> : vector<4x128xf32>
    %500 = tpu.matmul %464, %4, %cst_107 {dimension_numbers = #tpu.dot_dimension_numbers<[1], [0], [0], [1], [0, 0, 1, 1], [], []>} : vector<4x32xf32>, vector<32x128xf32>, vector<4x128xf32> -> vector<4x128xf32>
    %501 = arith.addf %499, %500 : vector<4x128xf32>
    %502 = vector.broadcast %5 : vector<1x128xf32> to vector<4x128xf32>
    %503 = arith.addf %501, %502 : vector<4x128xf32>
    %504 = vector.extract_strided_slice %503 {offsets = [0, 0], sizes = [4, 32], strides = [1, 1]} : vector<4x128xf32> to vector<4x32xf32>
    %505 = arith.negf %504 : vector<4x32xf32>
    %506 = math.exp %505 : vector<4x32xf32>
    %cst_108 = arith.constant 1.000000e+00 : f32
    %507 = vector.broadcast %cst_108 : f32 to vector<4x32xf32>
    %508 = arith.addf %507, %506 : vector<4x32xf32>
    %509 = arith.divf %507, %508 : vector<4x32xf32>
    %510 = vector.extract_strided_slice %503 {offsets = [0, 32], sizes = [4, 32], strides = [1, 1]} : vector<4x128xf32> to vector<4x32xf32>
    %511 = arith.negf %510 : vector<4x32xf32>
    %512 = math.exp %511 : vector<4x32xf32>
    %cst_109 = arith.constant 1.000000e+00 : f32
    %513 = vector.broadcast %cst_109 : f32 to vector<4x32xf32>
    %514 = arith.addf %513, %512 : vector<4x32xf32>
    %515 = arith.divf %513, %514 : vector<4x32xf32>
    %516 = vector.extract_strided_slice %503 {offsets = [0, 64], sizes = [4, 32], strides = [1, 1]} : vector<4x128xf32> to vector<4x32xf32>
    %517 = math.tanh %516 : vector<4x32xf32>
    %518 = vector.extract_strided_slice %503 {offsets = [0, 96], sizes = [4, 32], strides = [1, 1]} : vector<4x128xf32> to vector<4x32xf32>
    %519 = arith.negf %518 : vector<4x32xf32>
    %520 = math.exp %519 : vector<4x32xf32>
    %cst_110 = arith.constant 1.000000e+00 : f32
    %521 = vector.broadcast %cst_110 : f32 to vector<4x32xf32>
    %522 = arith.addf %521, %520 : vector<4x32xf32>
    %523 = arith.divf %521, %522 : vector<4x32xf32>
    %524 = arith.mulf %515, %462 : vector<4x32xf32>
    %525 = arith.mulf %509, %517 : vector<4x32xf32>
    %526 = arith.addf %524, %525 : vector<4x32xf32>
    %527 = math.tanh %526 : vector<4x32xf32>
    %528 = arith.mulf %523, %527 : vector<4x32xf32>
    %c0_111 = arith.constant 0 : index
    %c7 = arith.constant 7 : index
    %c0_112 = arith.constant 0 : index
    %529 = vector.load %arg10[%c0_111, %c7, %c0_112] : memref<4x8x32xf32, #tpu.memory_space<vmem>>, vector<4x1x32xf32>
    %530 = vector.shape_cast %529 : vector<4x1x32xf32> to vector<4x32xf32>
    %531 = vector.shape_cast %528 : vector<4x32xf32> to vector<4x1x32xf32>
    tpu.vector_store %arg10[%c0_111, %c7, %c0_112], %531 {strides = array<i32>} : memref<4x8x32xf32, #tpu.memory_space<vmem>>, vector<4x1x32xf32>,
    return
  }
}

</mosaic_0001>

<bundles_post_ra>
// kernel: tpu_custom_call.1
= control target key start
LH: loop header
LB: loop body
LE: loop exit
PB: predicated region body
PF: predicated region fallthrough
CT: control target
= control target key end

     0   :  { %s15821_s0 = inlined_call_operand.vmem [shape: f32[4,8,10,16], index: 0, kind: input, shape index: {}]   ;;  %s15822_s1 = inlined_call_operand.vmem [shape: f32[64,8], index: 1, kind: input, shape index: {}]   ;;  %s15823_s2 = inlined_call_operand.vmem [shape: f32[1,8], index: 2, kind: input, shape index: {}]   ;;  %s15824_s3 = inlined_call_operand.vmem [shape: f32[16,8], index: 3, kind: input, shape index: {}]   ;;  %s15825_s4 = inlined_call_operand.vmem [shape: f32[1,8], index: 4, kind: input, shape index: {}]   ;;  %s15826_s5 = inlined_call_operand.vmem [shape: f32[1,8], index: 5, kind: input, shape index: {}]   ;;  %s15827_s6 = inlined_call_operand.<no memory space> [shape: f32[1,1], index: 6, kind: input, shape index: {}]   ;;  %s15828_s7 = inlined_call_operand.vmem [shape: f32[16,128], index: 7, kind: input, shape index: {}]   ;;  %s15829_s8 = inlined_call_operand.vmem [shape: f32[32,128], index: 8, kind: input, shape index: {}]   ;;  %s15830_s9 = inlined_call_operand.vmem [shape: f32[1,128], index: 9, kind: input, shape index: {}]   ;;  %s15831_s10 = inlined_call_operand.hbm [shape: f32[4,8,32], index: 10, kind: output, shape index: {}]  }
   0x1   :  { %v15_v0 = vstv %s15827_s6 }
   0x2   :  { %16 = vst [vmem:[#allocation2] sm:$0x1] %v15_v0 }
   0x3   :  { %v119_v1 = vld [vmem:[%s15824_s3 + $0x8] sm:$0xff]  ;;  %v118_v2 = vld [vmem:[%s15824_s3] sm:$0xff]  ;;  %v15832_v4 = vlaneseq  ;;  %v12270_v5 = vmov 1983009808   ;;  %v56_v7 = vld [vmem:[%s15821_s0 + $0x10] sm:$0xff]  ;;  %v15833_v18 = vmov 0.0  }
   0x4   :  { %v54_v3 = vld [vmem:[%s15821_s0] sm:$0xff]  ;;  %11257 = vmatprep.subr.mxu0 %v119_v1  ;;  %v192_v6 = vunpack.c.l.s4 %v12270_v5  ;;  %11625 = vmatprep.subr.mxu1 %v119_v1  ;;  %v214_v11 = vcombine.high %v56_v7, %v56_v7  ;;  %v60_v13 = vld [vmem:[%s15821_s0 + $0x30] sm:$0xff]  ;;  %vm1705_vm0 = vcmask 130048   ;;  %v12408_v0 = vld [vmem:[%s15822_s1 + $0x38] sm:$0xff] }
   0x5   :  { %11258 = vmatpush3.msra.mxu0 %v119_v1  ;;  %v12351_v8 = vshrl.u32 %v15832_v4, 7  ;;  %11627 = vmatpush3.msra.mxu1 %v119_v1  ;;  %v190_v9 = vcombine.high %v54_v3, %v54_v3  ;;  %v58_v12 = vld [vmem:[%s15821_s0 + $0x20] sm:$0xff]  ;;  %v262_v15 = vcombine.high %v60_v13, %v60_v13  ;;  %v64_v19 = vld [vmem:[%s15821_s0 + $0x50] sm:$0xff] }
   0x6   :  { %11259 = vmatprep.subr.mxu0 %v118_v2  ;;  %v193_v10 = vunpack.c.0.s8 %v192_v6  ;;  %11626 = vmatprep.subr.mxu1 %v118_v2  ;;  %v238_v14 = vcombine.high %v58_v12, %v58_v12  ;;  %v62_v16 = vld [vmem:[%s15821_s0 + $0x40] sm:$0xff]  ;;  %v10899_v21 = vld.sshfl [vmem:[%s15821_s0 + $0x8] sm:$0x3 pattern:$0x76325410]  ;;  %v310_v23 = vcombine.high %v64_v19, %v64_v19 }
   0x7   :  { %11260 = vmatpush3.msra.mxu0 %v118_v2  ;;  %11628 = vmatpush3.msra.mxu1 %v118_v2  ;;  %v66_v20 = vld [vmem:[%s15821_s0 + $0x60] sm:$0xff]  ;;  %v286_v22 = vcombine.high %v62_v16, %v62_v16  ;;  %v10901_v29 = vld.sshfl [vmem:[%s15821_s0 + $0x28] sm:$0x3 pattern:$0x76325410] }
   0x8   :  { %v12363_v17 = vsub.s32 %v193_v10, %v12351_v8  ;;  %11385 = vmatprep.subr.mxu0 %v15833_v18  ;;  %v334_v24 = vcombine.high %v66_v20, %v66_v20  ;;  %v10900_v38 = vld.sshfl [vmem:[%s15821_s0 + $0x18] sm:$0x3 pattern:$0x76325410] }
   0x9   :  { %v10902_v54 = vld.sshfl [vmem:[%s15821_s0 + $0x38] sm:$0x3 pattern:$0x76325410] }
   0xa   :  { %v197_v25 = vrot.slane %v54_v3, %v12363_v17  ;;  %v204_v26 = vrot.slane %v190_v9, %v12363_v17  ;;  %v221_v27 = vrot.slane %v56_v7, %v12363_v17  ;;  %v228_v28 = vrot.slane %v214_v11, %v12363_v17  ;;  %v10903_v6 = vld.sshfl [vmem:[%s15821_s0 + $0x48] sm:$0x3 pattern:$0x76325410] }
   0xb   :  { %v245_v30 = vrot.slane %v58_v12, %v12363_v17  ;;  %v252_v31 = vrot.slane %v238_v14, %v12363_v17  ;;  %v269_v32 = vrot.slane %v60_v13, %v12363_v17  ;;  %v276_v33 = vrot.slane %v262_v15, %v12363_v17  ;;  %v12429_v14 = vld [vmem:[%s15822_s1 + $0x30] sm:$0xff] }
   0xc   :  { %v205_v34 = vcombine.high %v197_v25, %v197_v25  ;;  %v206_v35 = vcombine.high %v204_v26, %v204_v26  ;;  %v229_v36 = vcombine.high %v221_v27, %v221_v27  ;;  %v992_v37 = vcombine.low %v10899_v21, %v221_v27 }
   0xd   :  { %v230_v39 = vcombine.high %v228_v28, %v228_v28  ;;  %v253_v40 = vcombine.high %v245_v30, %v245_v30  ;;  %v254_v41 = vcombine.high %v252_v31, %v252_v31  ;;  %v1027_v42 = vcombine.low %v10901_v29, %v269_v32 }
   0xe   :  { %v975_v43 = vcombine.low %v197_v25, %v205_v34  ;;  %v976_v44 = vcombine.low %v204_v26, %v206_v35  ;;  %v993_v45 = vcombine.low %v229_v36, %v228_v28  ;;  %v1000_v46 = vrot.slane %v992_v37, %v12363_v17 }
   0xf   :  { %v1009_v47 = vcombine.low %v230_v39, %v10900_v38  ;;  %v1010_v48 = vcombine.low %v245_v30, %v253_v40  ;;  %v1026_v49 = vcombine.low %v252_v31, %v254_v41  ;;  %v1041_v50 = vrot.slane %v1027_v42, %v12363_v17  ;;  %v10905_v31 = vld.sshfl [vmem:[%s15821_s0 + $0x68] sm:$0x3 pattern:$0x76325410]  ;;  %v70_v41 = vld [vmem:[%s15821_s0 + $0x80] sm:$0xff] }
  0x10   :  { %v983_v51 = vrot.slane %v975_v43, %v12363_v17  ;;  %v990_v52 = vrot.slane %v976_v44, %v12363_v17  ;;  %v1007_v53 = vrot.slane %v993_v45, %v12363_v17  ;;  %v277_v55 = vcombine.high %v269_v32, %v269_v32 }
  0x11   :  { %v1017_v56 = vrot.slane %v1009_v47, %v12363_v17  ;;  %v1024_v57 = vrot.slane %v1010_v48, %v12363_v17  ;;  %v1034_v58 = vrot.slane %v1026_v49, %v12363_v17  ;;  %v278_v59 = vcombine.high %v276_v33, %v276_v33 }
  0x12   :  { %v12400_v60 = vcombine.low %v983_v51, %v990_v52  ;;  %v12402_v61 = vcombine.low %v1000_v46, %v1007_v53  ;;  %v1043_v62 = vcombine.low %v277_v55, %v276_v33  ;;  %v293_v63 = vrot.slane %v62_v16, %v12363_v17  ;;  %v12454_v33 = vld [vmem:[%s15822_s1 + $0x28] sm:$0xff]  ;;  %v72_v46 = vld [vmem:[%s15821_s0 + $0x90] sm:$0xff] }
  0x13   :  { %v12410_v1 = vcombine.low %v1017_v56, %v1024_v57  ;;  %v12412_v2 = vcombine.low %v1034_v58, %v1041_v50  ;;  %v1044_v3 = vcombine.low %v278_v59, %v10902_v54  ;;  %v300_v5 = vrot.slane %v286_v22, %v12363_v17 }
  0x14   :  { %11261 = vmatprep.mubr.msk.f32.mxu0 %vm1705_vm0, %v12400_v60  ;;  %v1051_v7 = vrot.slane %v1043_v62, %v12363_v17  ;;  %v301_v9 = vcombine.high %v293_v63, %v293_v63  ;;  %v317_v10 = vrot.slane %v64_v19, %v12363_v17  ;;  %v324_v11 = vrot.slane %v310_v23, %v12363_v17  ;;  %v10904_v23 = vld.sshfl [vmem:[%s15821_s0 + $0x58] sm:$0x3 pattern:$0x76325410] }
  0x15   :  { %11262 = vmatmul.mubr.msk.f32.vlgmr.msra.gmra.mxu0 %vm1705_vm0, %v12402_v61  ;;  %v1058_v12 = vrot.slane %v1044_v3, %v12363_v17  ;;  %v302_v13 = vcombine.high %v300_v5, %v300_v5  ;;  %v341_v15 = vrot.slane %v66_v20, %v12363_v17  ;;  %v348_v16 = vrot.slane %v334_v24, %v12363_v17  ;;  %v68_v24 = vld [vmem:[%s15821_s0 + $0x70] sm:$0xff] }
  0x16   :  { %11386 = vmatpush3.msra.mxu0 %v12408_v0  ;;  %11264 = vmatprep.mubr.msk.f32.mxu0 %vm1705_vm0, %v12410_v1  ;;  %v1060_v19 = vcombine.low %v293_v63, %v301_v9  ;;  %v325_v21 = vcombine.high %v317_v10, %v317_v10  ;;  %v1077_v22 = vcombine.low %v10903_v6, %v317_v10 }
  0x17   :  { %v12439_v25 = vcombine.low %v1051_v7, %v1058_v12  ;;  %v1061_v26 = vcombine.low %v300_v5, %v302_v13  ;;  %11387 = vmatprep.subr.mxu0 %v15833_v18  ;;  %v326_v20 = vcombine.high %v324_v11, %v324_v11  ;;  %v349_v27 = vcombine.high %v341_v15, %v341_v15 }
  0x18   :  { %v1068_v28 = vrot.slane %v1060_v19, %v12363_v17  ;;  %11388 = vmatpush3.msra.mxu0 %v12429_v14  ;;  %v1078_v29 = vcombine.low %v325_v21, %v324_v11  ;;  %v1085_v30 = vrot.slane %v1077_v22, %v12363_v17  ;;  %v350_v32 = vcombine.high %v348_v16, %v348_v16 }
  0x19   :  { %11265 = vmatmul.mubr.msk.f32.gmra.mxu0 %vm1705_vm0, %v12412_v2  ;;  %v1075_v34 = vrot.slane %v1061_v26, %v12363_v17  ;;  %v1094_v35 = vcombine.low %v326_v20, %v10904_v23  ;;  %v1095_v36 = vcombine.low %v341_v15, %v349_v27  ;;  %v365_v37 = vrot.slane %v68_v24, %v12363_v17 }
  0x1a   :  { %11267 = vmatprep.mubr.msk.f32.mxu0 %vm1705_vm0, %v12439_v25  ;;  %v1092_v38 = vrot.slane %v1078_v29, %v12363_v17  ;;  %v1111_v39 = vcombine.low %v348_v16, %v350_v32  ;;  %v358_v40 = vcombine.high %v68_v24, %v68_v24  ;;  %11389 = vmatprep.subr.mxu0 %v15833_v18 }
  0x1b   :  { %v12467_v42 = vcombine.low %v1068_v28, %v1075_v34  ;;  %v1102_v43 = vrot.slane %v1094_v35, %v12363_v17  ;;  %v1109_v44 = vrot.slane %v1095_v36, %v12363_v17  ;;  %v1112_v45 = vcombine.low %v10905_v31, %v365_v37  ;;  %11390 = vmatpush3.msra.mxu0 %v12454_v33 }
  0x1c   :  { %17 = vsyncpa [#allocation4], 0  ;;  %v12475_v47 = vcombine.low %v1085_v30, %v1092_v38  ;;  %v1119_v48 = vrot.slane %v1111_v39, %v12363_v17  ;;  %v372_v49 = vrot.slane %v358_v40, %v12363_v17  ;;  %v373_v50 = vcombine.high %v365_v37, %v365_v37  ;;  %v74_v51 = vld [vmem:[%s15821_s0 + $0xa0] sm:$0xff]  ;;  %11391 = vmatprep.subr.mxu0 %v15833_v18  ;;  %v12514_v15 = vld [vmem:[%s15822_s1 + $0x18] sm:$0xff]  ;;  %s12275_s24 = smov 64   ;;  %s12276_s25 = smov 32  }
  0x1d   :  { %v12486_v52 = vld [vmem:[%s15822_s1 + $0x20] sm:$0xff]  ;;  %11268 = vmatmul.mubr.msk.f32.gmra.mxu0 %vm1705_vm0, %v12467_v42  ;;  %v12490_v53 = vcombine.low %v1102_v43, %v1109_v44  ;;  %v1126_v54 = vrot.slane %v1112_v45, %v12363_v17  ;;  %v10906_v55 = vld.sshfl [vmem:[%s15821_s0 + $0x78] sm:$0x3 pattern:$0x76325410]  ;;  %v382_v56 = vcombine.high %v70_v41, %v70_v41  ;;  %v389_v57 = vrot.slane %v70_v41, %v12363_v17  ;;  %v76_v24 = vld [vmem:[%s15821_s0 + $0xb0] sm:$0xff] }
  0x1e   :  { %11270 = vmatprep.mubr.msk.f32.mxu0 %vm1705_vm0, %v12475_v47  ;;  %v374_v58 = vcombine.high %v372_v49, %v372_v49  ;;  %v1128_v59 = vcombine.low %v373_v50, %v372_v49  ;;  %v10907_v62 = vld.sshfl [vmem:[%s15821_s0 + $0x88] sm:$0x3 pattern:$0x76325410]  ;;  %v406_v63 = vcombine.high %v72_v46, %v72_v46  ;;  %v413_v3 = vrot.slane %v72_v46, %v12363_v17  ;;  %v12530_v29 = vld [vmem:[%s15822_s1 + $0x10] sm:$0xff]  ;;  %v78_v35 = vld [vmem:[%s15821_s0 + $0xc0] sm:$0xff] }
  0x1f   :  { %v12503_v5 = vcombine.low %v1119_v48, %v1126_v54  ;;  %v396_v6 = vrot.slane %v382_v56, %v12363_v17  ;;  %v397_v7 = vcombine.high %v389_v57, %v389_v57  ;;  %v437_v9 = vrot.slane %v74_v51, %v12363_v17  ;;  %11392 = vmatpush3.msra.mxu0 %v12486_v52  ;;  %v10908_v22 = vld.sshfl [vmem:[%s15821_s0 + $0x98] sm:$0x3 pattern:$0x76325410]  ;;  %v12553_v46 = vld [vmem:[%s15822_s1 + $0x8] sm:$0xff]  ;;  %v80_v54 = vld [vmem:[%s15821_s0 + $0xd0] sm:$0xff] }
  0x20   :  { %v1129_v10 = vcombine.low %v374_v58, %v10906_v55  ;;  %v1136_v11 = vrot.slane %v1128_v59, %v12363_v17  ;;  %v420_v12 = vrot.slane %v406_v63, %v12363_v17  ;;  %v421_v13 = vcombine.high %v413_v3, %v413_v3  ;;  %11393 = vmatprep.subr.mxu0 %v15833_v18  ;;  %v10909_v39 = vld.sshfl [vmem:[%s15821_s0 + $0xa8] sm:$0x3 pattern:$0x76325410] }
  0x21   :  { %11271 = vmatmul.mubr.msk.f32.gmra.mxu0 %vm1705_vm0, %v12490_v53  ;;  %v398_v16 = vcombine.high %v396_v6, %v396_v6  ;;  %v1145_v19 = vcombine.low %v389_v57, %v397_v7  ;;  %v1162_v21 = vcombine.low %v10907_v62, %v413_v3  ;;  %v445_v23 = vcombine.high %v437_v9, %v437_v9  ;;  %v10910_v63 = vld.sshfl [vmem:[%s15821_s0 + $0xb8] sm:$0x3 pattern:$0x76325410]  ;;  %v82_v7 = vld [vmem:[%s15821_s0 + $0xe0] sm:$0xff] }
  0x22   :  { %11273 = vmatprep.mubr.msk.f32.mxu0 %vm1705_vm0, %v12503_v5  ;;  %v1143_v26 = vrot.slane %v1129_v10, %v12363_v17  ;;  %v1163_v20 = vcombine.low %v421_v13, %v420_v12  ;;  %v422_v27 = vcombine.high %v420_v12, %v420_v12  ;;  %v430_v28 = vcombine.high %v74_v51, %v74_v51 }
  0x23   :  { %v1146_v30 = vcombine.low %v396_v6, %v398_v16  ;;  %v1153_v31 = vrot.slane %v1145_v19, %v12363_v17  ;;  %v1170_v32 = vrot.slane %v1162_v21, %v12363_v17  ;;  %v1180_v34 = vcombine.low %v437_v9, %v445_v23  ;;  %11394 = vmatpush3.msra.mxu0 %v12514_v15  ;;  %v10911_v21 = vld.sshfl [vmem:[%s15821_s0 + $0xc8] sm:$0x3 pattern:$0x76325410]  ;;  %v12591_v23 = vld [vmem:[%s15822_s1] sm:$0xff] }
  0x24   :  { %v12538_v36 = vcombine.low %v1136_v11, %v1143_v26  ;;  %v1177_v37 = vrot.slane %v1163_v20, %v12363_v17  ;;  %v1179_v38 = vcombine.low %v422_v27, %v10908_v22  ;;  %v444_v40 = vrot.slane %v430_v28, %v12363_v17  ;;  %11395 = vmatprep.subr.mxu0 %v15833_v18 }
  0x25   :  { %v1160_v41 = vrot.slane %v1146_v30, %v12363_v17  ;;  %v1194_v43 = vrot.slane %v1180_v34, %v12363_v17  ;;  %v461_v44 = vrot.slane %v76_v24, %v12363_v17  ;;  %v454_v45 = vcombine.high %v76_v24, %v76_v24  ;;  %11396 = vmatpush3.msra.mxu0 %v12530_v29  ;;  %v10912_v34 = vld.sshfl [vmem:[%s15821_s0 + $0xd8] sm:$0x3 pattern:$0x76325410] }
  0x26   :  { %15938 = vst [vmem:[#allocation6_spill] sm:$0xff] %v12538_v36  ;;  %11274 = vmatmul.mubr.msk.f32.gmra.mxu0 %vm1705_vm0, %v12538_v36  ;;  %v12557_v48 = vcombine.low %v1170_v32, %v1177_v37  ;;  %v1187_v49 = vrot.slane %v1179_v38, %v12363_v17  ;;  %v446_v50 = vcombine.high %v444_v40, %v444_v40  ;;  %vm12272_vm1 = vmmov 0  }
  0x27   :  { %v478_v51 = vcombine.high %v78_v35, %v78_v35  ;;  %v12563_v55 = vcombine.low %v1153_v31, %v1160_v41  ;;  %v1197_v56 = vcombine.low %v10909_v39, %v461_v44  ;;  %v468_v57 = vrot.slane %v454_v45, %v12363_v17  ;;  %11397 = vmatprep.subr.mxu0 %v15833_v18 }
  0x28   :  { %15939 = vst [vmem:[#allocation7_spill] sm:$0xff] %v12557_v48  ;;  %v469_v58 = vcombine.high %v461_v44, %v461_v44  ;;  %v12567_v59 = vcombine.low %v1187_v49, %v1194_v43  ;;  %v1196_v62 = vcombine.low %v444_v40, %v446_v50  ;;  %v485_v3 = vrot.slane %v78_v35, %v12363_v17  ;;  %v84_v44 = vld [vmem:[%s15821_s0 + $0xf0] sm:$0xff]  ;;  %v86_v49 = vld [vmem:[%s15821_s0 + $0x100] sm:$0xff] }
  0x29   :  { %15940 = vst [vmem:[#allocation8_spill] sm:$0xff] %v12563_v55  ;;  %v492_v6 = vrot.slane %v478_v51, %v12363_v17  ;;  %11398 = vmatpush3.msra.mxu0 %v12553_v46  ;;  %11276 = vmatprep.mubr.msk.f32.mxu0 %vm1705_vm0, %v12563_v55  ;;  %v1211_v9 = vrot.slane %v1197_v56, %v12363_v17  ;;  %vm4017_vm2 = vcmask 64512   ;;  %vm4021_vm3 = vcmask 58368  }
  0x2a   :  { %15941 = vst [vmem:[#allocation9_spill] sm:$0xff] %v12567_v59  ;;  %v470_v10 = vcombine.high %v468_v57, %v468_v57  ;;  %v1213_v11 = vcombine.low %v469_v58, %v468_v57  ;;  %v502_v12 = vcombine.high %v80_v54, %v80_v54  ;;  %11277 = vmatmul.mubr.msk.f32.gmra.mxu0 %vm1705_vm0, %v12557_v48  ;;  %v10913_v57 = vld.sshfl [vmem:[%s15821_s0 + $0xe8] sm:$0x3 pattern:$0x76325410]  ;;  %vm4079_vm4 = vcmask 130112  }
  0x2b   :  { %v1204_v13 = vrot.slane %v1196_v62, %v12363_v17  ;;  %v493_v16 = vcombine.high %v485_v3, %v485_v3  ;;  %v494_v19 = vcombine.high %v492_v6, %v492_v6  ;;  %v509_v22 = vrot.slane %v80_v54, %v12363_v17  ;;  %11279 = vmatprep.mubr.msk.f32.mxu0 %vm1705_vm0, %v12567_v59 }
  0x2c   :  { %v1214_v26 = vcombine.low %v470_v10, %v10910_v63  ;;  %v1221_v20 = vrot.slane %v1213_v11, %v12363_v17  ;;  %v516_v27 = vrot.slane %v502_v12, %v12363_v17  ;;  %v533_v24 = vrot.slane %v82_v7, %v12363_v17  ;;  %11399 = vmatprep.subr.mxu0 %v15833_v18  ;;  %v88_v11 = vld [vmem:[%s15821_s0 + $0x110] sm:$0xff] }
  0x2d   :  { %v12598_v28 = vcombine.low %v1204_v13, %v1211_v9  ;;  %v1230_v30 = vcombine.low %v485_v3, %v493_v16  ;;  %v1231_v31 = vcombine.low %v492_v6, %v494_v19  ;;  %v517_v32 = vcombine.high %v509_v22, %v509_v22  ;;  %11400 = vmatpush3.msra.mxu0 %v12591_v23 }
  0x2e   :  { %v1228_v35 = vrot.slane %v1214_v26, %v12363_v17  ;;  %v1247_v37 = vcombine.low %v10911_v21, %v509_v22  ;;  %v518_v38 = vcombine.high %v516_v27, %v516_v27  ;;  %v541_v39 = vcombine.high %v533_v24, %v533_v24  ;;  %11415 = vmatprep.subr.mxu0 %v15833_v18 }
  0x2f   :  { %15942 = vst [vmem:[#allocation10_spill] sm:$0xff] %v12598_v28  ;;  %11280 = vmatmul.mubr.msk.f32.gmra.mxu0 %vm1705_vm0, %v12598_v28  ;;  %v1238_v40 = vrot.slane %v1230_v30, %v12363_v17  ;;  %v1245_v41 = vrot.slane %v1231_v31, %v12363_v17  ;;  %v1248_v43 = vcombine.low %v517_v32, %v516_v27  ;;  %v10915_v27 = vld.sshfl [vmem:[%s15821_s0 + $0x108] sm:$0x3 pattern:$0x76325410]  ;;  %vm4108_vm5 = vcmask 1041409  }
  0x30   :  { %v526_v45 = vcombine.high %v82_v7, %v82_v7  ;;  %v12616_v50 = vcombine.low %v1221_v20, %v1228_v35  ;;  %v1255_v51 = vrot.slane %v1247_v37, %v12363_v17  ;;  %v1264_v54 = vcombine.low %v518_v38, %v10912_v34  ;;  %v10914_v31 = vld.sshfl [vmem:[%s15821_s0 + $0xf8] sm:$0x3 pattern:$0x76325410] }
  0x31   :  { %v1265_v56 = vcombine.low %v533_v24, %v541_v39  ;;  %v12623_v58 = vcombine.low %v1238_v40, %v1245_v41  ;;  %v1262_v62 = vrot.slane %v1248_v43, %v12363_v17  ;;  %v557_v3 = vrot.slane %v84_v44, %v12363_v17 }
  0x32   :  { %15943 = vst [vmem:[#allocation11_spill] sm:$0xff] %v12616_v50  ;;  %v540_v63 = vrot.slane %v526_v45, %v12363_v17  ;;  %11282 = vmatprep.mubr.msk.f32.mxu0 %vm1705_vm0, %v12616_v50  ;;  %v1272_v6 = vrot.slane %v1264_v54, %v12363_v17  ;;  %v550_v9 = vcombine.high %v84_v44, %v84_v44  ;;  %v90_v45 = vld [vmem:[%s15821_s0 + $0x120] sm:$0xff]  ;;  %vm4110_vm6 = vcmask 1042434  }
  0x33   :  { %15944 = vst [vmem:[#allocation12_spill] sm:$0xff] %v12623_v58  ;;  %v1279_v7 = vrot.slane %v1265_v56, %v12363_v17  ;;  %v574_v10 = vcombine.high %v86_v49, %v86_v49  ;;  %11283 = vmatmul.mubr.msk.f32.gmra.mxu0 %vm1705_vm0, %v12623_v58  ;;  %v12637_v12 = vcombine.low %v1255_v51, %v1262_v62  ;;  %v92_v62 = vld [vmem:[%s15821_s0 + $0x130] sm:$0xff]  ;;  %vm4112_vm7 = vcmask 1043459  }
  0x34   :  { %v542_v13 = vcombine.high %v540_v63, %v540_v63  ;;  %v1282_v16 = vcombine.low %v10913_v57, %v557_v3  ;;  %v565_v19 = vcombine.high %v557_v3, %v557_v3  ;;  %v564_v22 = vrot.slane %v550_v9, %v12363_v17  ;;  %v10916_v57 = vld.sshfl [vmem:[%s15821_s0 + $0x118] sm:$0x3 pattern:$0x76325410] }
  0x35   :  { %15945 = vst [vmem:[#allocation13_spill] sm:$0xff] %v12637_v12  ;;  %v12639_v21 = vcombine.low %v1272_v6, %v1279_v7  ;;  %v581_v26 = vrot.slane %v86_v49, %v12363_v17  ;;  %v588_v20 = vrot.slane %v574_v10, %v12363_v17  ;;  %11285 = vmatprep.mubr.msk.f32.mxu0 %vm1705_vm0, %v12637_v12  ;;  %v12273_v12 = vmov 1966171168  }
  0x36   :  { %v1281_v24 = vcombine.low %v540_v63, %v542_v13  ;;  %v1296_v30 = vrot.slane %v1282_v16, %v12363_v17  ;;  %v598_v32 = vcombine.high %v88_v11, %v88_v11  ;;  %v605_v34 = vrot.slane %v88_v11, %v12363_v17  ;;  %v10917_v16 = vld.sshfl [vmem:[%s15821_s0 + $0x128] sm:$0x3 pattern:$0x76325410] }
  0x37   :  { %15946 = vst [vmem:[#allocation14_spill] sm:$0xff] %v12639_v21  ;;  %v566_v35 = vcombine.high %v564_v22, %v564_v22  ;;  %v1298_v37 = vcombine.low %v565_v19, %v564_v22  ;;  %v589_v38 = vcombine.high %v581_v26, %v581_v26  ;;  %v590_v39 = vcombine.high %v588_v20, %v588_v20 }
  0x38   :  { %11286 = vmatmul.mubr.msk.f32.gmra.mxu0 %vm1705_vm0, %v12639_v21  ;;  %v1289_v40 = vrot.slane %v1281_v24, %v12363_v17  ;;  %v612_v41 = vrot.slane %v598_v32, %v12363_v17  ;;  %v613_v43 = vcombine.high %v605_v34, %v605_v34  ;;  %v1332_v44 = vcombine.low %v10915_v27, %v605_v34  ;;  %v94_v27 = vld [vmem:[%s15821_s0 + $0x140] sm:$0xff]  ;;  %v96_v34 = vld [vmem:[%s15821_s0 + $0x150] sm:$0xff] }
  0x39   :  { %v1299_v49 = vcombine.low %v566_v35, %v10914_v31  ;;  %v1306_v51 = vrot.slane %v1298_v37, %v12363_v17  ;;  %v1315_v54 = vcombine.low %v581_v26, %v589_v38  ;;  %v1316_v56 = vcombine.low %v588_v20, %v590_v39 }
  0x3a   :  { %v12668_v63 = vcombine.low %v1289_v40, %v1296_v30  ;;  %v1333_v3 = vcombine.low %v613_v43, %v612_v41  ;;  %v1340_v6 = vrot.slane %v1332_v44, %v12363_v17  ;;  %v614_v7 = vcombine.high %v612_v41, %v612_v41 }
  0x3b   :  { %v1313_v9 = vrot.slane %v1299_v49, %v12363_v17  ;;  %v1323_v10 = vrot.slane %v1315_v54, %v12363_v17  ;;  %v1330_v11 = vrot.slane %v1316_v56, %v12363_v17  ;;  %v629_v13 = vrot.slane %v90_v45, %v12363_v17 }
  0x3c   :  { %15947 = vst [vmem:[#allocation15_spill] sm:$0xff] %v12668_v63  ;;  %11288 = vmatprep.mubr.msk.f32.mxu0 %vm1705_vm0, %v12668_v63  ;;  %v1347_v19 = vrot.slane %v1333_v3, %v12363_v17  ;;  %v1349_v22 = vcombine.low %v614_v7, %v10916_v57  ;;  %v622_v26 = vcombine.high %v90_v45, %v90_v45  ;;  %v10919_v7 = vld.sshfl [vmem:[%s15821_s0 + $0x148] sm:$0x3 pattern:$0x76325410]  ;;  %v3840_v58 = vunpack.c.l.s4 %v12273_v12 }
  0x3d   :  { %v653_v20 = vrot.slane %v92_v62, %v12363_v17  ;;  %v12685_v24 = vcombine.low %v1306_v51, %v1313_v9  ;;  %v12687_v30 = vcombine.low %v1323_v10, %v1330_v11  ;;  %v637_v31 = vcombine.high %v629_v13, %v629_v13  ;;  %v10918_v51 = vld.sshfl [vmem:[%s15821_s0 + $0x138] sm:$0x3 pattern:$0x76325410] }
  0x3e   :  { %v646_v32 = vcombine.high %v92_v62, %v92_v62  ;;  %v12692_v35 = vcombine.low %v1340_v6, %v1347_v19  ;;  %v1357_v37 = vrot.slane %v1349_v22, %v12363_v17  ;;  %v636_v38 = vrot.slane %v622_v26, %v12363_v17 }
  0x3f   :  { %15948 = vst [vmem:[#allocation16_spill] sm:$0xff] %v12685_v24  ;;  %15949 = vst [vmem:[#allocation17_spill] sm:$0xff] %v12687_v30  ;;  %v1367_v39 = vcombine.low %v10917_v16, %v653_v20  ;;  %11289 = vmatmul.mubr.msk.f32.gmra.mxu0 %vm1705_vm0, %v12685_v24  ;;  %v1350_v40 = vcombine.low %v629_v13, %v637_v31  ;;  %v661_v43 = vcombine.high %v653_v20, %v653_v20  ;;  %v98_v16 = vld [vmem:[%s15821_s0 + $0x160] sm:$0xff]  ;;  %vm4115_vm8 = vcmask 76800  }
  0x40   :  { %15950 = vst [vmem:[#allocation18_spill] sm:$0xff] %v12692_v35  ;;  %v660_v41 = vrot.slane %v646_v32, %v12363_v17  ;;  %v670_v44 = vcombine.high %v94_v27, %v94_v27  ;;  %11291 = vmatprep.mubr.msk.f32.mxu0 %vm1705_vm0, %v12687_v30  ;;  %v638_v45 = vcombine.high %v636_v38, %v636_v38  ;;  %vm4421_vm9 = vcmask 1041408  }
  0x41   :  { %v1381_v49 = vrot.slane %v1367_v39, %v12363_v17  ;;  %v677_v54 = vrot.slane %v94_v27, %v12363_v17  ;;  %v694_v56 = vcombine.high %v96_v34, %v96_v34  ;;  %v1364_v57 = vrot.slane %v1350_v40, %v12363_v17 }
  0x42   :  { %v662_v62 = vcombine.high %v660_v41, %v660_v41  ;;  %v1383_v3 = vcombine.low %v661_v43, %v660_v41  ;;  %v684_v6 = vrot.slane %v670_v44, %v12363_v17  ;;  %v1366_v9 = vcombine.low %v636_v38, %v638_v45  ;;  %v10920_v38 = vld.sshfl [vmem:[%s15821_s0 + $0x158] sm:$0x3 pattern:$0x76325410]  ;;  %v100_v43 = vld [vmem:[%s15821_s0 + $0x170] sm:$0xff] }
  0x43   :  { %v685_v10 = vcombine.high %v677_v54, %v677_v54  ;;  %v701_v11 = vrot.slane %v96_v34, %v12363_v17  ;;  %v708_v13 = vrot.slane %v694_v56, %v12363_v17  ;;  %11292 = vmatmul.mubr.msk.f32.gmra.mxu0 %vm1705_vm0, %v12692_v35  ;;  %v12718_v19 = vcombine.low %v1357_v37, %v1364_v57  ;;  %v102_v56 = vld [vmem:[%s15821_s0 + $0x180] sm:$0xff] }
  0x44   :  { %v1384_v22 = vcombine.low %v662_v62, %v10918_v51  ;;  %v1391_v26 = vrot.slane %v1383_v3, %v12363_v17  ;;  %v686_v20 = vcombine.high %v684_v6, %v684_v6  ;;  %v1374_v27 = vrot.slane %v1366_v9, %v12363_v17 }
  0x45   :  { %15951 = vst [vmem:[#allocation19_spill] sm:$0xff] %v12718_v19  ;;  %v1400_v31 = vcombine.low %v677_v54, %v685_v10  ;;  %v709_v32 = vcombine.high %v701_v11, %v701_v11  ;;  %v1417_v34 = vcombine.low %v10919_v7, %v701_v11  ;;  %11294 = vmatprep.mubr.msk.f32.mxu0 %vm1705_vm0, %v12718_v19  ;;  %vm4454_vm10 = vcmask 261120  }
  0x46   :  { %v1398_v39 = vrot.slane %v1384_v22, %v12363_v17  ;;  %v1401_v37 = vcombine.low %v684_v6, %v686_v20  ;;  %v710_v40 = vcombine.high %v708_v13, %v708_v13  ;;  %v725_v41 = vrot.slane %v98_v16, %v12363_v17 }
  0x47   :  { %v12732_v44 = vcombine.low %v1374_v27, %v1381_v49  ;;  %v1408_v45 = vrot.slane %v1400_v31, %v12363_v17  ;;  %v1418_v51 = vcombine.low %v709_v32, %v708_v13  ;;  %v1425_v54 = vrot.slane %v1417_v34, %v12363_v17  ;;  %v10921_v49 = vld.sshfl [vmem:[%s15821_s0 + $0x168] sm:$0x3 pattern:$0x76325410]  ;;  %v104_v27 = vld [vmem:[%s15821_s0 + $0x190] sm:$0xff] }
  0x48   :  { %v12739_v57 = vcombine.low %v1391_v26, %v1398_v39  ;;  %v1415_v62 = vrot.slane %v1401_v37, %v12363_v17  ;;  %v733_v3 = vcombine.high %v725_v41, %v725_v41  ;;  %v1434_v6 = vcombine.low %v710_v40, %v10920_v38  ;;  %v10922_v39 = vld.sshfl [vmem:[%s15821_s0 + $0x178] sm:$0x3 pattern:$0x76325410] }
  0x49   :  { %15952 = vst [vmem:[#allocation20_spill] sm:$0xff] %v12732_v44  ;;  %11295 = vmatmul.mubr.msk.f32.gmra.mxu0 %vm1705_vm0, %v12732_v44  ;;  %v1432_v7 = vrot.slane %v1418_v51, %v12363_v17  ;;  %v718_v9 = vcombine.high %v98_v16, %v98_v16  ;;  %v749_v10 = vrot.slane %v100_v43, %v12363_v17  ;;  %vm3764_vm11 = vcmask 523264  }
  0x4a   :  { %15953 = vst [vmem:[#allocation21_spill] sm:$0xff] %v12739_v57  ;;  %v742_v11 = vcombine.high %v100_v43, %v100_v43  ;;  %11297 = vmatprep.mubr.msk.f32.mxu0 %vm1705_vm0, %v12739_v57  ;;  %v12751_v13 = vcombine.low %v1408_v45, %v1415_v62  ;;  %v1435_v22 = vcombine.low %v725_v41, %v733_v3  ;;  %v106_v62 = vld [vmem:[%s15821_s0 + $0x1a0] sm:$0xff]  ;;  %vm4661_vm12 = vcmask 253952  }
  0x4b   :  { %v1442_v26 = vrot.slane %v1434_v6, %v12363_v17  ;;  %v766_v20 = vcombine.high %v102_v56, %v102_v56  ;;  %v12757_v31 = vcombine.low %v1425_v54, %v1432_v7  ;;  %v732_v16 = vrot.slane %v718_v9, %v12363_v17  ;;  %v10923_v7 = vld.sshfl [vmem:[%s15821_s0 + $0x188] sm:$0x3 pattern:$0x76325410] }
  0x4c   :  { %15954 = vst [vmem:[#allocation22_spill] sm:$0xff] %v12751_v13  ;;  %v1452_v32 = vcombine.low %v10921_v49, %v749_v10  ;;  %v756_v34 = vrot.slane %v742_v11, %v12363_v17  ;;  %v1449_v38 = vrot.slane %v1435_v22, %v12363_v17  ;;  %v757_v37 = vcombine.high %v749_v10, %v749_v10 }
  0x4d   :  { %15955 = vst [vmem:[#allocation23_spill] sm:$0xff] %v12757_v31  ;;  %v773_v40 = vrot.slane %v102_v56, %v12363_v17  ;;  %v780_v41 = vrot.slane %v766_v20, %v12363_v17  ;;  %11298 = vmatmul.mubr.msk.f32.gmra.mxu0 %vm1705_vm0, %v12751_v13  ;;  %v734_v43 = vcombine.high %v732_v16, %v732_v16 }
  0x4e   :  { %v1466_v45 = vrot.slane %v1452_v32, %v12363_v17  ;;  %v758_v51 = vcombine.high %v756_v34, %v756_v34  ;;  %v790_v54 = vcombine.high %v104_v27, %v104_v27  ;;  %11300 = vmatprep.mubr.msk.f32.mxu0 %vm1705_vm0, %v12757_v31  ;;  %v12775_v3 = vcombine.low %v1442_v26, %v1449_v38 }
  0x4f   :  { %v1468_v56 = vcombine.low %v757_v37, %v756_v34  ;;  %v781_v6 = vcombine.high %v773_v40, %v773_v40  ;;  %v782_v49 = vcombine.high %v780_v41, %v780_v41  ;;  %v1451_v9 = vcombine.low %v732_v16, %v734_v43 }
  0x50   :  { %15956 = vst [vmem:[#allocation24_spill] sm:$0xff] %v12775_v3  ;;  %v1469_v10 = vcombine.low %v758_v51, %v10922_v39  ;;  %v797_v11 = vrot.slane %v104_v27, %v12363_v17  ;;  %v804_v22 = vrot.slane %v790_v54, %v12363_v17  ;;  %v821_v26 = vrot.slane %v106_v62, %v12363_v17  ;;  %v10924_v27 = vld.sshfl [vmem:[%s15821_s0 + $0x198] sm:$0x3 pattern:$0x76325410]  ;;  %v108_v51 = vld [vmem:[%s15821_s0 + $0x1b0] sm:$0xff] }
  0x51   :  { %v1476_v20 = vrot.slane %v1468_v56, %v12363_v17  ;;  %v1485_v32 = vcombine.low %v773_v40, %v781_v6  ;;  %v1486_v4 = vcombine.low %v780_v41, %v782_v49  ;;  %11301 = vmatmul.mubr.msk.f32.gmra.mxu0 %vm1705_vm0, %v12775_v3  ;;  %v1459_v34 = vrot.slane %v1451_v9, %v12363_v17  ;;  %v110_v54 = vld [vmem:[%s15821_s0 + $0x1c0] sm:$0xff] }
  0x52   :  { %v1483_v38 = vrot.slane %v1469_v10, %v12363_v17  ;;  %v805_v37 = vcombine.high %v797_v11, %v797_v11  ;;  %v1502_v16 = vcombine.low %v10923_v7, %v797_v11  ;;  %v806_v41 = vcombine.high %v804_v22, %v804_v22  ;;  %v10925_v11 = vld.sshfl [vmem:[%s15821_s0 + $0x1a8] sm:$0x3 pattern:$0x76325410] }
  0x53   :  { %v1493_v39 = vrot.slane %v1485_v32, %v12363_v17  ;;  %v1500_v40 = vrot.slane %v1486_v4, %v12363_v17  ;;  %v829_v43 = vcombine.high %v821_v26, %v821_v26  ;;  %v12799_v56 = vcombine.low %v1459_v34, %v1466_v45 }
  0x54   :  { %v12801_v6 = vcombine.low %v1476_v20, %v1483_v38  ;;  %v1503_v49 = vcombine.low %v805_v37, %v804_v22  ;;  %v1510_v7 = vrot.slane %v1502_v16, %v12363_v17  ;;  %v1519_v4 = vcombine.low %v806_v41, %v10924_v27  ;;  %v112_v16 = vld [vmem:[%s15821_s0 + $0x1d0] sm:$0xff] }
  0x55   :  { %15957 = vst [vmem:[#allocation25_spill] sm:$0xff] %v12799_v56  ;;  %v12804_v9 = vcombine.low %v1493_v39, %v1500_v40  ;;  %v1520_v10 = vcombine.low %v821_v26, %v829_v43  ;;  %v814_v32 = vcombine.high %v106_v62, %v106_v62  ;;  %11303 = vmatprep.mubr.msk.f32.mxu0 %vm1705_vm0, %v12799_v56 }
  0x56   :  { %15958 = vst [vmem:[#allocation26_spill] sm:$0xff] %v12801_v6  ;;  %v1517_v45 = vrot.slane %v1503_v49, %v12363_v17  ;;  %v845_v20 = vrot.slane %v108_v51, %v12363_v17  ;;  %v838_v34 = vcombine.high %v108_v51, %v108_v51  ;;  %v862_v22 = vcombine.high %v110_v54, %v110_v54 }
  0x57   :  { %15959 = vst [vmem:[#allocation27_spill] sm:$0xff] %v12804_v9  ;;  %11304 = vmatmul.mubr.msk.f32.gmra.mxu0 %vm1705_vm0, %v12801_v6  ;;  %v1527_v38 = vrot.slane %v1519_v4, %v12363_v17  ;;  %v1534_v26 = vrot.slane %v1520_v10, %v12363_v17  ;;  %v828_v37 = vrot.slane %v814_v32, %v12363_v17  ;;  %v114_v10 = vld [vmem:[%s15821_s0 + $0x1e0] sm:$0xff] }
  0x58   :  { %v869_v62 = vrot.slane %v110_v54, %v12363_v17  ;;  %11306 = vmatprep.mubr.msk.f32.mxu0 %vm1705_vm0, %v12804_v9  ;;  %v12824_v27 = vcombine.low %v1510_v7, %v1517_v45  ;;  %v1537_v39 = vcombine.low %v10925_v11, %v845_v20  ;;  %v852_v40 = vrot.slane %v838_v34, %v12363_v17  ;;  %v10926_v54 = vld.sshfl [vmem:[%s15821_s0 + $0x1b8] sm:$0x3 pattern:$0x76325410] }
  0x59   :  { %v853_v41 = vcombine.high %v845_v20, %v845_v20  ;;  %v12827_v43 = vcombine.low %v1527_v38, %v1534_v26  ;;  %v830_v51 = vcombine.high %v828_v37, %v828_v37  ;;  %v876_v49 = vrot.slane %v862_v22, %v12363_v17  ;;  %v10927_v22 = vld.sshfl [vmem:[%s15821_s0 + $0x1c8] sm:$0x3 pattern:$0x76325410] }
  0x5a   :  { %15960 = vst [vmem:[#allocation28_spill] sm:$0xff] %v12824_v27  ;;  %v877_v4 = vcombine.high %v869_v62, %v869_v62  ;;  %v1551_v7 = vrot.slane %v1537_v39, %v12363_v17  ;;  %v854_v11 = vcombine.high %v852_v40, %v852_v40  ;;  %v886_v45 = vcombine.high %v112_v16, %v112_v16 }
  0x5b   :  { %15961 = vst [vmem:[#allocation29_spill] sm:$0xff] %v12827_v43  ;;  %v1553_v32 = vcombine.low %v853_v41, %v852_v40  ;;  %11307 = vmatmul.mubr.msk.f32.gmra.mxu0 %vm1705_vm0, %v12824_v27  ;;  %v1536_v20 = vcombine.low %v828_v37, %v830_v51  ;;  %v878_v34 = vcombine.high %v876_v49, %v876_v49  ;;  %v116_v37 = vld [vmem:[%s15821_s0 + $0x1f0] sm:$0xff] }
  0x5c   :  { %v1570_v38 = vcombine.low %v869_v62, %v877_v4  ;;  %v893_v26 = vrot.slane %v112_v16, %v12363_v17  ;;  %11309 = vmatprep.mubr.msk.f32.mxu0 %vm1705_vm0, %v12827_v43  ;;  %v1554_v18 = vcombine.low %v854_v11, %v10926_v54  ;;  %v900_v40 = vrot.slane %v886_v45, %v12363_v17 }
  0x5d   :  { %v1561_v39 = vrot.slane %v1553_v32, %v12363_v17  ;;  %v910_v41 = vcombine.high %v114_v10, %v114_v10  ;;  %v1544_v62 = vrot.slane %v1536_v20, %v12363_v17  ;;  %v1571_v51 = vcombine.low %v876_v49, %v878_v34  ;;  %v10929_v20 = vld.sshfl [vmem:[%s15821_s0 + $0x1e8] sm:$0x3 pattern:$0x76325410] }
  0x5e   :  { %v1578_v4 = vrot.slane %v1570_v38, %v12363_v17  ;;  %v901_v27 = vcombine.high %v893_v26, %v893_v26  ;;  %v1568_v16 = vrot.slane %v1554_v18, %v12363_v17  ;;  %v1587_v9 = vcombine.low %v10927_v22, %v893_v26 }
  0x5f   :  { %v917_v54 = vrot.slane %v114_v10, %v12363_v17  ;;  %v924_v11 = vrot.slane %v910_v41, %v12363_v17  ;;  %v12855_v32 = vcombine.low %v1544_v62, %v1551_v7  ;;  %v1585_v45 = vrot.slane %v1571_v51, %v12363_v17  ;;  %v10928_v10 = vld.sshfl [vmem:[%s15821_s0 + $0x1d8] sm:$0x3 pattern:$0x76325410] }
  0x60   :  { %v1588_v43 = vcombine.low %v901_v27, %v900_v40  ;;  %v934_v49 = vcombine.high %v116_v37, %v116_v37  ;;  %v12861_v34 = vcombine.low %v1561_v39, %v1568_v16  ;;  %v1595_v38 = vrot.slane %v1587_v9, %v12363_v17  ;;  %v10898_v27 = vld [vmem:[%s15825_s4] ss:$0 sm:$0xff]  ;;  %v10930_v16 = vld.sshfl [vmem:[%s15821_s0 + $0x1f8] sm:$0x3 pattern:$0x76325410] }
  0x61   :  { %15962 = vst [vmem:[#allocation30_spill] sm:$0xff] %v12855_v32  ;;  %v926_v18 = vcombine.high %v924_v11, %v924_v11  ;;  %v941_v22 = vrot.slane %v116_v37, %v12363_v17  ;;  %11310 = vmatmul.mubr.msk.f32.gmra.mxu0 %vm1705_vm0, %v12855_v32  ;;  %v12873_v7 = vcombine.low %v1578_v4, %v1585_v45 }
  0x62   :  { %15963 = vst [vmem:[#allocation31_spill] sm:$0xff] %v12861_v34  ;;  %v1602_v26 = vrot.slane %v1588_v43, %v12363_v17  ;;  %v948_v9 = vrot.slane %v934_v49, %v12363_v17  ;;  %v902_v39 = vcombine.high %v900_v40, %v900_v40  ;;  %11312 = vmatprep.mubr.msk.f32.mxu0 %vm1705_vm0, %v12861_v34 }
  0x63   :  { %15964 = vst [vmem:[#allocation32_spill] sm:$0xff] %v12873_v7  ;;  %v949_v37 = vcombine.high %v941_v22, %v941_v22  ;;  %v1621_v41 = vcombine.low %v924_v11, %v926_v18  ;;  %v1622_v62 = vcombine.low %v10929_v20, %v941_v22  ;;  %v925_v51 = vcombine.high %v917_v54, %v917_v54 }
  0x64   :  { %v12882_v6 = vcombine.low %v1595_v38, %v1602_v26  ;;  %v1604_v4 = vcombine.low %v902_v39, %v10928_v10  ;;  %v950_v45 = vcombine.high %v948_v9, %v948_v9  ;;  %v958_v32 = vcombine.high %v10898_v27, %v10898_v27 }
  0x65   :  { %v1629_v43 = vrot.slane %v1621_v41, %v12363_v17  ;;  %v1636_v40 = vrot.slane %v1622_v62, %v12363_v17  ;;  %v1605_v49 = vcombine.low %v917_v54, %v925_v51  ;;  %v1638_v56 = vcombine.low %v949_v37, %v948_v9  ;;  %11313 = vmatmul.mubr.msk.f32.gmra.mxu0 %vm1705_vm0, %v12873_v7 }
  0x66   :  { %15965 = vst [vmem:[#allocation33_spill] sm:$0xff] %v12882_v6  ;;  %v1612_v11 = vrot.slane %v1604_v4, %v12363_v17  ;;  %v1639_v20 = vcombine.low %v950_v45, %v10930_v16  ;;  %v965_v18 = vrot.slane %v10898_v27, %v12363_v17  ;;  %v972_v38 = vrot.slane %v958_v32, %v12363_v17 }
  0x67   :  { %11315 = vmatprep.mubr.msk.f32.mxu0 %vm1705_vm0, %v12882_v6  ;;  %v12893_v22 = vcombine.low %v1629_v43, %v1636_v40  ;;  %v1619_v10 = vrot.slane %v1605_v49, %v12363_v17  ;;  %v1646_v54 = vrot.slane %v1638_v56, %v12363_v17  ;;  %v15969_v56 = vmov 0.0  }
  0x68   :  { %v1653_v26 = vrot.slane %v1639_v20, %v12363_v17  ;;  %v973_v9 = vcombine.high %v965_v18, %v965_v18  ;;  %v1672_v39 = vcombine.low %v965_v18, %v965_v18  ;;  %v974_v37 = vcombine.high %v972_v38, %v972_v38 }
  0x69   :  { %15966 = vst [vmem:[#allocation34_spill] sm:$0xff] %v12893_v22  ;;  %11318 = vmatprep.mubr.msk.f32.mxu1 %vm1705_vm0, %v12893_v22  ;;  %v12900_v27 = vcombine.low %v1612_v11, %v1619_v10 }
  0x6a   :  { %v12902_v32 = vcombine.low %v1646_v54, %v1653_v26  ;;  %v1673_v41 = vcombine.low %v973_v9, %v972_v38  ;;  %v1655_v62 = vcombine.low %v965_v18, %v973_v9  ;;  %v1656_v51 = vcombine.low %v972_v38, %v974_v37 }
  0x6b   :  { %15967 = vst [vmem:[#allocation35_spill] sm:$0xff] %v12900_v27  ;;  %11316 = vmatmul.mubr.msk.f32.gmra.mxu0 %vm1705_vm0, %v12900_v27  ;;  %v1689_v16 = vcombine.low %v974_v37, %v965_v18  ;;  %v1680_v4 = vrot.slane %v1672_v39, %v12363_v17 }
  0x6c   :  { %15968 = vst [vmem:[#allocation36_spill] sm:$0xff] %v12902_v32  ;;  %11319 = vmatmul.mubr.msk.f32.vlgmr.msra.gmra.mxu1 %vm1705_vm0, %v12902_v32  ;;  %11401 = vmatprep.mubr.msk.f32.mxu0 %vm12272_vm1, %v15969_v56  ;;  %v1687_v45 = vrot.slane %v1673_v41, %v12363_v17  ;;  %v12913_v43 = vrot.slane %v1655_v62, %v12363_v17 }
  0x6d   :  { %v12916_v40 = vrot.slane %v1656_v51, %v12363_v17  ;;  %v1696_v49 = vrot.slane %v1689_v16, %v12363_v17  ;;  %11325 = vmatprep.mubr.msk.f32.mxu1 %vm1705_vm0, %v12400_v60 }
  0x6e   :  { %v12948_v60 = vcombine.low %v1680_v4, %v1687_v45 }
  0x6f   :  { %11402 = vmatmul.mubr.f32.vlgmr.msra.gmra.mxu0 %v15969_v56  ;;  %v12923_v11 = vcombine.low %v12916_v40, %v1680_v4  ;;  %v12926_v20 = vcombine.low %v1696_v49, %v12913_v43  ;;  %v12928_v18 = vcombine.low %v1687_v45, %v1696_v49 }
  0x70   :  { %11416 = vmatpush3.msra.mxu0 %v12408_v0  ;;  %11431 = vmatprep.mubr.msk.f32.mxu0 %vm12272_vm1, %v15969_v56 }
  0x71   :  { %11417 = vmatprep.subr.mxu0 %v15969_v56 }
  0x72   :  { %11418 = vmatpush3.msra.mxu0 %v12429_v14 }
  0x73   :  { %11419 = vmatprep.subr.mxu0 %v15969_v56 }
  0x74   :  { %11420 = vmatpush3.msra.mxu0 %v12454_v33 }
  0x75   :  { %11421 = vmatprep.subr.mxu0 %v15969_v56 }
  0x76   :  { %11422 = vmatpush3.msra.mxu0 %v12486_v52 }
  0x77   :  { %11423 = vmatprep.subr.mxu0 %v15969_v56 }
  0x78   :  { %11424 = vmatpush3.msra.mxu0 %v12514_v15 }
  0x79   :  { %11425 = vmatprep.subr.mxu0 %v15969_v56 }
  0x7a   :  { %11426 = vmatpush3.msra.mxu0 %v12530_v29 }
  0x7b   :  { %11427 = vmatprep.subr.mxu0 %v15969_v56 }
  0x7c   :  { %11428 = vmatpush3.msra.mxu0 %v12553_v46 }
  0x7d   :  { %11429 = vmatprep.subr.mxu0 %v15969_v56 }
  0x7e   :  { %11430 = vmatpush3.msra.mxu0 %v12591_v23 }
  0x7f   :  { %11464 = vmatprep.subr.mxu0 %v15969_v56 }
  0xd5   :  { %v11263_v0 = vpop.f32.mrf.mxu0 }
  0xd6   :  { %v1858_v14 = vadd.f32 %v11263_v0, %v12948_v60 }
  0xd7   :  { %v12951_v33 = vpop.f32.mrf.mxu0 }
  0xd8   :  { %v2108_v52 = vcombine.high %v1858_v14, %v1858_v14  ;;  %v12954_v15 = vrot.slane %v1858_v14, %v12363_v17 }
  0xd9   :  { %v11266_v29 = vpop.f32.mrf.mxu0 }
  0xda   :  { %v2122_v46 = vrot.slane %v2108_v52, %v12363_v17  ;;  %v2123_v38 = vcombine.high %v12954_v15, %v12954_v15  ;;  %v12960_v23 = vadd.f32 %v11266_v29, %v12923_v11 }
  0xdb   :  { %v1862_v10 = vpop.f32.mrf.mxu0 }
  0xdc   :  { %v4805_v54 = vcombine.low %v2123_v38, %v2122_v46  ;;  %v12963_v26 = vadd.f32 %v1862_v10, %v12926_v20  ;;  %v2142_v39 = vcombine.high %v12960_v23, %v12960_v23  ;;  %v2124_v37 = vcombine.high %v2122_v46, %v2122_v46 }
  0xdd   :  { %v12965_v9 = vpop.f32.mrf.mxu0 }
  0xde   :  { %15970 = vst [vmem:[#allocation37_spill] sm:$0xff] %v12965_v9  ;;  %v12971_v41 = vrot.slane %v12963_v26, %v12363_v17  ;;  %v4813_v4 = vrot.slane %v4805_v54, %v12363_v17  ;;  %v12976_v45 = vrot.slane %v2142_v39, %v12363_v17  ;;  %v2125_v35 = vcombine.high %v12963_v26, %v12963_v26 }
  0xdf   :  { %v1872_v62 = vpop.f32.mrf.mxu0 }
  0xe0   :  { %15971 = vst [vmem:[#allocation38_spill] sm:$0xff] %v12971_v41  ;;  %v4806_v51 = vcombine.low %v2124_v37, %v12971_v41  ;;  %15972 = vst [vmem:[#allocation39_spill] sm:$0xff] %v12976_v45  ;;  %v1873_v0 = vadd.f32 %v1872_v62, %v12928_v18  ;;  %v2158_v38 = vcombine.high %v12976_v45, %v12976_v45 }
  0xe1   :  { %v11272_v16 = vpop.f32.mrf.mxu0  ;;  %v2139_v26 = vrot.slane %v2125_v35, %v12363_v17 }
  0xe2   :  { %v4820_v49 = vrot.slane %v4806_v51, %v12363_v17  ;;  %v2159_v29 = vcombine.high %v1873_v0, %v1873_v0  ;;  %v2166_v46 = vrot.slane %v1873_v0, %v12363_v17  ;;  %v1888_v10 = vadd.f32 %v11272_v16, %v12926_v20 }
  0xe3   :  { %v1882_v14 = vpop.f32.mrf.mxu0  ;;  %v2141_v35 = vcombine.high %v2139_v26, %v2139_v26 }
  0xe4   :  { %v12980_v52 = vcombine.low %v4813_v4, %v4820_v49  ;;  %v1883_v54 = vadd.f32 %v1882_v14, %v12948_v60  ;;  %v12988_v39 = vrot.slane %v2159_v29, %v12363_v17  ;;  %v2174_v51 = vcombine.high %v2166_v46, %v2166_v46 }
  0xe5   :  { %v6581_v9 = vcombine.low %v2158_v38, %v2166_v46  ;;  %v2210_v62 = vcombine.high %v1888_v10, %v1888_v10 }
  0xe6   :  { %15973 = vst [vmem:[#allocation40_spill] sm:$0xff] %v12980_v52  ;;  %v11275_v37 = vpop.f32.mrf.mxu0  ;;  %15974 = vst [vmem:[#allocation41_spill] sm:$0xff] %v12988_v39  ;;  %v2193_v41 = vcombine.high %v1883_v54, %v1883_v54  ;;  %v6582_v49 = vcombine.low %v2174_v51, %v12988_v39  ;;  %v12993_v52 = vrot.slane %v1883_v54, %v12363_v17 }
  0xe7   :  { %v2224_v0 = vrot.slane %v2210_v62, %v12363_v17  ;;  %v6589_v16 = vrot.slane %v6581_v9, %v12363_v17  ;;  %v13005_v51 = vrot.slane %v1888_v10, %v12363_v17 }
  0xe8   :  { %v1892_v4 = vpop.f32.mrf.mxu0  ;;  %15975 = vst [vmem:[#allocation42_spill] sm:$0xff] %v12993_v52  ;;  %v6596_v14 = vrot.slane %v6582_v49, %v12363_v17  ;;  %v2207_v29 = vrot.slane %v2193_v41, %v12363_v17  ;;  %v2208_v46 = vcombine.high %v12993_v52, %v12993_v52  ;;  %v13015_v52 = vadd.f32 %v11275_v37, %v12928_v18 }
  0xe9   :  { %15977 = vst [vmem:[#allocation44_spill] sm:$0xff] %v13005_v51  ;;  %v1893_v54 = vadd.f32 %v1892_v4, %v12923_v11  ;;  %v2226_v39 = vcombine.high %v2224_v0, %v2224_v0 }
  0xea   :  { %v11278_v45 = vpop.f32.mrf.mxu0  ;;  %v13002_v32 = vcombine.low %v6589_v16, %v6596_v14  ;;  %v2209_v62 = vcombine.high %v2207_v29, %v2207_v29  ;;  %v13008_v22 = vcombine.low %v2208_v46, %v2207_v29  ;;  %v13029_v37 = vrot.slane %v13015_v52, %v12363_v17 }
  0xeb   :  { %v1908_v9 = vadd.f32 %v11278_v45, %v12948_v60  ;;  %v2227_v16 = vcombine.high %v1893_v54, %v1893_v54  ;;  %v2234_v14 = vrot.slane %v1893_v54, %v12363_v17  ;;  %v9245_v4 = vcombine.low %v2224_v0, %v2226_v39 }
  0xec   :  { %v13000_v38 = vpop.f32.mrf.mxu0  ;;  %15976 = vst [vmem:[#allocation43_spill] sm:$0xff] %v13002_v32  ;;  %v13012_v41 = vcombine.low %v2209_v62, %v13005_v51 }
  0xed   :  { %v2278_v10 = vcombine.high %v1908_v9, %v1908_v9  ;;  %v13019_v27 = vrot.slane %v2227_v16, %v12363_v17  ;;  %v2242_v29 = vcombine.high %v2234_v14, %v2234_v14  ;;  %v13022_v46 = vrot.slane %v1908_v9, %v12363_v17 }
  0xee   :  { %v9253_v9 = vrot.slane %v9245_v4, %v12363_v17 }
  0xef   :  { %v11281_v49 = vpop.f32.mrf.mxu0  ;;  %15978 = vst [vmem:[#allocation45_spill] sm:$0xff] %v13019_v27  ;;  %v2292_v45 = vrot.slane %v2278_v10, %v12363_v17  ;;  %v2243_v54 = vcombine.high %v13019_v27, %v13019_v27  ;;  %v9246_v51 = vcombine.low %v2234_v14, %v2242_v29  ;;  %v2293_v16 = vcombine.high %v13022_v46, %v13022_v46 }
  0xf0   :  { %v1918_v6 = vadd.f32 %v11281_v49, %v12923_v11 }
  0xf1   :  { %v1912_v32 = vpop.f32.mrf.mxu0  ;;  %v13036_v0 = vcombine.low %v2243_v54, %v13029_v37  ;;  %v9260_v10 = vrot.slane %v9246_v51, %v12363_v17  ;;  %v2294_v13 = vcombine.high %v2292_v45, %v2292_v45 }
  0xf2   :  { %v1913_v34 = vadd.f32 %v1912_v32, %v12926_v20  ;;  %v2312_v14 = vcombine.high %v1918_v6, %v1918_v6  ;;  %v2319_v29 = vrot.slane %v1918_v6, %v12363_v17 }
  0xf3   :  { %v13025_v62 = vpop.f32.mrf.mxu0  ;;  %v13042_v3 = vcombine.low %v9253_v9, %v9260_v10 }
  0xf4   :  { %15979 = vst [vmem:[#allocation46_spill] sm:$0xff] %v13025_v62  ;;  %v4829_v62 = vcombine.low %v2293_v16, %v2292_v45  ;;  %v2295_v27 = vcombine.high %v1913_v34, %v1913_v34  ;;  %v13046_v31 = vrot.slane %v1913_v34, %v12363_v17  ;;  %v13049_v4 = vrot.slane %v2312_v14, %v12363_v17 }
  0xf5   :  { %v1922_v39 = vpop.f32.mrf.mxu0  ;;  %15980 = vst [vmem:[#allocation47_spill] sm:$0xff] %v13042_v3  ;;  %v2327_v51 = vcombine.high %v2319_v29, %v2319_v29 }
  0xf6   :  { %15981 = vst [vmem:[#allocation48_spill] sm:$0xff] %v13046_v31  ;;  %15982 = vst [vmem:[#allocation49_spill] sm:$0xff] %v13049_v4  ;;  %v2309_v49 = vrot.slane %v2295_v27, %v12363_v17  ;;  %v1923_v16 = vadd.f32 %v1922_v39, %v12928_v18  ;;  %v4830_v32 = vcombine.low %v2294_v13, %v13046_v31 }
  0xf7   :  { %v5718_v9 = vcombine.low %v2319_v29, %v2327_v51  ;;  %v4837_v6 = vrot.slane %v4829_v62, %v12363_v17  ;;  %v2328_v45 = vcombine.high %v13049_v4, %v13049_v4  ;;  %v13069_v4 = vcombine.low %v12913_v43, %v12916_v40 }
  0xf8   :  { %v11287_v7 = vpop.f32.mrf.mxu0  ;;  %v2311_v10 = vcombine.high %v2309_v49, %v2309_v49  ;;  %v4844_v34 = vrot.slane %v4830_v32, %v12363_v17  ;;  %v2329_v14 = vcombine.high %v1923_v16, %v1923_v16  ;;  %v2336_v44 = vrot.slane %v1923_v16, %v12363_v17 }
  0xf9   :  { %v5732_v27 = vrot.slane %v5718_v9, %v12363_v17  ;;  %v1938_v13 = vadd.f32 %v11287_v7, %v12926_v20  ;;  %15985 = vst [vmem:[#allocation52_spill] sm:$0xff] %v13069_v4  ;;  %v1853_v40 = vadd.f32 %v12951_v33, %v13069_v4 }
  0xfa   :  { %v1932_v54 = vpop.f32.mrf.mxu0  ;;  %v5717_v57 = vcombine.low %v2309_v49, %v2311_v10  ;;  %v13060_v39 = vcombine.low %v4837_v6, %v4844_v34  ;;  %v13065_v62 = vrot.slane %v2329_v14, %v12363_v17  ;;  %v2344_v51 = vcombine.high %v2336_v44, %v2336_v44 }
  0xfb   :  { %v6605_v49 = vcombine.low %v2328_v45, %v2336_v44  ;;  %v2380_v10 = vcombine.high %v1938_v13, %v1938_v13  ;;  %v13096_v33 = vrot.slane %v1938_v13, %v12363_v17 }
  0xfc   :  { %15983 = vst [vmem:[#allocation50_spill] sm:$0xff] %v13060_v39  ;;  %v5725_v29 = vrot.slane %v5717_v57, %v12363_v17  ;;  %15984 = vst [vmem:[#allocation51_spill] sm:$0xff] %v13065_v62  ;;  %v6606_v9 = vcombine.low %v2344_v51, %v13065_v62  ;;  %v1933_v57 = vadd.f32 %v1932_v54, %v12948_v60 }
  0xfd   :  { %v2394_v7 = vrot.slane %v2380_v10, %v12363_v17  ;;  %v6613_v34 = vrot.slane %v6605_v49, %v12363_v17  ;;  %15989 = vst [vmem:[#allocation56_spill] sm:$0xff] %v13096_v33 }
  0xfe   :  { %v13071_v16 = vcombine.low %v5725_v29, %v5732_v27  ;;  %v6620_v44 = vrot.slane %v6606_v9, %v12363_v17  ;;  %v2363_v39 = vcombine.high %v1933_v57, %v1933_v57  ;;  %v13086_v29 = vrot.slane %v1933_v57, %v12363_v17 }
  0xff   :  { %v11290_v3 = vpop.f32.mrf.mxu0  ;;  %v2396_v14 = vcombine.high %v2394_v7, %v2394_v7 }
 0x100   :  { %15986 = vst [vmem:[#allocation53_spill] sm:$0xff] %v13071_v16  ;;  %v13083_v27 = vcombine.low %v6613_v34, %v6620_v44  ;;  %15988 = vst [vmem:[#allocation55_spill] sm:$0xff] %v13086_v29  ;;  %v2377_v51 = vrot.slane %v2363_v39, %v12363_v17  ;;  %v13090_v54 = vadd.f32 %v11290_v3, %v12928_v18 }
 0x101   :  { %v1942_v19 = vpop.f32.mrf.mxu0  ;;  %v9269_v9 = vcombine.low %v2394_v7, %v2396_v14  ;;  %v2378_v62 = vcombine.high %v13086_v29, %v13086_v29  ;;  %v2091_v3 = vcombine.high %v1853_v40, %v1853_v40 }
 0x102   :  { %v1943_v45 = vadd.f32 %v1942_v19, %v12923_v11  ;;  %15987 = vst [vmem:[#allocation54_spill] sm:$0xff] %v13083_v27  ;;  %v2379_v34 = vcombine.high %v2377_v51, %v2377_v51  ;;  %v13107_v7 = vrot.slane %v13090_v54, %v12363_v17 }
 0x103   :  { %v11293_v32 = vpop.f32.mrf.mxu0  ;;  %v8381_v27 = vcombine.low %v2378_v62, %v2377_v51 }
 0x104   :  { %v2397_v49 = vcombine.high %v1943_v45, %v1943_v45  ;;  %v2404_v10 = vrot.slane %v1943_v45, %v12363_v17  ;;  %v1958_v16 = vadd.f32 %v11293_v32, %v12948_v60  ;;  %v8382_v45 = vcombine.low %v2379_v34, %v13096_v33 }
 0x105   :  { %v13074_v6 = vpop.f32.mrf.mxu0  ;;  %v8389_v31 = vrot.slane %v8381_v27, %v12363_v17  ;;  %v2105_v27 = vrot.slane %v2091_v3, %v12363_v17 }
 0x106   :  { %v13099_v57 = vrot.slane %v2397_v49, %v12363_v17  ;;  %v2412_v44 = vcombine.high %v2404_v10, %v2404_v10  ;;  %v9277_v49 = vrot.slane %v9269_v9, %v12363_v17  ;;  %v8396_v62 = vrot.slane %v8382_v45, %v12363_v17 }
 0x107   :  { %v13119_v34 = vrot.slane %v1958_v16, %v12363_v17 }
 0x108   :  { %15990 = vst [vmem:[#allocation57_spill] sm:$0xff] %v13099_v57  ;;  %v2413_v13 = vcombine.high %v13099_v57, %v13099_v57  ;;  %v9270_v14 = vcombine.low %v2404_v10, %v2412_v44  ;;  %v13125_v44 = vcombine.low %v8389_v31, %v8396_v62  ;;  %v2107_v62 = vcombine.high %v2105_v27, %v2105_v27 }
 0x109   :  { %v11296_v43 = vpop.f32.mrf.mxu0 }
 0x10a   :  { %v9284_v32 = vrot.slane %v9270_v14, %v12363_v17  ;;  %v13116_v51 = vcombine.low %v2413_v13, %v13107_v7  ;;  %v1968_v10 = vadd.f32 %v11296_v43, %v12923_v11  ;;  %15992 = vst [vmem:[#allocation59_spill] sm:$0xff] %v13125_v44  ;;  %v2463_v13 = vcombine.high %v13119_v34, %v13119_v34 }
 0x10b   :  { %v1962_v19 = vpop.f32.mrf.mxu0  ;;  %v3884_v50 = vcombine.low %v2105_v27, %v2107_v62  ;;  %v1903_v62 = vadd.f32 %v13000_v38, %v13069_v4 }
 0x10c   :  { %v1963_v9 = vadd.f32 %v1962_v19, %v12926_v20  ;;  %v13127_v45 = vcombine.low %v9277_v49, %v9284_v32  ;;  %v2489_v43 = vrot.slane %v1968_v10, %v12363_v17  ;;  %v2149_v19 = vrot.slane %v12960_v23, %v12363_v17 }
 0x10d   :  { %v13101_v39 = vpop.f32.mrf.mxu0  ;;  %v2482_v31 = vcombine.high %v1968_v10, %v1968_v10 }
 0x10e   :  { %15991 = vst [vmem:[#allocation58_spill] sm:$0xff] %v13101_v39  ;;  %v2448_v39 = vcombine.high %v1958_v16, %v1958_v16  ;;  %15993 = vst [vmem:[#allocation60_spill] sm:$0xff] %v13127_v45  ;;  %v2098_v16 = vrot.slane %v1853_v40, %v12363_v17  ;;  %v2465_v30 = vcombine.high %v1963_v9, %v1963_v9 }
 0x10f   :  { %v1972_v29 = vpop.f32.mrf.mxu0  ;;  %v13138_v3 = vrot.slane %v1963_v9, %v12363_v17  ;;  %v2497_v32 = vcombine.high %v2489_v43, %v2489_v43  ;;  %v2157_v23 = vcombine.high %v2149_v19, %v2149_v19  ;;  %v13146_v10 = vrot.slane %v2482_v31, %v12363_v17 }
 0x110   :  { %v2462_v57 = vrot.slane %v2448_v39, %v12363_v17  ;;  %v2479_v40 = vrot.slane %v2465_v30, %v12363_v17  ;;  %v2106_v44 = vcombine.high %v2098_v16, %v2098_v16 }
 0x111   :  { %v11302_v33 = vpop.f32.mrf.mxu0  ;;  %15994 = vst [vmem:[#allocation61_spill] sm:$0xff] %v13138_v3  ;;  %v5742_v24 = vcombine.low %v2489_v43, %v2497_v32  ;;  %15995 = vst [vmem:[#allocation62_spill] sm:$0xff] %v13146_v10  ;;  %v1973_v43 = vadd.f32 %v1972_v29, %v12928_v18  ;;  %v2498_v27 = vcombine.high %v13146_v10, %v13146_v10 }
 0x112   :  { %v4853_v39 = vcombine.low %v2463_v13, %v2462_v57  ;;  %v2464_v45 = vcombine.high %v2462_v57, %v2462_v57  ;;  %v2481_v63 = vcombine.high %v2479_v40, %v2479_v40  ;;  %v3883_v59 = vcombine.low %v2098_v16, %v2106_v44 }
 0x113   :  { %v1982_v14 = vpop.f32.mrf.mxu0  ;;  %v1988_v12 = vadd.f32 %v11302_v33, %v12926_v20  ;;  %v3898_v44 = vrot.slane %v3884_v50, %v12363_v17  ;;  %v13162_v29 = vcombine.low %v2149_v19, %v2157_v23  ;;  %v2244_v50 = vcombine.high %v13015_v52, %v13015_v52 }
 0x114   :  { %v4854_v21 = vcombine.low %v2464_v45, %v13138_v3  ;;  %v4861_v57 = vrot.slane %v4853_v39, %v12363_v17  ;;  %v5741_v28 = vcombine.low %v2479_v40, %v2481_v63  ;;  %v5756_v45 = vrot.slane %v5742_v24, %v12363_v17 }
 0x115   :  { %v2499_v39 = vcombine.high %v1973_v43, %v1973_v43  ;;  %v3841_v63 = vunpack.c.0.s8 %v3840_v58  ;;  %v2550_v24 = vcombine.high %v1988_v12, %v1988_v12  ;;  %v1983_v58 = vadd.f32 %v1982_v14, %v12948_v60 }
 0x116   :  { %v4868_v30 = vrot.slane %v4854_v21, %v12363_v17  ;;  %v5749_v31 = vrot.slane %v5741_v28, %v12363_v17  ;;  %v2506_v21 = vrot.slane %v1973_v43, %v12363_v17  ;;  %v13172_v43 = vcombine.low %v2139_v26, %v2141_v35 }
 0x117   :  { %v13140_v49 = vpop.f32.mrf.mxu0  ;;  %v13169_v28 = vrot.slane %v2499_v39, %v12363_v17  ;;  %v2564_v23 = vrot.slane %v2550_v24, %v12363_v17  ;;  %v2533_v14 = vcombine.high %v1983_v58, %v1983_v58  ;;  %v2261_v35 = vcombine.high %v1903_v62, %v1903_v62 }
 0x118   :  { %v13154_v3 = vcombine.low %v4861_v57, %v4868_v30  ;;  %v13164_v16 = vcombine.low %v5749_v31, %v5756_v45  ;;  %v2514_v33 = vcombine.high %v2506_v21, %v2506_v21  ;;  %v6629_v40 = vcombine.low %v2498_v27, %v2506_v21 }
 0x119   :  { %v1992_v13 = vpop.f32.mrf.mxu0  ;;  %15998 = vst [vmem:[#allocation65_spill] sm:$0xff] %v13169_v28  ;;  %v3891_v30 = vrot.slane %v3883_v59, %v12363_v17  ;;  %v13182_v45 = vsub.s32 %v3841_v63, %v12351_v8  ;;  %v13185_v31 = vsub.s32 0, %v12351_v8  ;;  %v13196_v21 = vrot.slane %v1983_v58, %v12363_v17 }
 0x11a   :  { %15996 = vst [vmem:[#allocation63_spill] sm:$0xff] %v13154_v3  ;;  %15997 = vst [vmem:[#allocation64_spill] sm:$0xff] %v13164_v16  ;;  %v6630_v19 = vcombine.low %v2514_v33, %v13169_v28  ;;  %v6637_v27 = vrot.slane %v6629_v40, %v12363_v17  ;;  %v2547_v33 = vrot.slane %v2533_v14, %v12363_v17 }
 0x11b   :  { %v11308_v9 = vpop.f32.mrf.mxu0  ;;  %v13189_v26 = vcombine.low %v3891_v30, %v3898_v44  ;;  %15999 = vst [vmem:[#allocation66_spill] sm:$0xff] %v13196_v21  ;;  %v13203_v44 = vrot.slane %v2244_v50, %v12363_v17  ;;  %v1993_v30 = vadd.f32 %v1992_v13, %v12923_v11  ;;  %v2268_v59 = vrot.slane %v1903_v62, %v12363_v17 }
 0x11c   :  { %v6644_v39 = vrot.slane %v6630_v19, %v12363_v17  ;;  %v2566_v19 = vcombine.high %v2564_v23, %v2564_v23  ;;  %v2548_v58 = vcombine.high %v13196_v21, %v13196_v21  ;;  %v2549_v24 = vcombine.high %v2547_v33, %v2547_v33 }
 0x11d   :  { %v13151_v32 = vpop.f32.mrf.mxu0  ;;  %16001 = vst [vmem:[#allocation68_spill] sm:$0xff] %v13203_v44  ;;  %v13219_v50 = vadd.f32 %v13140_v49, %v12928_v18  ;;  %v2567_v14 = vcombine.high %v1993_v30, %v1993_v30  ;;  %v2275_v13 = vrot.slane %v2261_v35, %v12363_v17  ;;  %v2259_v21 = vcombine.high %v13029_v37, %v13029_v37 }
 0x11e   :  { %v13208_v40 = vcombine.low %v6637_v27, %v6644_v39  ;;  %v8405_v62 = vcombine.low %v2548_v58, %v2547_v33  ;;  %v2574_v27 = vrot.slane %v1993_v30, %v12363_v17  ;;  %v2008_v39 = vadd.f32 %v11308_v9, %v12948_v60 }
 0x11f   :  { %v13230_v28 = vrot.slane %v2567_v14, %v12363_v17  ;;  %v2276_v16 = vcombine.high %v2268_v59, %v2268_v59  ;;  %v9293_v35 = vcombine.low %v2564_v23, %v2566_v19  ;;  %v13238_v37 = vrot.slane %v13219_v50, %v12363_v17 }
 0x120   :  { %16002 = vst [vmem:[#allocation69_spill] sm:$0xff] %v13208_v40  ;;  %v2582_v33 = vcombine.high %v2574_v27, %v2574_v27  ;;  %v2618_v58 = vcombine.high %v2008_v39, %v2008_v39  ;;  %v8413_v30 = vrot.slane %v8405_v62, %v12363_v17  ;;  %v2277_v14 = vcombine.high %v2275_v13, %v2275_v13 }
 0x121   :  { %v11311_v57 = vpop.f32.mrf.mxu0  ;;  %16004 = vst [vmem:[#allocation71_spill] sm:$0xff] %v13230_v28  ;;  %v13245_v10 = vrot.slane %v2008_v39, %v12363_v17 }
 0x122   :  { %v2632_v23 = vrot.slane %v2618_v58, %v12363_v17  ;;  %v2018_v3 = vadd.f32 %v11311_v57, %v12923_v11  ;;  %v13263_v58 = vcombine.low %v2259_v21, %v13203_v44 }
 0x123   :  { %v13179_v38 = vpop.f32.mrf.mxu0 }
 0x124   :  { %v2659_v57 = vrot.slane %v2018_v3, %v12363_v17  ;;  %v2652_v55 = vcombine.high %v2018_v3, %v2018_v3  ;;  %v2634_v44 = vcombine.high %v2632_v23, %v2632_v23 }
 0x125   :  { %v13198_v63 = vpop.f32.mrf.mxu0 }
 0x126   :  { %16000 = vst [vmem:[#allocation67_spill] sm:$0xff] %v13198_v63  ;;  %v13215_v63 = vrot.slane %v1988_v12, %v12363_v17  ;;  %v1953_v12 = vadd.f32 %v13074_v6, %v13069_v4  ;;  %v2583_v6 = vcombine.high %v13230_v28, %v13230_v28 }
 0x127   :  { %v13212_v52 = vpop.f32.mrf.mxu0 }
 0x128   :  { %16003 = vst [vmem:[#allocation70_spill] sm:$0xff] %v13215_v63  ;;  %v8406_v40 = vcombine.low %v2549_v24, %v13215_v63  ;;  %v9294_v63 = vcombine.low %v2574_v27, %v2582_v33  ;;  %v2431_v19 = vcombine.high %v1953_v12, %v1953_v12  ;;  %v9301_v27 = vrot.slane %v9293_v35, %v12363_v17 }
 0x129   :  { %v2633_v33 = vcombine.high %v13245_v10, %v13245_v10 }
 0x12a   :  { %v8420_v9 = vrot.slane %v8406_v40, %v12363_v17  ;;  %v13251_v40 = vcombine.low %v2583_v6, %v13238_v37  ;;  %v9308_v39 = vrot.slane %v9294_v63, %v12363_v17  ;;  %v2013_v63 = vadd.f32 %v13179_v38, %v12926_v20 }
 0x12b   :  { %v13232_v49 = vpop.f32.mrf.mxu0  ;;  %v4877_v28 = vcombine.low %v2633_v33, %v2632_v23  ;;  %v2438_v33 = vrot.slane %v1953_v12, %v12363_v17 }
 0x12c   :  { %v13248_v62 = vcombine.low %v8413_v30, %v8420_v9  ;;  %v3907_v30 = vcombine.low %v2268_v59, %v2276_v16  ;;  %v2414_v9 = vcombine.high %v13090_v54, %v13090_v54  ;;  %v3908_v16 = vcombine.low %v2275_v13, %v2277_v14 }
 0x12d   :  { %v13242_v24 = vpop.f32.mrf.mxu0  ;;  %v2445_v59 = vrot.slane %v2431_v19, %v12363_v17  ;;  %v2667_v54 = vcombine.high %v2659_v57, %v2659_v57  ;;  %v2635_v36 = vcombine.high %v2013_v63, %v2013_v63  ;;  %v13290_v14 = vrot.slane %v2652_v55, %v12363_v17 }
 0x12e   :  { %16005 = vst [vmem:[#allocation72_spill] sm:$0xff] %v13248_v62  ;;  %v13268_v62 = vcombine.low %v9301_v27, %v9308_v39  ;;  %v13278_v27 = vrot.slane %v2013_v63, %v12363_v17  ;;  %v13283_v38 = vrot.slane %v2414_v9, %v12363_v17  ;;  %v2429_v39 = vcombine.high %v13107_v7, %v13107_v7 }
 0x12f   :  { %v13254_v48 = vpop.f32.mrf.mxu0  ;;  %v3915_v13 = vrot.slane %v3907_v30, %v12363_v17  ;;  %16008 = vst [vmem:[#allocation75_spill] sm:$0xff] %v13290_v14  ;;  %v2649_v23 = vrot.slane %v2635_v36, %v12363_v17  ;;  %v2447_v63 = vcombine.high %v2445_v59, %v2445_v59  ;;  %v2003_v9 = vadd.f32 %v13151_v32, %v13069_v4 }
 0x130   :  { %16006 = vst [vmem:[#allocation73_spill] sm:$0xff] %v13268_v62  ;;  %16007 = vst [vmem:[#allocation74_spill] sm:$0xff] %v13283_v38  ;;  %v4878_v19 = vcombine.low %v2634_v44, %v13278_v27  ;;  %v2023_v7 = vadd.f32 %v13212_v52, %v12928_v18  ;;  %v4885_v12 = vrot.slane %v4877_v28, %v12363_v17 }
 0x131   :  { %v11403_v6 = vpop.f32.mrf.mxu0  ;;  %v5766_v21 = vcombine.low %v2659_v57, %v2667_v54  ;;  %v2651_v30 = vcombine.high %v2649_v23, %v2649_v23  ;;  %v13302_v3 = vcombine.low %v2429_v39, %v13283_v38  ;;  %v2446_v36 = vcombine.high %v2438_v33, %v2438_v33  ;;  %v11320_v57 = vpop.f32.mrf.mxu1 }
 0x132   :  { %v3922_v6 = vrot.slane %v3908_v16, %v12363_v17  ;;  %v4892_v55 = vrot.slane %v4878_v19, %v12363_v17  ;;  %v2584_v44 = vcombine.high %v13219_v50, %v13219_v50  ;;  %v2669_v16 = vcombine.high %v2023_v7, %v2023_v7 }
 0x133   :  { %v5765_v32 = vcombine.low %v2649_v23, %v2651_v30  ;;  %v2668_v52 = vcombine.high %v13290_v14, %v13290_v14  ;;  %v2676_v28 = vrot.slane %v2023_v7, %v12363_v17  ;;  %v3932_v54 = vcombine.low %v2445_v59, %v2447_v63 }
 0x134   :  { %v13306_v35 = vcombine.low %v4885_v12, %v4892_v55  ;;  %v2601_v62 = vcombine.high %v2003_v9, %v2003_v9  ;;  %v13312_v19 = vrot.slane %v2669_v16, %v12363_v17  ;;  %v2048_v39 = vadd.f32 %v11320_v57, %v12928_v18 }
 0x135   :  { %v5780_v38 = vrot.slane %v5766_v21, %v12363_v17  ;;  %v5773_v50 = vrot.slane %v5765_v32, %v12363_v17  ;;  %v2684_v12 = vcombine.high %v2676_v28, %v2676_v28  ;;  %v6653_v55 = vcombine.low %v2668_v52, %v2676_v28  ;;  %v2042_v32 = vpop.f32.mrf.mxu1 }
 0x136   :  { %16009 = vst [vmem:[#allocation76_spill] sm:$0xff] %v13312_v19  ;;  %v10141_v23 = vrot.slane %v13036_v0, %v12363_v17  ;;  %v3931_v30 = vcombine.low %v2438_v33, %v2446_v36  ;;  %v13320_v7 = vrot.slane %v2584_v44, %v12363_v17  ;;  %v2599_v59 = vcombine.high %v13238_v37, %v13238_v37 }
 0x137   :  { %v13324_v63 = vcombine.low %v3915_v13, %v3922_v6  ;;  %v10172_v18 = vrot.slane %v13302_v3, %v12363_v17  ;;  %v13328_v21 = vcombine.low %v5773_v50, %v5780_v38  ;;  %v6654_v16 = vcombine.low %v2684_v12, %v13312_v19 }
 0x138   :  { %16010 = vst [vmem:[#allocation77_spill] sm:$0xff] %v13320_v7  ;;  %v3946_v52 = vrot.slane %v3932_v54, %v12363_v17  ;;  %v2608_v0 = vrot.slane %v2003_v9, %v12363_v17  ;;  %v2615_v33 = vrot.slane %v2601_v62, %v12363_v17  ;;  %v2754_v36 = vcombine.high %v2048_v39, %v2048_v39  ;;  %v11011_v62 = vld [vmem:[%s15823_s2] ss:$0 sm:$0xff] }
 0x139   :  { %16011 = vst [vmem:[#allocation78_spill] sm:$0xff] %v13328_v21  ;;  %v6661_v44 = vrot.slane %v6653_v55, %v12363_v17  ;;  %v6668_v37 = vrot.slane %v6654_v16, %v12363_v17  ;;  %v2761_v13 = vrot.slane %v2048_v39, %v12363_v17  ;;  %v2033_v3 = vadd.f32 %v13242_v24, %v12948_v60 }
 0x13a   :  { %v3939_v38 = vrot.slane %v3931_v30, %v12363_v17  ;;  %v10182_v6 = vcombine.low %v2599_v59, %v13320_v7  ;;  %v13342_v28 = vrot.slane %v2754_v36, %v12363_v17  ;;  %v13345_v9 = vadd.f32 %v2042_v32, %v12923_v11 }
 0x13b   :  { %v13350_v57 = vcombine.low %v6661_v44, %v6668_v37  ;;  %v13354_v54 = vadd.f32 %v13232_v49, %v12926_v20  ;;  %v2769_v60 = vcombine.high %v2761_v13, %v2761_v13  ;;  %v2703_v24 = vcombine.high %v2033_v3, %v2033_v3 }
 0x13c   :  { %16012 = vst [vmem:[#allocation79_spill] sm:$0xff] %v13342_v28  ;;  %16013 = vst [vmem:[#allocation80_spill] sm:$0xff] %v13345_v9  ;;  %v10165_v39 = vrot.slane %v13116_v51, %v12363_v17  ;;  %v2616_v50 = vcombine.high %v2608_v0, %v2608_v0  ;;  %v13359_v12 = vrot.slane %v2033_v3, %v12363_v17 }
 0x13d   :  { %16014 = vst [vmem:[#allocation81_spill] sm:$0xff] %v13350_v57  ;;  %16015 = vst [vmem:[#allocation82_spill] sm:$0xff] %v13354_v54  ;;  %v2737_v11 = vcombine.high %v13345_v9, %v13345_v9  ;;  %v3947_v55 = vcombine.low %v3939_v38, %v3946_v52  ;;  %v2617_v30 = vcombine.high %v2615_v33, %v2615_v33 }
 0x13e   :  { %16016 = vst [vmem:[#allocation83_spill] sm:$0xff] %v13359_v12  ;;  %v2717_v59 = vrot.slane %v2703_v24, %v12363_v17  ;;  %v3835_v16 = vadd.f32 %v11011_v62, %v13254_v48  ;;  %v10196_v20 = vrot.slane %v10182_v6, %v12363_v17  ;;  %v10206_v49 = vcombine.low %v2769_v60, %v13342_v28 }
 0x13f   :  { %v2718_v51 = vcombine.high %v13359_v12, %v13359_v12  ;;  %v13370_v32 = vrot.slane %v2737_v11, %v12363_v17  ;;  %v10189_v36 = vrot.slane %v13251_v40, %v12363_v17  ;;  %v13376_v52 = vrot.slane %v13354_v54, %v12363_v17 }
 0x140   :  { %v2719_v44 = vcombine.high %v2717_v59, %v2717_v59  ;;  %v3845_v48 = vrot.slane %v3835_v16, %v13182_v45  ;;  %v3955_v37 = vcombine.low %v2608_v0, %v2616_v50  ;;  %v3956_v6 = vcombine.low %v2615_v33, %v2617_v30 }
 0x141   :  { %16017 = vst [vmem:[#allocation84_spill] sm:$0xff] %v13370_v32  ;;  %16018 = vst [vmem:[#allocation85_spill] sm:$0xff] %v13376_v52  ;;  %v8429_v3 = vcombine.low %v2718_v51, %v2717_v59  ;;  %v2753_v38 = vcombine.high %v13370_v32, %v13370_v32  ;;  %v12274_v11 = vmov 0   ;;  %v10220_v40 = vrot.slane %v10206_v49, %v12363_v17 }
 0x142   :  { %v8430_v62 = vcombine.low %v2719_v44, %v13376_v52  ;;  %v3846_v60 = vcombine.high %v3845_v48, %v3845_v48  ;;  %v3853_v24 = vrot.slane %v3845_v48, %v13182_v45  ;;  %11639 = vset.pattern.permute.xlu0 %v12274_v11  ;;  %11640 = vset.pattern.permute.xlu1 %v12274_v11 }
 0x143   :  { %v10205_v28 = vcombine.low %v2753_v38, %v2761_v13  ;;  %v16019_v16 = vrot.slane %v13162_v29, %v12363_v17  ;;  %v16020_v0 = vrot.slane %v13172_v43, %v12363_v17  ;;  %v16022_v33 = vrot.slane %v13012_v41, %v12363_v17 }
 0x144   :  { %v16023_v30 = vrot.slane %v13008_v22, %v12363_v17  ;;  %v8437_v49 = vrot.slane %v8429_v3, %v12363_v17  ;;  %v8444_v13 = vrot.slane %v8430_v62, %v12363_v17  ;;  %v3860_v51 = vrot.slane %v3846_v60, %v13182_v45 }
 0x145   :  { %v13390_v50 = vcombine.low %v16020_v0, %v16019_v16  ;;  %v3861_v29 = vcombine.high %v3853_v24, %v3853_v24  ;;  %v10213_v44 = vrot.slane %v10205_v28, %v12363_v17  ;;  %v3866_v43 = vrot.slane %v3853_v24, %v13185_v31 }
 0x146   :  { %v13398_v59 = vcombine.low %v16023_v30, %v16022_v33  ;;  %v16025_v48 = vrot.slane %v13263_v58, %v12363_v17  ;;  %v13410_v38 = vcombine.low %v10165_v39, %v10172_v18  ;;  %v3970_v22 = vrot.slane %v3956_v6, %v12363_v17 }
 0x147   :  { %16021 = vst [vmem:[#allocation86_spill] sm:$0xff] %v13390_v50  ;;  %v13413_v11 = vcombine.low %v8437_v49, %v8444_v13  ;;  %v3862_v3 = vcombine.high %v3860_v51, %v3860_v51  ;;  %v3870_v62 = vrot.slane %v3860_v51, %v13185_v31  ;;  %v13416_v60 = vcombine.low %v10213_v44, %v10220_v40 }
 0x148   :  { %16024 = vst [vmem:[#allocation87_spill] sm:$0xff] %v13398_v59  ;;  %v13408_v41 = vcombine.low %v10141_v23, %v16025_v48  ;;  %16027 = vst [vmem:[#allocation89_spill] sm:$0xff] %v13410_v38  ;;  %v3874_v28 = vrot.slane %v3861_v29, %v13185_v31  ;;  %v3987_v24 = vadd.f32 %v13189_v26, %v3866_v43 }
 0x149   :  { %16028 = vst [vmem:[#allocation90_spill] sm:$0xff] %v13413_v11  ;;  %16029 = vst [vmem:[#allocation91_spill] sm:$0xff] %v13416_v60  ;;  %v16030_v58 = vrot.slane %v12954_v15, %v12363_v17  ;;  %v3954_v18 = vrot.slane %v13119_v34, %v12363_v17  ;;  %v3989_v39 = vadd.f32 %v13324_v63, %v3870_v62 }
 0x14a   :  { %16026 = vst [vmem:[#allocation88_spill] sm:$0xff] %v13408_v41  ;;  %v16031_v6 = vrot.slane %v13022_v46, %v12363_v17  ;;  %v13429_v0 = vcombine.low %v10189_v36, %v10196_v20  ;;  %v3963_v40 = vrot.slane %v3955_v37, %v12363_v17  ;;  %v3878_v33 = vrot.slane %v3862_v3, %v13185_v31  ;;  %v11012_v20 = vld [vmem:[%s15826_s5] ss:$0 sm:$0xff] }
 0x14b   :  { %v3988_v23 = vadd.f32 %v16030_v58, %v3866_v43  ;;  %v3991_v26 = vadd.f32 %v3947_v55, %v3874_v28  ;;  %11673 = vtanh.f32 %v3987_v24  ;;  %v3992_v30 = vadd.f32 %v3954_v18, %v3874_v28 }
 0x14c   :  { %v3990_v16 = vadd.f32 %v16031_v6, %v3870_v62  ;;  %16032 = vst [vmem:[#allocation92_spill] sm:$0xff] %v13429_v0  ;;  %v3971_v15 = vcombine.low %v3963_v40, %v3970_v22  ;;  %v3978_v34 = vrot.slane %v13245_v10, %v12363_v17 }
 0x14d   :  { %11675 = vtanh.f32 %v3988_v23 }
 0x14e   :  { %11677 = vtanh.f32 %v3989_v39  ;;  %v3993_v63 = vadd.f32 %v3971_v15, %v3878_v33  ;;  %v3994_v46 = vadd.f32 %v3978_v34, %v3878_v33 }
 0x14f   :  { %11679 = vtanh.f32 %v3990_v16 }
 0x150   :  { %11681 = vtanh.f32 %v3991_v26  ;;  %v11013_v26 = vld [vmem:[#allocation2] ss:$0 sm:$0xff] }
 0x151   :  { %11683 = vtanh.f32 %v3992_v30 }
 0x152   :  { %11685 = vtanh.f32 %v3993_v63 }
 0x153   :  { %11687 = vtanh.f32 %v3994_v46 }
 0x158   :  { %v11674_v55 = vpop.eup %11673 }
 0x159   :  { %v4009_v37 = vmul.f32 %v11674_v55, %v11012_v20  ;;  %v16033_v55 = vlaneseq }
 0x15a   :  { %v11676_v36 = vpop.eup %11675 }
 0x15b   :  { %v11678_v49 = vpop.eup %11677  ;;  %v4018_v51 = vsel %vm4017_vm2, %v4009_v37, 0.0  ;;  %v4010_v10 = vmul.f32 %v11676_v36, %v11012_v20  ;;  %v4069_v36 = vand.u32 127, %v16033_v55 }
 0x15c   :  { %v11680_v13 = vpop.eup %11679  ;;  %v4011_v29 = vmul.f32 %v11678_v49, %v11012_v20  ;;  %4019 = vadd.xlane.f32.xlu0 %v4018_v51 }
 0x15d   :  { %v11682_v44 = vpop.eup %11681  ;;  %v4012_v48 = vmul.f32 %v11680_v13, %v11012_v20  ;;  %v4022_v3 = vsel %vm4021_vm3, %v4010_v10, 0.0  ;;  %v4074_v49 = vadd.s32 4294967288, %v4069_v36 }
 0x15e   :  { %v4025_v43 = vsel %vm4017_vm2, %v4011_v29, 0.0  ;;  %v11684_v22 = vpop.eup %11683  ;;  %v4013_v62 = vmul.f32 %v11682_v44, %v11012_v20 }
 0x15f   :  { %4026 = vadd.xlane.f32.xlu1 %v4025_v43  ;;  %v11686_v28 = vpop.eup %11685  ;;  %v4028_v24 = vsel %vm4021_vm3, %v4012_v48, 0.0  ;;  %v4014_v58 = vmul.f32 %v11684_v22, %v11012_v20  ;;  %v13451_v51 = vsub.s32 %v4074_v49, %v12351_v8  ;;  %v13483_v49 = vsub.s32 1, %v12351_v8 }
 0x160   :  { %4023 = vadd.xlane.f32.xlu0 %v4022_v3  ;;  %v11688_v23 = vpop.eup %11687  ;;  %v4031_v18 = vsel %vm4017_vm2, %v4013_v62, 0.0  ;;  %v4015_v39 = vmul.f32 %v11686_v28, %v11012_v20 }
 0x161   :  { %v4034_v6 = vsel %vm4021_vm3, %v4014_v58, 0.0  ;;  %v4016_v16 = vmul.f32 %v11688_v23, %v11012_v20  ;;  %v13448_v20 = vsub.s32 %v4069_v36, %v12351_v8 }
 0x162   :  { %v4037_v40 = vsel %vm4017_vm2, %v4015_v39, 0.0 }
 0x163   :  { %4029 = vadd.xlane.f32.xlu1 %v4028_v24  ;;  %v4040_v33 = vsel %vm4021_vm3, %v4016_v16, 0.0 }
 0x164   :  { %4032 = vadd.xlane.f32.xlu0 %v4031_v18 }
 0x167   :  { %4035 = vadd.xlane.f32.xlu1 %v4034_v6 }
 0x168   :  { %4038 = vadd.xlane.f32.xlu0 %v4037_v40 }
 0x16b   :  { %4041 = vadd.xlane.f32.xlu1 %v4040_v33 }
 0x17e   :  { %4049 = vperm.xlu0 %11639, %v11013_v26  }
 0x1e5   :  { %v4020_v15 = vpop.xlane.xlu0 %4019 }
 0x1e8   :  { %v4027_v30 = vpop.xlane.xlu1 %4026 }
 0x1e9   :  { %v4024_v34 = vpop.xlane.xlu0 %4023 }
 0x1ec   :  { %v4030_v63 = vpop.xlane.xlu1 %4029 }
 0x1ed   :  { %v4033_v46 = vpop.xlane.xlu0 %4032 }
 0x1f0   :  { %v4036_v37 = vpop.xlane.xlu1 %4035 }
 0x1f1   :  { %v4039_v13 = vpop.xlane.xlu0 %4038 }
 0x1f4   :  { %v4042_v10 = vpop.xlane.xlu1 %4041 }
 0x1f9   :  { %v13453_v29 = vpop.permute.xlu0 %4049 }
 0x1fa   :  { %v4052_v44 = vadd.f32 %v13453_v29, %v4020_v15  ;;  %v4053_v43 = vadd.f32 %v13453_v29, %v4024_v34  ;;  %v4054_v48 = vadd.f32 %v13453_v29, %v4027_v30  ;;  %v4055_v22 = vadd.f32 %v13453_v29, %v4030_v63 }
 0x1fb   :  { %v4056_v3 = vadd.f32 %v13453_v29, %v4033_v46  ;;  %v4057_v62 = vadd.f32 %v13453_v29, %v4036_v37  ;;  %v4058_v28 = vadd.f32 %v13453_v29, %v4039_v13  ;;  %v4059_v24 = vadd.f32 %v13453_v29, %v4042_v10 }
 0x1fc   :  { %v4073_v58 = vrot.slane %v4052_v44, %v13448_v20  ;;  %v4078_v23 = vrot.slane %v4053_v43, %v13451_v51  ;;  %v4084_v18 = vrot.slane %v4054_v48, %v13448_v20  ;;  %v4088_v39 = vrot.slane %v4055_v22, %v13451_v51 }
 0x1fd   :  { %v4093_v6 = vrot.slane %v4056_v3, %v13448_v20  ;;  %v4097_v16 = vrot.slane %v4057_v62, %v13451_v51  ;;  %v4102_v40 = vrot.slane %v4058_v28, %v13448_v20  ;;  %v4106_v33 = vrot.slane %v4059_v24, %v13451_v51 }
 0x1fe   :  { %v4080_v26 = vsel %vm4079_vm4, %v4078_v23, %v4073_v58  ;;  %v4089_v15 = vsel %vm4079_vm4, %v4088_v39, %v4084_v18  ;;  %v13480_v37 = vsub.s32 3, %v12351_v8 }
 0x1ff   :  { %v4098_v30 = vsel %vm4079_vm4, %v4097_v16, %v4093_v6  ;;  %v4109_v34 = vsel %vm4108_vm5, %v4089_v15, %v4080_v26  ;;  %v4107_v63 = vsel %vm4079_vm4, %v4106_v33, %v4102_v40  ;;  %v13489_v40 = vsub.s32 2, %v12351_v8 }
 0x200   :  { %v4111_v46 = vsel %vm4110_vm6, %v4098_v30, %v4109_v34 }
 0x201   :  { %v4113_v55 = vsel %vm4112_vm7, %v4107_v63, %v4111_v46 }
 0x202   :  { %v4116_v36 = vsel %vm4115_vm8, %v4113_v55, -inf }
 0x203   :  { %4117 = vmax.xlane.f32.xlu1 %v4116_v36 }
 0x28c   :  { %v4118_v13 = vpop.xlane.xlu1 %4117 }
 0x28d   :  { %v4123_v10 = vrot.slane %v4118_v13, %v13185_v31  ;;  %v4135_v58 = vrot.slane %v4118_v13, %v13480_v37  ;;  %v4127_v23 = vrot.slane %v4118_v13, %v13483_v49  ;;  %v4131_v30 = vrot.slane %v4118_v13, %v13489_v40 }
 0x28f   :  { %v4140_v18 = vsub.f32 %v4052_v44, %v4123_v10  ;;  %v4141_v39 = vsub.f32 %v4053_v43, %v4123_v10  ;;  %v4147_v16 = vsub.f32 %v4059_v24, %v4135_v58  ;;  %v4142_v33 = vsub.f32 %v4054_v48, %v4127_v23 }
 0x290   :  { %v4143_v34 = vsub.f32 %v4055_v22, %v4127_v23  ;;  %v4144_v46 = vsub.f32 %v4056_v3, %v4131_v30  ;;  %v4145_v44 = vsub.f32 %v4057_v62, %v4131_v30  ;;  %v4146_v8 = vsub.f32 %v4058_v28, %v4135_v58  ;;  %v2772_v23 = vld [vmem:[%s15828_s7 + $0x8] sm:$0xff]  ;;  %v16044_v30 = vld [vmem:[#allocation16_spill] sm:$0xff] }
 0x291   :  { %v4148_v6 = vmul.f32 1.442695, %v4140_v18  ;;  %v4150_v26 = vmul.f32 1.442695, %v4141_v39  ;;  %v4162_v15 = vmul.f32 1.442695, %v4147_v16  ;;  %11321 = vmatprep.subr.mxu1 %v2772_v23 }
 0x292   :  { %v4152_v63 = vmul.f32 1.442695, %v4142_v33  ;;  %v4154_v55 = vmul.f32 1.442695, %v4143_v34  ;;  %v4156_v43 = vmul.f32 1.442695, %v4144_v46  ;;  %11322 = vmatpush3.msra.mxu1 %v2772_v23 }
 0x293   :  { %11689 = vpow2.f32 %v4148_v6  ;;  %v4158_v48 = vmul.f32 1.442695, %v4145_v44  ;;  %v4160_v3 = vmul.f32 1.442695, %v4146_v8  ;;  %v2771_v18 = vld [vmem:[%s15828_s7] sm:$0xff]  ;;  %v52_v39 = vld [vmem:[%s15829_s8 + $0x18] sm:$0xff] }
 0x294   :  { %11691 = vpow2.f32 %v4150_v26  ;;  %11323 = vmatprep.subr.mxu1 %v2771_v18  ;;  %v51_v6 = vld [vmem:[%s15829_s8 + $0x10] sm:$0xff]  ;;  %v50_v16 = vld [vmem:[%s15829_s8 + $0x8] sm:$0xff]  ;;  %v16045_v34 = vld [vmem:[#allocation17_spill] sm:$0xff] }
 0x295   :  { %11693 = vpow2.f32 %v4162_v15  ;;  %11324 = vmatpush3.msra.mxu1 %v2771_v18  ;;  %v16038_v33 = vld [vmem:[#allocation10_spill] sm:$0xff]  ;;  %v16043_v15 = vld [vmem:[#allocation15_spill] sm:$0xff]  ;;  %v16049_v44 = vld [vmem:[#allocation21_spill] sm:$0xff] }
 0x296   :  { %11695 = vpow2.f32 %v4152_v63  ;;  %11326 = vmatmul.mubr.msk.f32.vlgmr.msra.gmra.mxu1 %vm1705_vm0, %v12402_v61  ;;  %11404 = vmatprep.subr.mxu1 %v15969_v56  ;;  %v49_v61 = vld [vmem:[%s15829_s8] sm:$0xff]  ;;  %v16047_v46 = vld [vmem:[#allocation19_spill] sm:$0xff] }
 0x297   :  { %11697 = vpow2.f32 %v4154_v55  ;;  %11328 = vmatprep.mubr.msk.f32.mxu1 %vm1705_vm0, %v12410_v1  ;;  %11405 = vmatpush3.msra.mxu1 %v52_v39  ;;  %v16034_v1 = vld [vmem:[#allocation6_spill] sm:$0xff]  ;;  %v16048_v55 = vld [vmem:[#allocation20_spill] sm:$0xff]  ;;  %v16051_v8 = vld [vmem:[#allocation23_spill] sm:$0xff] }
 0x298   :  { %11699 = vpow2.f32 %v4156_v43  ;;  %11406 = vmatprep.subr.mxu1 %v15969_v56  ;;  %v16042_v26 = vld [vmem:[#allocation14_spill] sm:$0xff]  ;;  %v16055_v18 = vld [vmem:[#allocation27_spill] sm:$0xff] }
 0x299   :  { %11701 = vpow2.f32 %v4158_v48  ;;  %11407 = vmatpush3.msra.mxu1 %v51_v6  ;;  %v16046_v63 = vld [vmem:[#allocation18_spill] sm:$0xff]  ;;  %v16052_v48 = vld [vmem:[#allocation24_spill] sm:$0xff] }
 0x29a   :  { %11703 = vpow2.f32 %v4160_v3  ;;  %11329 = vmatmul.mubr.msk.f32.gmra.mxu1 %vm1705_vm0, %v12412_v2  ;;  %11408 = vmatprep.subr.mxu1 %v15969_v56  ;;  %v16035_v2 = vld [vmem:[#allocation8_spill] sm:$0xff]  ;;  %v16050_v43 = vld [vmem:[#allocation22_spill] sm:$0xff]  ;;  %v16053_v3 = vld [vmem:[#allocation25_spill] sm:$0xff] }
 0x29b   :  { %11331 = vmatprep.mubr.msk.f32.mxu1 %vm1705_vm0, %v12439_v25  ;;  %11409 = vmatpush3.msra.mxu1 %v50_v16  ;;  %v16036_v25 = vld [vmem:[#allocation7_spill] sm:$0xff]  ;;  %v16054_v23 = vld [vmem:[#allocation26_spill] sm:$0xff] }
 0x29c   :  { %11410 = vmatprep.subr.mxu1 %v15969_v56 }
 0x29d   :  { %11411 = vmatpush3.msra.mxu1 %v49_v61 }
 0x29e   :  { %11332 = vmatmul.mubr.msk.f32.gmra.mxu1 %vm1705_vm0, %v12467_v42  ;;  %11434 = vmatprep.subr.mxu1 %v15969_v56  ;;  %v16037_v42 = vld [vmem:[#allocation9_spill] sm:$0xff] }
 0x29f   :  { %11334 = vmatprep.mubr.msk.f32.mxu1 %vm1705_vm0, %v12475_v47  ;;  %v16039_v47 = vld [vmem:[#allocation11_spill] sm:$0xff] }
 0x2a0   :  { %v13492_v24 = vpop.eup %11689 }
 0x2a1   :  { %4173 = vperm.xlu1 %11640, %v13492_v24   ;;  %v13495_v36 = vpop.eup %11691 }
 0x2a2   :  { %v13498_v22 = vpop.eup %11693  ;;  %11335 = vmatmul.mubr.msk.f32.gmra.mxu1 %vm1705_vm0, %v12490_v53  ;;  %v16040_v53 = vld [vmem:[#allocation12_spill] sm:$0xff] }
 0x2a3   :  { %v13500_v13 = vpop.eup %11695  ;;  %4194 = vperm.xlu0 %11639, %v13498_v22   ;;  %11337 = vmatprep.mubr.msk.f32.mxu1 %vm1705_vm0, %v12503_v5  ;;  %v16041_v5 = vld [vmem:[#allocation13_spill] sm:$0xff] }
 0x2a4   :  { %v13504_v62 = vpop.eup %11697 }
 0x2a5   :  { %4176 = vperm.xlu1 %11640, %v13495_v36   ;;  %v13507_v28 = vpop.eup %11699 }
 0x2a6   :  { %v13510_v10 = vpop.eup %11701  ;;  %11338 = vmatmul.mubr.msk.f32.gmra.mxu1 %vm1705_vm0, %v16034_v1  ;;  %v16056_v1 = vld [vmem:[#allocation28_spill] sm:$0xff] }
 0x2a7   :  { %v13513_v58 = vpop.eup %11703  ;;  %11340 = vmatprep.mubr.msk.f32.mxu1 %vm1705_vm0, %v16035_v2  ;;  %v16057_v2 = vld [vmem:[#allocation29_spill] sm:$0xff] }
 0x2a9   :  { %4179 = vperm.xlu1 %11640, %v13500_v13  }
 0x2aa   :  { %11341 = vmatmul.mubr.msk.f32.gmra.mxu1 %vm1705_vm0, %v16036_v25  ;;  %v16058_v25 = vld [vmem:[#allocation30_spill] sm:$0xff] }
 0x2ab   :  { %11343 = vmatprep.mubr.msk.f32.mxu1 %vm1705_vm0, %v16037_v42  ;;  %v16059_v42 = vld [vmem:[#allocation31_spill] sm:$0xff] }
 0x2ad   :  { %4182 = vperm.xlu1 %11640, %v13504_v62  }
 0x2ae   :  { %11344 = vmatmul.mubr.msk.f32.gmra.mxu1 %vm1705_vm0, %v16038_v33  ;;  %v16060_v33 = vld [vmem:[#allocation32_spill] sm:$0xff] }
 0x2af   :  { %11346 = vmatprep.mubr.msk.f32.mxu1 %vm1705_vm0, %v16039_v47  ;;  %v16061_v47 = vld [vmem:[#allocation33_spill] sm:$0xff] }
 0x2b1   :  { %4185 = vperm.xlu1 %11640, %v13507_v28  }
 0x2b2   :  { %11347 = vmatmul.mubr.msk.f32.gmra.mxu1 %vm1705_vm0, %v16040_v53  ;;  %v16062_v53 = vld [vmem:[#allocation35_spill] sm:$0xff] }
 0x2b3   :  { %11349 = vmatprep.mubr.msk.f32.mxu1 %vm1705_vm0, %v16041_v5  ;;  %v16063_v5 = vld [vmem:[#allocation34_spill] sm:$0xff] }
 0x2b5   :  { %4188 = vperm.xlu1 %11640, %v13510_v10  }
 0x2b6   :  { %11350 = vmatmul.mubr.msk.f32.gmra.mxu1 %vm1705_vm0, %v16042_v26  ;;  %v16064_v26 = vld [vmem:[#allocation36_spill] sm:$0xff] }
 0x2b7   :  { %11352 = vmatprep.mubr.msk.f32.mxu1 %vm1705_vm0, %v16043_v15 }
 0x2b9   :  { %4191 = vperm.xlu1 %11640, %v13513_v58  }
 0x2ba   :  { %11353 = vmatmul.mubr.msk.f32.gmra.mxu1 %vm1705_vm0, %v16044_v30 }
 0x2bb   :  { %11355 = vmatprep.mubr.msk.f32.mxu1 %vm1705_vm0, %v16045_v34 }
 0x2be   :  { %11356 = vmatmul.mubr.msk.f32.gmra.mxu1 %vm1705_vm0, %v16046_v63 }
 0x2bf   :  { %11358 = vmatprep.mubr.msk.f32.mxu1 %vm1705_vm0, %v16047_v46 }
 0x2c2   :  { %11359 = vmatmul.mubr.msk.f32.gmra.mxu1 %vm1705_vm0, %v16048_v55 }
 0x2c3   :  { %11361 = vmatprep.mubr.msk.f32.mxu1 %vm1705_vm0, %v16049_v44 }
 0x2c6   :  { %11362 = vmatmul.mubr.msk.f32.gmra.mxu1 %vm1705_vm0, %v16050_v43 }
 0x2c7   :  { %11364 = vmatprep.mubr.msk.f32.mxu1 %vm1705_vm0, %v16051_v8 }
 0x2ca   :  { %11365 = vmatmul.mubr.msk.f32.gmra.mxu1 %vm1705_vm0, %v16052_v48 }
 0x2cb   :  { %11367 = vmatprep.mubr.msk.f32.mxu1 %vm1705_vm0, %v16053_v3 }
 0x2ce   :  { %11368 = vmatmul.mubr.msk.f32.gmra.mxu1 %vm1705_vm0, %v16054_v23 }
 0x2cf   :  { %11370 = vmatprep.mubr.msk.f32.mxu1 %vm1705_vm0, %v16055_v18 }
 0x2d2   :  { %11371 = vmatmul.mubr.msk.f32.gmra.mxu1 %vm1705_vm0, %v16056_v1 }
 0x2d3   :  { %11373 = vmatprep.mubr.msk.f32.mxu1 %vm1705_vm0, %v16057_v2 }
 0x2d6   :  { %11374 = vmatmul.mubr.msk.f32.gmra.mxu1 %vm1705_vm0, %v16058_v25 }
 0x2d7   :  { %11376 = vmatprep.mubr.msk.f32.mxu1 %vm1705_vm0, %v16059_v42 }
 0x2da   :  { %11377 = vmatmul.mubr.msk.f32.gmra.mxu1 %vm1705_vm0, %v16060_v33 }
 0x2db   :  { %11379 = vmatprep.mubr.msk.f32.mxu1 %vm1705_vm0, %v16061_v47 }
 0x2de   :  { %11380 = vmatmul.mubr.msk.f32.gmra.mxu1 %vm1705_vm0, %v16062_v53 }
 0x2df   :  { %11382 = vmatprep.mubr.msk.f32.mxu1 %vm1705_vm0, %v16063_v5 }
 0x2e2   :  { %11383 = vmatmul.mubr.msk.f32.gmra.mxu1 %vm1705_vm0, %v16064_v26 }
 0x2e3   :  { %11412 = vmatprep.mubr.msk.f32.mxu1 %vm12272_vm1, %v15969_v56 }
 0x2e6   :  { %11413 = vmatmul.mubr.f32.vlgmr.msra.gmra.mxu1 %v15969_v56 }
 0x2e7   :  { %11435 = vmatpush3.msra.mxu1 %v52_v39  ;;  %11442 = vmatprep.mubr.msk.f32.mxu1 %vm12272_vm1, %v15969_v56 }
 0x2e8   :  { %11436 = vmatprep.subr.mxu1 %v15969_v56 }
 0x2e9   :  { %11437 = vmatpush3.msra.mxu1 %v51_v6 }
 0x2ea   :  { %11438 = vmatprep.subr.mxu1 %v15969_v56 }
 0x2eb   :  { %11439 = vmatpush3.msra.mxu1 %v50_v16 }
 0x2ec   :  { %11440 = vmatprep.subr.mxu1 %v15969_v56 }
 0x2ed   :  { %11441 = vmatpush3.msra.mxu1 %v49_v61 }
 0x2ee   :  { %11445 = vmatprep.subr.mxu1 %v15969_v56 }
 0x31c   :  { %v4174_v15 = vpop.permute.xlu1 %4173 }
 0x31d   :  { %v4199_v61 = vrot.slane %v4174_v15, %v13448_v20 }
 0x31e   :  { %v4195_v16 = vpop.permute.xlu0 %4194 }
 0x31f   :  { %v4230_v18 = vrot.slane %v4195_v16, %v13451_v51 }
 0x320   :  { %v4177_v30 = vpop.permute.xlu1 %4176 }
 0x321   :  { %v4203_v44 = vrot.slane %v4177_v30, %v13451_v51 }
 0x323   :  { %v4204_v1 = vsel %vm4079_vm4, %v4203_v44, %v4199_v61 }
 0x324   :  { %v4180_v34 = vpop.permute.xlu1 %4179 }
 0x325   :  { %v4208_v6 = vrot.slane %v4180_v34, %v13448_v20 }
 0x328   :  { %v4183_v63 = vpop.permute.xlu1 %4182 }
 0x329   :  { %v4212_v39 = vrot.slane %v4183_v63, %v13451_v51 }
 0x32b   :  { %v4213_v48 = vsel %vm4079_vm4, %v4212_v39, %v4208_v6 }
 0x32c   :  { %v4186_v46 = vpop.permute.xlu1 %4185  ;;  %v4232_v25 = vsel %vm4108_vm5, %v4213_v48, %v4204_v1 }
 0x32d   :  { %v4217_v8 = vrot.slane %v4186_v46, %v13448_v20 }
 0x330   :  { %v4189_v55 = vpop.permute.xlu1 %4188 }
 0x331   :  { %v4221_v43 = vrot.slane %v4189_v55, %v13451_v51 }
 0x333   :  { %v4222_v23 = vsel %vm4079_vm4, %v4221_v43, %v4217_v8 }
 0x334   :  { %v4192_v3 = vpop.permute.xlu1 %4191  ;;  %v4233_v33 = vsel %vm4110_vm6, %v4222_v23, %v4232_v25 }
 0x335   :  { %v4226_v2 = vrot.slane %v4192_v3, %v13448_v20 }
 0x337   :  { %v4231_v42 = vsel %vm4079_vm4, %v4230_v18, %v4226_v2 }
 0x338   :  { %v4234_v47 = vsel %vm4112_vm7, %v4231_v42, %v4233_v33 }
 0x339   :  { %v4236_v53 = vsel %vm4115_vm8, %v4234_v47, 0.0 }
 0x33a   :  { %4237 = vadd.xlane.f32.xlu1 %v4236_v53 }
 0x356   :  { %v11327_v5 = vpop.f32.mrf.mxu1 }
 0x357   :  { %v3095_v26 = vcombine.high %v11327_v5, %v11327_v5  ;;  %v13643_v15 = vrot.slane %v11327_v5, %v12363_v17 }
 0x358   :  { %v13645_v30 = vpop.f32.mrf.mxu1 }
 0x359   :  { %v3109_v34 = vrot.slane %v3095_v26, %v12363_v17  ;;  %v3110_v63 = vcombine.high %v13643_v15, %v13643_v15 }
 0x35a   :  { %v13650_v46 = vpop.f32.mrf.mxu1 }
 0x35b   :  { %16065 = vst [vmem:[#allocation6_spill] sm:$0xff] %v13650_v46  ;;  %v5206_v39 = vcombine.low %v3110_v63, %v3109_v34  ;;  %v3111_v44 = vcombine.high %v3109_v34, %v3109_v34 }
 0x35c   :  { %v13652_v55 = vpop.f32.mrf.mxu1 }
 0x35d   :  { %v13656_v6 = vrot.slane %v13652_v55, %v12363_v17 }
 0x35e   :  { %v13658_v43 = vpop.f32.mrf.mxu1 }
 0x35f   :  { %16066 = vst [vmem:[#allocation8_spill] sm:$0xff] %v13656_v6  ;;  %16067 = vst [vmem:[#allocation7_spill] sm:$0xff] %v13658_v43  ;;  %v5207_v16 = vcombine.low %v3111_v44, %v13656_v6  ;;  %v5214_v43 = vrot.slane %v5206_v39, %v12363_v17 }
 0x360   :  { %v13661_v8 = vpop.f32.mrf.mxu1 }
 0x361   :  { %16068 = vst [vmem:[#allocation9_spill] sm:$0xff] %v13661_v8 }
 0x362   :  { %v13663_v61 = vpop.f32.mrf.mxu1 }
 0x364   :  { %v13665_v48 = vpop.f32.mrf.mxu1 }
 0x366   :  { %v13667_v3 = vpop.f32.mrf.mxu1 }
 0x367   :  { %16069 = vst [vmem:[#allocation10_spill] sm:$0xff] %v13667_v3 }
 0x368   :  { %v13669_v23 = vpop.f32.mrf.mxu1 }
 0x369   :  { %16070 = vst [vmem:[#allocation11_spill] sm:$0xff] %v13669_v23 }
 0x36a   :  { %v11342_v18 = vpop.f32.mrf.mxu1 }
 0x36b   :  { %v3265_v1 = vcombine.high %v11342_v18, %v11342_v18  ;;  %v13672_v2 = vrot.slane %v11342_v18, %v12363_v17 }
 0x36c   :  { %v13674_v25 = vpop.f32.mrf.mxu1 }
 0x36d   :  { %v3279_v42 = vrot.slane %v3265_v1, %v12363_v17  ;;  %v3280_v33 = vcombine.high %v13672_v2, %v13672_v2 }
 0x36e   :  { %v13679_v47 = vpop.f32.mrf.mxu1 }
 0x36f   :  { %v5230_v53 = vcombine.low %v3280_v33, %v3279_v42  ;;  %v3281_v26 = vcombine.high %v3279_v42, %v3279_v42 }
 0x370   :  { %v13681_v5 = vpop.f32.mrf.mxu1 }
 0x371   :  { %v13685_v34 = vrot.slane %v13681_v5, %v12363_v17 }
 0x372   :  { %v13687_v63 = vpop.f32.mrf.mxu1 }
 0x373   :  { %16071 = vst [vmem:[#allocation12_spill] sm:$0xff] %v13687_v63  ;;  %v5231_v44 = vcombine.low %v3281_v26, %v13685_v34  ;;  %v5221_v63 = vrot.slane %v5207_v16, %v12363_v17 }
 0x374   :  { %v13690_v18 = vpop.f32.mrf.mxu1 }
 0x375   :  { %16072 = vst [vmem:[#allocation13_spill] sm:$0xff] %v13690_v18 }
 0x376   :  { %v13692_v1 = vpop.f32.mrf.mxu1 }
 0x378   :  { %v13694_v3 = vpop.f32.mrf.mxu1 }
 0x37a   :  { %v13696_v60 = vpop.f32.mrf.mxu1 }
 0x37b   :  { %16073 = vst [vmem:[#allocation14_spill] sm:$0xff] %v13696_v60 }
 0x37c   :  { %v13698_v33 = vpop.f32.mrf.mxu1 }
 0x37d   :  { %16074 = vst [vmem:[#allocation15_spill] sm:$0xff] %v13698_v33 }
 0x37e   :  { %v11357_v0 = vpop.f32.mrf.mxu1 }
 0x37f   :  { %v3435_v42 = vcombine.high %v11357_v0, %v11357_v0  ;;  %v13701_v38 = vrot.slane %v11357_v0, %v12363_v17 }
 0x380   :  { %v13703_v41 = vpop.f32.mrf.mxu1 }
 0x381   :  { %v3449_v7 = vrot.slane %v3435_v42, %v12363_v17  ;;  %v3450_v26 = vcombine.high %v13701_v38, %v13701_v38 }
 0x382   :  { %v13708_v32 = vpop.f32.mrf.mxu1 }
 0x383   :  { %v5254_v9 = vcombine.low %v3450_v26, %v3449_v7  ;;  %v3451_v60 = vcombine.high %v3449_v7, %v3449_v7  ;;  %v13729_v7 = vcombine.low %v5214_v43, %v5221_v63  ;;  %v5245_v43 = vrot.slane %v5231_v44, %v12363_v17 }
 0x384   :  { %v13710_v54 = vpop.f32.mrf.mxu1 }
 0x385   :  { %v13714_v11 = vrot.slane %v13710_v54, %v12363_v17  ;;  %16078 = vst [vmem:[#allocation19_spill] sm:$0xff] %v13729_v7 }
 0x386   :  { %v13716_v52 = vpop.f32.mrf.mxu1 }
 0x387   :  { %16075 = vst [vmem:[#allocation16_spill] sm:$0xff] %v13716_v52  ;;  %v5255_v0 = vcombine.low %v3451_v60, %v13714_v11 }
 0x388   :  { %v13719_v59 = vpop.f32.mrf.mxu1 }
 0x389   :  { %16076 = vst [vmem:[#allocation17_spill] sm:$0xff] %v13719_v59 }
 0x38a   :  { %v13721_v42 = vpop.f32.mrf.mxu1 }
 0x38c   :  { %v13725_v26 = vpop.f32.mrf.mxu1 }
 0x38e   :  { %v13727_v12 = vpop.f32.mrf.mxu1 }
 0x38f   :  { %16077 = vst [vmem:[#allocation18_spill] sm:$0xff] %v13727_v12  ;;  %v5238_v12 = vrot.slane %v5230_v53, %v12363_v17 }
 0x390   :  { %v13731_v4 = vpop.f32.mrf.mxu1 }
 0x391   :  { %16079 = vst [vmem:[#allocation20_spill] sm:$0xff] %v13731_v4  ;;  %v13743_v63 = vcombine.low %v5238_v12, %v5245_v43  ;;  %v5262_v43 = vrot.slane %v5254_v9, %v12363_v17  ;;  %v3136_v9 = vrot.slane %v13650_v46, %v12363_v17 }
 0x392   :  { %v11372_v8 = vpop.f32.mrf.mxu1 }
 0x393   :  { %v3605_v52 = vcombine.high %v11372_v8, %v11372_v8  ;;  %v13734_v60 = vrot.slane %v11372_v8, %v12363_v17 }
 0x394   :  { %v13745_v57 = vpop.f32.mrf.mxu1 }
 0x395   :  { %v3619_v59 = vrot.slane %v3605_v52, %v12363_v17  ;;  %v3620_v39 = vcombine.high %v13734_v60, %v13734_v60 }
 0x396   :  { %v13749_v21 = vpop.f32.mrf.mxu1 }
 0x397   :  { %v13739_v18 = vcombine.low %v3620_v39, %v3619_v59  ;;  %16080 = vst [vmem:[#allocation21_spill] sm:$0xff] %v13749_v21  ;;  %v3621_v14 = vcombine.high %v3619_v59, %v3619_v59  ;;  %v3112_v59 = vcombine.high %v13652_v55, %v13652_v55 }
 0x398   :  { %v13751_v39 = vpop.f32.mrf.mxu1 }
 0x399   :  { %v13755_v53 = vrot.slane %v13751_v39, %v12363_v17 }
 0x39b   :  { %16081 = vst [vmem:[#allocation22_spill] sm:$0xff] %v13755_v53 }
 0x3c3   :  { %v4238_v16 = vpop.xlane.xlu1 %4237 }
 0x3c4   :  { %11705 = vrcp.f32 %v4238_v16  ;;  %v5279_v16 = vcombine.low %v3621_v14, %v13755_v53  ;;  %v3126_v14 = vrot.slane %v3112_v59, %v12363_v17  ;;  %v3180_v59 = vcombine.high %v13665_v48, %v13665_v48 }
 0x3d1   :  { %v11706_v19 = vpop.eup %11705 }
 0x3d2   :  { %v4248_v8 = vrot.slane %v11706_v19, %v13483_v49  ;;  %v4252_v44 = vrot.slane %v11706_v19, %v13489_v40  ;;  %v4244_v50 = vrot.slane %v11706_v19, %v13185_v31  ;;  %v4256_v55 = vrot.slane %v11706_v19, %v13480_v37 }
 0x3d4   :  { %v4264_v52 = vmul.f32 %v13504_v62, %v4248_v8  ;;  %v4263_v12 = vmul.f32 %v13500_v13, %v4248_v8  ;;  %v5269_v62 = vrot.slane %v5255_v0, %v12363_v17  ;;  %v13768_v13 = vpop.f32.mrf.mxu1  ;;  %v4262_v8 = vmul.f32 %v13495_v36, %v4244_v50 }
 0x3d5   :  { %16083 = vst [vmem:[#allocation24_spill] sm:$0xff] %v13768_v13  ;;  %v4265_v0 = vmul.f32 %v13507_v28, %v4252_v44  ;;  %v3144_v36 = vcombine.high %v3136_v9, %v3136_v9  ;;  %v4268_v28 = vmul.f32 %v13498_v22, %v4256_v55 }
 0x3d6   :  { %4286 = vperm.xlu0 %11639, %v4264_v52   ;;  %v4266_v52 = vmul.f32 %v13510_v10, %v4252_v44  ;;  %v13766_v7 = vcombine.low %v5262_v43, %v5269_v62  ;;  %v3128_v43 = vcombine.high %v3126_v14, %v3126_v14  ;;  %v3197_v62 = vcombine.high %v13663_v61, %v13663_v61 }
 0x3d7   :  { %v6095_v53 = vcombine.low %v3136_v9, %v3144_v36 }
 0x3d8   :  { %16082 = vst [vmem:[#allocation23_spill] sm:$0xff] %v13766_v7  ;;  %v6094_v19 = vcombine.low %v3126_v14, %v3128_v43  ;;  %v3211_v44 = vrot.slane %v3197_v62, %v12363_v17  ;;  %v3194_v7 = vrot.slane %v3180_v59, %v12363_v17 }
 0x3d9   :  { %v6109_v36 = vrot.slane %v6095_v53, %v12363_v17 }
 0x3da   :  { %4281 = vperm.xlu0 %11639, %v4263_v12   ;;  %v13772_v12 = vpop.f32.mrf.mxu1  ;;  %v3213_v22 = vcombine.high %v3211_v44, %v3211_v44  ;;  %v6102_v62 = vrot.slane %v6094_v19, %v12363_v17  ;;  %v3196_v9 = vcombine.high %v3194_v7, %v3194_v7  ;;  %v4267_v19 = vmul.f32 %v13513_v58, %v4256_v55 }
 0x3db   :  { %16084 = vst [vmem:[#allocation25_spill] sm:$0xff] %v13772_v12  ;;  %v3221_v12 = vrot.slane %v13669_v23, %v12363_v17  ;;  %v13807_v23 = vrot.slane %v13663_v61, %v12363_v17 }
 0x3dc   :  { %v13776_v10 = vpop.f32.mrf.mxu1 }
 0x3dd   :  { %v3229_v14 = vcombine.high %v3221_v12, %v3221_v12  ;;  %16088 = vst [vmem:[#allocation29_spill] sm:$0xff] %v13807_v23 }
 0x3de   :  { %4296 = vperm.xlu0 %11639, %v4266_v52   ;;  %v13782_v52 = vpop.f32.mrf.mxu1 }
 0x3df   :  { %v9647_v61 = vcombine.low %v3221_v12, %v3229_v14  ;;  %v3350_v14 = vcombine.high %v13694_v3, %v13694_v3 }
 0x3e0   :  { %v13790_v13 = vpop.f32.mrf.mxu1 }
 0x3e1   :  { %16086 = vst [vmem:[#allocation27_spill] sm:$0xff] %v13790_v13  ;;  %v4261_v13 = vmul.f32 %v13492_v24, %v4244_v50  ;;  %v5286_v50 = vrot.slane %v13739_v18, %v12363_v17  ;;  %v5293_v24 = vrot.slane %v5279_v16, %v12363_v17  ;;  %v9661_v58 = vrot.slane %v9647_v61, %v12363_v17 }
 0x3e2   :  { %4276 = vperm.xlu0 %11639, %v4262_v8   ;;  %v13788_v8 = vrot.slane %v13665_v48, %v12363_v17  ;;  %v13796_v46 = vpop.f32.mrf.mxu1  ;;  %v13850_v61 = vrot.slane %v13692_v1, %v12363_v17 }
 0x3e3   :  { %16087 = vst [vmem:[#allocation28_spill] sm:$0xff] %v13796_v46  ;;  %v13818_v6 = vcombine.low %v5286_v50, %v5293_v24 }
 0x3e4   :  { %16085 = vst [vmem:[#allocation26_spill] sm:$0xff] %v13788_v8  ;;  %v3195_v48 = vcombine.high %v13788_v8, %v13788_v8  ;;  %v9646_v8 = vcombine.low %v3211_v44, %v3213_v22  ;;  %v3367_v22 = vcombine.high %v13692_v1, %v13692_v1  ;;  %16093 = vst [vmem:[#allocation35_spill] sm:$0xff] %v13850_v61 }
 0x3e6   :  { %4291 = vperm.xlu0 %11639, %v4265_v0   ;;  %v13801_v0 = vpop.f32.mrf.mxu1  ;;  %v8758_v59 = vcombine.low %v3195_v48, %v3194_v7  ;;  %v3306_v7 = vrot.slane %v13679_v47, %v12363_v17 }
 0x3e8   :  { %v11414_v43 = vpop.f32.mrf.mxu1  ;;  %v8766_v18 = vrot.slane %v8758_v59, %v12363_v17  ;;  %v3314_v55 = vcombine.high %v3306_v7, %v3306_v7  ;;  %v3364_v59 = vrot.slane %v3350_v14, %v12363_v17 }
 0x3e9   :  { %v13815_v43 = vcombine.low %v6102_v62, %v6109_v36  ;;  %v13838_v36 = vrot.slane %v13694_v3, %v12363_v17 }
 0x3ea   :  { %4306 = vperm.xlu0 %11639, %v4268_v28   ;;  %v3282_v28 = vcombine.high %v13681_v5, %v13681_v5  ;;  %v8759_v5 = vcombine.low %v3196_v9, %v13807_v23  ;;  %v6119_v62 = vcombine.low %v3306_v7, %v3314_v55  ;;  %v3366_v7 = vcombine.high %v3364_v59, %v3364_v59 }
 0x3eb   :  { %16089 = vst [vmem:[#allocation30_spill] sm:$0xff] %v13815_v43  ;;  %16092 = vst [vmem:[#allocation33_spill] sm:$0xff] %v13838_v36  ;;  %v3365_v50 = vcombine.high %v13838_v36, %v13838_v36 }
 0x3ec   :  { %v3296_v53 = vrot.slane %v3282_v28, %v12363_v17  ;;  %v8773_v16 = vrot.slane %v8759_v5, %v12363_v17  ;;  %v3391_v28 = vrot.slane %v13698_v33, %v12363_v17  ;;  %v8783_v55 = vcombine.low %v3366_v7, %v13850_v61 }
 0x3ed   :  { %v13874_v7 = vrot.slane %v13725_v26, %v12363_v17 }
 0x3ee   :  { %4271 = vperm.xlu0 %11639, %v4261_v13   ;;  %v9654_v13 = vrot.slane %v9646_v8, %v12363_v17  ;;  %v3298_v12 = vcombine.high %v3296_v53, %v3296_v53  ;;  %v13828_v44 = vcombine.low %v8766_v18, %v8773_v16  ;;  %v3381_v8 = vrot.slane %v3367_v22, %v12363_v17 }
 0x3ef   :  { %v8782_v18 = vcombine.low %v3365_v50, %v3364_v59  ;;  %v3452_v16 = vcombine.high %v13710_v54, %v13710_v54  ;;  %v8797_v14 = vrot.slane %v8783_v55, %v12363_v17  ;;  %v3537_v50 = vcombine.high %v13721_v42, %v13721_v42  ;;  %16096 = vst [vmem:[#allocation93_spill] sm:$0xff] %v13874_v7 }
 0x3f0   :  { %16090 = vst [vmem:[#allocation31_spill] sm:$0xff] %v13828_v44  ;;  %v13830_v48 = vcombine.low %v9654_v13, %v9661_v58  ;;  %v6118_v9 = vcombine.low %v3296_v53, %v3298_v12  ;;  %v3383_v3 = vcombine.high %v3381_v8, %v3381_v8  ;;  %v3399_v53 = vcombine.high %v3391_v28, %v3391_v28 }
 0x3f1   :  { %v3476_v12 = vrot.slane %v13708_v32, %v12363_v17  ;;  %v3466_v22 = vrot.slane %v3452_v16, %v12363_v17  ;;  %v8790_v1 = vrot.slane %v8782_v18, %v12363_v17  ;;  %v3561_v16 = vrot.slane %v13731_v4, %v12363_v17 }
 0x3f2   :  { %4301 = vperm.xlu0 %11639, %v4267_v19   ;;  %16091 = vst [vmem:[#allocation32_spill] sm:$0xff] %v13830_v48  ;;  %v6126_v24 = vrot.slane %v6118_v9, %v12363_v17  ;;  %v6133_v19 = vrot.slane %v6119_v62, %v12363_v17  ;;  %v9670_v13 = vcombine.low %v3381_v8, %v3383_v3 }
 0x3f3   :  { %v9671_v58 = vcombine.low %v3391_v28, %v3399_v53  ;;  %v13862_v62 = vcombine.low %v8790_v1, %v8797_v14  ;;  %v3484_v54 = vcombine.high %v3476_v12, %v3476_v12  ;;  %v3468_v8 = vcombine.high %v3466_v22, %v3466_v22 }
 0x3f4   :  { %v13852_v5 = vcombine.low %v6126_v24, %v6133_v19  ;;  %v9678_v9 = vrot.slane %v9670_v13, %v12363_v17  ;;  %v3520_v24 = vcombine.high %v13725_v26, %v13725_v26  ;;  %v3551_v53 = vrot.slane %v3537_v50, %v12363_v17 }
 0x3f5   :  { %16094 = vst [vmem:[#allocation34_spill] sm:$0xff] %v13862_v62  ;;  %v9685_v59 = vrot.slane %v9671_v58, %v12363_v17  ;;  %v6143_v19 = vcombine.low %v3476_v12, %v3484_v54  ;;  %v6142_v3 = vcombine.low %v3466_v22, %v3468_v8  ;;  %v3535_v13 = vcombine.high %v13874_v7, %v13874_v7  ;;  %v16114_v62 = vld [vmem:[#allocation50_spill] sm:$0xff] }
 0x3f6   :  { %v3534_v18 = vrot.slane %v3520_v24, %v12363_v17  ;;  %v13886_v12 = vrot.slane %v13721_v42, %v12363_v17  ;;  %v3553_v26 = vcombine.high %v3551_v53, %v3551_v53  ;;  %v3569_v1 = vcombine.high %v3561_v16, %v3561_v16 }
 0x3f7   :  { %v13866_v28 = vcombine.low %v9678_v9, %v9685_v59  ;;  %v6150_v58 = vrot.slane %v6142_v3, %v12363_v17  ;;  %v6157_v55 = vrot.slane %v6143_v19, %v12363_v17  ;;  %v3622_v59 = vcombine.high %v13751_v39, %v13751_v39 }
 0x3f8   :  { %16097 = vst [vmem:[#allocation94_spill] sm:$0xff] %v13886_v12  ;;  %v3536_v22 = vcombine.high %v3534_v18, %v3534_v18  ;;  %v8806_v9 = vcombine.low %v3535_v13, %v3534_v18  ;;  %v9694_v54 = vcombine.low %v3551_v53, %v3553_v26  ;;  %v9695_v8 = vcombine.low %v3561_v16, %v3569_v1 }
 0x3f9   :  { %16095 = vst [vmem:[#allocation36_spill] sm:$0xff] %v13866_v28  ;;  %v13888_v14 = vcombine.low %v6150_v58, %v6157_v55  ;;  %v3646_v24 = vrot.slane %v13749_v21, %v12363_v17  ;;  %v3636_v19 = vrot.slane %v3622_v59, %v12363_v17  ;;  %v3707_v58 = vcombine.high %v13776_v10, %v13776_v10 }
 0x3fa   :  { %v8807_v50 = vcombine.low %v3536_v22, %v13886_v12  ;;  %v8814_v42 = vrot.slane %v8806_v9, %v12363_v17  ;;  %v9702_v18 = vrot.slane %v9694_v54, %v12363_v17  ;;  %v9709_v13 = vrot.slane %v9695_v8, %v12363_v17 }
 0x3fb   :  { %16098 = vst [vmem:[#allocation95_spill] sm:$0xff] %v13888_v14  ;;  %v3654_v39 = vcombine.high %v3646_v24, %v3646_v24  ;;  %v3638_v53 = vcombine.high %v3636_v19, %v3636_v19  ;;  %v3690_v55 = vcombine.high %v13782_v52, %v13782_v52  ;;  %v13910_v1 = vrot.slane %v13782_v52, %v12363_v17 }
 0x3fc   :  { %v8821_v3 = vrot.slane %v8807_v50, %v12363_v17  ;;  %v13902_v16 = vcombine.low %v9702_v18, %v9709_v13  ;;  %v3721_v9 = vrot.slane %v3707_v58, %v12363_v17  ;;  %v3731_v54 = vrot.slane %v13796_v46, %v12363_v17 }
 0x3fd   :  { %v6167_v26 = vcombine.low %v3646_v24, %v3654_v39  ;;  %v6166_v22 = vcombine.low %v3636_v19, %v3638_v53  ;;  %16101 = vst [vmem:[#allocation98_spill] sm:$0xff] %v13910_v1  ;;  %v3704_v59 = vrot.slane %v3690_v55, %v12363_v17  ;;  %v3705_v8 = vcombine.high %v13910_v1, %v13910_v1  ;;  %v16115_v1 = vld [vmem:[#allocation63_spill] sm:$0xff] }
 0x3fe   :  { %v13898_v48 = vcombine.low %v8814_v42, %v8821_v3  ;;  %16100 = vst [vmem:[#allocation97_spill] sm:$0xff] %v13902_v16  ;;  %v13922_v24 = vrot.slane %v13776_v10, %v12363_v17  ;;  %v3723_v52 = vcombine.high %v3721_v9, %v3721_v9  ;;  %v3739_v3 = vcombine.high %v3731_v54, %v3731_v54 }
 0x3ff   :  { %v6174_v50 = vrot.slane %v6166_v22, %v12363_v17  ;;  %v6181_v42 = vrot.slane %v6167_v26, %v12363_v17  ;;  %v3706_v19 = vcombine.high %v3704_v59, %v3704_v59  ;;  %v8830_v13 = vcombine.low %v3705_v8, %v3704_v59 }
 0x400   :  { %16099 = vst [vmem:[#allocation96_spill] sm:$0xff] %v13898_v48  ;;  %16102 = vst [vmem:[#allocation99_spill] sm:$0xff] %v13922_v24  ;;  %v9718_v39 = vcombine.low %v3721_v9, %v3723_v52  ;;  %v9719_v53 = vcombine.low %v3731_v54, %v3739_v3  ;;  %v3255_v9 = vrot.slane %v13674_v25, %v12363_v17  ;;  %v16112_v48 = vld [vmem:[#allocation40_spill] sm:$0xff] }
 0x401   :  { %v13924_v18 = vcombine.low %v6174_v50, %v6181_v42  ;;  %v8831_v58 = vcombine.low %v3706_v19, %v13922_v24  ;;  %v8838_v55 = vrot.slane %v8830_v13, %v12363_v17  ;;  %v3248_v50 = vcombine.high %v13674_v25, %v13674_v25 }
 0x402   :  { %v9726_v26 = vrot.slane %v9718_v39, %v12363_v17  ;;  %v9733_v10 = vrot.slane %v9719_v53, %v12363_v17  ;;  %v3263_v54 = vcombine.high %v3255_v9, %v3255_v9  ;;  %v3418_v19 = vcombine.high %v13703_v41, %v13703_v41 }
 0x403   :  { %16103 = vst [vmem:[#allocation100_spill] sm:$0xff] %v13924_v18  ;;  %v8845_v22 = vrot.slane %v8831_v58, %v12363_v17  ;;  %v3262_v59 = vrot.slane %v3248_v50, %v12363_v17  ;;  %v3425_v3 = vrot.slane %v13703_v41, %v12363_v17  ;;  %v4356_v25 = vrot.slane %v13672_v2, %v12363_v17 }
 0x404   :  { %v13933_v16 = vcombine.low %v9726_v26, %v9733_v10  ;;  %v4333_v42 = vcombine.low %v3255_v9, %v3263_v54  ;;  %v3432_v13 = vrot.slane %v3418_v19, %v12363_v17 }
 0x405   :  { %v13929_v46 = vcombine.low %v8838_v55, %v8845_v22  ;;  %v3264_v8 = vcombine.high %v3262_v59, %v3262_v59  ;;  %v3078_v55 = vcombine.high %v13645_v30, %v13645_v30  ;;  %v3433_v26 = vcombine.high %v3425_v3, %v3425_v3 }
 0x406   :  { %16105 = vst [vmem:[#allocation102_spill] sm:$0xff] %v13933_v16  ;;  %v4341_v39 = vrot.slane %v4333_v42, %v12363_v17  ;;  %v3434_v10 = vcombine.high %v3432_v13, %v3432_v13 }
 0x407   :  { %16104 = vst [vmem:[#allocation101_spill] sm:$0xff] %v13929_v46  ;;  %v4334_v52 = vcombine.low %v3262_v59, %v3264_v8  ;;  %v3085_v59 = vrot.slane %v13645_v30, %v12363_v17  ;;  %v3092_v54 = vrot.slane %v3078_v55, %v12363_v17  ;;  %v4357_v42 = vcombine.low %v3425_v3, %v3433_v26 }
 0x408   :  { %v4358_v2 = vcombine.low %v3432_v13, %v3434_v10  ;;  %v4380_v3 = vrot.slane %v13701_v38, %v12363_v17 }
 0x409   :  { %v4348_v53 = vrot.slane %v4334_v52, %v12363_v17  ;;  %v3588_v52 = vcombine.high %v13745_v57, %v13745_v57  ;;  %v3093_v16 = vcombine.high %v3085_v59, %v3085_v59  ;;  %v3094_v4 = vcombine.high %v3092_v54, %v3092_v54 }
 0x40a   :  { %v4365_v55 = vrot.slane %v4357_v42, %v12363_v17 }
 0x40b   :  { %v4349_v50 = vcombine.low %v4341_v39, %v4348_v53  ;;  %v3595_v39 = vrot.slane %v13745_v57, %v12363_v17  ;;  %v3602_v53 = vrot.slane %v3588_v52, %v12363_v17  ;;  %v4309_v10 = vcombine.low %v3085_v59, %v3093_v16 }
 0x40c   :  { %v4332_v59 = vrot.slane %v13643_v15, %v12363_v17  ;;  %v4404_v15 = vrot.slane %v13734_v60, %v12363_v17 }
 0x451   :  { %v4287_v58 = vpop.permute.xlu0 %4286 }
 0x452   :  { %v4416_v22 = vmul.f32 %v4356_v25, %v4287_v58 }
 0x454   :  { %v4430_v8 = vsel %vm4421_vm9, %v4416_v22, 0.0  ;;  %v4372_v22 = vrot.slane %v4358_v2, %v12363_v17  ;;  %v4317_v2 = vrot.slane %v4309_v10, %v12363_v17 }
 0x455   :  { %v4282_v9 = vpop.permute.xlu0 %4281 }
 0x456   :  { %v4415_v41 = vmul.f32 %v4349_v50, %v4282_v9  ;;  %v4310_v50 = vcombine.low %v3092_v54, %v3094_v4  ;;  %v4373_v33 = vcombine.low %v4365_v55, %v4372_v22  ;;  %v13973_v54 = vld [vmem:[%s15830_s9] ss:$0 sm:$0xff] }
 0x458   :  { %v4431_v19 = vadd.f32 %v4430_v8, %v4415_v41  ;;  %v3603_v41 = vcombine.high %v3595_v39, %v3595_v39  ;;  %v3604_v8 = vcombine.high %v3602_v53, %v3602_v53  ;;  %v4324_v38 = vrot.slane %v4310_v50, %v12363_v17 }
 0x459   :  { %v4297_v25 = vpop.permute.xlu0 %4296 }
 0x45a   :  { %v4432_v58 = vrot.slane %v4431_v19, 4  ;;  %v4418_v9 = vmul.f32 %v4380_v3, %v4297_v25  ;;  %v4382_v44 = vcombine.low %v3602_v53, %v3604_v8  ;;  %v4325_v22 = vcombine.low %v4317_v2, %v4324_v38 }
 0x45c   :  { %v4433_v30 = vadd.f32 %v4432_v58, %v4431_v19  ;;  %v4528_v19 = vrot.slane %v13801_v0, 1  ;;  %v4438_v42 = vsel %vm4421_vm9, %v4418_v9, 0.0  ;;  %v4381_v58 = vcombine.low %v3595_v39, %v3603_v41 }
 0x45d   :  { %v4277_v13 = vpop.permute.xlu0 %4276 }
 0x45e   :  { %v4434_v26 = vrot.slane %v4433_v30, 2  ;;  %v4414_v55 = vmul.f32 %v4332_v59, %v4277_v13  ;;  %v4389_v39 = vrot.slane %v4381_v58, %v12363_v17 }
 0x460   :  { %v4435_v28 = vadd.f32 %v4434_v26, %v4433_v30  ;;  %v4422_v50 = vsel %vm4421_vm9, %v4414_v55, 0.0 }
 0x461   :  { %v4292_v57 = vpop.permute.xlu0 %4291 }
 0x462   :  { %v4436_v46 = vrot.slane %v4435_v28, 1  ;;  %v4417_v52 = vmul.f32 %v4373_v33, %v4292_v57 }
 0x464   :  { %v4439_v16 = vadd.f32 %v4438_v42, %v4417_v52  ;;  %v4437_v4 = vadd.f32 %v4436_v46, %v4435_v28  ;;  %v4396_v46 = vrot.slane %v4382_v44, %v12363_v17 }
 0x465   :  { %v4307_v33 = vpop.permute.xlu0 %4306 }
 0x466   :  { %v4440_v25 = vrot.slane %v4439_v16, 4  ;;  %v4536_v30 = vadd.f32 %v4528_v19, %v4437_v4  ;;  %v4420_v9 = vmul.f32 %v4404_v15, %v4307_v33  ;;  %v4397_v8 = vcombine.low %v4389_v39, %v4396_v46 }
 0x467   :  { %v4529_v19 = vrot.slane %v13801_v0, 2 }
 0x468   :  { %v4441_v3 = vadd.f32 %v4440_v25, %v4439_v16  ;;  %v4546_v26 = vadd.f32 %v13973_v54, %v4536_v30  ;;  %v4446_v44 = vsel %vm4421_vm9, %v4420_v9, 0.0 }
 0x469   :  { %v4272_v28 = vpop.permute.xlu0 %4271 }
 0x46a   :  { %v4442_v53 = vrot.slane %v4441_v3, 2  ;;  %11707 = vtanh.f32 %v4546_v26  ;;  %v4413_v10 = vmul.f32 %v4325_v22, %v4272_v28 }
 0x46c   :  { %v4443_v41 = vadd.f32 %v4442_v53, %v4441_v3  ;;  %v4423_v13 = vadd.f32 %v4422_v50, %v4413_v10  ;;  %v4530_v53 = vrot.slane %v13801_v0, 3 }
 0x46d   :  { %v4302_v57 = vpop.permute.xlu0 %4301 }
 0x46e   :  { %v4444_v52 = vrot.slane %v4443_v41, 1  ;;  %v4424_v42 = vrot.slane %v4423_v13, 4  ;;  %v4419_v2 = vmul.f32 %v4397_v8, %v4302_v57 }
 0x470   :  { %v4445_v38 = vadd.f32 %v4444_v52, %v4443_v41  ;;  %v4425_v60 = vadd.f32 %v4424_v42, %v4423_v13  ;;  %v4447_v58 = vadd.f32 %v4446_v44, %v4419_v2  ;;  %v11016_v52 = vmul.f32 -1.442695, %v4546_v26 }
 0x472   :  { %v4537_v16 = vadd.f32 %v4529_v19, %v4445_v38  ;;  %v4426_v4 = vrot.slane %v4425_v60, 2  ;;  %v4448_v59 = vrot.slane %v4447_v58, 4 }
 0x474   :  { %v4547_v25 = vadd.f32 %v13973_v54, %v4537_v16  ;;  %v4427_v33 = vadd.f32 %v4426_v4, %v4425_v60  ;;  %v4449_v30 = vadd.f32 %v4448_v59, %v4447_v58 }
 0x476   :  { %11709 = vtanh.f32 %v4547_v25  ;;  %v4428_v55 = vrot.slane %v4427_v33, 1  ;;  %v4450_v22 = vrot.slane %v4449_v30, 2 }
 0x477   :  { %v11708_v3 = vpop.eup %11707 }
 0x478   :  { %v4429_v39 = vadd.f32 %v4428_v55, %v4427_v33  ;;  %v4451_v46 = vadd.f32 %v4450_v22, %v4449_v30  ;;  %4587 = vrot.lane.b32.xlu0 %v11708_v3, %s12275_s24 }
 0x47a   :  { %v4535_v15 = vadd.f32 %v13801_v0, %v4429_v39  ;;  %v4452_v28 = vrot.slane %v4451_v46, 1  ;;  %v11017_v0 = vmul.f32 -1.442695, %v4547_v25 }
 0x47c   :  { %v4545_v10 = vadd.f32 %v13973_v54, %v4535_v15  ;;  %v4453_v50 = vadd.f32 %v4452_v28, %v4451_v46 }
 0x47e   :  { %11711 = vtanh.f32 %v4545_v10  ;;  %v4538_v9 = vadd.f32 %v4530_v53, %v4453_v50  ;;  %v11015_v2 = vmul.f32 -1.442695, %v4545_v10 }
 0x480   :  { %v4548_v41 = vadd.f32 %v13973_v54, %v4538_v9 }
 0x482   :  { %11713 = vtanh.f32 %v4548_v41  ;;  %v11018_v44 = vmul.f32 -1.442695, %v4548_v41 }
 0x483   :  { %v11710_v13 = vpop.eup %11709  ;;  %11715 = vpow2.f32 %v11016_v52 }
 0x484   :  { %4589 = vrot.lane.b32.xlu1 %v11710_v13, %s12275_s24  ;;  %11717 = vpow2.f32 %v11017_v0 }
 0x48b   :  { %v11712_v8 = vpop.eup %11711 }
 0x48c   :  { %4585 = vrot.lane.b32.xlu0 %v11712_v8, %s12275_s24 }
 0x48f   :  { %v11714_v57 = vpop.eup %11713 }
 0x490   :  { %4591 = vrot.lane.b32.xlu0 %v11714_v57, %s12275_s24  ;;  %v11716_v19 = vpop.eup %11715 }
 0x491   :  { %v4562_v42 = vadd.f32 1.0, %v11716_v19  ;;  %v11718_v38 = vpop.eup %11717 }
 0x492   :  { %v4563_v60 = vadd.f32 1.0, %v11718_v38 }
 0x493   :  { %11719 = vrcp.f32 %v4562_v42 }
 0x494   :  { %11721 = vpow2.f32 %v11015_v2 }
 0x495   :  { %11723 = vpow2.f32 %v11018_v44 }
 0x496   :  { %11725 = vrcp.f32 %v4563_v60 }
 0x4a0   :  { %v11720_v58 = vpop.eup %11719 }
 0x4a1   :  { %v11722_v16 = vpop.eup %11721  ;;  %v4578_v10 = vmul.f32 0.0, %v11720_v58 }
 0x4a2   :  { %v4561_v33 = vadd.f32 1.0, %v11722_v16  ;;  %v11724_v26 = vpop.eup %11723 }
 0x4a3   :  { %v4564_v25 = vadd.f32 1.0, %v11724_v26  ;;  %v11726_v30 = vpop.eup %11725 }
 0x4a4   :  { %11727 = vrcp.f32 %v4561_v33  ;;  %v4579_v41 = vmul.f32 0.0, %v11726_v30 }
 0x4a5   :  { %11729 = vrcp.f32 %v4564_v25 }
 0x4b1   :  { %v11728_v3 = vpop.eup %11727 }
 0x4b2   :  { %v11730_v15 = vpop.eup %11729  ;;  %v4577_v52 = vmul.f32 0.0, %v11728_v3 }
 0x4b3   :  { %v4580_v42 = vmul.f32 0.0, %v11730_v15 }
 0x4ea   :  { %v4588_v4 = vpop.permute.xlu0 %4587 }
 0x4eb   :  { %v4598_v59 = vmul.f32 %v11720_v58, %v4588_v4 }
 0x4ed   :  { %4607 = vrot.lane.b32.xlu0 %v4598_v59, %s12276_s25 }
 0x4f6   :  { %v4590_v55 = vpop.permute.xlu1 %4589 }
 0x4f7   :  { %v4599_v22 = vmul.f32 %v11726_v30, %v4590_v55 }
 0x4f9   :  { %4609 = vrot.lane.b32.xlu0 %v4599_v22, %s12276_s25 }
 0x4fe   :  { %v4586_v39 = vpop.permute.xlu0 %4585 }
 0x4ff   :  { %v4597_v46 = vmul.f32 %v11728_v3, %v4586_v39 }
 0x501   :  { %4605 = vrot.lane.b32.xlu1 %v4597_v46, %s12276_s25 }
 0x502   :  { %v4592_v28 = vpop.permute.xlu0 %4591 }
 0x503   :  { %v4600_v53 = vmul.f32 %v11730_v15, %v4592_v28 }
 0x505   :  { %4611 = vrot.lane.b32.xlu0 %v4600_v53, %s12276_s25 }
 0x55f   :  { %v4608_v50 = vpop.permute.xlu0 %4607 }
 0x560   :  { %v13996_v9 = vadd.f32 %v4608_v50, %v4578_v10 }
 0x562   :  { %11731 = vtanh.f32 %v13996_v9 }
 0x56b   :  { %v4610_v13 = vpop.permute.xlu0 %4609 }
 0x56c   :  { %v13999_v8 = vadd.f32 %v4610_v13, %v4579_v41 }
 0x56e   :  { %11733 = vtanh.f32 %v13999_v8  ;;  %v4681_v41 = vrot.slane %v13999_v8, 6 }
 0x56f   :  { %v11732_v57 = vpop.eup %11731 }
 0x570   :  { %4631 = vrot.lane.b32.xlu1 %v11732_v57, %s12275_s24 }
 0x573   :  { %v4606_v0 = vpop.permute.xlu1 %4605 }
 0x574   :  { %v14003_v19 = vadd.f32 %v4606_v0, %v4577_v52 }
 0x576   :  { %11735 = vtanh.f32 %v14003_v19 }
 0x577   :  { %v4612_v2 = vpop.permute.xlu0 %4611 }
 0x578   :  { %v14006_v44 = vadd.f32 %v4612_v2, %v4580_v42  ;;  %v14041_v42 = vld [vmem:[%s15822_s1 + $0x38] sm:$0xff] }
 0x579   :  { %v14048_v2 = vld [vmem:[%s15829_s8 + $0x18] sm:$0xff] }
 0x57a   :  { %11737 = vtanh.f32 %v14006_v44 }
 0x57b   :  { %v11734_v38 = vpop.eup %11733 }
 0x57c   :  { %4633 = vrot.lane.b32.xlu0 %v11734_v38, %s12275_s24  ;;  %v14054_v38 = vld [vmem:[%s15822_s1 + $0x30] sm:$0xff] }
 0x583   :  { %v11736_v60 = vpop.eup %11735 }
 0x584   :  { %4629 = vrot.lane.b32.xlu1 %v11736_v60, %s12275_s24  ;;  %v14062_v60 = vld [vmem:[%s15829_s8 + $0x10] sm:$0xff] }
 0x587   :  { %v11738_v16 = vpop.eup %11737 }
 0x588   :  { %4635 = vrot.lane.b32.xlu0 %v11738_v16, %s12275_s24  ;;  %v14068_v16 = vld [vmem:[%s15822_s1 + $0x28] sm:$0xff] }
 0x5e2   :  { %v4632_v4 = vpop.permute.xlu1 %4631 }
 0x5e3   :  { %v14012_v59 = vmul.f32 %v11720_v58, %v4632_v4  ;;  %v14076_v4 = vld [vmem:[%s15829_s8 + $0x8] sm:$0xff] }
 0x5e5   :  { %16106 = vst [vmem:[#allocation103_spill] sm:$0xff] %v14012_v59  ;;  %v4666_v22 = vrot.slane %v14012_v59, 7 }
 0x5ee   :  { %v4634_v33 = vpop.permute.xlu0 %4633 }
 0x5ef   :  { %v14016_v55 = vmul.f32 %v11726_v30, %v4634_v33  ;;  %v4679_v30 = vrot.slane %v13996_v9, 7  ;;  %v14082_v33 = vld [vmem:[%s15822_s1 + $0x20] sm:$0xff] }
 0x5f1   :  { %16108 = vst [vmem:[#allocation105_spill] sm:$0xff] %v14016_v55  ;;  %v4668_v53 = vrot.slane %v14016_v55, 6 }
 0x5f6   :  { %v4630_v26 = vpop.permute.xlu1 %4629 }
 0x5f7   :  { %v14014_v25 = vmul.f32 %v11728_v3, %v4630_v26  ;;  %v4680_v3 = vsel %vm4108_vm5, %v4679_v30, %v14003_v19  ;;  %v14090_v26 = vld [vmem:[%s15829_s8] sm:$0xff] }
 0x5f8   :  { %v4682_v13 = vsel %vm4110_vm6, %v4681_v41, %v4680_v3 }
 0x5f9   :  { %16107 = vst [vmem:[#allocation104_spill] sm:$0xff] %v14014_v25  ;;  %v4667_v28 = vsel %vm4108_vm5, %v4666_v22, %v14014_v25  ;;  %v14096_v22 = vld [vmem:[%s15822_s1 + $0x18] sm:$0xff] }
 0x5fa   :  { %v4636_v39 = vpop.permute.xlu0 %4635  ;;  %v4669_v58 = vsel %vm4110_vm6, %v4668_v53, %v4667_v28  ;;  %v14115_v28 = vld [vmem:[%s15822_s1 + $0x8] sm:$0xff]  ;;  %v14122_v53 = vld [vmem:[%s15822_s1] sm:$0xff] }
 0x5fb   :  { %v14019_v46 = vmul.f32 %v11730_v15, %v4636_v39  ;;  %v4683_v15 = vrot.slane %v14006_v44, 5  ;;  %v14107_v39 = vld [vmem:[%s15822_s1 + $0x10] sm:$0xff] }
 0x5fd   :  { %16109 = vst [vmem:[#allocation106_spill] sm:$0xff] %v14019_v46  ;;  %v4670_v10 = vrot.slane %v14019_v46, 5  ;;  %v4684_v57 = vsel %vm4112_vm7, %v4683_v15, %v4682_v13  ;;  %v16110_v13 = vld [vmem:[#allocation38_spill] sm:$0xff] }
 0x5ff   :  { %v4671_v50 = vsel %vm4112_vm7, %v4670_v10, %v4669_v58 }
 0x600   :  { %4672 = vrot.lane.b32.xlu1 %v4671_v50, %s12276_s25  ;;  %v14131_v50 = vld [vmem:[%s15823_s2] ss:$0 sm:$0xff] }
 0x672   :  { %v4673_v52 = vpop.permute.xlu1 %4672 }
 0x673   :  { %v4686_v0 = vsel %vm4454_vm10, %v4673_v52, %v4684_v57  ;;  %11443 = vmatmul.mubr.msk.f32.vlgmr.msra.gmra.mxu1 %vm4454_vm10, %v4673_v52  ;;  %v2140_v57 = vcombine.high %v16110_v13, %v16110_v13  ;;  %v16111_v52 = vld [vmem:[#allocation48_spill] sm:$0xff] }
 0x674   :  { %11432 = vmatmul.mubr.msk.f32.vlgmr.msra.gmra.mxu0 %vm3764_vm11, %v4686_v0  ;;  %11446 = vmatpush3.msra.mxu1 %v14041_v42  ;;  %v2310_v0 = vcombine.high %v16111_v52, %v16111_v52  ;;  %v16113_v52 = vld [vmem:[#allocation61_spill] sm:$0xff] }
 0x675   :  { %11447 = vmatprep.subr.mxu1 %v15969_v56  ;;  %11465 = vmatpush3.msra.mxu0 %v14048_v2  ;;  %v2480_v12 = vcombine.high %v16113_v52, %v16113_v52 }
 0x676   :  { %11448 = vmatpush3.msra.mxu1 %v14054_v38  ;;  %11466 = vmatprep.subr.mxu0 %v15969_v56 }
 0x677   :  { %11449 = vmatprep.subr.mxu1 %v15969_v56  ;;  %11467 = vmatpush3.msra.mxu0 %v14062_v60 }
 0x678   :  { %11450 = vmatpush3.msra.mxu1 %v14068_v16  ;;  %11468 = vmatprep.subr.mxu0 %v15969_v56 }
 0x679   :  { %11451 = vmatprep.subr.mxu1 %v15969_v56  ;;  %11469 = vmatpush3.msra.mxu0 %v14076_v4 }
 0x67a   :  { %11452 = vmatpush3.msra.mxu1 %v14082_v33  ;;  %11470 = vmatprep.subr.mxu0 %v15969_v56 }
 0x67b   :  { %11453 = vmatprep.subr.mxu1 %v15969_v56  ;;  %11471 = vmatpush3.msra.mxu0 %v14090_v26 }
 0x67c   :  { %11454 = vmatpush3.msra.mxu1 %v14096_v22  ;;  %11472 = vmatprep.mubr.msk.f32.mxu0 %vm12272_vm1, %v15969_v56 }
 0x67d   :  { %11455 = vmatprep.subr.mxu1 %v15969_v56  ;;  %11461 = vmatprep.mubr.msk.f32.mxu1 %vm12272_vm1, %v15969_v56 }
 0x67e   :  { %11456 = vmatpush3.msra.mxu1 %v14107_v39  ;;  %11475 = vmatprep.subr.mxu0 %v15969_v56 }
 0x67f   :  { %11457 = vmatprep.subr.mxu1 %v15969_v56 }
 0x680   :  { %11458 = vmatpush3.msra.mxu1 %v14115_v28 }
 0x681   :  { %11459 = vmatprep.subr.mxu1 %v15969_v56 }
 0x682   :  { %11460 = vmatpush3.msra.mxu1 %v14122_v53 }
 0x683   :  { %11494 = vmatprep.subr.mxu1 %v15969_v56 }
 0x733   :  { %v14126_v10 = vpop.f32.mrf.mxu1 }
 0x734   :  { %v4756_v58 = vpop.f32.mrf.mxu0 }
 0x735   :  { %v4757_v30 = vadd.f32 %v14131_v50, %v4756_v58  ;;  %v11444_v3 = vpop.f32.mrf.mxu1  ;;  %v4828_v58 = vrot.slane %v2140_v57, %v12363_v17 }
 0x736   :  { %v11433_v15 = vpop.f32.mrf.mxu0  ;;  %v4852_v3 = vrot.slane %v2310_v0, %v12363_v17  ;;  %v4876_v0 = vrot.slane %v2480_v12, %v12363_v17  ;;  %v14160_v12 = vld [vmem:[%s15826_s5] ss:$0 sm:$0xff] }
 0x737   :  { %v4767_v41 = vrot.slane %v4757_v30, %v13182_v45 }
 0x739   :  { %v4768_v46 = vcombine.high %v4767_v41, %v4767_v41  ;;  %v4775_v55 = vrot.slane %v4767_v41, %v13182_v45 }
 0x73b   :  { %v4782_v59 = vrot.slane %v4768_v46, %v13182_v45  ;;  %v4783_v25 = vcombine.high %v4775_v55, %v4775_v55  ;;  %v4788_v24 = vrot.slane %v4775_v55, %v13185_v31 }
 0x73d   :  { %v4784_v15 = vcombine.high %v4782_v59, %v4782_v59  ;;  %v4792_v30 = vrot.slane %v4782_v59, %v13185_v31  ;;  %v4796_v13 = vrot.slane %v4783_v25, %v13185_v31  ;;  %v4909_v23 = vadd.f32 %v16112_v48, %v4788_v24 }
 0x73e   :  { %v4910_v41 = vadd.f32 %v4828_v58, %v4788_v24  ;;  %v2650_v59 = vcombine.high %v13278_v27, %v13278_v27 }
 0x73f   :  { %v4800_v46 = vrot.slane %v4784_v15, %v13185_v31  ;;  %v4911_v61 = vadd.f32 %v16114_v62, %v4792_v30  ;;  %v4912_v55 = vadd.f32 %v4852_v3, %v4792_v30  ;;  %v4913_v57 = vadd.f32 %v16115_v1, %v4796_v13 }
 0x740   :  { %11739 = vtanh.f32 %v4909_v23  ;;  %v4914_v25 = vadd.f32 %v4876_v0, %v4796_v13  ;;  %v4900_v24 = vrot.slane %v2650_v59, %v12363_v17 }
 0x741   :  { %11741 = vtanh.f32 %v4910_v41  ;;  %v4915_v48 = vadd.f32 %v13306_v35, %v4800_v46 }
 0x742   :  { %11743 = vtanh.f32 %v4911_v61  ;;  %v4916_v62 = vadd.f32 %v4900_v24, %v4800_v46 }
 0x743   :  { %11745 = vtanh.f32 %v4912_v55 }
 0x744   :  { %11747 = vtanh.f32 %v4913_v57 }
 0x745   :  { %11749 = vtanh.f32 %v4915_v48 }
 0x746   :  { %11751 = vtanh.f32 %v4914_v25 }
 0x747   :  { %11753 = vtanh.f32 %v4916_v62 }
 0x74d   :  { %v11740_v1 = vpop.eup %11739 }
 0x74e   :  { %v11742_v23 = vpop.eup %11741  ;;  %v4925_v27 = vmul.f32 %v14160_v12, %v11740_v1 }
 0x74f   :  { %v11744_v35 = vpop.eup %11743  ;;  %v4926_v61 = vmul.f32 %v14160_v12, %v11742_v23 }
 0x750   :  { %v11746_v58 = vpop.eup %11745  ;;  %v4933_v3 = vsel %vm4017_vm2, %v4925_v27, 0.0  ;;  %v4927_v15 = vmul.f32 %v14160_v12, %v11744_v35 }
 0x751   :  { %v11748_v30 = vpop.eup %11747  ;;  %v4936_v13 = vsel %vm4021_vm3, %v4926_v61, 0.0  ;;  %4934 = vadd.xlane.f32.xlu0 %v4933_v3  ;;  %v4928_v55 = vmul.f32 %v14160_v12, %v11746_v58 }
 0x752   :  { %4937 = vadd.xlane.f32.xlu1 %v4936_v13  ;;  %v4929_v52 = vmul.f32 %v14160_v12, %v11748_v30  ;;  %v11750_v41 = vpop.eup %11749  ;;  %v4939_v46 = vsel %vm4017_vm2, %v4927_v15, 0.0 }
 0x753   :  { %v11752_v57 = vpop.eup %11751  ;;  %v4931_v59 = vmul.f32 %v14160_v12, %v11750_v41  ;;  %v4942_v48 = vsel %vm4021_vm3, %v4928_v55, 0.0 }
 0x754   :  { %v4945_v0 = vsel %vm4017_vm2, %v4929_v52, 0.0  ;;  %v4930_v25 = vmul.f32 %v14160_v12, %v11752_v57  ;;  %v11754_v24 = vpop.eup %11753 }
 0x755   :  { %4940 = vadd.xlane.f32.xlu0 %v4939_v46  ;;  %v4951_v62 = vsel %vm4017_vm2, %v4931_v59, 0.0  ;;  %v4932_v23 = vmul.f32 %v14160_v12, %v11754_v24 }
 0x756   :  { %4946 = vadd.xlane.f32.xlu1 %v4945_v0  ;;  %v4948_v1 = vsel %vm4021_vm3, %v4930_v25, 0.0 }
 0x757   :  { %v4954_v27 = vsel %vm4021_vm3, %v4932_v23, 0.0 }
 0x759   :  { %4943 = vadd.xlane.f32.xlu0 %v4942_v48 }
 0x75a   :  { %4952 = vadd.xlane.f32.xlu1 %v4951_v62 }
 0x75d   :  { %4949 = vadd.xlane.f32.xlu0 %v4948_v1 }
 0x761   :  { %4955 = vadd.xlane.f32.xlu0 %v4954_v27 }
 0x7da   :  { %v4935_v35 = vpop.xlane.xlu0 %4934 }
 0x7db   :  { %v4938_v61 = vpop.xlane.xlu1 %4937  ;;  %v4957_v13 = vadd.f32 %v4935_v35, %v13453_v29 }
 0x7dc   :  { %v4958_v52 = vadd.f32 %v4938_v61, %v13453_v29 }
 0x7dd   :  { %v4976_v48 = vrot.slane %v4957_v13, %v13448_v20 }
 0x7de   :  { %v4941_v58 = vpop.xlane.xlu0 %4940  ;;  %v4980_v25 = vrot.slane %v4958_v52, %v13451_v51 }
 0x7df   :  { %v4947_v3 = vpop.xlane.xlu1 %4946  ;;  %v4959_v41 = vadd.f32 %v4941_v58, %v13453_v29 }
 0x7e0   :  { %v4961_v46 = vadd.f32 %v4947_v3, %v13453_v29 }
 0x7e1   :  { %v4985_v24 = vrot.slane %v4959_v41, %v13448_v20 }
 0x7e2   :  { %v4944_v15 = vpop.xlane.xlu0 %4943  ;;  %v4994_v23 = vrot.slane %v4961_v46, %v13448_v20 }
 0x7e3   :  { %v4960_v30 = vadd.f32 %v4944_v15, %v13453_v29  ;;  %v4953_v55 = vpop.xlane.xlu1 %4952 }
 0x7e4   :  { %v4963_v62 = vadd.f32 %v4953_v55, %v13453_v29 }
 0x7e5   :  { %v4989_v0 = vrot.slane %v4960_v30, %v13451_v51 }
 0x7e6   :  { %v4950_v57 = vpop.xlane.xlu0 %4949  ;;  %v5003_v3 = vrot.slane %v4963_v62, %v13448_v20 }
 0x7e7   :  { %v4962_v59 = vadd.f32 %v4950_v57, %v13453_v29  ;;  %v4990_v61 = vsel %vm4079_vm4, %v4989_v0, %v4985_v24  ;;  %v4981_v57 = vsel %vm4079_vm4, %v4980_v25, %v4976_v48 }
 0x7e8   :  { %v5009_v7 = vsel %vm4108_vm5, %v4990_v61, %v4981_v57 }
 0x7e9   :  { %v4998_v1 = vrot.slane %v4962_v59, %v13451_v51 }
 0x7ea   :  { %v4956_v27 = vpop.xlane.xlu0 %4955 }
 0x7eb   :  { %v4964_v35 = vadd.f32 %v4956_v27, %v13453_v29  ;;  %v4999_v58 = vsel %vm4079_vm4, %v4998_v1, %v4994_v23 }
 0x7ec   :  { %v5010_v36 = vsel %vm4110_vm6, %v4999_v58, %v5009_v7 }
 0x7ed   :  { %v5007_v15 = vrot.slane %v4964_v35, %v13451_v51 }
 0x7ef   :  { %v5008_v55 = vsel %vm4079_vm4, %v5007_v15, %v5003_v3 }
 0x7f0   :  { %v5011_v18 = vsel %vm4112_vm7, %v5008_v55, %v5010_v36 }
 0x7f1   :  { %v5013_v27 = vsel %vm4115_vm8, %v5011_v18, -inf }
 0x7f2   :  { %5014 = vmax.xlane.f32.xlu1 %v5013_v27 }
 0x87b   :  { %v5015_v0 = vpop.xlane.xlu1 %5014 }
 0x87c   :  { %v5020_v24 = vrot.slane %v5015_v0, %v13185_v31  ;;  %v5024_v1 = vrot.slane %v5015_v0, %v13483_v49  ;;  %v5028_v23 = vrot.slane %v5015_v0, %v13489_v40  ;;  %v5032_v7 = vrot.slane %v5015_v0, %v13480_v37 }
 0x87e   :  { %v5037_v43 = vsub.f32 %v4957_v13, %v5020_v24  ;;  %v5038_v48 = vsub.f32 %v4958_v52, %v5020_v24  ;;  %v5040_v25 = vsub.f32 %v4960_v30, %v5024_v1  ;;  %v5039_v61 = vsub.f32 %v4959_v41, %v5024_v1 }
 0x87f   :  { %v5042_v58 = vsub.f32 %v4962_v59, %v5028_v23  ;;  %v5041_v18 = vsub.f32 %v4961_v46, %v5028_v23  ;;  %v5044_v55 = vsub.f32 %v4964_v35, %v5032_v7  ;;  %v5043_v14 = vsub.f32 %v4963_v62, %v5032_v7 }
 0x880   :  { %v5045_v57 = vmul.f32 1.442695, %v5037_v43  ;;  %v5047_v3 = vmul.f32 1.442695, %v5038_v48  ;;  %v5051_v36 = vmul.f32 1.442695, %v5040_v25 }
 0x881   :  { %v5049_v15 = vmul.f32 1.442695, %v5039_v61  ;;  %v5055_v27 = vmul.f32 1.442695, %v5042_v58  ;;  %v5053_v21 = vmul.f32 1.442695, %v5041_v18 }
 0x882   :  { %11755 = vpow2.f32 %v5045_v57  ;;  %v5059_v13 = vmul.f32 1.442695, %v5044_v55  ;;  %v5057_v30 = vmul.f32 1.442695, %v5043_v14 }
 0x883   :  { %11757 = vpow2.f32 %v5047_v3 }
 0x884   :  { %11759 = vpow2.f32 %v5051_v36 }
 0x885   :  { %11761 = vpow2.f32 %v5049_v15 }
 0x886   :  { %11763 = vpow2.f32 %v5055_v27 }
 0x887   :  { %11765 = vpow2.f32 %v5053_v21 }
 0x888   :  { %11767 = vpow2.f32 %v5059_v13 }
 0x889   :  { %11769 = vpow2.f32 %v5057_v30 }
 0x88f   :  { %v11756_v43 = vpop.eup %11755 }
 0x890   :  { %v11758_v52 = vpop.eup %11757  ;;  %5070 = vperm.xlu0 %11639, %v11756_v43  }
 0x891   :  { %5073 = vperm.xlu1 %11640, %v11758_v52   ;;  %v11760_v41 = vpop.eup %11759 }
 0x892   :  { %v11762_v46 = vpop.eup %11761 }
 0x893   :  { %v11764_v59 = vpop.eup %11763 }
 0x894   :  { %5079 = vperm.xlu0 %11639, %v11760_v41   ;;  %v11766_v35 = vpop.eup %11765 }
 0x895   :  { %5076 = vperm.xlu1 %11640, %v11762_v46   ;;  %v11768_v62 = vpop.eup %11767 }
 0x896   :  { %v11770_v0 = vpop.eup %11769 }
 0x898   :  { %5085 = vperm.xlu0 %11639, %v11764_v59  }
 0x899   :  { %5082 = vperm.xlu1 %11640, %v11766_v35  }
 0x89c   :  { %5091 = vperm.xlu0 %11639, %v11768_v62  }
 0x89d   :  { %5088 = vperm.xlu1 %11640, %v11770_v0  }
 0x90b   :  { %v5071_v21 = vpop.permute.xlu0 %5070 }
 0x90c   :  { %v5074_v14 = vpop.permute.xlu1 %5073  ;;  %v5096_v7 = vrot.slane %v5071_v21, %v13448_v20 }
 0x90d   :  { %v5100_v3 = vrot.slane %v5074_v14, %v13451_v51 }
 0x90f   :  { %v5080_v24 = vpop.permute.xlu0 %5079  ;;  %v5101_v13 = vsel %vm4079_vm4, %v5100_v3, %v5096_v7 }
 0x910   :  { %v5077_v1 = vpop.permute.xlu1 %5076  ;;  %v5109_v48 = vrot.slane %v5080_v24, %v13451_v51 }
 0x911   :  { %v5105_v23 = vrot.slane %v5077_v1, %v13448_v20 }
 0x913   :  { %v5086_v25 = vpop.permute.xlu0 %5085  ;;  %v5110_v36 = vsel %vm4079_vm4, %v5109_v48, %v5105_v23 }
 0x914   :  { %v5083_v61 = vpop.permute.xlu1 %5082  ;;  %v5118_v57 = vrot.slane %v5086_v25, %v13451_v51  ;;  %v5129_v24 = vsel %vm4108_vm5, %v5110_v36, %v5101_v13 }
 0x915   :  { %v5114_v58 = vrot.slane %v5083_v61, %v13448_v20 }
 0x917   :  { %v5092_v18 = vpop.permute.xlu0 %5091  ;;  %v5119_v27 = vsel %vm4079_vm4, %v5118_v57, %v5114_v58 }
 0x918   :  { %v5089_v15 = vpop.permute.xlu1 %5088  ;;  %v5127_v55 = vrot.slane %v5092_v18, %v13451_v51  ;;  %v5130_v21 = vsel %vm4110_vm6, %v5119_v27, %v5129_v24 }
 0x919   :  { %v5123_v30 = vrot.slane %v5089_v15, %v13448_v20 }
 0x91b   :  { %v5128_v14 = vsel %vm4079_vm4, %v5127_v55, %v5123_v30 }
 0x91c   :  { %v5131_v1 = vsel %vm4112_vm7, %v5128_v14, %v5130_v21 }
 0x91d   :  { %v5133_v23 = vsel %vm4115_vm8, %v5131_v1, 0.0 }
 0x91e   :  { %5134 = vadd.xlane.f32.xlu1 %v5133_v23 }
 0x9a7   :  { %v5135_v48 = vpop.xlane.xlu1 %5134 }
 0x9a8   :  { %11771 = vrcp.f32 %v5135_v48 }
 0x9b5   :  { %v11772_v25 = vpop.eup %11771 }
 0x9b6   :  { %v5145_v61 = vrot.slane %v11772_v25, %v13483_v49  ;;  %v5149_v7 = vrot.slane %v11772_v25, %v13489_v40  ;;  %v5141_v36 = vrot.slane %v11772_v25, %v13185_v31  ;;  %v5153_v55 = vrot.slane %v11772_v25, %v13480_v37 }
 0x9b8   :  { %v5161_v57 = vmul.f32 %v11760_v41, %v5145_v61  ;;  %v5160_v3 = vmul.f32 %v11762_v46, %v5145_v61  ;;  %v5163_v58 = vmul.f32 %v11764_v59, %v5149_v7  ;;  %v5159_v18 = vmul.f32 %v11758_v52, %v5141_v36 }
 0x9b9   :  { %v5162_v15 = vmul.f32 %v11766_v35, %v5149_v7  ;;  %v5165_v27 = vmul.f32 %v11768_v62, %v5153_v55  ;;  %v5158_v13 = vmul.f32 %v11756_v43, %v5141_v36  ;;  %v5164_v41 = vmul.f32 %v11770_v0, %v5153_v55 }
 0x9ba   :  { %5183 = vperm.xlu0 %11639, %v5161_v57   ;;  %v3297_v46 = vcombine.high %v13685_v34, %v13685_v34  ;;  %v3467_v62 = vcombine.high %v13714_v11, %v13714_v11  ;;  %v16116_v57 = vld [vmem:[#allocation8_spill] sm:$0xff]  ;;  %v5423_v11 = vrot.slane %v14126_v10, 1 }
 0x9bc   :  { %v5253_v59 = vrot.slane %v3297_v46, %v12363_v17  ;;  %v5277_v23 = vrot.slane %v3467_v62, %v12363_v17 }
 0x9be   :  { %5178 = vperm.xlu0 %11639, %v5160_v3   ;;  %v3127_v3 = vcombine.high %v16116_v57, %v16116_v57 }
 0x9c2   :  { %5193 = vperm.xlu0 %11639, %v5163_v58   ;;  %v16117_v58 = vld [vmem:[#allocation23_spill] sm:$0xff] }
 0x9c6   :  { %5173 = vperm.xlu0 %11639, %v5159_v18  }
 0x9ca   :  { %5188 = vperm.xlu0 %11639, %v5162_v15  }
 0x9ce   :  { %5203 = vperm.xlu0 %11639, %v5165_v27   ;;  %v16118_v27 = vld [vmem:[#allocation22_spill] sm:$0xff] }
 0x9d2   :  { %5168 = vperm.xlu0 %11639, %v5158_v13   ;;  %v3637_v13 = vcombine.high %v16118_v27, %v16118_v27 }
 0x9d6   :  { %5198 = vperm.xlu0 %11639, %v5164_v41   ;;  %v5229_v41 = vrot.slane %v3127_v3, %v12363_v17 }
 0xa35   :  { %v5184_v30 = vpop.permute.xlu0 %5183 }
 0xa36   :  { %v5313_v24 = vmul.f32 %v5253_v59, %v5184_v30 }
 0xa38   :  { %v5326_v35 = vsel %vm4421_vm9, %v5313_v24, 0.0 }
 0xa39   :  { %v5179_v14 = vpop.permute.xlu0 %5178 }
 0xa3a   :  { %v5312_v52 = vmul.f32 %v13743_v63, %v5179_v14 }
 0xa3c   :  { %v5327_v21 = vadd.f32 %v5326_v35, %v5312_v52  ;;  %v5301_v35 = vrot.slane %v3637_v13, %v12363_v17 }
 0xa3d   :  { %v5194_v43 = vpop.permute.xlu0 %5193 }
 0xa3e   :  { %v5328_v1 = vrot.slane %v5327_v21, 4  ;;  %v5315_v25 = vmul.f32 %v5277_v23, %v5194_v43  ;;  %v16119_v43 = vld [vmem:[#allocation19_spill] sm:$0xff] }
 0xa40   :  { %v5329_v0 = vadd.f32 %v5328_v1, %v5327_v21  ;;  %v5334_v18 = vsel %vm4421_vm9, %v5315_v25, 0.0 }
 0xa41   :  { %v5174_v48 = vpop.permute.xlu0 %5173 }
 0xa42   :  { %v5330_v34 = vrot.slane %v5329_v0, 2  ;;  %v5311_v24 = vmul.f32 %v5229_v41, %v5174_v48 }
 0xa44   :  { %v5331_v61 = vadd.f32 %v5330_v34, %v5329_v0  ;;  %v5318_v0 = vsel %vm4421_vm9, %v5311_v24, 0.0 }
 0xa45   :  { %v5189_v7 = vpop.permute.xlu0 %5188 }
 0xa46   :  { %v5332_v63 = vrot.slane %v5331_v61, 1  ;;  %v5314_v36 = vmul.f32 %v16117_v58, %v5189_v7 }
 0xa48   :  { %v5333_v15 = vadd.f32 %v5332_v63, %v5331_v61  ;;  %v5335_v55 = vadd.f32 %v5334_v18, %v5314_v36  ;;  %v5424_v63 = vrot.slane %v14126_v10, 2 }
 0xa49   :  { %v5204_v46 = vpop.permute.xlu0 %5203 }
 0xa4a   :  { %v5431_v59 = vadd.f32 %v5423_v11, %v5333_v15  ;;  %v5336_v30 = vrot.slane %v5335_v55, 4  ;;  %v5317_v23 = vmul.f32 %v5301_v35, %v5204_v46 }
 0xa4c   :  { %v5435_v14 = vadd.f32 %v13973_v54, %v5431_v59  ;;  %v5337_v52 = vadd.f32 %v5336_v30, %v5335_v55  ;;  %v5342_v7 = vsel %vm4421_vm9, %v5317_v23, 0.0 }
 0xa4d   :  { %v5169_v21 = vpop.permute.xlu0 %5168 }
 0xa4e   :  { %11773 = vtanh.f32 %v5435_v14  ;;  %v5338_v62 = vrot.slane %v5337_v52, 2  ;;  %v5310_v1 = vmul.f32 %v16119_v43, %v5169_v21  ;;  %v5425_v21 = vrot.slane %v14126_v10, 3 }
 0xa50   :  { %v5339_v34 = vadd.f32 %v5338_v62, %v5337_v52  ;;  %v5319_v25 = vadd.f32 %v5318_v0, %v5310_v1 }
 0xa51   :  { %v5199_v61 = vpop.permute.xlu0 %5198 }
 0xa52   :  { %v5340_v57 = vrot.slane %v5339_v34, 1  ;;  %v5320_v3 = vrot.slane %v5319_v25, 4  ;;  %v5316_v48 = vmul.f32 %v13818_v6, %v5199_v61  ;;  %v11022_v61 = vmul.f32 -1.442695, %v5435_v14 }
 0xa54   :  { %v5341_v58 = vadd.f32 %v5340_v57, %v5339_v34  ;;  %v5321_v36 = vadd.f32 %v5320_v3, %v5319_v25  ;;  %v5343_v18 = vadd.f32 %v5342_v7, %v5316_v48 }
 0xa56   :  { %v5432_v11 = vadd.f32 %v5424_v63, %v5341_v58  ;;  %v5322_v15 = vrot.slane %v5321_v36, 2  ;;  %v5344_v55 = vrot.slane %v5343_v18, 4 }
 0xa58   :  { %v5436_v27 = vadd.f32 %v13973_v54, %v5432_v11  ;;  %v5323_v13 = vadd.f32 %v5322_v15, %v5321_v36  ;;  %v5345_v41 = vadd.f32 %v5344_v55, %v5343_v18 }
 0xa5a   :  { %11775 = vtanh.f32 %v5436_v27  ;;  %v5324_v46 = vrot.slane %v5323_v13, 1  ;;  %v5346_v59 = vrot.slane %v5345_v41, 2 }
 0xa5b   :  { %v11774_v30 = vpop.eup %11773 }
 0xa5c   :  { %v5325_v24 = vadd.f32 %v5324_v46, %v5323_v13  ;;  %v5347_v6 = vadd.f32 %v5346_v59, %v5345_v41  ;;  %5476 = vrot.lane.b32.xlu0 %v11774_v30, %s12275_s24 }
 0xa5e   :  { %v5430_v52 = vadd.f32 %v14126_v10, %v5325_v24  ;;  %v5348_v35 = vrot.slane %v5347_v6, 1  ;;  %v11023_v10 = vmul.f32 -1.442695, %v5436_v27 }
 0xa60   :  { %v5434_v62 = vadd.f32 %v13973_v54, %v5430_v52  ;;  %v5349_v43 = vadd.f32 %v5348_v35, %v5347_v6 }
 0xa62   :  { %11777 = vtanh.f32 %v5434_v62  ;;  %v5433_v1 = vadd.f32 %v5425_v21, %v5349_v43  ;;  %v11021_v48 = vmul.f32 -1.442695, %v5434_v62 }
 0xa64   :  { %v5437_v0 = vadd.f32 %v13973_v54, %v5433_v1 }
 0xa66   :  { %11779 = vtanh.f32 %v5437_v0  ;;  %v11024_v54 = vmul.f32 -1.442695, %v5437_v0 }
 0xa67   :  { %v11776_v23 = vpop.eup %11775  ;;  %11781 = vpow2.f32 %v11022_v61 }
 0xa68   :  { %5478 = vrot.lane.b32.xlu1 %v11776_v23, %s12275_s24  ;;  %11783 = vpow2.f32 %v11023_v10 }
 0xa6f   :  { %v11778_v34 = vpop.eup %11777 }
 0xa70   :  { %5474 = vrot.lane.b32.xlu0 %v11778_v34, %s12275_s24 }
 0xa73   :  { %v11780_v25 = vpop.eup %11779 }
 0xa74   :  { %5480 = vrot.lane.b32.xlu0 %v11780_v25, %s12275_s24  ;;  %v11782_v57 = vpop.eup %11781 }
 0xa75   :  { %v5451_v3 = vadd.f32 1.0, %v11782_v57  ;;  %v11784_v7 = vpop.eup %11783 }
 0xa76   :  { %v5452_v63 = vadd.f32 1.0, %v11784_v7 }
 0xa77   :  { %11785 = vrcp.f32 %v5451_v3 }
 0xa78   :  { %11787 = vpow2.f32 %v11021_v48 }
 0xa79   :  { %11789 = vpow2.f32 %v11024_v54 }
 0xa7a   :  { %11791 = vrcp.f32 %v5452_v63 }
 0xa84   :  { %v11786_v58 = vpop.eup %11785 }
 0xa85   :  { %v11788_v36 = vpop.eup %11787  ;;  %v5467_v35 = vmul.f32 %v11786_v58, %v13996_v9 }
 0xa86   :  { %v5450_v15 = vadd.f32 1.0, %v11788_v36  ;;  %v11790_v14 = vpop.eup %11789 }
 0xa87   :  { %v5453_v55 = vadd.f32 1.0, %v11790_v14  ;;  %v11792_v27 = vpop.eup %11791 }
 0xa88   :  { %11793 = vrcp.f32 %v5450_v15  ;;  %v5468_v43 = vmul.f32 %v11792_v27, %v13999_v8 }
 0xa89   :  { %11795 = vrcp.f32 %v5453_v55 }
 0xa95   :  { %v11794_v46 = vpop.eup %11793 }
 0xa96   :  { %v11796_v24 = vpop.eup %11795  ;;  %v5466_v34 = vmul.f32 %v11794_v46, %v14003_v19 }
 0xa97   :  { %v5469_v9 = vmul.f32 %v11796_v24, %v14006_v44 }
 0xace   :  { %v5477_v18 = vpop.permute.xlu0 %5476 }
 0xacf   :  { %v5487_v11 = vmul.f32 %v11786_v58, %v5477_v18 }
 0xad1   :  { %5496 = vrot.lane.b32.xlu0 %v5487_v11, %s12276_s25 }
 0xada   :  { %v5479_v13 = vpop.permute.xlu1 %5478 }
 0xadb   :  { %v5488_v41 = vmul.f32 %v11792_v27, %v5479_v13 }
 0xadd   :  { %5498 = vrot.lane.b32.xlu0 %v5488_v41, %s12276_s25 }
 0xae2   :  { %v5475_v59 = vpop.permute.xlu0 %5474 }
 0xae3   :  { %v5486_v30 = vmul.f32 %v11794_v46, %v5475_v59 }
 0xae5   :  { %5494 = vrot.lane.b32.xlu1 %v5486_v30, %s12276_s25 }
 0xae6   :  { %v5481_v6 = vpop.permute.xlu0 %5480 }
 0xae7   :  { %v5489_v52 = vmul.f32 %v11796_v24, %v5481_v6 }
 0xae9   :  { %5500 = vrot.lane.b32.xlu0 %v5489_v52, %s12276_s25 }
 0xb43   :  { %v5497_v21 = vpop.permute.xlu0 %5496 }
 0xb44   :  { %v14263_v62 = vadd.f32 %v5497_v21, %v5467_v35 }
 0xb46   :  { %11797 = vtanh.f32 %v14263_v62 }
 0xb4f   :  { %v5499_v1 = vpop.permute.xlu0 %5498 }
 0xb50   :  { %v14267_v0 = vadd.f32 %v5499_v1, %v5468_v43 }
 0xb52   :  { %11799 = vtanh.f32 %v14267_v0  ;;  %v5569_v30 = vrot.slane %v14267_v0, 6 }
 0xb53   :  { %v11798_v23 = vpop.eup %11797 }
 0xb54   :  { %5520 = vrot.lane.b32.xlu1 %v11798_v23, %s12275_s24  ;;  %v16122_v23 = vld [vmem:[#allocation86_spill] sm:$0xff] }
 0xb57   :  { %v5495_v25 = vpop.permute.xlu1 %5494 }
 0xb58   :  { %v14272_v61 = vadd.f32 %v5495_v25, %v5466_v34  ;;  %v16123_v25 = vld [vmem:[#allocation49_spill] sm:$0xff] }
 0xb5a   :  { %11801 = vtanh.f32 %v14272_v61 }
 0xb5b   :  { %v5501_v10 = vpop.permute.xlu0 %5500 }
 0xb5c   :  { %v14276_v57 = vadd.f32 %v5501_v10, %v5469_v9  ;;  %v5740_v9 = vrot.slane %v16123_v25, %v12363_v17 }
 0xb5e   :  { %11803 = vtanh.f32 %v14276_v57  ;;  %v5571_v59 = vrot.slane %v14276_v57, 5 }
 0xb5f   :  { %v11800_v8 = vpop.eup %11799 }
 0xb60   :  { %5522 = vrot.lane.b32.xlu0 %v11800_v8, %s12275_s24  ;;  %v16124_v8 = vld [vmem:[#allocation62_spill] sm:$0xff] }
 0xb67   :  { %v11802_v3 = vpop.eup %11801 }
 0xb68   :  { %5518 = vrot.lane.b32.xlu1 %v11802_v3, %s12275_s24  ;;  %v5764_v3 = vrot.slane %v16124_v8, %v12363_v17 }
 0xb6b   :  { %v11804_v48 = vpop.eup %11803 }
 0xb6c   :  { %5524 = vrot.lane.b32.xlu0 %v11804_v48, %s12275_s24 }
 0xbc6   :  { %v5521_v19 = vpop.permute.xlu1 %5520 }
 0xbc7   :  { %v14282_v54 = vmul.f32 %v11786_v58, %v5521_v19  ;;  %v16125_v19 = vld [vmem:[#allocation53_spill] sm:$0xff] }
 0xbc9   :  { %v5554_v18 = vrot.slane %v14282_v54, 7 }
 0xbd2   :  { %v5523_v7 = vpop.permute.xlu0 %5522 }
 0xbd3   :  { %v14286_v36 = vmul.f32 %v11792_v27, %v5523_v7  ;;  %v5567_v27 = vrot.slane %v14263_v62, 7 }
 0xbd5   :  { %v5556_v55 = vrot.slane %v14286_v36, 6 }
 0xbda   :  { %v5519_v63 = vpop.permute.xlu1 %5518 }
 0xbdb   :  { %v14284_v44 = vmul.f32 %v11794_v46, %v5519_v63  ;;  %v5568_v46 = vsel %vm4108_vm5, %v5567_v27, %v14272_v61 }
 0xbdd   :  { %v5555_v14 = vsel %vm4108_vm5, %v5554_v18, %v14284_v44  ;;  %v16126_v18 = vld [vmem:[#allocation75_spill] sm:$0xff] }
 0xbde   :  { %v5525_v11 = vpop.permute.xlu0 %5524  ;;  %v5557_v58 = vsel %vm4110_vm6, %v5556_v55, %v5555_v14 }
 0xbdf   :  { %v14289_v15 = vmul.f32 %v11796_v24, %v5525_v11  ;;  %v5570_v24 = vsel %vm4110_vm6, %v5569_v30, %v5568_v46  ;;  %v5788_v11 = vrot.slane %v16126_v18, %v12363_v17 }
 0xbe0   :  { %v5572_v6 = vsel %vm4112_vm7, %v5571_v59, %v5570_v24 }
 0xbe1   :  { %16120 = vst [vmem:[#allocation38_spill] sm:$0xff] %v14289_v15  ;;  %v5558_v13 = vrot.slane %v14289_v15, 5 }
 0xbe3   :  { %v5559_v41 = vsel %vm4112_vm7, %v5558_v13, %v5557_v58  ;;  %v16127_v13 = vld [vmem:[#allocation64_spill] sm:$0xff] }
 0xbe4   :  { %5560 = vrot.lane.b32.xlu1 %v5559_v41, %s12276_s25  ;;  %v16128_v41 = vld [vmem:[#allocation78_spill] sm:$0xff] }
 0xc56   :  { %v5561_v52 = vpop.permute.xlu1 %5560 }
 0xc57   :  { %v5574_v35 = vsel %vm4454_vm10, %v5561_v52, %v5572_v6  ;;  %11473 = vmatmul.mubr.msk.f32.vlgmr.msra.gmra.mxu0 %vm4454_vm10, %v5561_v52 }
 0xc58   :  { %11462 = vmatmul.mubr.msk.f32.vlgmr.msra.gmra.mxu1 %vm3764_vm11, %v5574_v35  ;;  %11476 = vmatpush3.msra.mxu0 %v14041_v42 }
 0xc59   :  { %11477 = vmatprep.subr.mxu0 %v15969_v56  ;;  %11495 = vmatpush3.msra.mxu1 %v14048_v2 }
 0xc5a   :  { %11478 = vmatpush3.msra.mxu0 %v14054_v38  ;;  %11496 = vmatprep.subr.mxu1 %v15969_v56 }
 0xc5b   :  { %11479 = vmatprep.subr.mxu0 %v15969_v56  ;;  %11497 = vmatpush3.msra.mxu1 %v14062_v60 }
 0xc5c   :  { %11480 = vmatpush3.msra.mxu0 %v14068_v16  ;;  %11498 = vmatprep.subr.mxu1 %v15969_v56 }
 0xc5d   :  { %11481 = vmatprep.subr.mxu0 %v15969_v56  ;;  %11499 = vmatpush3.msra.mxu1 %v14076_v4 }
 0xc5e   :  { %11482 = vmatpush3.msra.mxu0 %v14082_v33  ;;  %11500 = vmatprep.subr.mxu1 %v15969_v56 }
 0xc5f   :  { %11483 = vmatprep.subr.mxu0 %v15969_v56  ;;  %11501 = vmatpush3.msra.mxu1 %v14090_v26 }
 0xc60   :  { %11484 = vmatpush3.msra.mxu0 %v14096_v22  ;;  %11502 = vmatprep.mubr.msk.f32.mxu1 %vm12272_vm1, %v15969_v56 }
 0xc61   :  { %11485 = vmatprep.subr.mxu0 %v15969_v56  ;;  %11491 = vmatprep.mubr.msk.f32.mxu0 %vm12272_vm1, %v15969_v56 }
 0xc62   :  { %11486 = vmatpush3.msra.mxu0 %v14107_v39  ;;  %11505 = vmatprep.subr.mxu1 %v15969_v56 }
 0xc63   :  { %11487 = vmatprep.subr.mxu0 %v15969_v56 }
 0xc64   :  { %11488 = vmatpush3.msra.mxu0 %v14115_v28 }
 0xc65   :  { %11489 = vmatprep.subr.mxu0 %v15969_v56 }
 0xc66   :  { %11490 = vmatpush3.msra.mxu0 %v14122_v53  ;;  %v16121_v53 = vld [vmem:[#allocation39_spill] sm:$0xff] }
 0xc67   :  { %11524 = vmatprep.subr.mxu0 %v15969_v56  ;;  %v5716_v21 = vrot.slane %v16121_v53, %v12363_v17 }
 0xd17   :  { %v14336_v42 = vpop.f32.mrf.mxu0 }
 0xd18   :  { %v5644_v2 = vpop.f32.mrf.mxu1 }
 0xd19   :  { %v5645_v38 = vadd.f32 %v14131_v50, %v5644_v2  ;;  %v11474_v60 = vpop.f32.mrf.mxu0 }
 0xd1a   :  { %v11463_v16 = vpop.f32.mrf.mxu1 }
 0xd1b   :  { %v5655_v4 = vrot.slane %v5645_v38, %v13182_v45 }
 0xd1d   :  { %v5656_v33 = vcombine.high %v5655_v4, %v5655_v4  ;;  %v5663_v26 = vrot.slane %v5655_v4, %v13182_v45 }
 0xd1f   :  { %v5670_v22 = vrot.slane %v5656_v33, %v13182_v45  ;;  %v5671_v39 = vcombine.high %v5663_v26, %v5663_v26  ;;  %v5676_v28 = vrot.slane %v5663_v26, %v13185_v31 }
 0xd21   :  { %v5672_v43 = vcombine.high %v5670_v22, %v5670_v22  ;;  %v5680_v1 = vrot.slane %v5670_v22, %v13185_v31  ;;  %v5684_v50 = vrot.slane %v5671_v39, %v13185_v31  ;;  %v5797_v34 = vadd.f32 %v16122_v23, %v5676_v28 }
 0xd22   :  { %v5798_v10 = vadd.f32 %v5716_v21, %v5676_v28 }
 0xd23   :  { %v5688_v48 = vrot.slane %v5672_v43, %v13185_v31  ;;  %v5799_v7 = vadd.f32 %v16125_v19, %v5680_v1  ;;  %v5800_v63 = vadd.f32 %v5740_v9, %v5680_v1  ;;  %11805 = vtanh.f32 %v5797_v34 }
 0xd24   :  { %v5802_v14 = vadd.f32 %v5764_v3, %v5684_v50  ;;  %11807 = vtanh.f32 %v5798_v10  ;;  %v5801_v58 = vadd.f32 %v16127_v13, %v5684_v50 }
 0xd25   :  { %11809 = vtanh.f32 %v5799_v7  ;;  %v5804_v55 = vadd.f32 %v5788_v11, %v5688_v48  ;;  %v5803_v27 = vadd.f32 %v16128_v41, %v5688_v48 }
 0xd26   :  { %11811 = vtanh.f32 %v5800_v63 }
 0xd27   :  { %11813 = vtanh.f32 %v5802_v14 }
 0xd28   :  { %11815 = vtanh.f32 %v5804_v55 }
 0xd29   :  { %11817 = vtanh.f32 %v5801_v58 }
 0xd2a   :  { %11819 = vtanh.f32 %v5803_v27 }
 0xd30   :  { %v11806_v46 = vpop.eup %11805 }
 0xd31   :  { %v11808_v59 = vpop.eup %11807  ;;  %v5813_v30 = vmul.f32 %v14160_v12, %v11806_v46 }
 0xd32   :  { %v11810_v24 = vpop.eup %11809  ;;  %v5814_v6 = vmul.f32 %v14160_v12, %v11808_v59 }
 0xd33   :  { %v5821_v52 = vsel %vm4017_vm2, %v5813_v30, 0.0  ;;  %v5815_v35 = vmul.f32 %v14160_v12, %v11810_v24  ;;  %v11812_v2 = vpop.eup %11811 }
 0xd34   :  { %v5824_v38 = vsel %vm4021_vm3, %v5814_v6, 0.0  ;;  %5822 = vadd.xlane.f32.xlu0 %v5821_v52  ;;  %v11814_v60 = vpop.eup %11813  ;;  %v5816_v26 = vmul.f32 %v14160_v12, %v11812_v2 }
 0xd35   :  { %5825 = vadd.xlane.f32.xlu1 %v5824_v38  ;;  %v5818_v16 = vmul.f32 %v14160_v12, %v11814_v60  ;;  %v11816_v4 = vpop.eup %11815  ;;  %v5827_v33 = vsel %vm4017_vm2, %v5815_v35, 0.0 }
 0xd36   :  { %v11818_v22 = vpop.eup %11817  ;;  %v5820_v28 = vmul.f32 %v14160_v12, %v11816_v4  ;;  %v5830_v53 = vsel %vm4021_vm3, %v5816_v26, 0.0 }
 0xd37   :  { %v5836_v39 = vsel %vm4021_vm3, %v5818_v16, 0.0  ;;  %v5817_v21 = vmul.f32 %v14160_v12, %v11818_v22  ;;  %v11820_v43 = vpop.eup %11819 }
 0xd38   :  { %5828 = vadd.xlane.f32.xlu0 %v5827_v33  ;;  %v5842_v1 = vsel %vm4021_vm3, %v5820_v28, 0.0  ;;  %v5819_v23 = vmul.f32 %v14160_v12, %v11820_v43 }
 0xd39   :  { %5837 = vadd.xlane.f32.xlu1 %v5836_v39  ;;  %v5833_v50 = vsel %vm4017_vm2, %v5817_v21, 0.0 }
 0xd3a   :  { %v5839_v34 = vsel %vm4017_vm2, %v5819_v23, 0.0 }
 0xd3c   :  { %5831 = vadd.xlane.f32.xlu0 %v5830_v53 }
 0xd3d   :  { %5843 = vadd.xlane.f32.xlu1 %v5842_v1 }
 0xd40   :  { %5834 = vadd.xlane.f32.xlu0 %v5833_v50 }
 0xd44   :  { %5840 = vadd.xlane.f32.xlu0 %v5839_v34 }
 0xdbd   :  { %v5823_v25 = vpop.xlane.xlu0 %5822 }
 0xdbe   :  { %v5826_v9 = vpop.xlane.xlu1 %5825  ;;  %v5845_v19 = vadd.f32 %v5823_v25, %v13453_v29 }
 0xdbf   :  { %v5846_v7 = vadd.f32 %v5826_v9, %v13453_v29 }
 0xdc0   :  { %v5864_v13 = vrot.slane %v5845_v19, %v13448_v20 }
 0xdc1   :  { %v5829_v10 = vpop.xlane.xlu0 %5828  ;;  %v5868_v58 = vrot.slane %v5846_v7, %v13451_v51 }
 0xdc2   :  { %v5838_v8 = vpop.xlane.xlu1 %5837  ;;  %v5847_v63 = vadd.f32 %v5829_v10, %v13453_v29 }
 0xdc3   :  { %v5850_v18 = vadd.f32 %v5838_v8, %v13453_v29  ;;  %v5869_v35 = vsel %vm4079_vm4, %v5868_v58, %v5864_v13 }
 0xdc4   :  { %v5873_v41 = vrot.slane %v5847_v63, %v13448_v20 }
 0xdc5   :  { %v5832_v3 = vpop.xlane.xlu0 %5831  ;;  %v5886_v59 = vrot.slane %v5850_v18, %v13451_v51 }
 0xdc6   :  { %v5848_v48 = vadd.f32 %v5832_v3, %v13453_v29  ;;  %v5844_v12 = vpop.xlane.xlu1 %5843 }
 0xdc7   :  { %v5852_v27 = vadd.f32 %v5844_v12, %v13453_v29 }
 0xdc8   :  { %v5877_v14 = vrot.slane %v5848_v48, %v13451_v51 }
 0xdc9   :  { %v5835_v11 = vpop.xlane.xlu0 %5834  ;;  %v5895_v2 = vrot.slane %v5852_v27, %v13451_v51 }
 0xdca   :  { %v5849_v55 = vadd.f32 %v5835_v11, %v13453_v29  ;;  %v5878_v24 = vsel %vm4079_vm4, %v5877_v14, %v5873_v41 }
 0xdcb   :  { %v5897_v60 = vsel %vm4108_vm5, %v5878_v24, %v5869_v35 }
 0xdcc   :  { %v5882_v46 = vrot.slane %v5849_v55, %v13448_v20 }
 0xdcd   :  { %v5841_v30 = vpop.xlane.xlu0 %5840 }
 0xdce   :  { %v5851_v6 = vadd.f32 %v5841_v30, %v13453_v29  ;;  %v5887_v52 = vsel %vm4079_vm4, %v5886_v59, %v5882_v46 }
 0xdcf   :  { %v5898_v4 = vsel %vm4110_vm6, %v5887_v52, %v5897_v60 }
 0xdd0   :  { %v5891_v38 = vrot.slane %v5851_v6, %v13448_v20 }
 0xdd2   :  { %v5896_v16 = vsel %vm4079_vm4, %v5895_v2, %v5891_v38 }
 0xdd3   :  { %v5899_v33 = vsel %vm4112_vm7, %v5896_v16, %v5898_v4 }
 0xdd4   :  { %v5901_v26 = vsel %vm4115_vm8, %v5899_v33, -inf }
 0xdd5   :  { %5902 = vmax.xlane.f32.xlu0 %v5901_v26 }
 0xe5e   :  { %v5903_v22 = vpop.xlane.xlu0 %5902 }
 0xe5f   :  { %v5908_v39 = vrot.slane %v5903_v22, %v13185_v31  ;;  %v5912_v28 = vrot.slane %v5903_v22, %v13483_v49  ;;  %v5916_v53 = vrot.slane %v5903_v22, %v13489_v40  ;;  %v5920_v50 = vrot.slane %v5903_v22, %v13480_v37 }
 0xe61   :  { %v5925_v21 = vsub.f32 %v5845_v19, %v5908_v39  ;;  %v5926_v43 = vsub.f32 %v5846_v7, %v5908_v39  ;;  %v5927_v1 = vsub.f32 %v5847_v63, %v5912_v28  ;;  %v5930_v23 = vsub.f32 %v5850_v18, %v5916_v53 }
 0xe62   :  { %v5928_v9 = vsub.f32 %v5848_v48, %v5912_v28  ;;  %v5932_v8 = vsub.f32 %v5852_v27, %v5920_v50  ;;  %v5929_v12 = vsub.f32 %v5849_v55, %v5916_v53  ;;  %v5931_v13 = vsub.f32 %v5851_v6, %v5920_v50 }
 0xe63   :  { %v5933_v34 = vmul.f32 1.442695, %v5925_v21  ;;  %v5935_v25 = vmul.f32 1.442695, %v5926_v43  ;;  %v5937_v10 = vmul.f32 1.442695, %v5927_v1 }
 0xe64   :  { %v5943_v3 = vmul.f32 1.442695, %v5930_v23  ;;  %v5939_v11 = vmul.f32 1.442695, %v5928_v9  ;;  %v5947_v14 = vmul.f32 1.442695, %v5932_v8 }
 0xe65   :  { %11821 = vpow2.f32 %v5933_v34  ;;  %v5941_v19 = vmul.f32 1.442695, %v5929_v12  ;;  %v5945_v7 = vmul.f32 1.442695, %v5931_v13 }
 0xe66   :  { %11823 = vpow2.f32 %v5935_v25 }
 0xe67   :  { %11825 = vpow2.f32 %v5937_v10 }
 0xe68   :  { %11827 = vpow2.f32 %v5943_v3 }
 0xe69   :  { %11829 = vpow2.f32 %v5939_v11 }
 0xe6a   :  { %11831 = vpow2.f32 %v5947_v14 }
 0xe6b   :  { %11833 = vpow2.f32 %v5941_v19 }
 0xe6c   :  { %11835 = vpow2.f32 %v5945_v7 }
 0xe72   :  { %v11822_v63 = vpop.eup %11821 }
 0xe73   :  { %v11824_v18 = vpop.eup %11823  ;;  %5958 = vperm.xlu1 %11640, %v11822_v63  }
 0xe74   :  { %5961 = vperm.xlu0 %11639, %v11824_v18   ;;  %v11826_v48 = vpop.eup %11825 }
 0xe75   :  { %v11828_v58 = vpop.eup %11827 }
 0xe76   :  { %v11830_v55 = vpop.eup %11829 }
 0xe77   :  { %5964 = vperm.xlu1 %11640, %v11826_v48   ;;  %v11832_v41 = vpop.eup %11831 }
 0xe78   :  { %5973 = vperm.xlu0 %11639, %v11828_v58   ;;  %v11834_v27 = vpop.eup %11833 }
 0xe79   :  { %v11836_v46 = vpop.eup %11835 }
 0xe7b   :  { %5967 = vperm.xlu1 %11640, %v11830_v55  }
 0xe7c   :  { %5979 = vperm.xlu0 %11639, %v11832_v41  }
 0xe7f   :  { %5970 = vperm.xlu1 %11640, %v11834_v27  }
 0xe83   :  { %5976 = vperm.xlu1 %11640, %v11836_v46  }
 0xeee   :  { %v5959_v59 = vpop.permute.xlu1 %5958 }
 0xeef   :  { %v5962_v30 = vpop.permute.xlu0 %5961  ;;  %v5984_v60 = vrot.slane %v5959_v59, %v13448_v20 }
 0xef0   :  { %v5988_v38 = vrot.slane %v5962_v30, %v13451_v51 }
 0xef2   :  { %v5965_v24 = vpop.permute.xlu1 %5964  ;;  %v5989_v53 = vsel %vm4079_vm4, %v5988_v38, %v5984_v60 }
 0xef3   :  { %v5974_v6 = vpop.permute.xlu0 %5973  ;;  %v5993_v16 = vrot.slane %v5965_v24, %v13448_v20 }
 0xef4   :  { %v6006_v33 = vrot.slane %v5974_v6, %v13451_v51 }
 0xef6   :  { %v5968_v52 = vpop.permute.xlu1 %5967 }
 0xef7   :  { %v5997_v35 = vrot.slane %v5968_v52, %v13451_v51  ;;  %v5980_v26 = vpop.permute.xlu0 %5979  ;;  %v3469_v52 = vcombine.high %v13708_v32, %v13708_v32 }
 0xef8   :  { %v6015_v21 = vrot.slane %v5980_v26, %v13451_v51 }
 0xef9   :  { %v5998_v22 = vsel %vm4079_vm4, %v5997_v35, %v5993_v16  ;;  %v16129_v16 = vld [vmem:[#allocation6_spill] sm:$0xff] }
 0xefa   :  { %v5971_v2 = vpop.permute.xlu1 %5970  ;;  %v6017_v1 = vsel %vm4108_vm5, %v5998_v22, %v5989_v53 }
 0xefb   :  { %v6002_v4 = vrot.slane %v5971_v2, %v13448_v20  ;;  %v14434_v2 = vrot.slane %v3469_v52, %v12363_v17 }
 0xefd   :  { %v6007_v28 = vsel %vm4079_vm4, %v6006_v33, %v6002_v4  ;;  %v3129_v4 = vcombine.high %v16129_v16, %v16129_v16  ;;  %v6165_v33 = vrot.slane %v14434_v2, %v12363_v17 }
 0xefe   :  { %v5977_v39 = vpop.permute.xlu1 %5976  ;;  %v6018_v23 = vsel %vm4110_vm6, %v6007_v28, %v6017_v1  ;;  %v16130_v28 = vld [vmem:[#allocation21_spill] sm:$0xff]  ;;  %v16131_v1 = vld [vmem:[#allocation95_spill] sm:$0xff] }
 0xeff   :  { %v6011_v43 = vrot.slane %v5977_v39, %v13448_v20  ;;  %v3639_v53 = vcombine.high %v16130_v28, %v16130_v28 }
 0xf01   :  { %v6016_v50 = vsel %vm4079_vm4, %v6015_v21, %v6011_v43 }
 0xf02   :  { %v6019_v34 = vsel %vm4112_vm7, %v6016_v50, %v6018_v23 }
 0xf03   :  { %v6021_v25 = vsel %vm4115_vm8, %v6019_v34, 0.0  ;;  %v6311_v34 = vrot.slane %v14336_v42, 1 }
 0xf04   :  { %6022 = vadd.xlane.f32.xlu1 %v6021_v25 }
 0xf8d   :  { %v6023_v9 = vpop.xlane.xlu1 %6022 }
 0xf8e   :  { %11837 = vrcp.f32 %v6023_v9 }
 0xf9b   :  { %v11838_v10 = vpop.eup %11837 }
 0xf9c   :  { %v6033_v8 = vrot.slane %v11838_v10, %v13483_v49  ;;  %v6037_v11 = vrot.slane %v11838_v10, %v13489_v40  ;;  %v6029_v13 = vrot.slane %v11838_v10, %v13185_v31  ;;  %v6041_v59 = vrot.slane %v11838_v10, %v13480_v37 }
 0xf9d   :  { %v14449_v10 = vrot.slane %v3639_v53, %v12363_v17 }
 0xf9e   :  { %v6049_v3 = vmul.f32 %v11830_v55, %v6033_v8  ;;  %v6048_v12 = vmul.f32 %v11826_v48, %v6033_v8  ;;  %v6051_v14 = vmul.f32 %v11828_v58, %v6037_v11  ;;  %v6047_v19 = vmul.f32 %v11824_v18, %v6029_v13 }
 0xf9f   :  { %v6050_v7 = vmul.f32 %v11834_v27, %v6037_v11  ;;  %v6053_v30 = vmul.f32 %v11832_v41, %v6041_v59  ;;  %v6046_v24 = vmul.f32 %v11822_v63, %v6029_v13  ;;  %v6052_v55 = vmul.f32 %v11836_v46, %v6041_v59  ;;  %v14456_v13 = vld [vmem:[%s15830_s9] ss:$0 sm:$0xff] }
 0xfa0   :  { %6071 = vperm.xlu0 %11639, %v6049_v3   ;;  %v3299_v48 = vcombine.high %v13679_v47, %v13679_v47  ;;  %v6189_v59 = vrot.slane %v14449_v10, %v12363_v17 }
 0xfa2   :  { %v14425_v58 = vrot.slane %v3299_v48, %v12363_v17 }
 0xfa4   :  { %6066 = vperm.xlu0 %11639, %v6048_v12   ;;  %v6141_v18 = vrot.slane %v14425_v58, %v12363_v17 }
 0xfa8   :  { %6081 = vperm.xlu0 %11639, %v6051_v14  }
 0xfac   :  { %6061 = vperm.xlu0 %11639, %v6047_v19  }
 0xfb0   :  { %6076 = vperm.xlu0 %11639, %v6050_v7  }
 0xfb4   :  { %6091 = vperm.xlu0 %11639, %v6053_v30  }
 0xfb8   :  { %6056 = vperm.xlu0 %11639, %v6046_v24  }
 0xfbc   :  { %6086 = vperm.xlu0 %11639, %v6052_v55   ;;  %v16132_v55 = vld [vmem:[#allocation30_spill] sm:$0xff] }
0x101b   :  { %v6072_v6 = vpop.permute.xlu0 %6071 }
0x101c   :  { %v6201_v27 = vmul.f32 %v6141_v18, %v6072_v6 }
0x101e   :  { %v6214_v46 = vsel %vm4421_vm9, %v6201_v27, 0.0 }
0x101f   :  { %v6067_v41 = vpop.permute.xlu0 %6066 }
0x1020   :  { %v6200_v63 = vmul.f32 %v13852_v5, %v6067_v41  ;;  %v14441_v5 = vrot.slane %v3129_v4, %v12363_v17 }
0x1022   :  { %v6215_v35 = vadd.f32 %v6214_v46, %v6200_v63  ;;  %v6117_v8 = vrot.slane %v14441_v5, %v12363_v17 }
0x1023   :  { %v6082_v47 = vpop.permute.xlu0 %6081 }
0x1024   :  { %v6216_v38 = vrot.slane %v6215_v35, 4  ;;  %v6203_v22 = vmul.f32 %v6165_v33, %v6082_v47 }
0x1026   :  { %v6217_v60 = vadd.f32 %v6216_v38, %v6215_v35  ;;  %v6222_v23 = vsel %vm4421_vm9, %v6203_v22, 0.0  ;;  %v16133_v35 = vld [vmem:[#allocation100_spill] sm:$0xff] }
0x1027   :  { %v6062_v26 = vpop.permute.xlu0 %6061 }
0x1028   :  { %v6218_v32 = vrot.slane %v6217_v60, 2  ;;  %v6199_v14 = vmul.f32 %v6117_v8, %v6062_v26 }
0x102a   :  { %v6219_v39 = vadd.f32 %v6218_v32, %v6217_v60  ;;  %v6206_v18 = vsel %vm4421_vm9, %v6199_v14, 0.0  ;;  %v6312_v60 = vrot.slane %v14336_v42, 2 }
0x102b   :  { %v6077_v21 = vpop.permute.xlu0 %6076 }
0x102c   :  { %v6220_v43 = vrot.slane %v6219_v39, 1  ;;  %v6202_v50 = vmul.f32 %v16131_v1, %v6077_v21 }
0x102e   :  { %v6221_v25 = vadd.f32 %v6220_v43, %v6219_v39  ;;  %v6223_v9 = vadd.f32 %v6222_v23, %v6202_v50 }
0x102f   :  { %v6092_v3 = vpop.permute.xlu0 %6091 }
0x1030   :  { %v6319_v12 = vadd.f32 %v6311_v34, %v6221_v25  ;;  %v6224_v11 = vrot.slane %v6223_v9, 4  ;;  %v6205_v6 = vmul.f32 %v6189_v59, %v6092_v3 }
0x1032   :  { %v6323_v19 = vadd.f32 %v14456_v13, %v6319_v12  ;;  %v6225_v7 = vadd.f32 %v6224_v11, %v6223_v9  ;;  %v6230_v38 = vsel %vm4421_vm9, %v6205_v6, 0.0  ;;  %v6313_v9 = vrot.slane %v14336_v42, 3 }
0x1033   :  { %v6057_v30 = vpop.permute.xlu0 %6056 }
0x1034   :  { %11839 = vtanh.f32 %v6323_v19  ;;  %v6226_v24 = vrot.slane %v6225_v7, 2  ;;  %v6198_v48 = vmul.f32 %v16132_v55, %v6057_v30  ;;  %v11028_v30 = vmul.f32 -1.442695, %v6323_v19 }
0x1036   :  { %v6227_v27 = vadd.f32 %v6226_v24, %v6225_v7  ;;  %v6207_v52 = vadd.f32 %v6206_v18, %v6198_v48 }
0x1037   :  { %v6087_v41 = vpop.permute.xlu0 %6086 }
0x1038   :  { %v6228_v63 = vrot.slane %v6227_v27, 1  ;;  %v6208_v46 = vrot.slane %v6207_v52, 4  ;;  %v6204_v47 = vmul.f32 %v16133_v35, %v6087_v41 }
0x103a   :  { %v6229_v16 = vadd.f32 %v6228_v63, %v6227_v27  ;;  %v6209_v4 = vadd.f32 %v6208_v46, %v6207_v52  ;;  %v6231_v33 = vadd.f32 %v6230_v38, %v6204_v47 }
0x103c   :  { %v6320_v26 = vadd.f32 %v6312_v60, %v6229_v16  ;;  %v6210_v32 = vrot.slane %v6209_v4, 2  ;;  %v6232_v22 = vrot.slane %v6231_v33, 4 }
0x103e   :  { %v6324_v39 = vadd.f32 %v14456_v13, %v6320_v26  ;;  %v6211_v28 = vadd.f32 %v6210_v32, %v6209_v4  ;;  %v6233_v53 = vadd.f32 %v6232_v22, %v6231_v33 }
0x1040   :  { %11841 = vtanh.f32 %v6324_v39  ;;  %v6212_v21 = vrot.slane %v6211_v28, 1  ;;  %v6234_v43 = vrot.slane %v6233_v53, 2 }
0x1041   :  { %v11840_v1 = vpop.eup %11839 }
0x1042   :  { %v6213_v50 = vadd.f32 %v6212_v21, %v6211_v28  ;;  %v6235_v23 = vadd.f32 %v6234_v43, %v6233_v53  ;;  %6364 = vrot.lane.b32.xlu0 %v11840_v1, %s12275_s24 }
0x1044   :  { %v6318_v34 = vadd.f32 %v14336_v42, %v6213_v50  ;;  %v6236_v25 = vrot.slane %v6235_v23, 1  ;;  %v11029_v42 = vmul.f32 -1.442695, %v6324_v39 }
0x1046   :  { %v6322_v8 = vadd.f32 %v14456_v13, %v6318_v34  ;;  %v6237_v3 = vadd.f32 %v6236_v25, %v6235_v23 }
0x1048   :  { %11843 = vtanh.f32 %v6322_v8  ;;  %v6321_v12 = vadd.f32 %v6313_v9, %v6237_v3  ;;  %v11027_v48 = vmul.f32 -1.442695, %v6322_v8 }
0x104a   :  { %v6325_v11 = vadd.f32 %v14456_v13, %v6321_v12 }
0x104c   :  { %11845 = vtanh.f32 %v6325_v11  ;;  %v11030_v18 = vmul.f32 -1.442695, %v6325_v11 }
0x104d   :  { %v11842_v14 = vpop.eup %11841  ;;  %11847 = vpow2.f32 %v11028_v30 }
0x104e   :  { %6366 = vrot.lane.b32.xlu1 %v11842_v14, %s12275_s24  ;;  %11849 = vpow2.f32 %v11029_v42 }
0x1055   :  { %v11844_v7 = vpop.eup %11843 }
0x1056   :  { %6362 = vrot.lane.b32.xlu0 %v11844_v7, %s12275_s24 }
0x1059   :  { %v11846_v59 = vpop.eup %11845 }
0x105a   :  { %6368 = vrot.lane.b32.xlu0 %v11846_v59, %s12275_s24  ;;  %v11848_v24 = vpop.eup %11847 }
0x105b   :  { %v6339_v55 = vadd.f32 1.0, %v11848_v24  ;;  %v11850_v6 = vpop.eup %11849 }
0x105c   :  { %v6340_v27 = vadd.f32 1.0, %v11850_v6 }
0x105d   :  { %11851 = vrcp.f32 %v6339_v55 }
0x105e   :  { %11853 = vpow2.f32 %v11027_v48 }
0x105f   :  { %11855 = vpow2.f32 %v11030_v18 }
0x1060   :  { %11857 = vrcp.f32 %v6340_v27 }
0x106a   :  { %v11852_v52 = vpop.eup %11851 }
0x106b   :  { %v11854_v41 = vpop.eup %11853  ;;  %v6355_v28 = vmul.f32 %v11852_v52, %v14263_v62 }
0x106c   :  { %v6338_v35 = vadd.f32 1.0, %v11854_v41  ;;  %v11856_v19 = vpop.eup %11855 }
0x106d   :  { %v6341_v47 = vadd.f32 1.0, %v11856_v19  ;;  %v11858_v38 = vpop.eup %11857 }
0x106e   :  { %11859 = vrcp.f32 %v6338_v35  ;;  %v6356_v43 = vmul.f32 %v11858_v38, %v14267_v0 }
0x106f   :  { %11861 = vrcp.f32 %v6341_v47 }
0x107b   :  { %v11860_v4 = vpop.eup %11859 }
0x107c   :  { %v11862_v32 = vpop.eup %11861  ;;  %v6354_v34 = vmul.f32 %v11860_v4, %v14272_v61 }
0x107d   :  { %v6357_v62 = vmul.f32 %v11862_v32, %v14276_v57 }
0x10b4   :  { %v6365_v63 = vpop.permute.xlu0 %6364 }
0x10b5   :  { %v6375_v46 = vmul.f32 %v11852_v52, %v6365_v63 }
0x10b7   :  { %6384 = vrot.lane.b32.xlu0 %v6375_v46, %s12276_s25 }
0x10c0   :  { %v6367_v60 = vpop.permute.xlu1 %6366 }
0x10c1   :  { %v6376_v16 = vmul.f32 %v11858_v38, %v6367_v60 }
0x10c3   :  { %6386 = vrot.lane.b32.xlu0 %v6376_v16, %s12276_s25  ;;  %v14528_v16 = vld [vmem:[%s15822_s1 + $0x38] sm:$0xff] }
0x10c8   :  { %v6363_v33 = vpop.permute.xlu0 %6362 }
0x10c9   :  { %v6374_v26 = vmul.f32 %v11860_v4, %v6363_v33  ;;  %v14541_v33 = vld [vmem:[%s15822_s1 + $0x30] sm:$0xff] }
0x10cb   :  { %6382 = vrot.lane.b32.xlu0 %v6374_v26, %s12276_s25  ;;  %v14549_v26 = vld [vmem:[%s15829_s8 + $0x10] sm:$0xff] }
0x10cc   :  { %v6369_v22 = vpop.permute.xlu0 %6368 }
0x10cd   :  { %v6377_v39 = vmul.f32 %v11862_v32, %v6369_v22  ;;  %v14563_v22 = vld [vmem:[%s15829_s8 + $0x8] sm:$0xff] }
0x10cf   :  { %6388 = vrot.lane.b32.xlu1 %v6377_v39, %s12276_s25  ;;  %v14569_v39 = vld [vmem:[%s15822_s1 + $0x20] sm:$0xff] }
0x1129   :  { %v6385_v53 = vpop.permute.xlu0 %6384 }
0x112a   :  { %v14480_v21 = vadd.f32 %v6385_v53, %v6355_v28  ;;  %v14577_v28 = vld [vmem:[%s15829_s8] sm:$0xff]  ;;  %v14583_v53 = vld [vmem:[%s15822_s1 + $0x18] sm:$0xff] }
0x112c   :  { %11863 = vtanh.f32 %v14480_v21  ;;  %v6455_v41 = vrot.slane %v14480_v21, 7 }
0x1135   :  { %v6387_v1 = vpop.permute.xlu0 %6386 }
0x1136   :  { %v14484_v50 = vadd.f32 %v6387_v1, %v6356_v43  ;;  %v14594_v43 = vld [vmem:[%s15822_s1 + $0x10] sm:$0xff]  ;;  %v14602_v1 = vld [vmem:[%s15822_s1 + $0x8] sm:$0xff] }
0x1138   :  { %11865 = vtanh.f32 %v14484_v50  ;;  %v6457_v35 = vrot.slane %v14484_v50, 6 }
0x1139   :  { %v11864_v23 = vpop.eup %11863 }
0x113a   :  { %6408 = vrot.lane.b32.xlu0 %v11864_v23, %s12275_s24  ;;  %v14609_v23 = vld [vmem:[%s15822_s1] sm:$0xff] }
0x113d   :  { %v6383_v25 = vpop.permute.xlu0 %6382 }
0x113e   :  { %v14489_v9 = vadd.f32 %v6383_v25, %v6354_v34 }
0x1140   :  { %11867 = vtanh.f32 %v14489_v9  ;;  %v6456_v63 = vsel %vm4108_vm5, %v6455_v41, %v14489_v9 }
0x1141   :  { %v6389_v8 = vpop.permute.xlu1 %6388  ;;  %v6458_v19 = vsel %vm4110_vm6, %v6457_v35, %v6456_v63 }
0x1142   :  { %v14493_v3 = vadd.f32 %v6389_v8, %v6357_v62  ;;  %v14618_v62 = vld [vmem:[%s15823_s2] ss:$0 sm:$0xff] }
0x1144   :  { %11869 = vtanh.f32 %v14493_v3  ;;  %v6459_v46 = vrot.slane %v14493_v3, 5 }
0x1145   :  { %v11866_v0 = vpop.eup %11865 }
0x1146   :  { %6410 = vrot.lane.b32.xlu1 %v11866_v0, %s12275_s24  ;;  %v6460_v47 = vsel %vm4112_vm7, %v6459_v46, %v6458_v19 }
0x114d   :  { %v11868_v12 = vpop.eup %11867 }
0x114e   :  { %6406 = vrot.lane.b32.xlu0 %v11868_v12, %s12275_s24 }
0x1151   :  { %v11870_v11 = vpop.eup %11869 }
0x1152   :  { %6412 = vrot.lane.b32.xlu1 %v11870_v11, %s12275_s24 }
0x11ac   :  { %v6409_v61 = vpop.permute.xlu0 %6408 }
0x11ad   :  { %v14499_v14 = vmul.f32 %v11852_v52, %v6409_v61  ;;  %v16138_v61 = vld [vmem:[#allocation41_spill] sm:$0xff] }
0x11af   :  { %16134 = vst [vmem:[#allocation48_spill] sm:$0xff] %v14499_v14  ;;  %v6442_v42 = vrot.slane %v14499_v14, 7 }
0x11b8   :  { %v6411_v7 = vpop.permute.xlu1 %6410 }
0x11b9   :  { %v14503_v30 = vmul.f32 %v11858_v38, %v6411_v7  ;;  %v2175_v7 = vcombine.high %v16138_v61, %v16138_v61 }
0x11bb   :  { %16136 = vst [vmem:[#allocation61_spill] sm:$0xff] %v14503_v30  ;;  %v6444_v18 = vrot.slane %v14503_v30, 6  ;;  %v6604_v63 = vrot.slane %v2175_v7, %v12363_v17 }
0x11c0   :  { %v6407_v59 = vpop.permute.xlu0 %6406 }
0x11c1   :  { %v14501_v57 = vmul.f32 %v11860_v4, %v6407_v59  ;;  %v14535_v4 = vld [vmem:[%s15829_s8 + $0x18] sm:$0xff]  ;;  %v16139_v59 = vld [vmem:[#allocation51_spill] sm:$0xff] }
0x11c3   :  { %16135 = vst [vmem:[#allocation40_spill] sm:$0xff] %v14501_v57  ;;  %v6443_v55 = vsel %vm4108_vm5, %v6442_v42, %v14501_v57  ;;  %v2345_v42 = vcombine.high %v16139_v59, %v16139_v59 }
0x11c4   :  { %v6413_v24 = vpop.permute.xlu1 %6412  ;;  %v6445_v27 = vsel %vm4110_vm6, %v6444_v18, %v6443_v55  ;;  %v16140_v18 = vld [vmem:[#allocation65_spill] sm:$0xff] }
0x11c5   :  { %v14508_v48 = vmul.f32 %v11862_v32, %v6413_v24  ;;  %v14555_v32 = vld [vmem:[%s15822_s1 + $0x28] sm:$0xff]  ;;  %v6628_v46 = vrot.slane %v2345_v42, %v12363_v17 }
0x11c7   :  { %16137 = vst [vmem:[#allocation50_spill] sm:$0xff] %v14508_v48  ;;  %v6446_v6 = vrot.slane %v14508_v48, 5 }
0x11c9   :  { %v6447_v52 = vsel %vm4112_vm7, %v6446_v6, %v6445_v27  ;;  %v2515_v6 = vcombine.high %v16140_v18, %v16140_v18 }
0x11ca   :  { %6448 = vrot.lane.b32.xlu0 %v6447_v52, %s12276_s25 }
0x123c   :  { %v6449_v38 = vpop.permute.xlu0 %6448 }
0x123d   :  { %v6462_v60 = vsel %vm4454_vm10, %v6449_v38, %v6460_v47  ;;  %11503 = vmatmul.mubr.msk.f32.vlgmr.msra.gmra.mxu1 %vm4454_vm10, %v6449_v38  ;;  %v16141_v38 = vld [vmem:[#allocation43_spill] sm:$0xff] }
0x123e   :  { %11492 = vmatmul.mubr.msk.f32.vlgmr.msra.gmra.mxu0 %vm3764_vm11, %v6462_v60  ;;  %11506 = vmatpush3.msra.mxu1 %v14528_v16 }
0x123f   :  { %11507 = vmatprep.subr.mxu1 %v15969_v56  ;;  %11525 = vmatpush3.msra.mxu0 %v14535_v4 }
0x1240   :  { %11508 = vmatpush3.msra.mxu1 %v14541_v33  ;;  %11526 = vmatprep.subr.mxu0 %v15969_v56 }
0x1241   :  { %11509 = vmatprep.subr.mxu1 %v15969_v56  ;;  %11527 = vmatpush3.msra.mxu0 %v14549_v26 }
0x1242   :  { %11510 = vmatpush3.msra.mxu1 %v14555_v32  ;;  %11528 = vmatprep.subr.mxu0 %v15969_v56 }
0x1243   :  { %11511 = vmatprep.subr.mxu1 %v15969_v56  ;;  %11529 = vmatpush3.msra.mxu0 %v14563_v22 }
0x1244   :  { %11512 = vmatpush3.msra.mxu1 %v14569_v39  ;;  %11530 = vmatprep.subr.mxu0 %v15969_v56 }
0x1245   :  { %11513 = vmatprep.subr.mxu1 %v15969_v56  ;;  %11531 = vmatpush3.msra.mxu0 %v14577_v28 }
0x1246   :  { %11514 = vmatpush3.msra.mxu1 %v14583_v53  ;;  %11532 = vmatprep.mubr.msk.f32.mxu0 %vm12272_vm1, %v15969_v56 }
0x1247   :  { %11515 = vmatprep.subr.mxu1 %v15969_v56  ;;  %11521 = vmatprep.mubr.msk.f32.mxu1 %vm12272_vm1, %v15969_v56 }
0x1248   :  { %11516 = vmatpush3.msra.mxu1 %v14594_v43  ;;  %11535 = vmatprep.subr.mxu0 %v15969_v56 }
0x1249   :  { %11517 = vmatprep.subr.mxu1 %v15969_v56 }
0x124a   :  { %11518 = vmatpush3.msra.mxu1 %v14602_v1 }
0x124b   :  { %11519 = vmatprep.subr.mxu1 %v15969_v56 }
0x124c   :  { %11520 = vmatpush3.msra.mxu1 %v14609_v23 }
0x124d   :  { %11554 = vmatprep.subr.mxu1 %v15969_v56 }
0x12fd   :  { %v14613_v34 = vpop.f32.mrf.mxu1 }
0x12fe   :  { %v6532_v25 = vpop.f32.mrf.mxu0 }
0x12ff   :  { %v6533_v8 = vadd.f32 %v14618_v62, %v6532_v25  ;;  %v11504_v0 = vpop.f32.mrf.mxu1  ;;  %v16142_v25 = vld [vmem:[#allocation76_spill] sm:$0xff] }
0x1300   :  { %v11493_v12 = vpop.f32.mrf.mxu0 }
0x1301   :  { %v6543_v11 = vrot.slane %v6533_v8, %v13182_v45  ;;  %v2685_v8 = vcombine.high %v16142_v25, %v16142_v25  ;;  %v6652_v12 = vrot.slane %v2515_v6, %v12363_v17 }
0x1303   :  { %v6544_v24 = vcombine.high %v6543_v11, %v6543_v11  ;;  %v6551_v55 = vrot.slane %v6543_v11, %v13182_v45  ;;  %v16143_v11 = vld [vmem:[#allocation54_spill] sm:$0xff]  ;;  %v6676_v18 = vrot.slane %v2685_v8, %v12363_v17 }
0x1305   :  { %v6558_v27 = vrot.slane %v6544_v24, %v13182_v45  ;;  %v6559_v52 = vcombine.high %v6551_v55, %v6551_v55  ;;  %v6564_v41 = vrot.slane %v6551_v55, %v13185_v31  ;;  %v16144_v24 = vld [vmem:[#allocation69_spill] sm:$0xff] }
0x1307   :  { %v6560_v35 = vcombine.high %v6558_v27, %v6558_v27  ;;  %v6568_v19 = vrot.slane %v6558_v27, %v13185_v31  ;;  %v6572_v47 = vrot.slane %v6559_v52, %v13185_v31  ;;  %v6685_v60 = vadd.f32 %v16141_v38, %v6564_v41  ;;  %v16145_v52 = vld [vmem:[#allocation81_spill] sm:$0xff] }
0x1308   :  { %v6686_v0 = vadd.f32 %v6604_v63, %v6564_v41 }
0x1309   :  { %v6687_v61 = vadd.f32 %v16143_v11, %v6568_v19  ;;  %v6688_v59 = vadd.f32 %v6628_v46, %v6568_v19  ;;  %v6576_v7 = vrot.slane %v6560_v35, %v13185_v31  ;;  %v6689_v42 = vadd.f32 %v16144_v24, %v6572_v47  ;;  %v14647_v46 = vld [vmem:[%s15826_s5] ss:$0 sm:$0xff] }
0x130a   :  { %11871 = vtanh.f32 %v6685_v60  ;;  %v6690_v55 = vadd.f32 %v6652_v12, %v6572_v47 }
0x130b   :  { %11873 = vtanh.f32 %v6686_v0  ;;  %v6692_v27 = vadd.f32 %v6676_v18, %v6576_v7  ;;  %v6691_v41 = vadd.f32 %v16145_v52, %v6576_v7 }
0x130c   :  { %11875 = vtanh.f32 %v6687_v61 }
0x130d   :  { %11877 = vtanh.f32 %v6688_v59 }
0x130e   :  { %11879 = vtanh.f32 %v6689_v42 }
0x130f   :  { %11881 = vtanh.f32 %v6690_v55 }
0x1310   :  { %11883 = vtanh.f32 %v6692_v27 }
0x1311   :  { %11885 = vtanh.f32 %v6691_v41 }
0x1317   :  { %v11872_v6 = vpop.eup %11871 }
0x1318   :  { %v11874_v63 = vpop.eup %11873  ;;  %v6701_v35 = vmul.f32 %v14647_v46, %v11872_v6 }
0x1319   :  { %v11876_v19 = vpop.eup %11875  ;;  %v6702_v47 = vmul.f32 %v14647_v46, %v11874_v63 }
0x131a   :  { %v11878_v38 = vpop.eup %11877  ;;  %v6709_v60 = vsel %vm4017_vm2, %v6701_v35, 0.0  ;;  %v6703_v12 = vmul.f32 %v14647_v46, %v11876_v19 }
0x131b   :  { %v11880_v25 = vpop.eup %11879  ;;  %v6712_v8 = vsel %vm4021_vm3, %v6702_v47, 0.0  ;;  %6710 = vadd.xlane.f32.xlu1 %v6709_v60  ;;  %v6704_v0 = vmul.f32 %v14647_v46, %v11878_v38 }
0x131c   :  { %v11882_v11 = vpop.eup %11881  ;;  %6713 = vadd.xlane.f32.xlu0 %v6712_v8  ;;  %v6715_v24 = vsel %vm4017_vm2, %v6703_v12, 0.0  ;;  %v6705_v42 = vmul.f32 %v14647_v46, %v11880_v25 }
0x131d   :  { %v6718_v61 = vsel %vm4021_vm3, %v6704_v0, 0.0  ;;  %v6706_v59 = vmul.f32 %v14647_v46, %v11882_v11  ;;  %v11884_v7 = vpop.eup %11883 }
0x131e   :  { %v11886_v55 = vpop.eup %11885  ;;  %v6708_v27 = vmul.f32 %v14647_v46, %v11884_v7  ;;  %v6721_v52 = vsel %vm4017_vm2, %v6705_v42, 0.0 }
0x131f   :  { %6719 = vadd.xlane.f32.xlu1 %v6718_v61  ;;  %v6724_v18 = vsel %vm4021_vm3, %v6706_v59, 0.0  ;;  %v6707_v41 = vmul.f32 %v14647_v46, %v11886_v55 }
0x1320   :  { %6716 = vadd.xlane.f32.xlu0 %v6715_v24  ;;  %v6730_v6 = vsel %vm4021_vm3, %v6708_v27, 0.0 }
0x1321   :  { %v6727_v63 = vsel %vm4017_vm2, %v6707_v41, 0.0 }
0x1323   :  { %6725 = vadd.xlane.f32.xlu1 %v6724_v18 }
0x1324   :  { %6722 = vadd.xlane.f32.xlu0 %v6721_v52 }
0x1327   :  { %6731 = vadd.xlane.f32.xlu1 %v6730_v6 }
0x1328   :  { %6728 = vadd.xlane.f32.xlu0 %v6727_v63 }
0x13a4   :  { %v6711_v35 = vpop.xlane.xlu1 %6710 }
0x13a5   :  { %v6714_v19 = vpop.xlane.xlu0 %6713  ;;  %v6733_v0 = vadd.f32 %v6711_v35, %v13453_v29 }
0x13a6   :  { %v6734_v8 = vadd.f32 %v6714_v19, %v13453_v29 }
0x13a7   :  { %v6752_v18 = vrot.slane %v6733_v0, %v13448_v20 }
0x13a8   :  { %v6720_v47 = vpop.xlane.xlu1 %6719  ;;  %v6756_v55 = vrot.slane %v6734_v8, %v13451_v51 }
0x13a9   :  { %v6717_v38 = vpop.xlane.xlu0 %6716  ;;  %v6736_v60 = vadd.f32 %v6720_v47, %v13453_v29 }
0x13aa   :  { %v6735_v25 = vadd.f32 %v6717_v38, %v13453_v29  ;;  %v6757_v38 = vsel %vm4079_vm4, %v6756_v55, %v6752_v18 }
0x13ab   :  { %v6765_v59 = vrot.slane %v6736_v60, %v13451_v51 }
0x13ac   :  { %v6726_v12 = vpop.xlane.xlu1 %6725  ;;  %v6761_v7 = vrot.slane %v6735_v25, %v13448_v20 }
0x13ad   :  { %v6738_v11 = vadd.f32 %v6726_v12, %v13453_v29  ;;  %v6723_v61 = vpop.xlane.xlu0 %6722 }
0x13ae   :  { %v6737_v24 = vadd.f32 %v6723_v61, %v13453_v29  ;;  %v6766_v63 = vsel %vm4079_vm4, %v6765_v59, %v6761_v7 }
0x13af   :  { %v6774_v42 = vrot.slane %v6738_v11, %v13451_v51  ;;  %v6785_v61 = vsel %vm4108_vm5, %v6766_v63, %v6757_v38 }
0x13b0   :  { %v6770_v27 = vrot.slane %v6737_v24, %v13448_v20  ;;  %v6732_v52 = vpop.xlane.xlu1 %6731 }
0x13b1   :  { %v6740_v41 = vadd.f32 %v6732_v52, %v13453_v29  ;;  %v6729_v6 = vpop.xlane.xlu0 %6728 }
0x13b2   :  { %v6739_v35 = vadd.f32 %v6729_v6, %v13453_v29  ;;  %v6775_v47 = vsel %vm4079_vm4, %v6774_v42, %v6770_v27 }
0x13b3   :  { %v6783_v19 = vrot.slane %v6740_v41, %v13451_v51  ;;  %v6786_v14 = vsel %vm4110_vm6, %v6775_v47, %v6785_v61 }
0x13b4   :  { %v6779_v12 = vrot.slane %v6739_v35, %v13448_v20 }
0x13b6   :  { %v6784_v48 = vsel %vm4079_vm4, %v6783_v19, %v6779_v12 }
0x13b7   :  { %v6787_v52 = vsel %vm4112_vm7, %v6784_v48, %v6786_v14 }
0x13b8   :  { %v6789_v59 = vsel %vm4115_vm8, %v6787_v52, -inf }
0x13b9   :  { %6790 = vmax.xlane.f32.xlu0 %v6789_v59 }
0x1442   :  { %v6791_v7 = vpop.xlane.xlu0 %6790 }
0x1443   :  { %v6796_v6 = vrot.slane %v6791_v7, %v13185_v31  ;;  %v6800_v42 = vrot.slane %v6791_v7, %v13483_v49  ;;  %v6804_v55 = vrot.slane %v6791_v7, %v13489_v40  ;;  %v6808_v63 = vrot.slane %v6791_v7, %v13480_v37 }
0x1445   :  { %v6813_v18 = vsub.f32 %v6733_v0, %v6796_v6  ;;  %v6814_v27 = vsub.f32 %v6734_v8, %v6796_v6  ;;  %v6815_v30 = vsub.f32 %v6735_v25, %v6800_v42  ;;  %v6817_v19 = vsub.f32 %v6737_v24, %v6804_v55 }
0x1446   :  { %v6816_v12 = vsub.f32 %v6736_v60, %v6800_v42  ;;  %v6819_v48 = vsub.f32 %v6739_v35, %v6808_v63  ;;  %v6818_v52 = vsub.f32 %v6738_v11, %v6804_v55  ;;  %v6820_v57 = vsub.f32 %v6740_v41, %v6808_v63 }
0x1447   :  { %v6821_v38 = vmul.f32 1.442695, %v6813_v18  ;;  %v6823_v47 = vmul.f32 1.442695, %v6814_v27  ;;  %v6825_v14 = vmul.f32 1.442695, %v6815_v30 }
0x1448   :  { %v6829_v61 = vmul.f32 1.442695, %v6817_v19  ;;  %v6827_v59 = vmul.f32 1.442695, %v6816_v12  ;;  %v6833_v15 = vmul.f32 1.442695, %v6819_v48 }
0x1449   :  { %11887 = vpow2.f32 %v6821_v38  ;;  %v6831_v8 = vmul.f32 1.442695, %v6818_v52  ;;  %v6835_v25 = vmul.f32 1.442695, %v6820_v57 }
0x144a   :  { %11889 = vpow2.f32 %v6823_v47 }
0x144b   :  { %11891 = vpow2.f32 %v6825_v14 }
0x144c   :  { %11893 = vpow2.f32 %v6829_v61 }
0x144d   :  { %11895 = vpow2.f32 %v6827_v59 }
0x144e   :  { %11897 = vpow2.f32 %v6833_v15 }
0x144f   :  { %11899 = vpow2.f32 %v6831_v8 }
0x1450   :  { %11901 = vpow2.f32 %v6835_v25 }
0x1456   :  { %v11888_v0 = vpop.eup %11887 }
0x1457   :  { %v11890_v24 = vpop.eup %11889  ;;  %6846 = vperm.xlu1 %11640, %v11888_v0  }
0x1458   :  { %6849 = vperm.xlu0 %11639, %v11890_v24   ;;  %v11892_v30 = vpop.eup %11891 }
0x1459   :  { %v11894_v60 = vpop.eup %11893 }
0x145a   :  { %v11896_v11 = vpop.eup %11895 }
0x145b   :  { %6852 = vperm.xlu1 %11640, %v11892_v30   ;;  %v11898_v35 = vpop.eup %11897 }
0x145c   :  { %6858 = vperm.xlu0 %11639, %v11894_v60   ;;  %v11900_v7 = vpop.eup %11899 }
0x145d   :  { %v11902_v41 = vpop.eup %11901 }
0x145f   :  { %6855 = vperm.xlu1 %11640, %v11896_v11  }
0x1460   :  { %6864 = vperm.xlu0 %11639, %v11898_v35  }
0x1463   :  { %6861 = vperm.xlu1 %11640, %v11900_v7  }
0x1467   :  { %6867 = vperm.xlu1 %11640, %v11902_v41  }
0x14d2   :  { %v6847_v15 = vpop.permute.xlu1 %6846 }
0x14d3   :  { %v6850_v6 = vpop.permute.xlu0 %6849  ;;  %v6872_v19 = vrot.slane %v6847_v15, %v13448_v20 }
0x14d4   :  { %v6876_v63 = vrot.slane %v6850_v6, %v13451_v51 }
0x14d6   :  { %v6853_v57 = vpop.permute.xlu1 %6852  ;;  %v6877_v59 = vsel %vm4079_vm4, %v6876_v63, %v6872_v19 }
0x14d7   :  { %v6859_v42 = vpop.permute.xlu0 %6858  ;;  %v6881_v38 = vrot.slane %v6853_v57, %v13448_v20 }
0x14d8   :  { %v6890_v12 = vrot.slane %v6859_v42, %v13448_v20 }
0x14da   :  { %v6856_v55 = vpop.permute.xlu1 %6855 }
0x14db   :  { %v6885_v18 = vrot.slane %v6856_v55, %v13451_v51  ;;  %v6865_v14 = vpop.permute.xlu0 %6864 }
0x14dc   :  { %v6899_v8 = vrot.slane %v6865_v14, %v13448_v20 }
0x14dd   :  { %v6886_v48 = vsel %vm4079_vm4, %v6885_v18, %v6881_v38 }
0x14de   :  { %v6862_v27 = vpop.permute.xlu1 %6861  ;;  %v6905_v15 = vsel %vm4108_vm5, %v6886_v48, %v6877_v59 }
0x14df   :  { %v6894_v47 = vrot.slane %v6862_v27, %v13451_v51 }
0x14e1   :  { %v6895_v61 = vsel %vm4079_vm4, %v6894_v47, %v6890_v12 }
0x14e2   :  { %v6868_v52 = vpop.permute.xlu1 %6867  ;;  %v6906_v57 = vsel %vm4110_vm6, %v6895_v61, %v6905_v15 }
0x14e3   :  { %v6903_v25 = vrot.slane %v6868_v52, %v13451_v51 }
0x14e5   :  { %v6904_v6 = vsel %vm4079_vm4, %v6903_v25, %v6899_v8 }
0x14e6   :  { %v6907_v42 = vsel %vm4112_vm7, %v6904_v6, %v6906_v57 }
0x14e7   :  { %v6909_v55 = vsel %vm4115_vm8, %v6907_v42, 0.0  ;;  %v16147_v42 = vld [vmem:[#allocation17_spill] sm:$0xff] }
0x14e8   :  { %6910 = vadd.xlane.f32.xlu0 %v6909_v55 }
0x1571   :  { %v6911_v18 = vpop.xlane.xlu0 %6910 }
0x1572   :  { %11903 = vrcp.f32 %v6911_v18 }
0x157f   :  { %v11904_v27 = vpop.eup %11903 }
0x1580   :  { %v6921_v63 = vrot.slane %v11904_v27, %v13483_v49  ;;  %v6925_v47 = vrot.slane %v11904_v27, %v13489_v40  ;;  %v6917_v14 = vrot.slane %v11904_v27, %v13185_v31  ;;  %v6929_v52 = vrot.slane %v11904_v27, %v13480_v37 }
0x1582   :  { %v6937_v19 = vmul.f32 %v11896_v11, %v6921_v63  ;;  %v6936_v38 = vmul.f32 %v11892_v30, %v6921_v63  ;;  %v6939_v12 = vmul.f32 %v11900_v7, %v6925_v47  ;;  %v6935_v48 = vmul.f32 %v11890_v24, %v6917_v14  ;;  %v16146_v30 = vld [vmem:[#allocation13_spill] sm:$0xff] }
0x1583   :  { %v6938_v61 = vmul.f32 %v11894_v60, %v6925_v47  ;;  %v6941_v59 = vmul.f32 %v11902_v41, %v6929_v52  ;;  %v6934_v8 = vmul.f32 %v11888_v0, %v6917_v14  ;;  %v6940_v11 = vmul.f32 %v11898_v35, %v6929_v52 }
0x1584   :  { %6959 = vperm.xlu1 %11640, %v6937_v19   ;;  %v3316_v25 = vcombine.high %v16146_v30, %v16146_v30  ;;  %v3323_v7 = vrot.slane %v16146_v30, %v12363_v17  ;;  %v3315_v24 = vcombine.high %v14425_v58, %v14425_v58  ;;  %v3486_v0 = vcombine.high %v16147_v42, %v16147_v42 }
0x1585   :  { %v3493_v35 = vrot.slane %v16147_v42, %v12363_v17  ;;  %v3485_v19 = vcombine.high %v14434_v2, %v14434_v2 }
0x1586   :  { %v3330_v60 = vrot.slane %v3316_v25, %v12363_v17  ;;  %v3331_v15 = vcombine.high %v3323_v7, %v3323_v7  ;;  %v7006_v6 = vcombine.low %v3315_v24, %v3323_v7 }
0x1587   :  { %v3501_v47 = vcombine.high %v3493_v35, %v3493_v35 }
0x1588   :  { %6954 = vperm.xlu1 %11640, %v6936_v38   ;;  %v7007_v57 = vcombine.low %v3331_v15, %v3330_v60  ;;  %v3332_v41 = vcombine.high %v3330_v60, %v3330_v60  ;;  %v7014_v55 = vrot.slane %v7006_v6, %v12363_v17  ;;  %v3500_v38 = vrot.slane %v3486_v0, %v12363_v17 }
0x1589   :  { %v3145_v60 = vcombine.high %v14441_v5, %v14441_v5 }
0x158a   :  { %v7021_v18 = vrot.slane %v7007_v57, %v12363_v17  ;;  %v7029_v27 = vrot.slane %v3332_v41, %v12363_v17  ;;  %v7031_v30 = vcombine.low %v3501_v47, %v3500_v38  ;;  %v3502_v7 = vcombine.high %v3500_v38, %v3500_v38  ;;  %v16149_v57 = vld [vmem:[#allocation25_spill] sm:$0xff] }
0x158b   :  { %v3656_v41 = vcombine.high %v16149_v57, %v16149_v57  ;;  %v3663_v42 = vrot.slane %v16149_v57, %v12363_v17 }
0x158c   :  { %6969 = vperm.xlu1 %11640, %v6939_v12   ;;  %v7022_v12 = vcombine.low %v7014_v55, %v7021_v18  ;;  %v7045_v55 = vrot.slane %v7031_v30, %v12363_v17  ;;  %v7053_v18 = vrot.slane %v3502_v7, %v12363_v17 }
0x158d   :  { %v3670_v47 = vrot.slane %v3656_v41, %v12363_v17 }
0x158f   :  { %v3672_v57 = vcombine.high %v3670_v47, %v3670_v47 }
0x1590   :  { %6949 = vperm.xlu1 %11640, %v6935_v48  }
0x1594   :  { %6964 = vperm.xlu1 %11640, %v6938_v61   ;;  %v16148_v61 = vld [vmem:[#allocation9_spill] sm:$0xff] }
0x1595   :  { %v3146_v52 = vcombine.high %v16148_v61, %v16148_v61 }
0x1597   :  { %v3160_v15 = vrot.slane %v3146_v52, %v12363_v17 }
0x1598   :  { %6979 = vperm.xlu1 %11640, %v6941_v59   ;;  %v3153_v59 = vrot.slane %v16148_v61, %v12363_v17 }
0x1599   :  { %v3162_v61 = vcombine.high %v3160_v15, %v3160_v15 }
0x159a   :  { %v3161_v6 = vcombine.high %v3153_v59, %v3153_v59 }
0x159c   :  { %6944 = vperm.xlu1 %11640, %v6934_v8   ;;  %v6983_v5 = vcombine.low %v3161_v6, %v3160_v15  ;;  %v7005_v6 = vrot.slane %v3162_v61, %v12363_v17 }
0x15a0   :  { %6974 = vperm.xlu1 %11640, %v6940_v11   ;;  %v7030_v11 = vcombine.low %v3485_v19, %v3493_v35  ;;  %v3655_v19 = vcombine.high %v14449_v10, %v14449_v10  ;;  %v7199_v10 = vrot.slane %v14613_v34, 1 }
0x15a2   :  { %v7038_v35 = vrot.slane %v7030_v11, %v12363_v17  ;;  %v7054_v30 = vcombine.low %v3655_v19, %v3663_v42 }
0x15ff   :  { %v6960_v63 = vpop.permute.xlu1 %6959 }
0x1600   :  { %v7089_v58 = vmul.f32 %v7029_v27, %v6960_v63 }
0x1602   :  { %v7102_v8 = vsel %vm4421_vm9, %v7089_v58, 0.0  ;;  %v6982_v58 = vcombine.low %v3145_v60, %v3153_v59  ;;  %v6997_v59 = vrot.slane %v6983_v5, %v12363_v17  ;;  %v7077_v5 = vrot.slane %v3672_v57, %v12363_v17 }
0x1603   :  { %v6955_v14 = vpop.permute.xlu1 %6954 }
0x1604   :  { %v7088_v48 = vmul.f32 %v7022_v12, %v6955_v14  ;;  %v3671_v12 = vcombine.high %v3663_v42, %v3663_v42  ;;  %v6990_v7 = vrot.slane %v6982_v58, %v12363_v17 }
0x1606   :  { %v7103_v25 = vadd.f32 %v7102_v8, %v7088_v48  ;;  %v7046_v48 = vcombine.low %v7038_v35, %v7045_v55  ;;  %v6998_v55 = vcombine.low %v6990_v7, %v6997_v59  ;;  %v7200_v7 = vrot.slane %v14613_v34, 2 }
0x1607   :  { %v6970_v24 = vpop.permute.xlu1 %6969 }
0x1608   :  { %v7104_v2 = vrot.slane %v7103_v25, 4  ;;  %v7091_v38 = vmul.f32 %v7053_v18, %v6970_v24 }
0x160a   :  { %v7105_v0 = vadd.f32 %v7104_v2, %v7103_v25  ;;  %v7110_v25 = vsel %vm4421_vm9, %v7091_v38, 0.0  ;;  %v7055_v2 = vcombine.low %v3671_v12, %v3670_v47 }
0x160b   :  { %v6950_v27 = vpop.permute.xlu1 %6949 }
0x160c   :  { %v7106_v63 = vrot.slane %v7105_v0, 2  ;;  %v7087_v35 = vmul.f32 %v7005_v6, %v6950_v27  ;;  %v7069_v58 = vrot.slane %v7055_v2, %v12363_v17 }
0x160e   :  { %v7107_v14 = vadd.f32 %v7106_v63, %v7105_v0  ;;  %v7062_v63 = vrot.slane %v7054_v30, %v12363_v17  ;;  %v7094_v47 = vsel %vm4421_vm9, %v7087_v35, 0.0 }
0x160f   :  { %v6965_v52 = vpop.permute.xlu1 %6964 }
0x1610   :  { %v7108_v8 = vrot.slane %v7107_v14, 1  ;;  %v7090_v11 = vmul.f32 %v7046_v48, %v6965_v52  ;;  %v7070_v27 = vcombine.low %v7062_v63, %v7069_v58 }
0x1612   :  { %v7109_v24 = vadd.f32 %v7108_v8, %v7107_v14  ;;  %v7111_v60 = vadd.f32 %v7110_v25, %v7090_v11 }
0x1613   :  { %v6980_v41 = vpop.permute.xlu1 %6979 }
0x1614   :  { %v7207_v15 = vadd.f32 %v7199_v10, %v7109_v24  ;;  %v7112_v0 = vrot.slane %v7111_v60, 4  ;;  %v7093_v14 = vmul.f32 %v7077_v5, %v6980_v41 }
0x1616   :  { %v7211_v42 = vadd.f32 %v14456_v13, %v7207_v15  ;;  %v7113_v18 = vadd.f32 %v7112_v0, %v7111_v60  ;;  %v7118_v30 = vsel %vm4421_vm9, %v7093_v14, 0.0 }
0x1617   :  { %v6945_v19 = vpop.permute.xlu1 %6944 }
0x1618   :  { %11905 = vtanh.f32 %v7211_v42  ;;  %v7114_v38 = vrot.slane %v7113_v18, 2  ;;  %v7086_v12 = vmul.f32 %v6998_v55, %v6945_v19  ;;  %v7201_v19 = vrot.slane %v14613_v34, 3 }
0x161a   :  { %v7115_v48 = vadd.f32 %v7114_v38, %v7113_v18  ;;  %v7095_v61 = vadd.f32 %v7094_v47, %v7086_v12 }
0x161b   :  { %v6975_v52 = vpop.permute.xlu1 %6974 }
0x161c   :  { %v7116_v8 = vrot.slane %v7115_v48, 1  ;;  %v7096_v11 = vrot.slane %v7095_v61, 4  ;;  %v7092_v25 = vmul.f32 %v7070_v27, %v6975_v52  ;;  %v11034_v52 = vmul.f32 -1.442695, %v7211_v42 }
0x161e   :  { %v7117_v59 = vadd.f32 %v7116_v8, %v7115_v48  ;;  %v7097_v2 = vadd.f32 %v7096_v11, %v7095_v61  ;;  %v7119_v10 = vadd.f32 %v7118_v30, %v7092_v25 }
0x1620   :  { %v7208_v24 = vadd.f32 %v7200_v7, %v7117_v59  ;;  %v7098_v60 = vrot.slane %v7097_v2, 2  ;;  %v7120_v6 = vrot.slane %v7119_v10, 4 }
0x1622   :  { %v7212_v57 = vadd.f32 %v14456_v13, %v7208_v24  ;;  %v7099_v41 = vadd.f32 %v7098_v60, %v7097_v2  ;;  %v7121_v15 = vadd.f32 %v7120_v6, %v7119_v10 }
0x1624   :  { %11907 = vtanh.f32 %v7212_v57  ;;  %v7100_v0 = vrot.slane %v7099_v41, 1  ;;  %v7122_v35 = vrot.slane %v7121_v15, 2 }
0x1625   :  { %v11906_v55 = vpop.eup %11905 }
0x1626   :  { %v7101_v18 = vadd.f32 %v7100_v0, %v7099_v41  ;;  %v7123_v63 = vadd.f32 %v7122_v35, %v7121_v15  ;;  %7252 = vrot.lane.b32.xlu0 %v11906_v55, %s12275_s24 }
0x1628   :  { %v7206_v58 = vadd.f32 %v14613_v34, %v7101_v18  ;;  %v7124_v5 = vrot.slane %v7123_v63, 1  ;;  %v11035_v34 = vmul.f32 -1.442695, %v7212_v57 }
0x162a   :  { %v7210_v38 = vadd.f32 %v14456_v13, %v7206_v58  ;;  %v7125_v12 = vadd.f32 %v7124_v5, %v7123_v63 }
0x162c   :  { %11909 = vtanh.f32 %v7210_v38  ;;  %v7209_v47 = vadd.f32 %v7201_v19, %v7125_v12  ;;  %v11033_v25 = vmul.f32 -1.442695, %v7210_v38 }
0x162e   :  { %v7213_v14 = vadd.f32 %v14456_v13, %v7209_v47 }
0x1630   :  { %11911 = vtanh.f32 %v7213_v14  ;;  %v11036_v13 = vmul.f32 -1.442695, %v7213_v14 }
0x1631   :  { %v11908_v48 = vpop.eup %11907  ;;  %11913 = vpow2.f32 %v11034_v52 }
0x1632   :  { %7254 = vrot.lane.b32.xlu1 %v11908_v48, %s12275_s24  ;;  %11915 = vpow2.f32 %v11035_v34 }
0x1639   :  { %v11910_v61 = vpop.eup %11909 }
0x163a   :  { %7250 = vrot.lane.b32.xlu1 %v11910_v61, %s12275_s24 }
0x163d   :  { %v11912_v27 = vpop.eup %11911 }
0x163e   :  { %7256 = vrot.lane.b32.xlu1 %v11912_v27, %s12275_s24  ;;  %v11914_v8 = vpop.eup %11913 }
0x163f   :  { %v7227_v11 = vadd.f32 1.0, %v11914_v8  ;;  %v11916_v30 = vpop.eup %11915 }
0x1640   :  { %v7228_v7 = vadd.f32 1.0, %v11916_v30 }
0x1641   :  { %11917 = vrcp.f32 %v7227_v11 }
0x1642   :  { %11919 = vpow2.f32 %v11033_v25 }
0x1643   :  { %11921 = vpow2.f32 %v11036_v13 }
0x1644   :  { %11923 = vrcp.f32 %v7228_v7 }
0x164e   :  { %v11918_v59 = vpop.eup %11917 }
0x164f   :  { %v11920_v2 = vpop.eup %11919  ;;  %v7243_v5 = vmul.f32 %v11918_v59, %v14480_v21 }
0x1650   :  { %v7226_v60 = vadd.f32 1.0, %v11920_v2  ;;  %v11922_v42 = vpop.eup %11921 }
0x1651   :  { %v7229_v6 = vadd.f32 1.0, %v11922_v42  ;;  %v11924_v57 = vpop.eup %11923 }
0x1652   :  { %11925 = vrcp.f32 %v7226_v60  ;;  %v7244_v12 = vmul.f32 %v11924_v57, %v14484_v50 }
0x1653   :  { %11927 = vrcp.f32 %v7229_v6 }
0x165f   :  { %v11926_v0 = vpop.eup %11925 }
0x1660   :  { %v11928_v18 = vpop.eup %11927  ;;  %v7242_v61 = vmul.f32 %v11926_v0, %v14489_v9 }
0x1661   :  { %v7245_v21 = vmul.f32 %v11928_v18, %v14493_v3 }
0x1698   :  { %v7253_v10 = vpop.permute.xlu0 %7252 }
0x1699   :  { %v7263_v24 = vmul.f32 %v11918_v59, %v7253_v10 }
0x169b   :  { %7272 = vrot.lane.b32.xlu1 %v7263_v24, %s12276_s25 }
0x16a4   :  { %v7255_v41 = vpop.permute.xlu1 %7254 }
0x16a5   :  { %v7264_v15 = vmul.f32 %v11924_v57, %v7255_v41 }
0x16a7   :  { %7274 = vrot.lane.b32.xlu1 %v7264_v15, %s12276_s25 }
0x16ac   :  { %v7251_v35 = vpop.permute.xlu1 %7250 }
0x16ad   :  { %v7262_v55 = vmul.f32 %v11926_v0, %v7251_v35 }
0x16af   :  { %7270 = vrot.lane.b32.xlu1 %v7262_v55, %s12276_s25 }
0x16b0   :  { %v7257_v63 = vpop.permute.xlu1 %7256 }
0x16b1   :  { %v7265_v58 = vmul.f32 %v11928_v18, %v7257_v63 }
0x16b3   :  { %7276 = vrot.lane.b32.xlu0 %v7265_v58, %s12276_s25 }
0x170d   :  { %v7273_v19 = vpop.permute.xlu1 %7272 }
0x170e   :  { %v14774_v38 = vadd.f32 %v7273_v19, %v7243_v5 }
0x1710   :  { %11929 = vtanh.f32 %v14774_v38 }
0x1719   :  { %v7275_v47 = vpop.permute.xlu1 %7274 }
0x171a   :  { %v14778_v14 = vadd.f32 %v7275_v47, %v7244_v12  ;;  %v16155_v47 = vld [vmem:[#allocation67_spill] sm:$0xff] }
0x171c   :  { %11931 = vtanh.f32 %v14778_v14  ;;  %v7345_v55 = vrot.slane %v14778_v14, 6 }
0x171d   :  { %v11930_v48 = vpop.eup %11929 }
0x171e   :  { %7296 = vrot.lane.b32.xlu1 %v11930_v48, %s12275_s24 }
0x1721   :  { %v7271_v27 = vpop.permute.xlu1 %7270 }
0x1722   :  { %v14783_v52 = vadd.f32 %v7271_v27, %v7242_v61 }
0x1724   :  { %11933 = vtanh.f32 %v14783_v52 }
0x1725   :  { %v7277_v34 = vpop.permute.xlu0 %7276 }
0x1726   :  { %v14787_v8 = vadd.f32 %v7277_v34, %v7245_v21 }
0x1728   :  { %11935 = vtanh.f32 %v14787_v8  ;;  %v7347_v35 = vrot.slane %v14787_v8, 5 }
0x1729   :  { %v11932_v50 = vpop.eup %11931 }
0x172a   :  { %7298 = vrot.lane.b32.xlu0 %v11932_v50, %s12275_s24 }
0x1731   :  { %v11934_v11 = vpop.eup %11933 }
0x1732   :  { %7294 = vrot.lane.b32.xlu1 %v11934_v11, %s12275_s24 }
0x1735   :  { %v11936_v25 = vpop.eup %11935 }
0x1736   :  { %7300 = vrot.lane.b32.xlu0 %v11936_v25, %s12275_s24 }
0x1790   :  { %v7297_v9 = vpop.permute.xlu1 %7296 }
0x1791   :  { %v14793_v13 = vmul.f32 %v11918_v59, %v7297_v9 }
0x1793   :  { %v7330_v10 = vrot.slane %v14793_v13, 7 }
0x179c   :  { %v7299_v30 = vpop.permute.xlu0 %7298 }
0x179d   :  { %v14797_v2 = vmul.f32 %v11924_v57, %v7299_v30  ;;  %v7343_v57 = vrot.slane %v14774_v38, 7 }
0x179f   :  { %v7332_v6 = vrot.slane %v14797_v2, 6 }
0x17a4   :  { %v7295_v7 = vpop.permute.xlu1 %7294 }
0x17a5   :  { %v14795_v3 = vmul.f32 %v11926_v0, %v7295_v7  ;;  %v7344_v0 = vsel %vm4108_vm5, %v7343_v57, %v14783_v52 }
0x17a7   :  { %v7331_v60 = vsel %vm4108_vm5, %v7330_v10, %v14795_v3 }
0x17a8   :  { %v7301_v24 = vpop.permute.xlu0 %7300  ;;  %v7333_v59 = vsel %vm4110_vm6, %v7332_v6, %v7331_v60 }
0x17a9   :  { %v14802_v42 = vmul.f32 %v11928_v18, %v7301_v24  ;;  %v7346_v18 = vsel %vm4110_vm6, %v7345_v55, %v7344_v0 }
0x17aa   :  { %v7348_v63 = vsel %vm4112_vm7, %v7347_v35, %v7346_v18 }
0x17ab   :  { %16150 = vst [vmem:[#allocation63_spill] sm:$0xff] %v14802_v42  ;;  %v7334_v41 = vrot.slane %v14802_v42, 5 }
0x17ad   :  { %v7335_v15 = vsel %vm4112_vm7, %v7334_v41, %v7333_v59 }
0x17ae   :  { %7336 = vrot.lane.b32.xlu1 %v7335_v15, %s12276_s25 }
0x1820   :  { %v7337_v58 = vpop.permute.xlu1 %7336 }
0x1821   :  { %v7350_v5 = vsel %vm4454_vm10, %v7337_v58, %v7348_v63  ;;  %11533 = vmatmul.mubr.msk.f32.vlgmr.msra.gmra.mxu0 %vm4454_vm10, %v7337_v58 }
0x1822   :  { %11522 = vmatmul.mubr.msk.f32.vlgmr.msra.gmra.mxu1 %vm3764_vm11, %v7350_v5  ;;  %11536 = vmatpush3.msra.mxu0 %v14528_v16  ;;  %v16151_v16 = vld [vmem:[#allocation52_spill] sm:$0xff] }
0x1823   :  { %11537 = vmatprep.subr.mxu0 %v15969_v56  ;;  %11555 = vmatpush3.msra.mxu1 %v14535_v4  ;;  %v16152_v4 = vld [vmem:[#allocation37_spill] sm:$0xff]  ;;  %v2028_v48 = vadd.f32 %v16155_v47, %v16151_v16 }
0x1824   :  { %11538 = vmatpush3.msra.mxu0 %v14541_v33  ;;  %11556 = vmatprep.subr.mxu1 %v15969_v56  ;;  %v1878_v33 = vadd.f32 %v16152_v4, %v16151_v16 }
0x1825   :  { %11539 = vmatprep.subr.mxu0 %v15969_v56  ;;  %11557 = vmatpush3.msra.mxu1 %v14549_v26  ;;  %v16153_v26 = vld [vmem:[#allocation46_spill] sm:$0xff]  ;;  %v2686_v11 = vcombine.high %v2028_v48, %v2028_v48  ;;  %v2693_v63 = vrot.slane %v2028_v48, %v12363_v17 }
0x1826   :  { %11540 = vmatpush3.msra.mxu0 %v14555_v32  ;;  %11558 = vmatprep.subr.mxu1 %v15969_v56  ;;  %v1928_v32 = vadd.f32 %v16153_v26, %v16151_v16  ;;  %v2183_v19 = vrot.slane %v1878_v33, %v12363_v17 }
0x1827   :  { %11541 = vmatprep.subr.mxu0 %v15969_v56  ;;  %11559 = vmatpush3.msra.mxu1 %v14563_v22  ;;  %v2176_v22 = vcombine.high %v1878_v33, %v1878_v33  ;;  %v2700_v15 = vrot.slane %v2686_v11, %v12363_v17  ;;  %v16158_v11 = vld [vmem:[#allocation66_spill] sm:$0xff] }
0x1828   :  { %11542 = vmatpush3.msra.mxu0 %v14569_v39  ;;  %11560 = vmatprep.subr.mxu1 %v15969_v56  ;;  %v2346_v39 = vcombine.high %v1928_v32, %v1928_v32  ;;  %v2191_v21 = vcombine.high %v2183_v19, %v2183_v19 }
0x1829   :  { %11543 = vmatprep.subr.mxu0 %v15969_v56  ;;  %11561 = vmatpush3.msra.mxu1 %v14577_v28  ;;  %v16154_v28 = vld [vmem:[#allocation58_spill] sm:$0xff]  ;;  %v2702_v33 = vcombine.high %v2700_v15, %v2700_v15 }
0x182a   :  { %11544 = vmatpush3.msra.mxu0 %v14583_v53  ;;  %11562 = vmatprep.mubr.msk.f32.mxu1 %vm12272_vm1, %v15969_v56  ;;  %v1978_v53 = vadd.f32 %v16154_v28, %v16151_v16  ;;  %v7469_v24 = vcombine.low %v2183_v19, %v2191_v21  ;;  %v16156_v28 = vld [vmem:[#allocation42_spill] sm:$0xff]  ;;  %v2701_v19 = vcombine.high %v2693_v63, %v2693_v63 }
0x182b   :  { %11545 = vmatprep.subr.mxu0 %v15969_v56  ;;  %11551 = vmatprep.mubr.msk.f32.mxu0 %vm12272_vm1, %v15969_v56 }
0x182c   :  { %11546 = vmatpush3.msra.mxu0 %v14594_v43  ;;  %11565 = vmatprep.subr.mxu1 %v15969_v56  ;;  %v2190_v43 = vrot.slane %v2176_v22, %v12363_v17  ;;  %v2516_v12 = vcombine.high %v1978_v53, %v1978_v53  ;;  %v2523_v7 = vrot.slane %v1978_v53, %v12363_v17 }
0x182d   :  { %11547 = vmatprep.subr.mxu0 %v15969_v56  ;;  %v7477_v58 = vrot.slane %v7469_v24, %v12363_v17  ;;  %v7492_v53 = vrot.slane %v16156_v28, %v12363_v17  ;;  %v7541_v24 = vcombine.low %v2693_v63, %v2701_v19 }
0x182e   :  { %11548 = vmatpush3.msra.mxu0 %v14602_v1  ;;  %v2360_v1 = vrot.slane %v2346_v39, %v12363_v17  ;;  %v2192_v61 = vcombine.high %v2190_v43, %v2190_v43  ;;  %v2530_v50 = vrot.slane %v2516_v12, %v12363_v17  ;;  %v2531_v18 = vcombine.high %v2523_v7, %v2523_v7 }
0x182f   :  { %11549 = vmatprep.subr.mxu0 %v15969_v56 }
0x1830   :  { %11550 = vmatpush3.msra.mxu0 %v14609_v23  ;;  %v2353_v23 = vrot.slane %v1928_v32, %v12363_v17  ;;  %v2362_v27 = vcombine.high %v2360_v1, %v2360_v1  ;;  %v7470_v25 = vcombine.low %v2190_v43, %v2192_v61  ;;  %v2532_v59 = vcombine.high %v2530_v50, %v2530_v50  ;;  %v16157_v61 = vld [vmem:[#allocation55_spill] sm:$0xff] }
0x1831   :  { %11584 = vmatprep.subr.mxu0 %v15969_v56 }
0x1832   :  { %v2361_v34 = vcombine.high %v2353_v23, %v2353_v23  ;;  %v7494_v30 = vcombine.low %v2360_v1, %v2362_v27  ;;  %v7484_v0 = vrot.slane %v7470_v25, %v12363_v17  ;;  %v7518_v4 = vcombine.low %v2530_v50, %v2532_v59 }
0x1833   :  { %v7517_v1 = vcombine.low %v2523_v7, %v2531_v18  ;;  %v7516_v27 = vrot.slane %v16157_v61, %v12363_v17  ;;  %v7540_v25 = vrot.slane %v16158_v11, %v12363_v17 }
0x1834   :  { %v7493_v41 = vcombine.low %v2353_v23, %v2361_v34  ;;  %v7508_v55 = vrot.slane %v7494_v30, %v12363_v17  ;;  %v7485_v26 = vcombine.low %v7477_v58, %v7484_v0  ;;  %v7532_v21 = vrot.slane %v7518_v4, %v12363_v17 }
0x1835   :  { %v7542_v34 = vcombine.low %v2700_v15, %v2702_v33 }
0x1836   :  { %v7501_v16 = vrot.slane %v7493_v41, %v12363_v17 }
0x1837   :  { %v7556_v15 = vrot.slane %v7542_v34, %v12363_v17 }
0x1838   :  { %v7509_v43 = vcombine.low %v7501_v16, %v7508_v55 }
0x18e1   :  { %v14860_v9 = vpop.f32.mrf.mxu0 }
0x18e2   :  { %v7420_v10 = vpop.f32.mrf.mxu1 }
0x18e3   :  { %v7421_v60 = vadd.f32 %v14618_v62, %v7420_v10  ;;  %v11534_v6 = vpop.f32.mrf.mxu0  ;;  %v7525_v10 = vrot.slane %v7517_v1, %v12363_v17 }
0x18e4   :  { %v11523_v57 = vpop.f32.mrf.mxu1  ;;  %v16159_v6 = vld [vmem:[#allocation83_spill] sm:$0xff] }
0x18e5   :  { %v7431_v35 = vrot.slane %v7421_v60, %v13182_v45  ;;  %v7564_v41 = vrot.slane %v16159_v6, %v12363_v17  ;;  %v7533_v57 = vcombine.low %v7525_v10, %v7532_v21 }
0x18e7   :  { %v7432_v5 = vcombine.high %v7431_v35, %v7431_v35  ;;  %v7439_v62 = vrot.slane %v7431_v35, %v13182_v45  ;;  %v7549_v35 = vrot.slane %v7541_v24, %v12363_v17 }
0x18e9   :  { %v7446_v32 = vrot.slane %v7432_v5, %v13182_v45  ;;  %v7447_v22 = vcombine.high %v7439_v62, %v7439_v62  ;;  %v7452_v39 = vrot.slane %v7439_v62, %v13185_v31  ;;  %v7557_v18 = vcombine.low %v7549_v35, %v7556_v15 }
0x18eb   :  { %v7448_v23 = vcombine.high %v7446_v32, %v7446_v32  ;;  %v7456_v12 = vrot.slane %v7446_v32, %v13185_v31  ;;  %v7460_v47 = vrot.slane %v7447_v22, %v13185_v31  ;;  %v7573_v48 = vadd.f32 %v7485_v26, %v7452_v39 }
0x18ec   :  { %v7574_v50 = vadd.f32 %v7492_v53, %v7452_v39 }
0x18ed   :  { %v7464_v30 = vrot.slane %v7448_v23, %v13185_v31  ;;  %v7575_v7 = vadd.f32 %v7509_v43, %v7456_v12  ;;  %v7576_v60 = vadd.f32 %v7516_v27, %v7456_v12  ;;  %11937 = vtanh.f32 %v7573_v48 }
0x18ee   :  { %v7578_v59 = vadd.f32 %v7540_v25, %v7460_v47  ;;  %11939 = vtanh.f32 %v7574_v50  ;;  %v7577_v55 = vadd.f32 %v7533_v57, %v7460_v47 }
0x18ef   :  { %11941 = vtanh.f32 %v7575_v7  ;;  %v7580_v0 = vadd.f32 %v7564_v41, %v7464_v30  ;;  %v7579_v63 = vadd.f32 %v7557_v18, %v7464_v30 }
0x18f0   :  { %11943 = vtanh.f32 %v7576_v60 }
0x18f1   :  { %11945 = vtanh.f32 %v7578_v59 }
0x18f2   :  { %11947 = vtanh.f32 %v7580_v0 }
0x18f3   :  { %11949 = vtanh.f32 %v7577_v55 }
0x18f4   :  { %11951 = vtanh.f32 %v7579_v63 }
0x18fa   :  { %v11938_v58 = vpop.eup %11937 }
0x18fb   :  { %v11940_v5 = vpop.eup %11939  ;;  %v7589_v62 = vmul.f32 %v14647_v46, %v11938_v58 }
0x18fc   :  { %v11942_v16 = vpop.eup %11941  ;;  %v7590_v4 = vmul.f32 %v14647_v46, %v11940_v5 }
0x18fd   :  { %v7597_v33 = vsel %vm4017_vm2, %v7589_v62, 0.0  ;;  %v7591_v26 = vmul.f32 %v14647_v46, %v11942_v16  ;;  %v11944_v32 = vpop.eup %11943 }
0x18fe   :  { %v7600_v22 = vsel %vm4021_vm3, %v7590_v4, 0.0  ;;  %7598 = vadd.xlane.f32.xlu0 %v7597_v33  ;;  %v11946_v39 = vpop.eup %11945  ;;  %v7592_v1 = vmul.f32 %v14647_v46, %v11944_v32 }
0x18ff   :  { %7601 = vadd.xlane.f32.xlu1 %v7600_v22  ;;  %v7594_v28 = vmul.f32 %v14647_v46, %v11946_v39  ;;  %v11948_v53 = vpop.eup %11947  ;;  %v7603_v43 = vsel %vm4017_vm2, %v7591_v26, 0.0 }
0x1900   :  { %v11950_v19 = vpop.eup %11949  ;;  %v7596_v12 = vmul.f32 %v14647_v46, %v11948_v53  ;;  %v7606_v47 = vsel %vm4021_vm3, %v7592_v1, 0.0 }
0x1901   :  { %v7612_v23 = vsel %vm4021_vm3, %v7594_v28, 0.0  ;;  %v7593_v48 = vmul.f32 %v14647_v46, %v11950_v19  ;;  %v11952_v61 = vpop.eup %11951 }
0x1902   :  { %7604 = vadd.xlane.f32.xlu0 %v7603_v43  ;;  %v7618_v27 = vsel %vm4021_vm3, %v7596_v12, 0.0  ;;  %v7595_v34 = vmul.f32 %v14647_v46, %v11952_v61 }
0x1903   :  { %7613 = vadd.xlane.f32.xlu1 %v7612_v23  ;;  %v7609_v21 = vsel %vm4017_vm2, %v7593_v48, 0.0 }
0x1904   :  { %v7615_v50 = vsel %vm4017_vm2, %v7595_v34, 0.0 }
0x1906   :  { %7607 = vadd.xlane.f32.xlu0 %v7606_v47 }
0x1907   :  { %7619 = vadd.xlane.f32.xlu1 %v7618_v27 }
0x190a   :  { %7610 = vadd.xlane.f32.xlu0 %v7609_v21 }
0x190e   :  { %7616 = vadd.xlane.f32.xlu0 %v7615_v50 }
0x1987   :  { %v7599_v11 = vpop.xlane.xlu0 %7598 }
0x1988   :  { %v7602_v25 = vpop.xlane.xlu1 %7601  ;;  %v7621_v60 = vadd.f32 %v7599_v11, %v13453_v29 }
0x1989   :  { %v7622_v6 = vadd.f32 %v7602_v25, %v13453_v29 }
0x198a   :  { %v7640_v35 = vrot.slane %v7621_v60, %v13448_v20 }
0x198b   :  { %v7605_v30 = vpop.xlane.xlu0 %7604  ;;  %v7644_v55 = vrot.slane %v7622_v6, %v13451_v51 }
0x198c   :  { %v7614_v7 = vpop.xlane.xlu1 %7613  ;;  %v7623_v41 = vadd.f32 %v7605_v30, %v13453_v29 }
0x198d   :  { %v7626_v59 = vadd.f32 %v7614_v7, %v13453_v29  ;;  %v7645_v26 = vsel %vm4079_vm4, %v7644_v55, %v7640_v35 }
0x198e   :  { %v7649_v18 = vrot.slane %v7623_v41, %v13448_v20 }
0x198f   :  { %v7608_v10 = vpop.xlane.xlu0 %7607  ;;  %v7662_v5 = vrot.slane %v7626_v59, %v13451_v51 }
0x1990   :  { %v7624_v24 = vadd.f32 %v7608_v10, %v13453_v29  ;;  %v7620_v46 = vpop.xlane.xlu1 %7619 }
0x1991   :  { %v7628_v63 = vadd.f32 %v7620_v46, %v13453_v29 }
0x1992   :  { %v7653_v15 = vrot.slane %v7624_v24, %v13451_v51 }
0x1993   :  { %v7611_v57 = vpop.xlane.xlu0 %7610  ;;  %v7671_v32 = vrot.slane %v7628_v63, %v13451_v51 }
0x1994   :  { %v7625_v0 = vadd.f32 %v7611_v57, %v13453_v29  ;;  %v7654_v16 = vsel %vm4079_vm4, %v7653_v15, %v7649_v18 }
0x1995   :  { %v7673_v39 = vsel %vm4108_vm5, %v7654_v16, %v7645_v26 }
0x1996   :  { %v7658_v58 = vrot.slane %v7625_v0, %v13448_v20 }
0x1997   :  { %v7617_v62 = vpop.xlane.xlu0 %7616 }
0x1998   :  { %v7627_v4 = vadd.f32 %v7617_v62, %v13453_v29  ;;  %v7663_v33 = vsel %vm4079_vm4, %v7662_v5, %v7658_v58 }
0x1999   :  { %v7674_v53 = vsel %vm4110_vm6, %v7663_v33, %v7673_v39 }
0x199a   :  { %v7667_v22 = vrot.slane %v7627_v4, %v13448_v20 }
0x199c   :  { %v7672_v28 = vsel %vm4079_vm4, %v7671_v32, %v7667_v22 }
0x199d   :  { %v7675_v43 = vsel %vm4112_vm7, %v7672_v28, %v7674_v53 }
0x199e   :  { %v7677_v1 = vsel %vm4115_vm8, %v7675_v43, -inf }
0x199f   :  { %7678 = vmax.xlane.f32.xlu0 %v7677_v1 }
0x1a28   :  { %v7679_v19 = vpop.xlane.xlu0 %7678 }
0x1a29   :  { %v7684_v23 = vrot.slane %v7679_v19, %v13185_v31  ;;  %v7688_v12 = vrot.slane %v7679_v19, %v13483_v49  ;;  %v7692_v47 = vrot.slane %v7679_v19, %v13489_v40  ;;  %v7696_v21 = vrot.slane %v7679_v19, %v13480_v37 }
0x1a2b   :  { %v7701_v48 = vsub.f32 %v7621_v60, %v7684_v23  ;;  %v7702_v61 = vsub.f32 %v7622_v6, %v7684_v23  ;;  %v7703_v27 = vsub.f32 %v7623_v41, %v7688_v12  ;;  %v7706_v34 = vsub.f32 %v7626_v59, %v7692_v47 }
0x1a2c   :  { %v7704_v25 = vsub.f32 %v7624_v24, %v7688_v12  ;;  %v7708_v7 = vsub.f32 %v7628_v63, %v7696_v21  ;;  %v7705_v46 = vsub.f32 %v7625_v0, %v7692_v47  ;;  %v7707_v35 = vsub.f32 %v7627_v4, %v7696_v21 }
0x1a2d   :  { %v7709_v50 = vmul.f32 1.442695, %v7701_v48  ;;  %v7711_v11 = vmul.f32 1.442695, %v7702_v61  ;;  %v7713_v30 = vmul.f32 1.442695, %v7703_v27 }
0x1a2e   :  { %v7719_v10 = vmul.f32 1.442695, %v7706_v34  ;;  %v7715_v57 = vmul.f32 1.442695, %v7704_v25  ;;  %v7723_v15 = vmul.f32 1.442695, %v7708_v7 }
0x1a2f   :  { %11953 = vpow2.f32 %v7709_v50  ;;  %v7717_v60 = vmul.f32 1.442695, %v7705_v46  ;;  %v7721_v6 = vmul.f32 1.442695, %v7707_v35 }
0x1a30   :  { %11955 = vpow2.f32 %v7711_v11 }
0x1a31   :  { %11957 = vpow2.f32 %v7713_v30 }
0x1a32   :  { %11959 = vpow2.f32 %v7719_v10 }
0x1a33   :  { %11961 = vpow2.f32 %v7715_v57 }
0x1a34   :  { %11963 = vpow2.f32 %v7723_v15 }
0x1a35   :  { %11965 = vpow2.f32 %v7717_v60 }
0x1a36   :  { %11967 = vpow2.f32 %v7721_v6 }
0x1a3c   :  { %v11954_v41 = vpop.eup %11953 }
0x1a3d   :  { %v11956_v59 = vpop.eup %11955  ;;  %7734 = vperm.xlu1 %11640, %v11954_v41  }
0x1a3e   :  { %7737 = vperm.xlu0 %11639, %v11956_v59   ;;  %v11958_v24 = vpop.eup %11957 }
0x1a3f   :  { %v11960_v55 = vpop.eup %11959 }
0x1a40   :  { %v11962_v0 = vpop.eup %11961 }
0x1a41   :  { %7740 = vperm.xlu1 %11640, %v11958_v24   ;;  %v11964_v18 = vpop.eup %11963 }
0x1a42   :  { %7749 = vperm.xlu0 %11639, %v11960_v55   ;;  %v11966_v63 = vpop.eup %11965 }
0x1a43   :  { %v11968_v58 = vpop.eup %11967 }
0x1a45   :  { %7743 = vperm.xlu1 %11640, %v11962_v0  }
0x1a46   :  { %7755 = vperm.xlu0 %11639, %v11964_v18  }
0x1a49   :  { %7746 = vperm.xlu1 %11640, %v11966_v63  }
0x1a4d   :  { %7752 = vperm.xlu1 %11640, %v11968_v58  }
0x1ab8   :  { %v7735_v5 = vpop.permute.xlu1 %7734 }
0x1ab9   :  { %v7738_v62 = vpop.permute.xlu0 %7737  ;;  %v7760_v39 = vrot.slane %v7735_v5, %v13448_v20 }
0x1aba   :  { %v7764_v22 = vrot.slane %v7738_v62, %v13451_v51 }
0x1abc   :  { %v7741_v16 = vpop.permute.xlu1 %7740  ;;  %v7765_v47 = vsel %vm4079_vm4, %v7764_v22, %v7760_v39  ;;  %v16161_v22 = vld [vmem:[#allocation16_spill] sm:$0xff] }
0x1abd   :  { %v7750_v4 = vpop.permute.xlu0 %7749  ;;  %v7769_v28 = vrot.slane %v7741_v16, %v13448_v20 }
0x1abe   :  { %v7782_v43 = vrot.slane %v7750_v4, %v13451_v51 }
0x1ac0   :  { %v7744_v33 = vpop.permute.xlu1 %7743 }
0x1ac1   :  { %v7773_v26 = vrot.slane %v7744_v33, %v13451_v51  ;;  %v7756_v1 = vpop.permute.xlu0 %7755 }
0x1ac2   :  { %v7791_v48 = vrot.slane %v7756_v1, %v13451_v51 }
0x1ac3   :  { %v7774_v19 = vsel %vm4079_vm4, %v7773_v26, %v7769_v28 }
0x1ac4   :  { %v7747_v32 = vpop.permute.xlu1 %7746  ;;  %v7793_v27 = vsel %vm4108_vm5, %v7774_v19, %v7765_v47  ;;  %v16163_v19 = vld [vmem:[#allocation7_spill] sm:$0xff] }
0x1ac5   :  { %v7778_v53 = vrot.slane %v7747_v32, %v13448_v20 }
0x1ac7   :  { %v7783_v23 = vsel %vm4079_vm4, %v7782_v43, %v7778_v53  ;;  %v16162_v53 = vld [vmem:[#allocation33_spill] sm:$0xff] }
0x1ac8   :  { %v7753_v12 = vpop.permute.xlu1 %7752  ;;  %v7794_v34 = vsel %vm4110_vm6, %v7783_v23, %v7793_v27  ;;  %v7917_v43 = vrot.slane %v16162_v53, %v12363_v17  ;;  %v3163_v23 = vcombine.high %v16163_v19, %v16163_v19 }
0x1ac9   :  { %v7787_v61 = vrot.slane %v7753_v12, %v13448_v20 }
0x1acb   :  { %v7792_v21 = vsel %vm4079_vm4, %v7791_v48, %v7787_v61 }
0x1acc   :  { %v7795_v50 = vsel %vm4112_vm7, %v7792_v21, %v7794_v34  ;;  %v3170_v34 = vrot.slane %v16163_v19, %v12363_v17 }
0x1acd   :  { %v7797_v11 = vsel %vm4115_vm8, %v7795_v50, 0.0  ;;  %v3177_v50 = vrot.slane %v3163_v23, %v12363_v17 }
0x1ace   :  { %7798 = vadd.xlane.f32.xlu1 %v7797_v11 }
0x1b57   :  { %v7799_v25 = vpop.xlane.xlu1 %7798 }
0x1b58   :  { %11969 = vrcp.f32 %v7799_v25 }
0x1b65   :  { %v11970_v30 = vpop.eup %11969 }
0x1b66   :  { %v7809_v7 = vrot.slane %v11970_v30, %v13483_v49  ;;  %v7813_v57 = vrot.slane %v11970_v30, %v13489_v40  ;;  %v7805_v35 = vrot.slane %v11970_v30, %v13185_v31  ;;  %v7817_v5 = vrot.slane %v11970_v30, %v13480_v37 }
0x1b68   :  { %v7825_v10 = vmul.f32 %v11962_v0, %v7809_v7  ;;  %v7824_v46 = vmul.f32 %v11958_v24, %v7809_v7  ;;  %v7827_v15 = vmul.f32 %v11960_v55, %v7813_v57  ;;  %v7823_v60 = vmul.f32 %v11956_v59, %v7805_v35  ;;  %v16160_v24 = vld [vmem:[#allocation12_spill] sm:$0xff] }
0x1b69   :  { %v7826_v6 = vmul.f32 %v11966_v63, %v7813_v57  ;;  %v7829_v62 = vmul.f32 %v11964_v18, %v7817_v5  ;;  %v7822_v16 = vmul.f32 %v11954_v41, %v7805_v35  ;;  %v7828_v0 = vmul.f32 %v11968_v58, %v7817_v5  ;;  %v16164_v7 = vld [vmem:[#allocation24_spill] sm:$0xff] }
0x1b6a   :  { %7847 = vperm.xlu0 %11639, %v7825_v10   ;;  %v3333_v4 = vcombine.high %v16160_v24, %v16160_v24  ;;  %v3340_v55 = vrot.slane %v16160_v24, %v12363_v17  ;;  %v3503_v18 = vcombine.high %v16161_v22, %v16161_v22  ;;  %v3510_v41 = vrot.slane %v16161_v22, %v12363_v17  ;;  %v16165_v24 = vld [vmem:[#allocation93_spill] sm:$0xff] }
0x1b6b   :  { %v3673_v10 = vcombine.high %v16164_v7, %v16164_v7  ;;  %v3178_v35 = vcombine.high %v3170_v34, %v3170_v34 }
0x1b6c   :  { %v3347_v33 = vrot.slane %v3333_v4, %v12363_v17  ;;  %v3348_v59 = vcombine.high %v3340_v55, %v3340_v55  ;;  %v3517_v58 = vrot.slane %v3503_v18, %v12363_v17  ;;  %v3518_v47 = vcombine.high %v3510_v41, %v3510_v41 }
0x1b6d   :  { %v3687_v5 = vrot.slane %v3673_v10, %v12363_v17  ;;  %v7941_v4 = vrot.slane %v16165_v24, %v12363_v17 }
0x1b6e   :  { %7842 = vperm.xlu0 %11639, %v7824_v46   ;;  %v3349_v26 = vcombine.high %v3347_v33, %v3347_v33  ;;  %v7894_v63 = vcombine.low %v3340_v55, %v3348_v59  ;;  %v3519_v48 = vcombine.high %v3517_v58, %v3517_v58  ;;  %v7918_v25 = vcombine.low %v3510_v41, %v3518_v47 }
0x1b6f   :  { %v7870_v59 = vcombine.low %v3170_v34, %v3178_v35  ;;  %v3689_v22 = vcombine.high %v3687_v5, %v3687_v5 }
0x1b70   :  { %v7895_v32 = vcombine.low %v3347_v33, %v3349_v26  ;;  %v7902_v39 = vrot.slane %v7894_v63, %v12363_v17  ;;  %v7919_v30 = vcombine.low %v3517_v58, %v3519_v48 }
0x1b71   :  { %v7943_v23 = vcombine.low %v3687_v5, %v3689_v22 }
0x1b72   :  { %7857 = vperm.xlu0 %11639, %v7827_v15   ;;  %v7909_v28 = vrot.slane %v7895_v32, %v12363_v17 }
0x1b74   :  { %v7910_v61 = vcombine.low %v7902_v39, %v7909_v28 }
0x1b76   :  { %7837 = vperm.xlu0 %11639, %v7823_v60   ;;  %v3179_v60 = vcombine.high %v3177_v50, %v3177_v50 }
0x1b78   :  { %v7871_v26 = vcombine.low %v3177_v50, %v3179_v60 }
0x1b7a   :  { %7852 = vperm.xlu0 %11639, %v7826_v6   ;;  %v3680_v6 = vrot.slane %v16164_v7, %v12363_v17  ;;  %v7885_v19 = vrot.slane %v7871_v26, %v12363_v17 }
0x1b7c   :  { %v3688_v63 = vcombine.high %v3680_v6, %v3680_v6 }
0x1b7e   :  { %7867 = vperm.xlu0 %11639, %v7829_v62   ;;  %v7942_v53 = vcombine.low %v3680_v6, %v3688_v63 }
0x1b82   :  { %7832 = vperm.xlu0 %11639, %v7822_v16   ;;  %v7926_v16 = vrot.slane %v7918_v25, %v12363_v17 }
0x1b86   :  { %7862 = vperm.xlu0 %11639, %v7828_v0   ;;  %v7933_v0 = vrot.slane %v7919_v30, %v12363_v17  ;;  %v14991_v30 = vld [vmem:[%s15830_s9] ss:$0 sm:$0xff] }
0x1b88   :  { %v7934_v41 = vcombine.low %v7926_v16, %v7933_v0 }
0x1be5   :  { %v7848_v1 = vpop.permute.xlu0 %7847 }
0x1be6   :  { %v7977_v12 = vmul.f32 %v7917_v43, %v7848_v1  ;;  %v7878_v1 = vrot.slane %v7870_v59, %v12363_v17 }
0x1be8   :  { %v7990_v11 = vsel %vm4421_vm9, %v7977_v12, 0.0  ;;  %v8087_v12 = vrot.slane %v14860_v9, 1  ;;  %v7886_v25 = vcombine.low %v7878_v1, %v7885_v19 }
0x1be9   :  { %v7843_v27 = vpop.permute.xlu0 %7842 }
0x1bea   :  { %v7976_v21 = vmul.f32 %v7910_v61, %v7843_v27  ;;  %v16166_v61 = vld [vmem:[#allocation26_spill] sm:$0xff] }
0x1beb   :  { %v7893_v27 = vrot.slane %v16166_v61, %v12363_v17 }
0x1bec   :  { %v7991_v46 = vadd.f32 %v7990_v11, %v7976_v21 }
0x1bed   :  { %v7858_v57 = vpop.permute.xlu0 %7857 }
0x1bee   :  { %v7992_v15 = vrot.slane %v7991_v46, 4  ;;  %v7979_v32 = vmul.f32 %v7941_v4, %v7858_v57  ;;  %v7957_v57 = vrot.slane %v7943_v23, %v12363_v17 }
0x1bf0   :  { %v7993_v62 = vadd.f32 %v7992_v15, %v7991_v46  ;;  %v7998_v43 = vsel %vm4421_vm9, %v7979_v32, 0.0  ;;  %v7950_v46 = vrot.slane %v7942_v53, %v12363_v17  ;;  %v16167_v15 = vld [vmem:[#allocation98_spill] sm:$0xff]  ;;  %v8088_v32 = vrot.slane %v14860_v9, 2 }
0x1bf1   :  { %v7838_v55 = vpop.permute.xlu0 %7837  ;;  %v7965_v35 = vrot.slane %v16167_v15, %v12363_v17 }
0x1bf2   :  { %v7994_v33 = vrot.slane %v7993_v62, 2  ;;  %v7975_v11 = vmul.f32 %v7893_v27, %v7838_v55  ;;  %v7958_v4 = vcombine.low %v7950_v46, %v7957_v57 }
0x1bf4   :  { %v7995_v18 = vadd.f32 %v7994_v33, %v7993_v62  ;;  %v7982_v62 = vsel %vm4421_vm9, %v7975_v11, 0.0 }
0x1bf5   :  { %v7853_v58 = vpop.permute.xlu0 %7852 }
0x1bf6   :  { %v7996_v39 = vrot.slane %v7995_v18, 1  ;;  %v7978_v28 = vmul.f32 %v7934_v41, %v7853_v58 }
0x1bf8   :  { %v7997_v47 = vadd.f32 %v7996_v39, %v7995_v18  ;;  %v7999_v48 = vadd.f32 %v7998_v43, %v7978_v28 }
0x1bf9   :  { %v7868_v21 = vpop.permute.xlu0 %7867 }
0x1bfa   :  { %v8095_v34 = vadd.f32 %v8087_v12, %v7997_v47  ;;  %v8000_v50 = vrot.slane %v7999_v48, 4  ;;  %v7981_v16 = vmul.f32 %v7965_v35, %v7868_v21  ;;  %v8089_v21 = vrot.slane %v14860_v9, 3 }
0x1bfc   :  { %v8099_v7 = vadd.f32 %v14991_v30, %v8095_v34  ;;  %v8001_v10 = vadd.f32 %v8000_v50, %v7999_v48  ;;  %v8006_v63 = vsel %vm4421_vm9, %v7981_v16, 0.0 }
0x1bfd   :  { %v7833_v60 = vpop.permute.xlu0 %7832 }
0x1bfe   :  { %11971 = vtanh.f32 %v8099_v7  ;;  %v8002_v6 = vrot.slane %v8001_v10, 2  ;;  %v7974_v5 = vmul.f32 %v7886_v25, %v7833_v60  ;;  %v11040_v15 = vmul.f32 -1.442695, %v8099_v7 }
0x1c00   :  { %v8003_v0 = vadd.f32 %v8002_v6, %v8001_v10  ;;  %v7983_v24 = vadd.f32 %v7982_v62, %v7974_v5 }
0x1c01   :  { %v7863_v55 = vpop.permute.xlu0 %7862 }
0x1c02   :  { %v8004_v33 = vrot.slane %v8003_v0, 1  ;;  %v7984_v59 = vrot.slane %v7983_v24, 4  ;;  %v7980_v26 = vmul.f32 %v7958_v4, %v7863_v55 }
0x1c04   :  { %v8005_v22 = vadd.f32 %v8004_v33, %v8003_v0  ;;  %v7985_v18 = vadd.f32 %v7984_v59, %v7983_v24  ;;  %v8007_v41 = vadd.f32 %v8006_v63, %v7980_v26 }
0x1c06   :  { %v8096_v58 = vadd.f32 %v8088_v32, %v8005_v22  ;;  %v7986_v39 = vrot.slane %v7985_v18, 2  ;;  %v8008_v28 = vrot.slane %v8007_v41, 4 }
0x1c08   :  { %v8100_v53 = vadd.f32 %v14991_v30, %v8096_v58  ;;  %v7987_v43 = vadd.f32 %v7986_v39, %v7985_v18  ;;  %v8009_v1 = vadd.f32 %v8008_v28, %v8007_v41 }
0x1c0a   :  { %11973 = vtanh.f32 %v8100_v53  ;;  %v7988_v19 = vrot.slane %v7987_v43, 1  ;;  %v8010_v23 = vrot.slane %v8009_v1, 2 }
0x1c0b   :  { %v11972_v12 = vpop.eup %11971 }
0x1c0c   :  { %v7989_v47 = vadd.f32 %v7988_v19, %v7987_v43  ;;  %v8011_v48 = vadd.f32 %v8010_v23, %v8009_v1  ;;  %8140 = vrot.lane.b32.xlu0 %v11972_v12, %s12275_s24 }
0x1c0e   :  { %v8094_v61 = vadd.f32 %v14860_v9, %v7989_v47  ;;  %v8012_v27 = vrot.slane %v8011_v48, 1  ;;  %v11041_v9 = vmul.f32 -1.442695, %v8100_v53 }
0x1c10   :  { %v8098_v34 = vadd.f32 %v14991_v30, %v8094_v61  ;;  %v8013_v50 = vadd.f32 %v8012_v27, %v8011_v48 }
0x1c12   :  { %11975 = vtanh.f32 %v8098_v34  ;;  %v8097_v11 = vadd.f32 %v8089_v21, %v8013_v50  ;;  %v11039_v6 = vmul.f32 -1.442695, %v8098_v34 }
0x1c14   :  { %v8101_v25 = vadd.f32 %v14991_v30, %v8097_v11 }
0x1c16   :  { %11977 = vtanh.f32 %v8101_v25  ;;  %v11042_v5 = vmul.f32 -1.442695, %v8101_v25 }
0x1c17   :  { %v11974_v10 = vpop.eup %11973  ;;  %11979 = vpow2.f32 %v11040_v15 }
0x1c18   :  { %8142 = vrot.lane.b32.xlu1 %v11974_v10, %s12275_s24  ;;  %11981 = vpow2.f32 %v11041_v9 }
0x1c1f   :  { %v11976_v46 = vpop.eup %11975 }
0x1c20   :  { %8138 = vrot.lane.b32.xlu0 %v11976_v46, %s12275_s24 }
0x1c23   :  { %v11978_v57 = vpop.eup %11977 }
0x1c24   :  { %8144 = vrot.lane.b32.xlu0 %v11978_v57, %s12275_s24  ;;  %v11980_v35 = vpop.eup %11979 }
0x1c25   :  { %v8115_v60 = vadd.f32 1.0, %v11980_v35  ;;  %v11982_v62 = vpop.eup %11981 }
0x1c26   :  { %v8116_v16 = vadd.f32 1.0, %v11982_v62 }
0x1c27   :  { %11983 = vrcp.f32 %v8115_v60 }
0x1c28   :  { %11985 = vpow2.f32 %v11039_v6 }
0x1c29   :  { %11987 = vpow2.f32 %v11042_v5 }
0x1c2a   :  { %11989 = vrcp.f32 %v8116_v16 }
0x1c34   :  { %v11984_v0 = vpop.eup %11983 }
0x1c35   :  { %v11986_v24 = vpop.eup %11985  ;;  %v8131_v53 = vmul.f32 %v11984_v0, %v14774_v38 }
0x1c36   :  { %v8114_v33 = vadd.f32 1.0, %v11986_v24  ;;  %v11988_v7 = vpop.eup %11987 }
0x1c37   :  { %v8117_v59 = vadd.f32 1.0, %v11988_v7  ;;  %v11990_v26 = vpop.eup %11989 }
0x1c38   :  { %11991 = vrcp.f32 %v8114_v33  ;;  %v8132_v19 = vmul.f32 %v11990_v26, %v14778_v14 }
0x1c39   :  { %11993 = vrcp.f32 %v8117_v59 }
0x1c45   :  { %v11992_v22 = vpop.eup %11991 }
0x1c46   :  { %v11994_v58 = vpop.eup %11993  ;;  %v8130_v48 = vmul.f32 %v11992_v22, %v14783_v52 }
0x1c47   :  { %v8133_v38 = vmul.f32 %v11994_v58, %v14787_v8 }
0x1c7e   :  { %v8141_v4 = vpop.permute.xlu0 %8140 }
0x1c7f   :  { %v8151_v55 = vmul.f32 %v11984_v0, %v8141_v4 }
0x1c81   :  { %8160 = vrot.lane.b32.xlu0 %v8151_v55, %s12276_s25 }
0x1c8a   :  { %v8143_v63 = vpop.permute.xlu1 %8142 }
0x1c8b   :  { %v8152_v32 = vmul.f32 %v11990_v26, %v8143_v63  ;;  %v15063_v63 = vld [vmem:[%s15822_s1 + $0x38] sm:$0xff] }
0x1c8d   :  { %8162 = vrot.lane.b32.xlu0 %v8152_v32, %s12276_s25  ;;  %v15070_v32 = vld [vmem:[%s15829_s8 + $0x18] sm:$0xff] }
0x1c92   :  { %v8139_v18 = vpop.permute.xlu0 %8138 }
0x1c93   :  { %v8150_v41 = vmul.f32 %v11992_v22, %v8139_v18  ;;  %v15084_v18 = vld [vmem:[%s15829_s8 + $0x10] sm:$0xff] }
0x1c95   :  { %8158 = vrot.lane.b32.xlu0 %v8150_v41, %s12276_s25  ;;  %v15090_v41 = vld [vmem:[%s15822_s1 + $0x28] sm:$0xff] }
0x1c96   :  { %v8145_v39 = vpop.permute.xlu0 %8144 }
0x1c97   :  { %v8153_v28 = vmul.f32 %v11994_v58, %v8145_v39  ;;  %v15104_v39 = vld [vmem:[%s15822_s1 + $0x20] sm:$0xff] }
0x1c99   :  { %8164 = vrot.lane.b32.xlu1 %v8153_v28, %s12276_s25  ;;  %v15112_v28 = vld [vmem:[%s15829_s8] sm:$0xff] }
0x1cf3   :  { %v8161_v43 = vpop.permute.xlu0 %8160 }
0x1cf4   :  { %v15015_v1 = vadd.f32 %v8161_v43, %v8131_v53  ;;  %v15118_v53 = vld [vmem:[%s15822_s1 + $0x18] sm:$0xff]  ;;  %v15129_v43 = vld [vmem:[%s15822_s1 + $0x10] sm:$0xff] }
0x1cf6   :  { %11995 = vtanh.f32 %v15015_v1 }
0x1cff   :  { %v8163_v23 = vpop.permute.xlu0 %8162 }
0x1d00   :  { %v15019_v12 = vadd.f32 %v8163_v23, %v8132_v19  ;;  %v15137_v19 = vld [vmem:[%s15822_s1 + $0x8] sm:$0xff]  ;;  %v15144_v23 = vld [vmem:[%s15822_s1] sm:$0xff] }
0x1d02   :  { %11997 = vtanh.f32 %v15019_v12  ;;  %v8233_v55 = vrot.slane %v15019_v12, 6 }
0x1d03   :  { %v11996_v47 = vpop.eup %11995 }
0x1d04   :  { %8184 = vrot.lane.b32.xlu0 %v11996_v47, %s12275_s24 }
0x1d07   :  { %v8159_v61 = vpop.permute.xlu0 %8158 }
0x1d08   :  { %v15024_v27 = vadd.f32 %v8159_v61, %v8130_v48  ;;  %v15153_v61 = vld [vmem:[%s15823_s2] ss:$0 sm:$0xff] }
0x1d0a   :  { %11999 = vtanh.f32 %v15024_v27 }
0x1d0b   :  { %v8165_v21 = vpop.permute.xlu1 %8164 }
0x1d0c   :  { %v15028_v34 = vadd.f32 %v8165_v21, %v8133_v38 }
0x1d0e   :  { %12001 = vtanh.f32 %v15028_v34  ;;  %v8235_v4 = vrot.slane %v15028_v34, 5 }
0x1d0f   :  { %v11998_v14 = vpop.eup %11997 }
0x1d10   :  { %8186 = vrot.lane.b32.xlu1 %v11998_v14, %s12275_s24 }
0x1d17   :  { %v12000_v50 = vpop.eup %11999 }
0x1d18   :  { %8182 = vrot.lane.b32.xlu0 %v12000_v50, %s12275_s24 }
0x1d1b   :  { %v12002_v11 = vpop.eup %12001 }
0x1d1c   :  { %8188 = vrot.lane.b32.xlu1 %v12002_v11, %s12275_s24  ;;  %v16171_v11 = vld [vmem:[#allocation44_spill] sm:$0xff] }
0x1d76   :  { %v8185_v52 = vpop.permute.xlu0 %8184 }
0x1d77   :  { %v15034_v25 = vmul.f32 %v11984_v0, %v8185_v52  ;;  %v8231_v0 = vrot.slane %v15015_v1, 7  ;;  %v2225_v52 = vcombine.high %v16171_v11, %v16171_v11 }
0x1d79   :  { %16168 = vst [vmem:[#allocation8_spill] sm:$0xff] %v15034_v25  ;;  %v8218_v15 = vrot.slane %v15034_v25, 7  ;;  %v8232_v24 = vsel %vm4108_vm5, %v8231_v0, %v15024_v27  ;;  %v8380_v0 = vrot.slane %v2225_v52, %v12363_v17 }
0x1d7a   :  { %v8234_v33 = vsel %vm4110_vm6, %v8233_v55, %v8232_v24 }
0x1d7b   :  { %v8236_v7 = vsel %vm4112_vm7, %v8235_v4, %v8234_v33 }
0x1d82   :  { %v8187_v10 = vpop.permute.xlu1 %8186 }
0x1d83   :  { %v15038_v57 = vmul.f32 %v11990_v26, %v8187_v10  ;;  %v16172_v10 = vld [vmem:[#allocation56_spill] sm:$0xff] }
0x1d85   :  { %16169 = vst [vmem:[#allocation23_spill] sm:$0xff] %v15038_v57  ;;  %v8220_v6 = vrot.slane %v15038_v57, 6 }
0x1d8a   :  { %v8183_v46 = vpop.permute.xlu0 %8182 }
0x1d8b   :  { %v15036_v8 = vmul.f32 %v11992_v22, %v8183_v46  ;;  %v15076_v22 = vld [vmem:[%s15822_s1 + $0x30] sm:$0xff]  ;;  %v2395_v46 = vcombine.high %v16172_v10, %v16172_v10 }
0x1d8c   :  { %v16177_v10 = vld [vmem:[#allocation72_spill] sm:$0xff] }
0x1d8d   :  { %v8219_v35 = vsel %vm4108_vm5, %v8218_v15, %v15036_v8  ;;  %v8404_v24 = vrot.slane %v2395_v46, %v12363_v17 }
0x1d8e   :  { %v8189_v9 = vpop.permute.xlu1 %8188  ;;  %v8221_v62 = vsel %vm4110_vm6, %v8220_v6, %v8219_v35  ;;  %v16173_v35 = vld [vmem:[#allocation70_spill] sm:$0xff] }
0x1d8f   :  { %v15043_v60 = vmul.f32 %v11994_v58, %v8189_v9  ;;  %v15098_v58 = vld [vmem:[%s15829_s8 + $0x8] sm:$0xff]  ;;  %v2565_v6 = vcombine.high %v16173_v35, %v16173_v35 }
0x1d91   :  { %16170 = vst [vmem:[#allocation22_spill] sm:$0xff] %v15043_v60  ;;  %v8222_v5 = vrot.slane %v15043_v60, 5 }
0x1d93   :  { %v8223_v16 = vsel %vm4112_vm7, %v8222_v5, %v8221_v62 }
0x1d94   :  { %8224 = vrot.lane.b32.xlu0 %v8223_v16, %s12276_s25 }
0x1e06   :  { %v8225_v59 = vpop.permute.xlu0 %8224 }
0x1e07   :  { %v8238_v26 = vsel %vm4454_vm10, %v8225_v59, %v8236_v7  ;;  %11563 = vmatmul.mubr.msk.f32.vlgmr.msra.gmra.mxu1 %vm4454_vm10, %v8225_v59  ;;  %v16174_v7 = vld [vmem:[#allocation87_spill] sm:$0xff] }
0x1e08   :  { %11552 = vmatmul.mubr.msk.f32.vlgmr.msra.gmra.mxu0 %vm3764_vm11, %v8238_v26  ;;  %11566 = vmatpush3.msra.mxu1 %v15063_v63  ;;  %v16175_v26 = vld [vmem:[#allocation85_spill] sm:$0xff] }
0x1e09   :  { %11567 = vmatprep.subr.mxu1 %v15969_v56  ;;  %11585 = vmatpush3.msra.mxu0 %v15070_v32 }
0x1e0a   :  { %11568 = vmatpush3.msra.mxu1 %v15076_v22  ;;  %11586 = vmatprep.subr.mxu0 %v15969_v56 }
0x1e0b   :  { %11569 = vmatprep.subr.mxu1 %v15969_v56  ;;  %11587 = vmatpush3.msra.mxu0 %v15084_v18 }
0x1e0c   :  { %11570 = vmatpush3.msra.mxu1 %v15090_v41  ;;  %11588 = vmatprep.subr.mxu0 %v15969_v56 }
0x1e0d   :  { %11571 = vmatprep.subr.mxu1 %v15969_v56  ;;  %11589 = vmatpush3.msra.mxu0 %v15098_v58 }
0x1e0e   :  { %11572 = vmatpush3.msra.mxu1 %v15104_v39  ;;  %11590 = vmatprep.subr.mxu0 %v15969_v56 }
0x1e0f   :  { %11573 = vmatprep.subr.mxu1 %v15969_v56  ;;  %11591 = vmatpush3.msra.mxu0 %v15112_v28 }
0x1e10   :  { %11574 = vmatpush3.msra.mxu1 %v15118_v53  ;;  %11592 = vmatprep.mubr.msk.f32.mxu0 %vm12272_vm1, %v15969_v56 }
0x1e11   :  { %11575 = vmatprep.subr.mxu1 %v15969_v56  ;;  %11581 = vmatprep.mubr.msk.f32.mxu1 %vm12272_vm1, %v15969_v56 }
0x1e12   :  { %11576 = vmatpush3.msra.mxu1 %v15129_v43  ;;  %11595 = vmatprep.subr.mxu0 %v15969_v56 }
0x1e13   :  { %11577 = vmatprep.subr.mxu1 %v15969_v56 }
0x1e14   :  { %11578 = vmatpush3.msra.mxu1 %v15137_v19 }
0x1e15   :  { %11579 = vmatprep.subr.mxu1 %v15969_v56 }
0x1e16   :  { %11580 = vmatpush3.msra.mxu1 %v15144_v23 }
0x1e17   :  { %11614 = vmatprep.subr.mxu1 %v15969_v56 }
0x1ec7   :  { %v15148_v47 = vpop.f32.mrf.mxu1 }
0x1ec8   :  { %v8308_v48 = vpop.f32.mrf.mxu0 }
0x1ec9   :  { %v8309_v38 = vadd.f32 %v15153_v61, %v8308_v48  ;;  %v11564_v21 = vpop.f32.mrf.mxu1  ;;  %v2735_v48 = vcombine.high %v16175_v26, %v16175_v26 }
0x1eca   :  { %v11553_v14 = vpop.f32.mrf.mxu0  ;;  %v8428_v21 = vrot.slane %v2565_v6, %v12363_v17 }
0x1ecb   :  { %v8319_v50 = vrot.slane %v8309_v38, %v13182_v45  ;;  %v16176_v14 = vld [vmem:[#allocation59_spill] sm:$0xff] }
0x1ecd   :  { %v8320_v15 = vcombine.high %v8319_v50, %v8319_v50  ;;  %v8327_v9 = vrot.slane %v8319_v50, %v13182_v45 }
0x1ecf   :  { %v8334_v5 = vrot.slane %v8320_v15, %v13182_v45  ;;  %v8335_v62 = vcombine.high %v8327_v9, %v8327_v9  ;;  %v8340_v16 = vrot.slane %v8327_v9, %v13185_v31  ;;  %v8452_v9 = vrot.slane %v2735_v48, %v12363_v17 }
0x1ed1   :  { %v8336_v4 = vcombine.high %v8334_v5, %v8334_v5  ;;  %v8344_v55 = vrot.slane %v8334_v5, %v13185_v31  ;;  %v8348_v33 = vrot.slane %v8335_v62, %v13185_v31  ;;  %v8461_v59 = vadd.f32 %v16174_v7, %v8340_v16  ;;  %v16178_v5 = vld [vmem:[#allocation90_spill] sm:$0xff] }
0x1ed2   :  { %v8462_v38 = vadd.f32 %v8380_v0, %v8340_v16  ;;  %v15182_v0 = vld [vmem:[%s15826_s5] ss:$0 sm:$0xff] }
0x1ed3   :  { %v8463_v50 = vadd.f32 %v16176_v14, %v8344_v55  ;;  %v8464_v11 = vadd.f32 %v8404_v24, %v8344_v55  ;;  %v8352_v52 = vrot.slane %v8336_v4, %v13185_v31  ;;  %v8465_v46 = vadd.f32 %v16177_v10, %v8348_v33 }
0x1ed4   :  { %12003 = vtanh.f32 %v8461_v59  ;;  %v8466_v15 = vadd.f32 %v8428_v21, %v8348_v33 }
0x1ed5   :  { %12005 = vtanh.f32 %v8462_v38  ;;  %v8468_v35 = vadd.f32 %v8452_v9, %v8352_v52  ;;  %v8467_v62 = vadd.f32 %v16178_v5, %v8352_v52 }
0x1ed6   :  { %12007 = vtanh.f32 %v8463_v50 }
0x1ed7   :  { %12009 = vtanh.f32 %v8464_v11 }
0x1ed8   :  { %12011 = vtanh.f32 %v8465_v46 }
0x1ed9   :  { %12013 = vtanh.f32 %v8466_v15 }
0x1eda   :  { %12015 = vtanh.f32 %v8468_v35 }
0x1edb   :  { %12017 = vtanh.f32 %v8467_v62 }
0x1ee1   :  { %v12004_v6 = vpop.eup %12003 }
0x1ee2   :  { %v12006_v16 = vpop.eup %12005  ;;  %v8477_v24 = vmul.f32 %v15182_v0, %v12004_v6 }
0x1ee3   :  { %v12008_v4 = vpop.eup %12007  ;;  %v8478_v55 = vmul.f32 %v15182_v0, %v12006_v16 }
0x1ee4   :  { %v12010_v33 = vpop.eup %12009  ;;  %v8485_v7 = vsel %vm4017_vm2, %v8477_v24, 0.0  ;;  %v8479_v38 = vmul.f32 %v15182_v0, %v12008_v4 }
0x1ee5   :  { %v12012_v59 = vpop.eup %12011  ;;  %v8488_v26 = vsel %vm4021_vm3, %v8478_v55, 0.0  ;;  %8486 = vadd.xlane.f32.xlu1 %v8485_v7  ;;  %v8480_v48 = vmul.f32 %v15182_v0, %v12010_v33 }
0x1ee6   :  { %v12014_v21 = vpop.eup %12013  ;;  %8489 = vadd.xlane.f32.xlu0 %v8488_v26  ;;  %v8491_v52 = vsel %vm4017_vm2, %v8479_v38, 0.0  ;;  %v8481_v10 = vmul.f32 %v15182_v0, %v12012_v59 }
0x1ee7   :  { %v8494_v14 = vsel %vm4021_vm3, %v8480_v48, 0.0  ;;  %v8482_v50 = vmul.f32 %v15182_v0, %v12014_v21  ;;  %v12016_v11 = vpop.eup %12015 }
0x1ee8   :  { %v12018_v46 = vpop.eup %12017  ;;  %v8484_v9 = vmul.f32 %v15182_v0, %v12016_v11  ;;  %v8497_v35 = vsel %vm4017_vm2, %v8481_v10, 0.0 }
0x1ee9   :  { %8495 = vadd.xlane.f32.xlu1 %v8494_v14  ;;  %v8500_v15 = vsel %vm4021_vm3, %v8482_v50, 0.0  ;;  %v8483_v5 = vmul.f32 %v15182_v0, %v12018_v46 }
0x1eea   :  { %8492 = vadd.xlane.f32.xlu0 %v8491_v52  ;;  %v8506_v62 = vsel %vm4021_vm3, %v8484_v9, 0.0 }
0x1eeb   :  { %v8503_v6 = vsel %vm4017_vm2, %v8483_v5, 0.0 }
0x1eed   :  { %8501 = vadd.xlane.f32.xlu1 %v8500_v15 }
0x1eee   :  { %8498 = vadd.xlane.f32.xlu0 %v8497_v35 }
0x1ef1   :  { %8507 = vadd.xlane.f32.xlu1 %v8506_v62 }
0x1ef2   :  { %8504 = vadd.xlane.f32.xlu0 %v8503_v6 }
0x1f6e   :  { %v8487_v16 = vpop.xlane.xlu1 %8486 }
0x1f6f   :  { %v8490_v24 = vpop.xlane.xlu0 %8489  ;;  %v8509_v26 = vadd.f32 %v8487_v16, %v13453_v29 }
0x1f70   :  { %v8510_v59 = vadd.f32 %v8490_v24, %v13453_v29 }
0x1f71   :  { %v8528_v46 = vrot.slane %v8509_v26, %v13448_v20 }
0x1f72   :  { %v8496_v4 = vpop.xlane.xlu1 %8495  ;;  %v8532_v10 = vrot.slane %v8510_v59, %v13451_v51 }
0x1f73   :  { %v8493_v55 = vpop.xlane.xlu0 %8492  ;;  %v8512_v33 = vadd.f32 %v8496_v4, %v13453_v29 }
0x1f74   :  { %v8511_v7 = vadd.f32 %v8493_v55, %v13453_v29  ;;  %v8533_v4 = vsel %vm4079_vm4, %v8532_v10, %v8528_v46 }
0x1f75   :  { %v8541_v14 = vrot.slane %v8512_v33, %v13451_v51 }
0x1f76   :  { %v8502_v48 = vpop.xlane.xlu1 %8501  ;;  %v8537_v50 = vrot.slane %v8511_v7, %v13448_v20 }
0x1f77   :  { %v8514_v38 = vadd.f32 %v8502_v48, %v13453_v29  ;;  %v8499_v21 = vpop.xlane.xlu0 %8498 }
0x1f78   :  { %v8513_v11 = vadd.f32 %v8499_v21, %v13453_v29  ;;  %v8542_v62 = vsel %vm4079_vm4, %v8541_v14, %v8537_v50 }
0x1f79   :  { %v8550_v52 = vrot.slane %v8514_v38, %v13451_v51  ;;  %v8561_v48 = vsel %vm4108_vm5, %v8542_v62, %v8533_v4 }
0x1f7a   :  { %v8546_v15 = vrot.slane %v8513_v11, %v13448_v20  ;;  %v8508_v9 = vpop.xlane.xlu1 %8507 }
0x1f7b   :  { %v8516_v35 = vadd.f32 %v8508_v9, %v13453_v29  ;;  %v8505_v5 = vpop.xlane.xlu0 %8504 }
0x1f7c   :  { %v8515_v6 = vadd.f32 %v8505_v5, %v13453_v29  ;;  %v8551_v24 = vsel %vm4079_vm4, %v8550_v52, %v8546_v15 }
0x1f7d   :  { %v8559_v16 = vrot.slane %v8516_v35, %v13451_v51  ;;  %v8562_v60 = vsel %vm4110_vm6, %v8551_v24, %v8561_v48 }
0x1f7e   :  { %v8555_v55 = vrot.slane %v8515_v6, %v13448_v20 }
0x1f80   :  { %v8560_v21 = vsel %vm4079_vm4, %v8559_v16, %v8555_v55 }
0x1f81   :  { %v8563_v9 = vsel %vm4112_vm7, %v8560_v21, %v8562_v60 }
0x1f82   :  { %v8565_v14 = vsel %vm4115_vm8, %v8563_v9, -inf }
0x1f83   :  { %8566 = vmax.xlane.f32.xlu0 %v8565_v14 }
0x200c   :  { %v8567_v50 = vpop.xlane.xlu0 %8566 }
0x200d   :  { %v8572_v5 = vrot.slane %v8567_v50, %v13185_v31  ;;  %v8576_v52 = vrot.slane %v8567_v50, %v13483_v49  ;;  %v8580_v10 = vrot.slane %v8567_v50, %v13489_v40  ;;  %v8584_v62 = vrot.slane %v8567_v50, %v13480_v37 }
0x200f   :  { %v8589_v46 = vsub.f32 %v8509_v26, %v8572_v5  ;;  %v8590_v15 = vsub.f32 %v8510_v59, %v8572_v5  ;;  %v8591_v25 = vsub.f32 %v8511_v7, %v8576_v52  ;;  %v8593_v16 = vsub.f32 %v8513_v11, %v8580_v10 }
0x2010   :  { %v8592_v55 = vsub.f32 %v8512_v33, %v8576_v52  ;;  %v8595_v48 = vsub.f32 %v8515_v6, %v8584_v62  ;;  %v8594_v9 = vsub.f32 %v8514_v38, %v8580_v10  ;;  %v8596_v42 = vsub.f32 %v8516_v35, %v8584_v62 }
0x2011   :  { %v8597_v4 = vmul.f32 1.442695, %v8589_v46  ;;  %v8599_v24 = vmul.f32 1.442695, %v8590_v15  ;;  %v8601_v60 = vmul.f32 1.442695, %v8591_v25 }
0x2012   :  { %v8605_v21 = vmul.f32 1.442695, %v8593_v16  ;;  %v8603_v14 = vmul.f32 1.442695, %v8592_v55  ;;  %v8609_v57 = vmul.f32 1.442695, %v8595_v48 }
0x2013   :  { %12019 = vpow2.f32 %v8597_v4  ;;  %v8607_v59 = vmul.f32 1.442695, %v8594_v9  ;;  %v8611_v7 = vmul.f32 1.442695, %v8596_v42 }
0x2014   :  { %12021 = vpow2.f32 %v8599_v24 }
0x2015   :  { %12023 = vpow2.f32 %v8601_v60 }
0x2016   :  { %12025 = vpow2.f32 %v8605_v21 }
0x2017   :  { %12027 = vpow2.f32 %v8603_v14 }
0x2018   :  { %12029 = vpow2.f32 %v8609_v57 }
0x2019   :  { %12031 = vpow2.f32 %v8607_v59 }
0x201a   :  { %12033 = vpow2.f32 %v8611_v7 }
0x2020   :  { %v12020_v26 = vpop.eup %12019 }
0x2021   :  { %v12022_v11 = vpop.eup %12021  ;;  %8622 = vperm.xlu1 %11640, %v12020_v26  }
0x2022   :  { %8625 = vperm.xlu0 %11639, %v12022_v11   ;;  %v12024_v25 = vpop.eup %12023 }
0x2023   :  { %v12026_v33 = vpop.eup %12025 }
0x2024   :  { %v12028_v38 = vpop.eup %12027 }
0x2025   :  { %8628 = vperm.xlu1 %11640, %v12024_v25   ;;  %v12030_v6 = vpop.eup %12029 }
0x2026   :  { %8634 = vperm.xlu0 %11639, %v12026_v33   ;;  %v12032_v50 = vpop.eup %12031 }
0x2027   :  { %v12034_v35 = vpop.eup %12033 }
0x2029   :  { %8631 = vperm.xlu1 %11640, %v12028_v38  }
0x202a   :  { %8640 = vperm.xlu0 %11639, %v12030_v6  }
0x202d   :  { %8637 = vperm.xlu1 %11640, %v12032_v50  }
0x2031   :  { %8643 = vperm.xlu1 %11640, %v12034_v35  }
0x209c   :  { %v8623_v57 = vpop.permute.xlu1 %8622 }
0x209d   :  { %v8626_v5 = vpop.permute.xlu0 %8625  ;;  %v8648_v16 = vrot.slane %v8623_v57, %v13448_v20 }
0x209e   :  { %v8652_v62 = vrot.slane %v8626_v5, %v13451_v51 }
0x20a0   :  { %v8629_v42 = vpop.permute.xlu1 %8628  ;;  %v8653_v14 = vsel %vm4079_vm4, %v8652_v62, %v8648_v16 }
0x20a1   :  { %v8635_v52 = vpop.permute.xlu0 %8634  ;;  %v8657_v4 = vrot.slane %v8629_v42, %v13448_v20 }
0x20a2   :  { %v8666_v55 = vrot.slane %v8635_v52, %v13448_v20 }
0x20a4   :  { %v8632_v10 = vpop.permute.xlu1 %8631 }
0x20a5   :  { %v8661_v46 = vrot.slane %v8632_v10, %v13451_v51  ;;  %v8641_v60 = vpop.permute.xlu0 %8640 }
0x20a6   :  { %v8675_v59 = vrot.slane %v8641_v60, %v13448_v20 }
0x20a7   :  { %v8662_v48 = vsel %vm4079_vm4, %v8661_v46, %v8657_v4 }
0x20a8   :  { %v8638_v15 = vpop.permute.xlu1 %8637  ;;  %v8681_v57 = vsel %vm4108_vm5, %v8662_v48, %v8653_v14 }
0x20a9   :  { %v8670_v24 = vrot.slane %v8638_v15, %v13451_v51 }
0x20ab   :  { %v8671_v21 = vsel %vm4079_vm4, %v8670_v24, %v8666_v55 }
0x20ac   :  { %v8644_v9 = vpop.permute.xlu1 %8643  ;;  %v8682_v42 = vsel %vm4110_vm6, %v8671_v21, %v8681_v57 }
0x20ad   :  { %v8679_v7 = vrot.slane %v8644_v9, %v13451_v51 }
0x20af   :  { %v8680_v5 = vsel %vm4079_vm4, %v8679_v7, %v8675_v59 }
0x20b0   :  { %v8683_v52 = vsel %vm4112_vm7, %v8680_v5, %v8682_v42 }
0x20b1   :  { %v8685_v10 = vsel %vm4115_vm8, %v8683_v52, 0.0 }
0x20b2   :  { %8686 = vadd.xlane.f32.xlu0 %v8685_v10 }
0x213b   :  { %v8687_v46 = vpop.xlane.xlu0 %8686 }
0x213c   :  { %12035 = vrcp.f32 %v8687_v46  ;;  %v16181_v46 = vld [vmem:[#allocation94_spill] sm:$0xff] }
0x2149   :  { %v12036_v15 = vpop.eup %12035 }
0x214a   :  { %v8697_v62 = vrot.slane %v12036_v15, %v13483_v49  ;;  %v8701_v24 = vrot.slane %v12036_v15, %v13489_v40  ;;  %v8693_v60 = vrot.slane %v12036_v15, %v13185_v31  ;;  %v8705_v9 = vrot.slane %v12036_v15, %v13480_v37 }
0x214c   :  { %v8713_v16 = vmul.f32 %v12028_v38, %v8697_v62  ;;  %v8712_v4 = vmul.f32 %v12024_v25, %v8697_v62  ;;  %v8715_v55 = vmul.f32 %v12032_v50, %v8701_v24  ;;  %v8711_v48 = vmul.f32 %v12022_v11, %v8693_v60  ;;  %v16179_v25 = vld [vmem:[#allocation35_spill] sm:$0xff]  ;;  %v16180_v11 = vld [vmem:[#allocation34_spill] sm:$0xff] }
0x214d   :  { %v8714_v21 = vmul.f32 %v12026_v33, %v8701_v24  ;;  %v8717_v14 = vmul.f32 %v12034_v35, %v8705_v9  ;;  %v8710_v59 = vmul.f32 %v12020_v26, %v8693_v60  ;;  %v8716_v38 = vmul.f32 %v12030_v6, %v8705_v9  ;;  %v16182_v60 = vld [vmem:[#allocation29_spill] sm:$0xff] }
0x214e   :  { %8735 = vperm.xlu1 %11640, %v8713_v16   ;;  %v3382_v7 = vcombine.high %v16179_v25, %v16179_v25  ;;  %v3552_v35 = vcombine.high %v16181_v46, %v16181_v46  ;;  %v8975_v25 = vrot.slane %v15148_v47, 1 }
0x2150   :  { %v8805_v50 = vrot.slane %v3382_v7, %v12363_v17  ;;  %v8829_v62 = vrot.slane %v3552_v35, %v12363_v17 }
0x2152   :  { %8730 = vperm.xlu1 %11640, %v8712_v4  }
0x2156   :  { %8745 = vperm.xlu1 %11640, %v8715_v55  }
0x215a   :  { %8725 = vperm.xlu1 %11640, %v8711_v48   ;;  %v3212_v48 = vcombine.high %v16182_v60, %v16182_v60 }
0x215e   :  { %8740 = vperm.xlu1 %11640, %v8714_v21  }
0x2162   :  { %8755 = vperm.xlu1 %11640, %v8717_v14   ;;  %v16183_v14 = vld [vmem:[#allocation96_spill] sm:$0xff] }
0x2166   :  { %8720 = vperm.xlu1 %11640, %v8710_v59  }
0x216a   :  { %8750 = vperm.xlu1 %11640, %v8716_v38  }
0x21c9   :  { %v8736_v57 = vpop.permute.xlu1 %8735 }
0x21ca   :  { %v8865_v5 = vmul.f32 %v8805_v50, %v8736_v57  ;;  %v16184_v57 = vld [vmem:[#allocation99_spill] sm:$0xff] }
0x21cc   :  { %v8878_v33 = vsel %vm4421_vm9, %v8865_v5, 0.0  ;;  %v3722_v5 = vcombine.high %v16184_v57, %v16184_v57 }
0x21cd   :  { %v8731_v42 = vpop.permute.xlu1 %8730 }
0x21ce   :  { %v8864_v52 = vmul.f32 %v16180_v11, %v8731_v42  ;;  %v8781_v42 = vrot.slane %v3212_v48, %v12363_v17 }
0x21d0   :  { %v8879_v10 = vadd.f32 %v8878_v33, %v8864_v52 }
0x21d1   :  { %v8746_v26 = vpop.permute.xlu1 %8745 }
0x21d2   :  { %v8880_v15 = vrot.slane %v8879_v10, 4  ;;  %v8867_v24 = vmul.f32 %v8829_v62, %v8746_v26  ;;  %v8853_v26 = vrot.slane %v3722_v5, %v12363_v17  ;;  %v16185_v62 = vld [vmem:[#allocation31_spill] sm:$0xff] }
0x21d4   :  { %v8881_v6 = vadd.f32 %v8880_v15, %v8879_v10  ;;  %v8886_v38 = vsel %vm4421_vm9, %v8867_v24, 0.0 }
0x21d5   :  { %v8726_v16 = vpop.permute.xlu1 %8725 }
0x21d6   :  { %v8882_v4 = vrot.slane %v8881_v6, 2  ;;  %v8863_v10 = vmul.f32 %v8781_v42, %v8726_v16 }
0x21d8   :  { %v8883_v55 = vadd.f32 %v8882_v4, %v8881_v6  ;;  %v8870_v24 = vsel %vm4421_vm9, %v8863_v10, 0.0 }
0x21d9   :  { %v8741_v21 = vpop.permute.xlu1 %8740 }
0x21da   :  { %v8884_v9 = vrot.slane %v8883_v55, 1  ;;  %v8866_v59 = vmul.f32 %v16183_v14, %v8741_v21 }
0x21dc   :  { %v8885_v7 = vadd.f32 %v8884_v9, %v8883_v55  ;;  %v8887_v50 = vadd.f32 %v8886_v38, %v8866_v59  ;;  %v16186_v59 = vld [vmem:[#allocation101_spill] sm:$0xff] }
0x21dd   :  { %v8756_v11 = vpop.permute.xlu1 %8755 }
0x21de   :  { %v8983_v52 = vadd.f32 %v8975_v25, %v8885_v7  ;;  %v8888_v33 = vrot.slane %v8887_v50, 4  ;;  %v8869_v55 = vmul.f32 %v8853_v26, %v8756_v11  ;;  %v8976_v25 = vrot.slane %v15148_v47, 2 }
0x21e0   :  { %v8987_v46 = vadd.f32 %v14991_v30, %v8983_v52  ;;  %v8889_v35 = vadd.f32 %v8888_v33, %v8887_v50  ;;  %v8894_v38 = vsel %vm4421_vm9, %v8869_v55, 0.0  ;;  %v8977_v55 = vrot.slane %v15148_v47, 3 }
0x21e1   :  { %v8721_v15 = vpop.permute.xlu1 %8720 }
0x21e2   :  { %12037 = vtanh.f32 %v8987_v46  ;;  %v8890_v6 = vrot.slane %v8889_v35, 2  ;;  %v8862_v4 = vmul.f32 %v16185_v62, %v8721_v15 }
0x21e4   :  { %v8891_v60 = vadd.f32 %v8890_v6, %v8889_v35  ;;  %v8871_v21 = vadd.f32 %v8870_v24, %v8862_v4 }
0x21e5   :  { %v8751_v48 = vpop.permute.xlu1 %8750 }
0x21e6   :  { %v8892_v9 = vrot.slane %v8891_v60, 1  ;;  %v8872_v14 = vrot.slane %v8871_v21, 4  ;;  %v8868_v16 = vmul.f32 %v16186_v59, %v8751_v48 }
0x21e8   :  { %v8893_v7 = vadd.f32 %v8892_v9, %v8891_v60  ;;  %v8873_v50 = vadd.f32 %v8872_v14, %v8871_v21  ;;  %v8895_v57 = vadd.f32 %v8894_v38, %v8868_v16  ;;  %v11046_v38 = vmul.f32 -1.442695, %v8987_v46 }
0x21ea   :  { %v8984_v5 = vadd.f32 %v8976_v25, %v8893_v7  ;;  %v8874_v42 = vrot.slane %v8873_v50, 2  ;;  %v8896_v52 = vrot.slane %v8895_v57, 4 }
0x21ec   :  { %v8988_v33 = vadd.f32 %v14991_v30, %v8984_v5  ;;  %v8875_v11 = vadd.f32 %v8874_v42, %v8873_v50  ;;  %v8897_v10 = vadd.f32 %v8896_v52, %v8895_v57 }
0x21ee   :  { %12039 = vtanh.f32 %v8988_v33  ;;  %v8876_v35 = vrot.slane %v8875_v11, 1  ;;  %v8898_v26 = vrot.slane %v8897_v10, 2 }
0x21ef   :  { %v12038_v15 = vpop.eup %12037 }
0x21f0   :  { %v8877_v6 = vadd.f32 %v8876_v35, %v8875_v11  ;;  %v8899_v62 = vadd.f32 %v8898_v26, %v8897_v10  ;;  %9028 = vrot.lane.b32.xlu0 %v12038_v15, %s12275_s24 }
0x21f2   :  { %v8982_v4 = vadd.f32 %v15148_v47, %v8877_v6  ;;  %v8900_v24 = vrot.slane %v8899_v62, 1  ;;  %v11047_v47 = vmul.f32 -1.442695, %v8988_v33 }
0x21f4   :  { %v8986_v60 = vadd.f32 %v14991_v30, %v8982_v4  ;;  %v8901_v21 = vadd.f32 %v8900_v24, %v8899_v62 }
0x21f6   :  { %12041 = vtanh.f32 %v8986_v60  ;;  %v8985_v48 = vadd.f32 %v8977_v55, %v8901_v21  ;;  %v11045_v50 = vmul.f32 -1.442695, %v8986_v60 }
0x21f8   :  { %v8989_v9 = vadd.f32 %v14991_v30, %v8985_v48 }
0x21fa   :  { %12043 = vtanh.f32 %v8989_v9  ;;  %v11048_v30 = vmul.f32 -1.442695, %v8989_v9 }
0x21fb   :  { %v12040_v14 = vpop.eup %12039  ;;  %12045 = vpow2.f32 %v11046_v38 }
0x21fc   :  { %9030 = vrot.lane.b32.xlu1 %v12040_v14, %s12275_s24  ;;  %12047 = vpow2.f32 %v11047_v47 }
0x2203   :  { %v12042_v59 = vpop.eup %12041 }
0x2204   :  { %9026 = vrot.lane.b32.xlu1 %v12042_v59, %s12275_s24 }
0x2207   :  { %v12044_v16 = vpop.eup %12043 }
0x2208   :  { %9032 = vrot.lane.b32.xlu1 %v12044_v16, %s12275_s24  ;;  %v12046_v25 = vpop.eup %12045 }
0x2209   :  { %v9003_v7 = vadd.f32 1.0, %v12046_v25  ;;  %v12048_v57 = vpop.eup %12047 }
0x220a   :  { %v9004_v5 = vadd.f32 1.0, %v12048_v57 }
0x220b   :  { %12049 = vrcp.f32 %v9003_v7 }
0x220c   :  { %12051 = vpow2.f32 %v11045_v50 }
0x220d   :  { %12053 = vpow2.f32 %v11048_v30 }
0x220e   :  { %12055 = vrcp.f32 %v9004_v5 }
0x2218   :  { %v12050_v42 = vpop.eup %12049 }
0x2219   :  { %v12052_v52 = vpop.eup %12051  ;;  %v9019_v48 = vmul.f32 %v12050_v42, %v15015_v1 }
0x221a   :  { %v9002_v35 = vadd.f32 1.0, %v12052_v52  ;;  %v12054_v46 = vpop.eup %12053 }
0x221b   :  { %v9005_v33 = vadd.f32 1.0, %v12054_v46  ;;  %v12056_v26 = vpop.eup %12055 }
0x221c   :  { %12057 = vrcp.f32 %v9002_v35  ;;  %v9020_v59 = vmul.f32 %v12056_v26, %v15019_v12 }
0x221d   :  { %12059 = vrcp.f32 %v9005_v33 }
0x2229   :  { %v12058_v62 = vpop.eup %12057 }
0x222a   :  { %v12060_v55 = vpop.eup %12059  ;;  %v9018_v25 = vmul.f32 %v12058_v62, %v15024_v27 }
0x222b   :  { %v9021_v1 = vmul.f32 %v12060_v55, %v15028_v34 }
0x2262   :  { %v9029_v11 = vpop.permute.xlu0 %9028 }
0x2263   :  { %v9039_v10 = vmul.f32 %v12050_v42, %v9029_v11 }
0x2265   :  { %9048 = vrot.lane.b32.xlu1 %v9039_v10, %s12276_s25 }
0x226e   :  { %v9031_v15 = vpop.permute.xlu1 %9030 }
0x226f   :  { %v9040_v6 = vmul.f32 %v12056_v26, %v9031_v15 }
0x2271   :  { %9050 = vrot.lane.b32.xlu1 %v9040_v6, %s12276_s25 }
0x2276   :  { %v9027_v4 = vpop.permute.xlu1 %9026 }
0x2277   :  { %v9038_v24 = vmul.f32 %v12058_v62, %v9027_v4 }
0x2279   :  { %9046 = vrot.lane.b32.xlu1 %v9038_v24, %s12276_s25 }
0x227a   :  { %v9033_v60 = vpop.permute.xlu1 %9032 }
0x227b   :  { %v9041_v21 = vmul.f32 %v12060_v55, %v9033_v60 }
0x227d   :  { %9052 = vrot.lane.b32.xlu0 %v9041_v21, %s12276_s25 }
0x22d7   :  { %v9049_v9 = vpop.permute.xlu1 %9048 }
0x22d8   :  { %v15285_v14 = vadd.f32 %v9049_v9, %v9019_v48 }
0x22da   :  { %12061 = vtanh.f32 %v15285_v14 }
0x22e3   :  { %v9051_v16 = vpop.permute.xlu1 %9050 }
0x22e4   :  { %v15289_v38 = vadd.f32 %v9051_v16, %v9020_v59 }
0x22e6   :  { %12063 = vtanh.f32 %v15289_v38 }
0x22e7   :  { %v12062_v47 = vpop.eup %12061 }
0x22e8   :  { %9072 = vrot.lane.b32.xlu1 %v12062_v47, %s12275_s24 }
0x22eb   :  { %v9047_v7 = vpop.permute.xlu1 %9046 }
0x22ec   :  { %v15294_v50 = vadd.f32 %v9047_v7, %v9018_v25 }
0x22ee   :  { %12065 = vtanh.f32 %v15294_v50 }
0x22ef   :  { %v9053_v30 = vpop.permute.xlu0 %9052 }
0x22f0   :  { %v15298_v57 = vadd.f32 %v9053_v30, %v9021_v1 }
0x22f2   :  { %12067 = vtanh.f32 %v15298_v57  ;;  %v9123_v48 = vrot.slane %v15298_v57, 5 }
0x22f3   :  { %v12064_v12 = vpop.eup %12063 }
0x22f4   :  { %9074 = vrot.lane.b32.xlu0 %v12064_v12, %s12275_s24 }
0x22fb   :  { %v12066_v5 = vpop.eup %12065 }
0x22fc   :  { %9070 = vrot.lane.b32.xlu1 %v12066_v5, %s12275_s24 }
0x22ff   :  { %v12068_v52 = vpop.eup %12067 }
0x2300   :  { %9076 = vrot.lane.b32.xlu0 %v12068_v52, %s12275_s24 }
0x235a   :  { %v9073_v27 = vpop.permute.xlu1 %9072 }
0x235b   :  { %v15304_v11 = vmul.f32 %v12050_v42, %v9073_v27 }
0x235d   :  { %v9106_v33 = vrot.slane %v15304_v11, 7 }
0x2366   :  { %v9075_v10 = vpop.permute.xlu0 %9074 }
0x2367   :  { %v15308_v46 = vmul.f32 %v12056_v26, %v9075_v10  ;;  %v9119_v26 = vrot.slane %v15285_v14, 7 }
0x2369   :  { %v9108_v24 = vrot.slane %v15308_v46, 6 }
0x236e   :  { %v9071_v35 = vpop.permute.xlu1 %9070 }
0x236f   :  { %v15306_v34 = vmul.f32 %v12058_v62, %v9071_v35  ;;  %v9120_v62 = vsel %vm4108_vm5, %v9119_v26, %v15294_v50  ;;  %v16190_v35 = vld [vmem:[#allocation47_spill] sm:$0xff] }
0x2371   :  { %v9107_v6 = vsel %vm4108_vm5, %v9106_v33, %v15306_v34 }
0x2372   :  { %v9077_v15 = vpop.permute.xlu0 %9076  ;;  %v9109_v42 = vsel %vm4110_vm6, %v9108_v24, %v9107_v6 }
0x2373   :  { %v15313_v4 = vmul.f32 %v12060_v55, %v9077_v15  ;;  %v9121_v55 = vrot.slane %v15289_v38, 6  ;;  %v16191_v15 = vld [vmem:[#allocation57_spill] sm:$0xff] }
0x2374   :  { %v9292_v6 = vrot.slane %v16191_v15, %v12363_v17 }
0x2375   :  { %v9110_v60 = vrot.slane %v15313_v4, 5  ;;  %v9122_v9 = vsel %vm4110_vm6, %v9121_v55, %v9120_v62 }
0x2376   :  { %v9124_v59 = vsel %vm4112_vm7, %v9123_v48, %v9122_v9  ;;  %v16193_v48 = vld [vmem:[#allocation60_spill] sm:$0xff] }
0x2377   :  { %v9111_v21 = vsel %vm4112_vm7, %v9110_v60, %v9109_v42 }
0x2378   :  { %9112 = vrot.lane.b32.xlu1 %v9111_v21, %s12276_s25  ;;  %v16192_v21 = vld [vmem:[#allocation71_spill] sm:$0xff] }
0x2379   :  { %v9316_v26 = vrot.slane %v16192_v21, %v12363_v17 }
0x23ea   :  { %v9113_v16 = vpop.permute.xlu1 %9112 }
0x23eb   :  { %v9126_v47 = vsel %vm4454_vm10, %v9113_v16, %v9124_v59  ;;  %11593 = vmatmul.mubr.msk.f32.vlgmr.msra.gmra.mxu0 %vm4454_vm10, %v9113_v16  ;;  %v16194_v59 = vld [vmem:[#allocation84_spill] sm:$0xff] }
0x23ec   :  { %11582 = vmatmul.mubr.msk.f32.vlgmr.msra.gmra.mxu1 %vm3764_vm11, %v9126_v47  ;;  %11596 = vmatpush3.msra.mxu0 %v15063_v63  ;;  %v16187_v63 = vld [vmem:[#allocation82_spill] sm:$0xff]  ;;  %v9340_v16 = vrot.slane %v16194_v59, %v12363_v17 }
0x23ed   :  { %11597 = vmatprep.subr.mxu0 %v15969_v56  ;;  %11615 = vmatpush3.msra.mxu1 %v15070_v32  ;;  %v2720_v32 = vcombine.high %v16187_v63, %v16187_v63 }
0x23ee   :  { %11598 = vmatpush3.msra.mxu0 %v15076_v22  ;;  %11616 = vmatprep.subr.mxu1 %v15969_v56 }
0x23ef   :  { %11599 = vmatprep.subr.mxu0 %v15969_v56  ;;  %11617 = vmatpush3.msra.mxu1 %v15084_v18 }
0x23f0   :  { %11600 = vmatpush3.msra.mxu0 %v15090_v41  ;;  %11618 = vmatprep.subr.mxu1 %v15969_v56 }
0x23f1   :  { %11601 = vmatprep.subr.mxu0 %v15969_v56  ;;  %11619 = vmatpush3.msra.mxu1 %v15098_v58 }
0x23f2   :  { %11602 = vmatpush3.msra.mxu0 %v15104_v39  ;;  %11620 = vmatprep.subr.mxu1 %v15969_v56  ;;  %v2734_v39 = vrot.slane %v2720_v32, %v12363_v17 }
0x23f3   :  { %11603 = vmatprep.subr.mxu0 %v15969_v56  ;;  %11621 = vmatpush3.msra.mxu1 %v15112_v28  ;;  %v16188_v28 = vld [vmem:[#allocation80_spill] sm:$0xff] }
0x23f4   :  { %11604 = vmatpush3.msra.mxu0 %v15118_v53  ;;  %11622 = vmatprep.mubr.msk.f32.mxu1 %vm12272_vm1, %v15969_v56  ;;  %v2744_v53 = vrot.slane %v16188_v28, %v12363_v17  ;;  %v2736_v25 = vcombine.high %v2734_v39, %v2734_v39 }
0x23f5   :  { %11605 = vmatprep.subr.mxu0 %v15969_v56  ;;  %11611 = vmatprep.mubr.msk.f32.mxu0 %vm12272_vm1, %v15969_v56 }
0x23f6   :  { %11606 = vmatpush3.msra.mxu0 %v15129_v43  ;;  %v2752_v7 = vcombine.high %v2744_v53, %v2744_v53  ;;  %v9317_v24 = vcombine.low %v2734_v39, %v2736_v25 }
0x23f7   :  { %11607 = vmatprep.subr.mxu0 %v15969_v56 }
0x23f8   :  { %11608 = vmatpush3.msra.mxu0 %v15137_v19  ;;  %v9318_v60 = vcombine.low %v2744_v53, %v2752_v7  ;;  %v9325_v63 = vrot.slane %v9317_v24, %v12363_v17 }
0x23f9   :  { %11609 = vmatprep.subr.mxu0 %v15969_v56 }
0x23fa   :  { %11610 = vmatpush3.msra.mxu0 %v15144_v23  ;;  %v9332_v32 = vrot.slane %v9318_v60, %v12363_v17 }
0x23fc   :  { %v9333_v39 = vcombine.low %v9325_v63, %v9332_v32 }
0x24ab   :  { %v15358_v22 = vpop.f32.mrf.mxu0 }
0x24ac   :  { %v9196_v18 = vpop.f32.mrf.mxu1 }
0x24ad   :  { %v9197_v41 = vadd.f32 %v15153_v61, %v9196_v18  ;;  %v11594_v58 = vpop.f32.mrf.mxu0  ;;  %v16189_v61 = vld [vmem:[#allocation45_spill] sm:$0xff] }
0x24ae   :  { %v11583_v43 = vpop.f32.mrf.mxu1  ;;  %v9268_v5 = vrot.slane %v16189_v61, %v12363_v17 }
0x24af   :  { %v9207_v19 = vrot.slane %v9197_v41, %v13182_v45  ;;  %v16195_v41 = vld [vmem:[#allocation73_spill] sm:$0xff] }
0x24b1   :  { %v9208_v56 = vcombine.high %v9207_v19, %v9207_v19  ;;  %v9215_v23 = vrot.slane %v9207_v19, %v13182_v45 }
0x24b3   :  { %v9222_v1 = vrot.slane %v9208_v56, %v13182_v45  ;;  %v9223_v30 = vcombine.high %v9215_v23, %v9215_v23  ;;  %v9228_v12 = vrot.slane %v9215_v23, %v13185_v31 }
0x24b5   :  { %v9224_v52 = vcombine.high %v9222_v1, %v9222_v1  ;;  %v9232_v27 = vrot.slane %v9222_v1, %v13185_v31  ;;  %v9236_v10 = vrot.slane %v9223_v30, %v13185_v31  ;;  %v9349_v33 = vadd.f32 %v16190_v35, %v9228_v12 }
0x24b6   :  { %v9350_v42 = vadd.f32 %v9268_v5, %v9228_v12 }
0x24b7   :  { %v9240_v62 = vrot.slane %v9224_v52, %v13185_v31  ;;  %v9351_v55 = vadd.f32 %v16193_v48, %v9232_v27  ;;  %v9352_v9 = vadd.f32 %v9292_v6, %v9232_v27  ;;  %12069 = vtanh.f32 %v9349_v33 }
0x24b8   :  { %v9354_v47 = vadd.f32 %v9316_v26, %v9236_v10  ;;  %12071 = vtanh.f32 %v9350_v42  ;;  %v9353_v58 = vadd.f32 %v16195_v41, %v9236_v10 }
0x24b9   :  { %12073 = vtanh.f32 %v9351_v55  ;;  %v9356_v18 = vadd.f32 %v9340_v16, %v9240_v62  ;;  %v9355_v28 = vadd.f32 %v9333_v39, %v9240_v62 }
0x24ba   :  { %12075 = vtanh.f32 %v9352_v9 }
0x24bb   :  { %12077 = vtanh.f32 %v9354_v47 }
0x24bc   :  { %12079 = vtanh.f32 %v9356_v18 }
0x24bd   :  { %12081 = vtanh.f32 %v9353_v58 }
0x24be   :  { %12083 = vtanh.f32 %v9355_v28 }
0x24c4   :  { %v12070_v53 = vpop.eup %12069 }
0x24c5   :  { %v12072_v43 = vpop.eup %12071  ;;  %v9365_v19 = vmul.f32 %v15182_v0, %v12070_v53 }
0x24c6   :  { %v12074_v56 = vpop.eup %12073  ;;  %v9366_v23 = vmul.f32 %v15182_v0, %v12072_v43 }
0x24c7   :  { %v9373_v25 = vsel %vm4017_vm2, %v9365_v19, 0.0  ;;  %v9367_v7 = vmul.f32 %v15182_v0, %v12074_v56  ;;  %v12076_v1 = vpop.eup %12075 }
0x24c8   :  { %v9376_v30 = vsel %vm4021_vm3, %v9366_v23, 0.0  ;;  %9374 = vadd.xlane.f32.xlu0 %v9373_v25  ;;  %v12078_v12 = vpop.eup %12077  ;;  %v9368_v27 = vmul.f32 %v15182_v0, %v12076_v1 }
0x24c9   :  { %9377 = vadd.xlane.f32.xlu1 %v9376_v30  ;;  %v9370_v61 = vmul.f32 %v15182_v0, %v12078_v12  ;;  %v12080_v5 = vpop.eup %12079  ;;  %v9379_v52 = vsel %vm4017_vm2, %v9367_v7, 0.0 }
0x24ca   :  { %v12082_v10 = vpop.eup %12081  ;;  %v9372_v33 = vmul.f32 %v15182_v0, %v12080_v5  ;;  %v9382_v15 = vsel %vm4021_vm3, %v9368_v27, 0.0 }
0x24cb   :  { %v9388_v35 = vsel %vm4021_vm3, %v9370_v61, 0.0  ;;  %v9369_v6 = vmul.f32 %v15182_v0, %v12082_v10  ;;  %v12084_v24 = vpop.eup %12083 }
0x24cc   :  { %9380 = vadd.xlane.f32.xlu0 %v9379_v52  ;;  %v9394_v60 = vsel %vm4021_vm3, %v9372_v33, 0.0  ;;  %v9371_v21 = vmul.f32 %v15182_v0, %v12084_v24 }
0x24cd   :  { %9389 = vadd.xlane.f32.xlu1 %v9388_v35  ;;  %v9385_v42 = vsel %vm4017_vm2, %v9369_v6, 0.0 }
0x24ce   :  { %v9391_v26 = vsel %vm4017_vm2, %v9371_v21, 0.0 }
0x24d0   :  { %9383 = vadd.xlane.f32.xlu0 %v9382_v15 }
0x24d1   :  { %9395 = vadd.xlane.f32.xlu1 %v9394_v60 }
0x24d4   :  { %9386 = vadd.xlane.f32.xlu0 %v9385_v42 }
0x24d8   :  { %9392 = vadd.xlane.f32.xlu0 %v9391_v26 }
0x2551   :  { %v9375_v62 = vpop.xlane.xlu0 %9374 }
0x2552   :  { %v9378_v48 = vpop.xlane.xlu1 %9377  ;;  %v9397_v47 = vadd.f32 %v9375_v62, %v13453_v29 }
0x2553   :  { %v9398_v63 = vadd.f32 %v9378_v48, %v13453_v29 }
0x2554   :  { %v9416_v28 = vrot.slane %v9397_v47, %v13448_v20 }
0x2555   :  { %v9381_v55 = vpop.xlane.xlu0 %9380  ;;  %v9420_v53 = vrot.slane %v9398_v63, %v13451_v51 }
0x2556   :  { %v9390_v9 = vpop.xlane.xlu1 %9389  ;;  %v9399_v32 = vadd.f32 %v9381_v55, %v13453_v29 }
0x2557   :  { %v9402_v18 = vadd.f32 %v9390_v9, %v13453_v29  ;;  %v9421_v12 = vsel %vm4079_vm4, %v9420_v53, %v9416_v28 }
0x2558   :  { %v9425_v43 = vrot.slane %v9399_v32, %v13448_v20 }
0x2559   :  { %v9384_v59 = vpop.xlane.xlu0 %9383  ;;  %v9438_v23 = vrot.slane %v9402_v18, %v13451_v51 }
0x255a   :  { %v9400_v16 = vadd.f32 %v9384_v59, %v13453_v29  ;;  %v9396_v0 = vpop.xlane.xlu1 %9395 }
0x255b   :  { %v9404_v19 = vadd.f32 %v9396_v0, %v13453_v29 }
0x255c   :  { %v9429_v58 = vrot.slane %v9400_v16, %v13451_v51 }
0x255d   :  { %v9387_v41 = vpop.xlane.xlu0 %9386  ;;  %v9447_v61 = vrot.slane %v9404_v19, %v13451_v51 }
0x255e   :  { %v9401_v39 = vadd.f32 %v9387_v41, %v13453_v29  ;;  %v9430_v7 = vsel %vm4079_vm4, %v9429_v58, %v9425_v43 }
0x255f   :  { %v9449_v52 = vsel %vm4108_vm5, %v9430_v7, %v9421_v12 }
0x2560   :  { %v9434_v56 = vrot.slane %v9401_v39, %v13448_v20 }
0x2561   :  { %v9393_v25 = vpop.xlane.xlu0 %9392 }
0x2562   :  { %v9403_v1 = vadd.f32 %v9393_v25, %v13453_v29  ;;  %v9439_v30 = vsel %vm4079_vm4, %v9438_v23, %v9434_v56 }
0x2563   :  { %v9450_v10 = vsel %vm4110_vm6, %v9439_v30, %v9449_v52 }
0x2564   :  { %v9443_v5 = vrot.slane %v9403_v1, %v13448_v20 }
0x2566   :  { %v9448_v27 = vsel %vm4079_vm4, %v9447_v61, %v9443_v5 }
0x2567   :  { %v9451_v35 = vsel %vm4112_vm7, %v9448_v27, %v9450_v10 }
0x2568   :  { %v9453_v33 = vsel %vm4115_vm8, %v9451_v35, -inf }
0x2569   :  { %9454 = vmax.xlane.f32.xlu0 %v9453_v33 }
0x25f2   :  { %v9455_v15 = vpop.xlane.xlu0 %9454 }
0x25f3   :  { %v9460_v6 = vrot.slane %v9455_v15, %v13185_v31  ;;  %v9464_v24 = vrot.slane %v9455_v15, %v13483_v49  ;;  %v9468_v60 = vrot.slane %v9455_v15, %v13489_v40  ;;  %v9472_v62 = vrot.slane %v9455_v15, %v13480_v37 }
0x25f5   :  { %v9477_v42 = vsub.f32 %v9397_v47, %v9460_v6  ;;  %v9478_v21 = vsub.f32 %v9398_v63, %v9460_v6  ;;  %v9479_v26 = vsub.f32 %v9399_v32, %v9464_v24  ;;  %v9482_v48 = vsub.f32 %v9402_v18, %v9468_v60 }
0x25f6   :  { %v9480_v59 = vsub.f32 %v9400_v16, %v9464_v24  ;;  %v9484_v41 = vsub.f32 %v9404_v19, %v9472_v62  ;;  %v9481_v28 = vsub.f32 %v9401_v39, %v9468_v60  ;;  %v9483_v56 = vsub.f32 %v9403_v1, %v9472_v62 }
0x25f7   :  { %v9485_v55 = vmul.f32 1.442695, %v9477_v42  ;;  %v9487_v9 = vmul.f32 1.442695, %v9478_v21  ;;  %v9489_v0 = vmul.f32 1.442695, %v9479_v26 }
0x25f8   :  { %v9495_v58 = vmul.f32 1.442695, %v9482_v48  ;;  %v9491_v53 = vmul.f32 1.442695, %v9480_v59  ;;  %v9499_v43 = vmul.f32 1.442695, %v9484_v41 }
0x25f9   :  { %12085 = vpow2.f32 %v9485_v55  ;;  %v9493_v47 = vmul.f32 1.442695, %v9481_v28  ;;  %v9497_v63 = vmul.f32 1.442695, %v9483_v56 }
0x25fa   :  { %12087 = vpow2.f32 %v9487_v9 }
0x25fb   :  { %12089 = vpow2.f32 %v9489_v0 }
0x25fc   :  { %12091 = vpow2.f32 %v9495_v58 }
0x25fd   :  { %12093 = vpow2.f32 %v9491_v53 }
0x25fe   :  { %12095 = vpow2.f32 %v9499_v43 }
0x25ff   :  { %12097 = vpow2.f32 %v9493_v47 }
0x2600   :  { %12099 = vpow2.f32 %v9497_v63 }
0x2606   :  { %v12086_v32 = vpop.eup %12085 }
0x2607   :  { %v12088_v18 = vpop.eup %12087  ;;  %9510 = vperm.xlu1 %11640, %v12086_v32  }
0x2608   :  { %9513 = vperm.xlu0 %11639, %v12088_v18   ;;  %v12090_v16 = vpop.eup %12089 }
0x2609   :  { %v12092_v19 = vpop.eup %12091 }
0x260a   :  { %v12094_v39 = vpop.eup %12093 }
0x260b   :  { %9516 = vperm.xlu1 %11640, %v12090_v16   ;;  %v12096_v23 = vpop.eup %12095 }
0x260c   :  { %9525 = vperm.xlu0 %11639, %v12092_v19   ;;  %v12098_v25 = vpop.eup %12097 }
0x260d   :  { %v12100_v7 = vpop.eup %12099 }
0x260f   :  { %9519 = vperm.xlu1 %11640, %v12094_v39  }
0x2610   :  { %9531 = vperm.xlu0 %11639, %v12096_v23  }
0x2613   :  { %9522 = vperm.xlu1 %11640, %v12098_v25  }
0x2617   :  { %9528 = vperm.xlu1 %11640, %v12100_v7  }
0x2682   :  { %v9511_v1 = vpop.permute.xlu1 %9510 }
0x2683   :  { %v9514_v30 = vpop.permute.xlu0 %9513  ;;  %v9536_v35 = vrot.slane %v9511_v1, %v13448_v20 }
0x2684   :  { %v9540_v10 = vrot.slane %v9514_v30, %v13451_v51 }
0x2686   :  { %v9517_v12 = vpop.permute.xlu1 %9516  ;;  %v9541_v26 = vsel %vm4079_vm4, %v9540_v10, %v9536_v35 }
0x2687   :  { %v9526_v61 = vpop.permute.xlu0 %9525  ;;  %v9545_v33 = vrot.slane %v9517_v12, %v13448_v20 }
0x2688   :  { %v9558_v6 = vrot.slane %v9526_v61, %v13451_v51 }
0x268a   :  { %v9520_v5 = vpop.permute.xlu1 %9519 }
0x268b   :  { %v9549_v52 = vrot.slane %v9520_v5, %v13451_v51  ;;  %v9532_v24 = vpop.permute.xlu0 %9531 }
0x268c   :  { %v9567_v62 = vrot.slane %v9532_v24, %v13451_v51 }
0x268d   :  { %v9550_v60 = vsel %vm4079_vm4, %v9549_v52, %v9545_v33  ;;  %v16197_v33 = vld [vmem:[#allocation36_spill] sm:$0xff] }
0x268e   :  { %v9523_v27 = vpop.permute.xlu1 %9522  ;;  %v9569_v55 = vsel %vm4108_vm5, %v9550_v60, %v9541_v26 }
0x268f   :  { %v9554_v15 = vrot.slane %v9523_v27, %v13448_v20 }
0x2691   :  { %v9559_v42 = vsel %vm4079_vm4, %v9558_v6, %v9554_v15 }
0x2692   :  { %v9529_v21 = vpop.permute.xlu1 %9528  ;;  %v9570_v59 = vsel %vm4110_vm6, %v9559_v42, %v9569_v55  ;;  %v16199_v55 = vld [vmem:[#allocation11_spill] sm:$0xff] }
0x2693   :  { %v9563_v48 = vrot.slane %v9529_v21, %v13448_v20 }
0x2695   :  { %v9568_v9 = vsel %vm4079_vm4, %v9567_v62, %v9563_v48 }
0x2696   :  { %v9571_v0 = vsel %vm4112_vm7, %v9568_v9, %v9570_v59  ;;  %v3214_v9 = vcombine.high %v16199_v55, %v16199_v55 }
0x2697   :  { %v9573_v41 = vsel %vm4115_vm8, %v9571_v0, 0.0 }
0x2698   :  { %9574 = vadd.xlane.f32.xlu1 %v9573_v41 }
0x2721   :  { %v9575_v58 = vpop.xlane.xlu1 %9574 }
0x2722   :  { %12101 = vrcp.f32 %v9575_v58 }
0x272f   :  { %v12102_v28 = vpop.eup %12101 }
0x2730   :  { %v9585_v53 = vrot.slane %v12102_v28, %v13483_v49  ;;  %v9589_v47 = vrot.slane %v12102_v28, %v13489_v40  ;;  %v9581_v1 = vrot.slane %v12102_v28, %v13185_v31  ;;  %v9593_v61 = vrot.slane %v12102_v28, %v13480_v37  ;;  %v16200_v28 = vld [vmem:[#allocation97_spill] sm:$0xff] }
0x2732   :  { %v9601_v43 = vmul.f32 %v12094_v39, %v9585_v53  ;;  %v9600_v56 = vmul.f32 %v12090_v16, %v9585_v53  ;;  %v9603_v63 = vmul.f32 %v12092_v19, %v9589_v47  ;;  %v9599_v30 = vmul.f32 %v12088_v18, %v9581_v1  ;;  %v16196_v16 = vld [vmem:[#allocation15_spill] sm:$0xff] }
0x2733   :  { %v9602_v12 = vmul.f32 %v12098_v25, %v9589_v47  ;;  %v9605_v5 = vmul.f32 %v12096_v23, %v9593_v61  ;;  %v9598_v52 = vmul.f32 %v12086_v32, %v9581_v1  ;;  %v9604_v39 = vmul.f32 %v12100_v7, %v9593_v61  ;;  %v16198_v23 = vld [vmem:[#allocation20_spill] sm:$0xff] }
0x2734   :  { %9623 = vperm.xlu0 %11639, %v9601_v43   ;;  %v3384_v27 = vcombine.high %v16196_v16, %v16196_v16  ;;  %v3554_v32 = vcombine.high %v16198_v23, %v16198_v23  ;;  %v15468_v43 = vrot.slane %v3214_v9, %v12363_v17  ;;  %v9863_v1 = vrot.slane %v15358_v22, 1  ;;  %v16202_v23 = vld [vmem:[#allocation32_spill] sm:$0xff] }
0x2736   :  { %v15451_v19 = vrot.slane %v3384_v27, %v12363_v17  ;;  %v15460_v42 = vrot.slane %v3554_v32, %v12363_v17  ;;  %v9669_v61 = vrot.slane %v15468_v43, %v12363_v17 }
0x2738   :  { %9618 = vperm.xlu0 %11639, %v9600_v56   ;;  %v9693_v18 = vrot.slane %v15451_v19, %v12363_v17  ;;  %v9717_v26 = vrot.slane %v15460_v42, %v12363_v17  ;;  %v16201_v56 = vld [vmem:[#allocation28_spill] sm:$0xff] }
0x2739   :  { %v3724_v47 = vcombine.high %v16201_v56, %v16201_v56 }
0x273b   :  { %v15477_v16 = vrot.slane %v3724_v47, %v12363_v17 }
0x273c   :  { %9633 = vperm.xlu0 %11639, %v9603_v63  }
0x2740   :  { %9613 = vperm.xlu0 %11639, %v9599_v30  }
0x2744   :  { %9628 = vperm.xlu0 %11639, %v9602_v12  }
0x2748   :  { %9643 = vperm.xlu0 %11639, %v9605_v5  }
0x274c   :  { %9608 = vperm.xlu0 %11639, %v9598_v52  }
0x2750   :  { %9638 = vperm.xlu0 %11639, %v9604_v39  }
0x27af   :  { %v9624_v10 = vpop.permute.xlu0 %9623 }
0x27b0   :  { %v9753_v25 = vmul.f32 %v9693_v18, %v9624_v10  ;;  %v15482_v18 = vld [vmem:[%s15830_s9] ss:$0 sm:$0xff] }
0x27b2   :  { %v9766_v7 = vsel %vm4421_vm9, %v9753_v25, 0.0 }
0x27b3   :  { %v9619_v35 = vpop.permute.xlu0 %9618 }
0x27b4   :  { %v9752_v15 = vmul.f32 %v16197_v33, %v9619_v35  ;;  %v9741_v35 = vrot.slane %v15477_v16, %v12363_v17 }
0x27b6   :  { %v9767_v6 = vadd.f32 %v9766_v7, %v9752_v15 }
0x27b7   :  { %v9634_v24 = vpop.permute.xlu0 %9633 }
0x27b8   :  { %v9768_v60 = vrot.slane %v9767_v6, 4  ;;  %v9755_v59 = vmul.f32 %v9717_v26, %v9634_v24 }
0x27ba   :  { %v9769_v21 = vadd.f32 %v9768_v60, %v9767_v6  ;;  %v9774_v63 = vsel %vm4421_vm9, %v9755_v59, 0.0  ;;  %v9864_v59 = vrot.slane %v15358_v22, 2 }
0x27bb   :  { %v9614_v62 = vpop.permute.xlu0 %9613 }
0x27bc   :  { %v9770_v48 = vrot.slane %v9769_v21, 2  ;;  %v9751_v27 = vmul.f32 %v9669_v61, %v9614_v62 }
0x27be   :  { %v9771_v0 = vadd.f32 %v9770_v48, %v9769_v21  ;;  %v9758_v7 = vsel %vm4421_vm9, %v9751_v27, 0.0  ;;  %v16203_v48 = vld [vmem:[#allocation102_spill] sm:$0xff] }
0x27bf   :  { %v9629_v41 = vpop.permute.xlu0 %9628 }
0x27c0   :  { %v9772_v58 = vrot.slane %v9771_v0, 1  ;;  %v9754_v53 = vmul.f32 %v16200_v28, %v9629_v41 }
0x27c2   :  { %v9773_v30 = vadd.f32 %v9772_v58, %v9771_v0  ;;  %v9775_v12 = vadd.f32 %v9774_v63, %v9754_v53 }
0x27c3   :  { %v9644_v5 = vpop.permute.xlu0 %9643 }
0x27c4   :  { %v9871_v52 = vadd.f32 %v9863_v1, %v9773_v30  ;;  %v9776_v39 = vrot.slane %v9775_v12, 4  ;;  %v9757_v6 = vmul.f32 %v9741_v35, %v9644_v5 }
0x27c6   :  { %v9875_v10 = vadd.f32 %v15482_v18, %v9871_v52  ;;  %v9777_v25 = vadd.f32 %v9776_v39, %v9775_v12  ;;  %v9782_v9 = vsel %vm4421_vm9, %v9757_v6, 0.0 }
0x27c7   :  { %v9609_v33 = vpop.permute.xlu0 %9608 }
0x27c8   :  { %12103 = vtanh.f32 %v9875_v10  ;;  %v9778_v15 = vrot.slane %v9777_v25, 2  ;;  %v9750_v32 = vmul.f32 %v16202_v23, %v9609_v33 }
0x27ca   :  { %v9779_v24 = vadd.f32 %v9778_v15, %v9777_v25  ;;  %v9759_v60 = vadd.f32 %v9758_v7, %v9750_v32  ;;  %v9865_v25 = vrot.slane %v15358_v22, 3 }
0x27cb   :  { %v9639_v21 = vpop.permute.xlu0 %9638 }
0x27cc   :  { %v9780_v26 = vrot.slane %v9779_v24, 1  ;;  %v9760_v62 = vrot.slane %v9759_v60, 4  ;;  %v9756_v55 = vmul.f32 %v16203_v48, %v9639_v21 }
0x27ce   :  { %v9781_v0 = vadd.f32 %v9780_v26, %v9779_v24  ;;  %v9761_v41 = vadd.f32 %v9760_v62, %v9759_v60  ;;  %v9783_v58 = vadd.f32 %v9782_v9, %v9756_v55  ;;  %v11052_v24 = vmul.f32 -1.442695, %v9875_v10 }
0x27d0   :  { %v9872_v28 = vadd.f32 %v9864_v59, %v9781_v0  ;;  %v9762_v53 = vrot.slane %v9761_v41, 2  ;;  %v9784_v56 = vrot.slane %v9783_v58, 4 }
0x27d2   :  { %v9876_v47 = vadd.f32 %v15482_v18, %v9872_v28  ;;  %v9763_v63 = vadd.f32 %v9762_v53, %v9761_v41  ;;  %v9785_v1 = vadd.f32 %v9784_v56, %v9783_v58 }
0x27d4   :  { %12105 = vtanh.f32 %v9876_v47  ;;  %v9764_v30 = vrot.slane %v9763_v63, 1  ;;  %v9786_v12 = vrot.slane %v9785_v1, 2 }
0x27d5   :  { %v12104_v61 = vpop.eup %12103 }
0x27d6   :  { %v9765_v5 = vadd.f32 %v9764_v30, %v9763_v63  ;;  %v9787_v52 = vadd.f32 %v9786_v12, %v9785_v1  ;;  %9916 = vrot.lane.b32.xlu0 %v12104_v61, %s12275_s24 }
0x27d8   :  { %v9870_v39 = vadd.f32 %v15358_v22, %v9765_v5  ;;  %v9788_v27 = vrot.slane %v9787_v52, 1  ;;  %v11053_v22 = vmul.f32 -1.442695, %v9876_v47 }
0x27da   :  { %v9874_v35 = vadd.f32 %v15482_v18, %v9870_v39  ;;  %v9789_v33 = vadd.f32 %v9788_v27, %v9787_v52 }
0x27dc   :  { %12107 = vtanh.f32 %v9874_v35  ;;  %v9873_v15 = vadd.f32 %v9865_v25, %v9789_v33  ;;  %v11051_v26 = vmul.f32 -1.442695, %v9874_v35 }
0x27de   :  { %v9877_v23 = vadd.f32 %v15482_v18, %v9873_v15 }
0x27e0   :  { %12109 = vtanh.f32 %v9877_v23  ;;  %v11054_v62 = vmul.f32 -1.442695, %v9877_v23 }
0x27e1   :  { %v12106_v32 = vpop.eup %12105  ;;  %12111 = vpow2.f32 %v11052_v24 }
0x27e2   :  { %9918 = vrot.lane.b32.xlu1 %v12106_v32, %s12275_s24  ;;  %12113 = vpow2.f32 %v11053_v22 }
0x27e9   :  { %v12108_v7 = vpop.eup %12107 }
0x27ea   :  { %9914 = vrot.lane.b32.xlu0 %v12108_v7, %s12275_s24 }
0x27ed   :  { %v12110_v6 = vpop.eup %12109 }
0x27ee   :  { %9920 = vrot.lane.b32.xlu0 %v12110_v6, %s12275_s24  ;;  %v12112_v60 = vpop.eup %12111 }
0x27ef   :  { %v9891_v21 = vadd.f32 1.0, %v12112_v60  ;;  %v12114_v48 = vpop.eup %12113 }
0x27f0   :  { %v9892_v55 = vadd.f32 1.0, %v12114_v48 }
0x27f1   :  { %12115 = vrcp.f32 %v9891_v21 }
0x27f2   :  { %12117 = vpow2.f32 %v11051_v26 }
0x27f3   :  { %12119 = vpow2.f32 %v11054_v62 }
0x27f4   :  { %12121 = vrcp.f32 %v9892_v55 }
0x27fe   :  { %v12116_v9 = vpop.eup %12115 }
0x27ff   :  { %v12118_v59 = vpop.eup %12117  ;;  %v9907_v52 = vmul.f32 %v12116_v9, %v15285_v14 }
0x2800   :  { %v9890_v58 = vadd.f32 1.0, %v12118_v59  ;;  %v12120_v10 = vpop.eup %12119 }
0x2801   :  { %v9893_v28 = vadd.f32 1.0, %v12120_v10  ;;  %v12122_v53 = vpop.eup %12121 }
0x2802   :  { %12123 = vrcp.f32 %v9890_v58  ;;  %v9908_v25 = vmul.f32 %v12122_v53, %v15289_v38 }
0x2803   :  { %12125 = vrcp.f32 %v9893_v28 }
0x280f   :  { %v12124_v63 = vpop.eup %12123 }
0x2810   :  { %v12126_v12 = vpop.eup %12125  ;;  %v9906_v23 = vmul.f32 %v12124_v63, %v15294_v50 }
0x2811   :  { %v9909_v14 = vmul.f32 %v12126_v12, %v15298_v57 }
0x2848   :  { %v9917_v0 = vpop.permute.xlu0 %9916 }
0x2849   :  { %v9927_v41 = vmul.f32 %v12116_v9, %v9917_v0 }
0x284b   :  { %9936 = vrot.lane.b32.xlu0 %v9927_v41, %s12276_s25 }
0x2854   :  { %v9919_v56 = vpop.permute.xlu1 %9918 }
0x2855   :  { %v9928_v47 = vmul.f32 %v12122_v53, %v9919_v56 }
0x2857   :  { %9938 = vrot.lane.b32.xlu0 %v9928_v47, %s12276_s25 }
0x285c   :  { %v9915_v1 = vpop.permute.xlu0 %9914 }
0x285d   :  { %v9926_v30 = vmul.f32 %v12124_v63, %v9915_v1 }
0x285f   :  { %9934 = vrot.lane.b32.xlu0 %v9926_v30, %s12276_s25 }
0x2860   :  { %v9921_v61 = vpop.permute.xlu0 %9920 }
0x2861   :  { %v9929_v5 = vmul.f32 %v12126_v12, %v9921_v61 }
0x2863   :  { %9940 = vrot.lane.b32.xlu1 %v9929_v5, %s12276_s25 }
0x28bd   :  { %v9937_v39 = vpop.permute.xlu0 %9936 }
0x28be   :  { %v15506_v27 = vadd.f32 %v9937_v39, %v9907_v52  ;;  %v12246_v39 = vld [vmem:[%s15823_s2] ss:$0 sm:$0xff] }
0x28c0   :  { %12127 = vtanh.f32 %v15506_v27 }
0x28c9   :  { %v9939_v35 = vpop.permute.xlu0 %9938 }
0x28ca   :  { %v15510_v33 = vadd.f32 %v9939_v35, %v9908_v25 }
0x28cc   :  { %12129 = vtanh.f32 %v15510_v33 }
0x28cd   :  { %v12128_v15 = vpop.eup %12127 }
0x28ce   :  { %9960 = vrot.lane.b32.xlu0 %v12128_v15, %s12275_s24 }
0x28d1   :  { %v9935_v32 = vpop.permute.xlu0 %9934 }
0x28d2   :  { %v15515_v7 = vadd.f32 %v9935_v32, %v9906_v23  ;;  %v16204_v32 = vld [vmem:[#allocation68_spill] sm:$0xff] }
0x28d4   :  { %12131 = vtanh.f32 %v15515_v7 }
0x28d5   :  { %v9941_v6 = vpop.permute.xlu1 %9940 }
0x28d6   :  { %v15519_v24 = vadd.f32 %v9941_v6, %v9909_v14  ;;  %v2260_v14 = vcombine.high %v16204_v32, %v16204_v32  ;;  %v16205_v6 = vld [vmem:[#allocation74_spill] sm:$0xff]  ;;  %v16211_v32 = vld [vmem:[#allocation91_spill] sm:$0xff] }
0x28d8   :  { %12133 = vtanh.f32 %v15519_v24  ;;  %v10011_v47 = vrot.slane %v15519_v24, 5 }
0x28d9   :  { %v12130_v38 = vpop.eup %12129 }
0x28da   :  { %9962 = vrot.lane.b32.xlu1 %v12130_v38, %s12275_s24  ;;  %v2430_v38 = vcombine.high %v16205_v6, %v16205_v6 }
0x28e1   :  { %v12132_v22 = vpop.eup %12131 }
0x28e2   :  { %9958 = vrot.lane.b32.xlu0 %v12132_v22, %s12275_s24 }
0x28e5   :  { %v12134_v60 = vpop.eup %12133 }
0x28e6   :  { %9964 = vrot.lane.b32.xlu1 %v12134_v60, %s12275_s24 }
0x2940   :  { %v9961_v50 = vpop.permute.xlu0 %9960 }
0x2941   :  { %v15525_v21 = vmul.f32 %v12116_v9, %v9961_v50  ;;  %v16206_v50 = vld [vmem:[#allocation77_spill] sm:$0xff] }
0x2943   :  { %v9994_v55 = vrot.slane %v15525_v21, 7 }
0x294c   :  { %v9963_v26 = vpop.permute.xlu1 %9962 }
0x294d   :  { %v15529_v48 = vmul.f32 %v12122_v53, %v9963_v26  ;;  %v10007_v53 = vrot.slane %v15506_v27, 7  ;;  %v2600_v26 = vcombine.high %v16206_v50, %v16206_v50 }
0x294f   :  { %v9996_v58 = vrot.slane %v15529_v48, 6  ;;  %v10008_v56 = vsel %vm4108_vm5, %v10007_v53, %v15515_v7  ;;  %v16207_v53 = vld [vmem:[#allocation88_spill] sm:$0xff] }
0x2954   :  { %v9959_v62 = vpop.permute.xlu0 %9958 }
0x2955   :  { %v15527_v57 = vmul.f32 %v12124_v63, %v9959_v62  ;;  %v10009_v63 = vrot.slane %v15510_v33, 6 }
0x2957   :  { %v9995_v0 = vsel %vm4108_vm5, %v9994_v55, %v15527_v57  ;;  %v10010_v1 = vsel %vm4110_vm6, %v10009_v63, %v10008_v56 }
0x2958   :  { %v9965_v59 = vpop.permute.xlu1 %9964  ;;  %v9997_v9 = vsel %vm4110_vm6, %v9996_v58, %v9995_v0  ;;  %v10012_v30 = vsel %vm4112_vm7, %v10011_v47, %v10010_v1  ;;  %v10156_v0 = vrot.slane %v2260_v14, %v12363_v17  ;;  %v10180_v58 = vrot.slane %v2430_v38, %v12363_v17  ;;  %v16208_v47 = vld [vmem:[#allocation79_spill] sm:$0xff] }
0x2959   :  { %v15534_v41 = vmul.f32 %v12126_v12, %v9965_v59  ;;  %v2770_v63 = vcombine.high %v16208_v47, %v16208_v47 }
0x295b   :  { %v9998_v10 = vrot.slane %v15534_v41, 5 }
0x295d   :  { %v9999_v28 = vsel %vm4112_vm7, %v9998_v10, %v9997_v9 }
0x295e   :  { %10000 = vrot.lane.b32.xlu0 %v9999_v28, %s12276_s25 }
0x29d0   :  { %v10001_v12 = vpop.permute.xlu0 %10000 }
0x29d1   :  { %v10014_v61 = vsel %vm4454_vm10, %v10001_v12, %v10012_v30  ;;  %11623 = vmatmul.mubr.msk.f32.vlgmr.msra.gmra.mxu1 %vm4454_vm10, %v10001_v12  ;;  %v16209_v30 = vld [vmem:[#allocation89_spill] sm:$0xff] }
0x29d2   :  { %11612 = vmatmul.mubr.msk.f32.vlgmr.msra.gmra.mxu0 %vm3764_vm11, %v10014_v61 }
0x2a91   :  { %v15551_v5 = vpop.f32.mrf.mxu1 }
0x2a92   :  { %v10084_v52 = vpop.f32.mrf.mxu0 }
0x2a93   :  { %v10085_v25 = vadd.f32 %v12246_v39, %v10084_v52  ;;  %v11624_v35 = vpop.f32.mrf.mxu1  ;;  %v16210_v39 = vld [vmem:[#allocation92_spill] sm:$0xff] }
0x2a94   :  { %v11613_v15 = vpop.f32.mrf.mxu0 }
0x2a95   :  { %v10095_v23 = vrot.slane %v10085_v25, %v13182_v45  ;;  %v10228_v15 = vrot.slane %v2770_v63, %v12363_v17 }
0x2a97   :  { %v10096_v22 = vcombine.high %v10095_v23, %v10095_v23  ;;  %v10103_v60 = vrot.slane %v10095_v23, %v13182_v45 }
0x2a99   :  { %v10110_v62 = vrot.slane %v10096_v22, %v13182_v45  ;;  %v10111_v55 = vcombine.high %v10103_v60, %v10103_v60  ;;  %v10116_v59 = vrot.slane %v10103_v60, %v13185_v31  ;;  %v10204_v45 = vrot.slane %v2600_v26, %v12363_v17  ;;  %v12247_v22 = vld [vmem:[%s15826_s5] ss:$0 sm:$0xff]  ;;  %s12277_s5 = smov [#allocation3]  }
0x2a9b   :  { %v10112_v10 = vcombine.high %v10110_v62, %v10110_v62  ;;  %v10120_v9 = vrot.slane %v10110_v62, %v13185_v31  ;;  %v10124_v28 = vrot.slane %v10111_v55, %v13185_v31  ;;  %v10237_v56 = vadd.f32 %v16207_v53, %v10116_v59 }
0x2a9c   :  { %v10238_v1 = vadd.f32 %v10156_v0, %v10116_v59 }
0x2a9d   :  { %v10239_v12 = vadd.f32 %v16209_v30, %v10120_v9  ;;  %v10240_v61 = vadd.f32 %v10180_v58, %v10120_v9  ;;  %v10128_v52 = vrot.slane %v10112_v10, %v13185_v31  ;;  %v10241_v25 = vadd.f32 %v16210_v39, %v10124_v28 }
0x2a9e   :  { %12135 = vtanh.f32 %v10237_v56  ;;  %v10242_v35 = vadd.f32 %v10204_v45, %v10124_v28 }
0x2a9f   :  { %12137 = vtanh.f32 %v10238_v1  ;;  %v10244_v23 = vadd.f32 %v10228_v15, %v10128_v52  ;;  %v10243_v14 = vadd.f32 %v16211_v32, %v10128_v52 }
0x2aa0   :  { %12139 = vtanh.f32 %v10239_v12 }
0x2aa1   :  { %12141 = vtanh.f32 %v10240_v61 }
0x2aa2   :  { %12143 = vtanh.f32 %v10241_v25 }
0x2aa3   :  { %12145 = vtanh.f32 %v10242_v35 }
0x2aa4   :  { %12147 = vtanh.f32 %v10244_v23 }
0x2aa5   :  { %12149 = vtanh.f32 %v10243_v14 }
0x2aab   :  { %v12136_v6 = vpop.eup %12135 }
0x2aac   :  { %v12138_v38 = vpop.eup %12137  ;;  %v10253_v60 = vmul.f32 %v12247_v22, %v12136_v6 }
0x2aad   :  { %v12140_v50 = vpop.eup %12139  ;;  %v10254_v26 = vmul.f32 %v12247_v22, %v12138_v38 }
0x2aae   :  { %v12142_v62 = vpop.eup %12141  ;;  %v10261_v55 = vsel %vm4017_vm2, %v10253_v60, 0.0  ;;  %v10255_v10 = vmul.f32 %v12247_v22, %v12140_v50 }
0x2aaf   :  { %v12144_v59 = vpop.eup %12143  ;;  %v10264_v0 = vsel %vm4021_vm3, %v10254_v26, 0.0  ;;  %10262 = vadd.xlane.f32.xlu1 %v10261_v55  ;;  %v10256_v58 = vmul.f32 %v12247_v22, %v12142_v62 }
0x2ab0   :  { %v12146_v9 = vpop.eup %12145  ;;  %10265 = vadd.xlane.f32.xlu0 %v10264_v0  ;;  %v10267_v47 = vsel %vm4017_vm2, %v10255_v10, 0.0  ;;  %v10257_v63 = vmul.f32 %v12247_v22, %v12144_v59 }
0x2ab1   :  { %v10270_v28 = vsel %vm4021_vm3, %v10256_v58, 0.0  ;;  %v10258_v53 = vmul.f32 %v12247_v22, %v12146_v9  ;;  %v12148_v56 = vpop.eup %12147 }
0x2ab2   :  { %v12150_v1 = vpop.eup %12149  ;;  %v10260_v30 = vmul.f32 %v12247_v22, %v12148_v56  ;;  %v10273_v12 = vsel %vm4017_vm2, %v10257_v63, 0.0 }
0x2ab3   :  { %10271 = vadd.xlane.f32.xlu1 %v10270_v28  ;;  %v10276_v45 = vsel %vm4021_vm3, %v10258_v53, 0.0  ;;  %v10259_v61 = vmul.f32 %v12247_v22, %v12150_v1 }
0x2ab4   :  { %10268 = vadd.xlane.f32.xlu0 %v10267_v47  ;;  %v10282_v52 = vsel %vm4021_vm3, %v10260_v30, 0.0 }
0x2ab5   :  { %v10279_v39 = vsel %vm4017_vm2, %v10259_v61, 0.0 }
0x2ab7   :  { %10277 = vadd.xlane.f32.xlu1 %v10276_v45 }
0x2ab8   :  { %10274 = vadd.xlane.f32.xlu0 %v10273_v12 }
0x2abb   :  { %10283 = vadd.xlane.f32.xlu1 %v10282_v52 }
0x2abc   :  { %10280 = vadd.xlane.f32.xlu0 %v10279_v39 }
0x2b38   :  { %v10263_v25 = vpop.xlane.xlu1 %10262 }
0x2b39   :  { %v10266_v35 = vpop.xlane.xlu0 %10265  ;;  %v10285_v38 = vadd.f32 %v10263_v25, %v13453_v29 }
0x2b3a   :  { %v10286_v6 = vadd.f32 %v10266_v35, %v13453_v29 }
0x2b3b   :  { %v10304_v58 = vrot.slane %v10285_v38, %v13448_v20 }
0x2b3c   :  { %v10272_v15 = vpop.xlane.xlu1 %10271  ;;  %v10308_v0 = vrot.slane %v10286_v6, %v13451_v51 }
0x2b3d   :  { %v10269_v23 = vpop.xlane.xlu0 %10268  ;;  %v10288_v32 = vadd.f32 %v10272_v15, %v13453_v29 }
0x2b3e   :  { %v10287_v14 = vadd.f32 %v10269_v23, %v13453_v29  ;;  %v10309_v45 = vsel %vm4079_vm4, %v10308_v0, %v10304_v58 }
0x2b3f   :  { %v10317_v26 = vrot.slane %v10288_v32, %v13451_v51 }
0x2b40   :  { %v10278_v22 = vpop.xlane.xlu1 %10277  ;;  %v10313_v62 = vrot.slane %v10287_v14, %v13448_v20 }
0x2b41   :  { %v10290_v60 = vadd.f32 %v10278_v22, %v13453_v29  ;;  %v10275_v50 = vpop.xlane.xlu0 %10274 }
0x2b42   :  { %v10289_v55 = vadd.f32 %v10275_v50, %v13453_v29  ;;  %v10318_v56 = vsel %vm4079_vm4, %v10317_v26, %v10313_v62 }
0x2b43   :  { %v10326_v59 = vrot.slane %v10290_v60, %v13451_v51  ;;  %v10337_v12 = vsel %vm4108_vm5, %v10318_v56, %v10309_v45 }
0x2b44   :  { %v10322_v10 = vrot.slane %v10289_v55, %v13448_v20  ;;  %v10284_v9 = vpop.xlane.xlu1 %10283 }
0x2b45   :  { %v10292_v28 = vadd.f32 %v10284_v9, %v13453_v29  ;;  %v10281_v53 = vpop.xlane.xlu0 %10280 }
0x2b46   :  { %v10291_v47 = vadd.f32 %v10281_v53, %v13453_v29  ;;  %v10327_v63 = vsel %vm4079_vm4, %v10326_v59, %v10322_v10 }
0x2b47   :  { %v10335_v1 = vrot.slane %v10292_v28, %v13451_v51  ;;  %v10338_v52 = vsel %vm4110_vm6, %v10327_v63, %v10337_v12 }
0x2b48   :  { %v10331_v30 = vrot.slane %v10291_v47, %v13448_v20 }
0x2b4a   :  { %v10336_v61 = vsel %vm4079_vm4, %v10335_v1, %v10331_v30 }
0x2b4b   :  { %v10339_v39 = vsel %vm4112_vm7, %v10336_v61, %v10338_v52 }
0x2b4c   :  { %v10341_v25 = vsel %vm4115_vm8, %v10339_v39, -inf }
0x2b4d   :  { %10342 = vmax.xlane.f32.xlu0 %v10341_v25 }
0x2bd6   :  { %v10343_v29 = vpop.xlane.xlu0 %10342 }
0x2bd7   :  { %v10348_v35 = vrot.slane %v10343_v29, %v13185_v31  ;;  %v10352_v15 = vrot.slane %v10343_v29, %v13483_v49  ;;  %v10356_v23 = vrot.slane %v10343_v29, %v13489_v40  ;;  %v10360_v62 = vrot.slane %v10343_v29, %v13480_v37 }
0x2bd9   :  { %v10365_v22 = vsub.f32 %v10285_v38, %v10348_v35  ;;  %v10366_v50 = vsub.f32 %v10286_v6, %v10348_v35  ;;  %v10367_v26 = vsub.f32 %v10287_v14, %v10352_v15  ;;  %v10369_v59 = vsub.f32 %v10289_v55, %v10356_v23 }
0x2bda   :  { %v10368_v10 = vsub.f32 %v10288_v32, %v10352_v15  ;;  %v10371_v53 = vsub.f32 %v10291_v47, %v10360_v62  ;;  %v10370_v63 = vsub.f32 %v10290_v60, %v10356_v23  ;;  %v10372_v30 = vsub.f32 %v10292_v28, %v10360_v62 }
0x2bdb   :  { %v10373_v0 = vmul.f32 1.442695, %v10365_v22  ;;  %v10375_v58 = vmul.f32 1.442695, %v10366_v50  ;;  %v10377_v9 = vmul.f32 1.442695, %v10367_v26 }
0x2bdc   :  { %v10381_v56 = vmul.f32 1.442695, %v10369_v59  ;;  %v10379_v1 = vmul.f32 1.442695, %v10368_v10  ;;  %v10385_v45 = vmul.f32 1.442695, %v10371_v53 }
0x2bdd   :  { %12151 = vpow2.f32 %v10373_v0  ;;  %v10383_v6 = vmul.f32 1.442695, %v10370_v63  ;;  %v10387_v14 = vmul.f32 1.442695, %v10372_v30 }
0x2bde   :  { %12153 = vpow2.f32 %v10375_v58 }
0x2bdf   :  { %12155 = vpow2.f32 %v10377_v9 }
0x2be0   :  { %12157 = vpow2.f32 %v10381_v56 }
0x2be1   :  { %12159 = vpow2.f32 %v10379_v1 }
0x2be2   :  { %12161 = vpow2.f32 %v10385_v45 }
0x2be3   :  { %12163 = vpow2.f32 %v10383_v6 }
0x2be4   :  { %12165 = vpow2.f32 %v10387_v14 }
0x2bea   :  { %v12152_v38 = vpop.eup %12151 }
0x2beb   :  { %v12154_v55 = vpop.eup %12153  ;;  %10398 = vperm.xlu1 %11640, %v12152_v38  }
0x2bec   :  { %10401 = vperm.xlu0 %11639, %v12154_v55   ;;  %v12156_v32 = vpop.eup %12155 }
0x2bed   :  { %v12158_v47 = vpop.eup %12157 }
0x2bee   :  { %v12160_v60 = vpop.eup %12159 }
0x2bef   :  { %10404 = vperm.xlu1 %11640, %v12156_v32   ;;  %v12162_v12 = vpop.eup %12161 }
0x2bf0   :  { %10410 = vperm.xlu0 %11639, %v12158_v47   ;;  %v12164_v61 = vpop.eup %12163 }
0x2bf1   :  { %v12166_v28 = vpop.eup %12165 }
0x2bf3   :  { %10407 = vperm.xlu1 %11640, %v12160_v60  }
0x2bf4   :  { %10416 = vperm.xlu0 %11639, %v12162_v12  }
0x2bf7   :  { %10413 = vperm.xlu1 %11640, %v12164_v61  }
0x2bfb   :  { %10419 = vperm.xlu1 %11640, %v12166_v28  }
0x2c66   :  { %v10399_v52 = vpop.permute.xlu1 %10398 }
0x2c67   :  { %v10402_v39 = vpop.permute.xlu0 %10401  ;;  %v10424_v50 = vrot.slane %v10399_v52, %v13448_v20 }
0x2c68   :  { %v10428_v22 = vrot.slane %v10402_v39, %v13451_v51 }
0x2c6a   :  { %v10405_v25 = vpop.permute.xlu1 %10404  ;;  %v10429_v53 = vsel %vm4079_vm4, %v10428_v22, %v10424_v50 }
0x2c6b   :  { %v10411_v29 = vpop.permute.xlu0 %10410  ;;  %v10433_v26 = vrot.slane %v10405_v25, %v13448_v20 }
0x2c6c   :  { %v10442_v59 = vrot.slane %v10411_v29, %v13448_v20 }
0x2c6e   :  { %v10408_v35 = vpop.permute.xlu1 %10407 }
0x2c6f   :  { %v10437_v15 = vrot.slane %v10408_v35, %v13451_v51  ;;  %v10417_v0 = vpop.permute.xlu0 %10416 }
0x2c70   :  { %v10451_v56 = vrot.slane %v10417_v0, %v13448_v20 }
0x2c71   :  { %v10438_v58 = vsel %vm4079_vm4, %v10437_v15, %v10433_v26 }
0x2c72   :  { %v10414_v23 = vpop.permute.xlu1 %10413  ;;  %v10457_v1 = vsel %vm4108_vm5, %v10438_v58, %v10429_v53 }
0x2c73   :  { %v10446_v62 = vrot.slane %v10414_v23, %v13451_v51 }
0x2c75   :  { %v10447_v10 = vsel %vm4079_vm4, %v10446_v62, %v10442_v59  ;;  %v16214_v59 = vld [vmem:[#allocation18_spill] sm:$0xff] }
0x2c76   :  { %v10420_v9 = vpop.permute.xlu1 %10419  ;;  %v10458_v30 = vsel %vm4110_vm6, %v10447_v10, %v10457_v1  ;;  %v3571_v0 = vcombine.high %v16214_v59, %v16214_v59  ;;  %v3578_v58 = vrot.slane %v16214_v59, %v12363_v17 }
0x2c77   :  { %v10455_v63 = vrot.slane %v10420_v9, %v13451_v51 }
0x2c79   :  { %v10456_v45 = vsel %vm4079_vm4, %v10455_v63, %v10451_v56 }
0x2c7a   :  { %v10459_v6 = vsel %vm4112_vm7, %v10456_v45, %v10458_v30  ;;  %v3585_v45 = vrot.slane %v3571_v0, %v12363_v17  ;;  %v3586_v30 = vcombine.high %v3578_v58, %v3578_v58 }
0x2c7b   :  { %v10461_v14 = vsel %vm4115_vm8, %v10459_v6, 0.0  ;;  %v3570_v6 = vcombine.high %v15460_v42, %v15460_v42 }
0x2c7c   :  { %10462 = vadd.xlane.f32.xlu0 %v10461_v14  ;;  %v16215_v14 = vld [vmem:[#allocation27_spill] sm:$0xff] }
0x2d05   :  { %v10463_v52 = vpop.xlane.xlu0 %10462 }
0x2d06   :  { %12167 = vrcp.f32 %v10463_v52  ;;  %v3741_v52 = vcombine.high %v16215_v14, %v16215_v14 }
0x2d13   :  { %v12168_v39 = vpop.eup %12167 }
0x2d14   :  { %v10469_v25 = vrot.slane %v12168_v39, %v13185_v31  ;;  %v10473_v20 = vrot.slane %v12168_v39, %v13483_v49  ;;  %v10477_v35 = vrot.slane %v12168_v39, %v13489_v40  ;;  %v10481_v23 = vrot.slane %v12168_v39, %v13480_v37  ;;  %v16212_v49 = vld [vmem:[#allocation10_spill] sm:$0xff] }
0x2d15   :  { %v3238_v40 = vrot.slane %v16212_v49, %v12363_v17  ;;  %v3748_v39 = vrot.slane %v16215_v14, %v12363_v17 }
0x2d16   :  { %v10487_v29 = vmul.f32 %v12154_v55, %v10469_v25  ;;  %v10489_v51 = vmul.f32 %v12160_v60, %v10473_v20  ;;  %v10491_v15 = vmul.f32 %v12164_v61, %v10477_v35  ;;  %v10493_v22 = vmul.f32 %v12166_v28, %v10481_v23  ;;  %v16213_v28 = vld [vmem:[#allocation14_spill] sm:$0xff] }
0x2d17   :  { %v10486_v50 = vmul.f32 %v12152_v38, %v10469_v25  ;;  %v10488_v26 = vmul.f32 %v12156_v32, %v10473_v20  ;;  %v10490_v62 = vmul.f32 %v12158_v47, %v10477_v35  ;;  %v10492_v31 = vmul.f32 %v12162_v12, %v10481_v23 }
0x2d18   :  { %10501 = vperm.xlu1 %11640, %v10487_v29   ;;  %v3231_v55 = vcombine.high %v16212_v49, %v16212_v49  ;;  %v3246_v61 = vcombine.high %v3238_v40, %v3238_v40  ;;  %v3230_v38 = vcombine.high %v15468_v43, %v15468_v43  ;;  %v3401_v32 = vcombine.high %v16213_v28, %v16213_v28 }
0x2d19   :  { %v3408_v47 = vrot.slane %v16213_v28, %v12363_v17  ;;  %v3400_v43 = vcombine.high %v15451_v19, %v15451_v19  ;;  %v10583_v23 = vcombine.low %v3586_v30, %v3585_v45  ;;  %v3756_v42 = vcombine.high %v3748_v39, %v3748_v39 }
0x2d1a   :  { %v3245_v37 = vrot.slane %v3231_v55, %v12363_v17  ;;  %v3415_v9 = vrot.slane %v3401_v32, %v12363_v17  ;;  %v10534_v56 = vcombine.low %v3230_v38, %v3238_v40 }
0x2d1b   :  { %v3416_v53 = vcombine.high %v3408_v47, %v3408_v47  ;;  %v10558_v20 = vcombine.low %v3400_v43, %v3408_v47 }
0x2d1c   :  { %10511 = vperm.xlu1 %11640, %v10489_v51   ;;  %v10535_v10 = vcombine.low %v3246_v61, %v3245_v37  ;;  %v3247_v63 = vcombine.high %v3245_v37, %v3245_v37  ;;  %v10542_v29 = vrot.slane %v10534_v56, %v12363_v17  ;;  %v3417_v35 = vcombine.high %v3415_v9, %v3415_v9 }
0x2d1d   :  { %v10559_v25 = vcombine.low %v3416_v53, %v3415_v9  ;;  %v10566_v49 = vrot.slane %v10558_v20, %v12363_v17  ;;  %v3587_v37 = vcombine.high %v3585_v45, %v3585_v45 }
0x2d1e   :  { %v10549_v19 = vrot.slane %v10535_v10, %v12363_v17  ;;  %v10557_v51 = vrot.slane %v3247_v63, %v12363_v17  ;;  %v10581_v40 = vrot.slane %v3417_v35, %v12363_v17 }
0x2d1f   :  { %v10573_v55 = vrot.slane %v10559_v25, %v12363_v17  ;;  %v10605_v10 = vrot.slane %v3587_v37, %v12363_v17 }
0x2d20   :  { %10521 = vperm.xlu1 %11640, %v10491_v15  }
0x2d24   :  { %10531 = vperm.xlu1 %11640, %v10493_v22   ;;  %v3755_v22 = vrot.slane %v3741_v52, %v12363_v17 }
0x2d26   :  { %v10607_v59 = vcombine.low %v3756_v42, %v3755_v22  ;;  %v3757_v9 = vcombine.high %v3755_v22, %v3755_v22 }
0x2d28   :  { %10496 = vperm.xlu1 %11640, %v10486_v50   ;;  %v10621_v52 = vrot.slane %v10607_v59, %v12363_v17  ;;  %v10629_v25 = vrot.slane %v3757_v9, %v12363_v17 }
0x2d2c   :  { %10506 = vperm.xlu1 %11640, %v10488_v26   ;;  %v10582_v26 = vcombine.low %v3570_v6, %v3578_v58 }
0x2d2e   :  { %v10590_v47 = vrot.slane %v10582_v26, %v12363_v17 }
0x2d30   :  { %10516 = vperm.xlu1 %11640, %v10490_v62   ;;  %v3740_v62 = vcombine.high %v15477_v16, %v15477_v16  ;;  %v10574_v16 = vcombine.low %v10566_v49, %v10573_v55 }
0x2d32   :  { %v10606_v58 = vcombine.low %v3740_v62, %v3748_v39 }
0x2d34   :  { %10526 = vperm.xlu1 %11640, %v10492_v31   ;;  %v10550_v31 = vcombine.low %v10542_v29, %v10549_v19  ;;  %v10614_v14 = vrot.slane %v10606_v58, %v12363_v17 }
0x2d93   :  { %v10502_v60 = vpop.permute.xlu1 %10501 }
0x2d94   :  { %v10639_v50 = vmul.f32 %v10557_v51, %v10502_v60  ;;  %v10597_v60 = vrot.slane %v10583_v23, %v12363_v17 }
0x2d96   :  { %v10646_v28 = vsel %vm4421_vm9, %v10639_v50, 0.0  ;;  %v10598_v30 = vcombine.low %v10590_v47, %v10597_v60  ;;  %v10751_v47 = vrot.slane %v15551_v5, 1 }
0x2d97   :  { %v10512_v12 = vpop.permute.xlu1 %10511 }
0x2d98   :  { %v10641_v32 = vmul.f32 %v10581_v40, %v10512_v12 }
0x2d9a   :  { %v10654_v63 = vsel %vm4421_vm9, %v10641_v32, 0.0 }
0x2d9b   :  { %v10522_v1 = vpop.permute.xlu1 %10521 }
0x2d9c   :  { %v10643_v45 = vmul.f32 %v10605_v10, %v10522_v1  ;;  %v10622_v1 = vcombine.low %v10614_v14, %v10621_v52 }
0x2d9e   :  { %v10662_v51 = vsel %vm4421_vm9, %v10643_v45, 0.0 }
0x2d9f   :  { %v10532_v15 = vpop.permute.xlu1 %10531 }
0x2da0   :  { %v10645_v35 = vmul.f32 %v10629_v25, %v10532_v15 }
0x2da2   :  { %v10670_v55 = vsel %vm4421_vm9, %v10645_v35, 0.0 }
0x2da3   :  { %v10497_v61 = vpop.permute.xlu1 %10496 }
0x2da4   :  { %v10638_v38 = vmul.f32 %v10550_v31, %v10497_v61 }
0x2da6   :  { %v10647_v0 = vadd.f32 %v10646_v28, %v10638_v38 }
0x2da7   :  { %v10507_v53 = vpop.permute.xlu1 %10506 }
0x2da8   :  { %v10648_v43 = vrot.slane %v10647_v0, 4  ;;  %v10640_v56 = vmul.f32 %v10574_v16, %v10507_v53  ;;  %v10752_v53 = vrot.slane %v15551_v5, 2 }
0x2daa   :  { %v10649_v6 = vadd.f32 %v10648_v43, %v10647_v0  ;;  %v10655_v12 = vadd.f32 %v10654_v63, %v10640_v56 }
0x2dab   :  { %v10517_v29 = vpop.permute.xlu1 %10516 }
0x2dac   :  { %v10650_v39 = vrot.slane %v10649_v6, 2  ;;  %v10656_v19 = vrot.slane %v10655_v12, 4  ;;  %v10642_v20 = vmul.f32 %v10598_v30, %v10517_v29 }
0x2dae   :  { %v10651_v23 = vadd.f32 %v10650_v39, %v10649_v6  ;;  %v10657_v22 = vadd.f32 %v10656_v19, %v10655_v12  ;;  %v10663_v42 = vadd.f32 %v10662_v51, %v10642_v20  ;;  %v10753_v12 = vrot.slane %v15551_v5, 3 }
0x2daf   :  { %v10527_v50 = vpop.permute.xlu1 %10526 }
0x2db0   :  { %v10652_v26 = vrot.slane %v10651_v23, 1  ;;  %v10658_v62 = vrot.slane %v10657_v22, 2  ;;  %v10664_v31 = vrot.slane %v10663_v42, 4  ;;  %v10644_v49 = vmul.f32 %v10622_v1, %v10527_v50 }
0x2db2   :  { %v10653_v40 = vadd.f32 %v10652_v26, %v10651_v23  ;;  %v10659_v17 = vadd.f32 %v10658_v62, %v10657_v22  ;;  %v10665_v37 = vadd.f32 %v10664_v31, %v10663_v42  ;;  %v10671_v61 = vadd.f32 %v10670_v55, %v10644_v49 }
0x2db4   :  { %v10758_v38 = vadd.f32 %v15551_v5, %v10653_v40  ;;  %v10660_v28 = vrot.slane %v10659_v17, 1  ;;  %v10666_v32 = vrot.slane %v10665_v37, 2  ;;  %v10672_v15 = vrot.slane %v10671_v61, 4 }
0x2db6   :  { %v10762_v60 = vadd.f32 %v15482_v18, %v10758_v38  ;;  %v10661_v59 = vadd.f32 %v10660_v28, %v10659_v17  ;;  %v10667_v0 = vadd.f32 %v10666_v32, %v10665_v37  ;;  %v10673_v16 = vadd.f32 %v10672_v15, %v10671_v61 }
0x2db8   :  { %12169 = vtanh.f32 %v10762_v60  ;;  %v10759_v58 = vadd.f32 %v10751_v47, %v10661_v59  ;;  %v10668_v10 = vrot.slane %v10667_v0, 1  ;;  %v10674_v9 = vrot.slane %v10673_v16, 2  ;;  %v16216_v59 = vld [vmem:[#allocation104_spill] sm:$0xff] }
0x2db9   :  { %v11057_v51 = vmul.f32 -1.442695, %v10762_v60 }
0x2dba   :  { %v10763_v43 = vadd.f32 %v15482_v18, %v10759_v58  ;;  %v10669_v56 = vadd.f32 %v10668_v10, %v10667_v0  ;;  %v10675_v63 = vadd.f32 %v10674_v9, %v10673_v16  ;;  %v16217_v0 = vld [vmem:[#allocation103_spill] sm:$0xff] }
0x2dbc   :  { %12171 = vtanh.f32 %v10763_v43  ;;  %v10760_v45 = vadd.f32 %v10752_v53, %v10669_v56  ;;  %v10676_v30 = vrot.slane %v10675_v63, 1  ;;  %v11058_v5 = vmul.f32 -1.442695, %v10763_v43 }
0x2dbe   :  { %v10764_v6 = vadd.f32 %v15482_v18, %v10760_v45  ;;  %v10677_v14 = vadd.f32 %v10676_v30, %v10675_v63 }
0x2dc0   :  { %12173 = vtanh.f32 %v10764_v6  ;;  %v10761_v52 = vadd.f32 %v10753_v12, %v10677_v14  ;;  %v11059_v35 = vmul.f32 -1.442695, %v10764_v6 }
0x2dc2   :  { %v10765_v25 = vadd.f32 %v15482_v18, %v10761_v52 }
0x2dc4   :  { %12175 = vtanh.f32 %v10765_v25  ;;  %v11060_v18 = vmul.f32 -1.442695, %v10765_v25 }
0x2dc5   :  { %v12170_v29 = vpop.eup %12169  ;;  %12177 = vpow2.f32 %v11057_v51  ;;  %v16226_v51 = vld [vmem:[#allocation23_spill] sm:$0xff] }
0x2dc6   :  { %10802 = vrot.lane.b32.xlu0 %v12170_v29, %s12275_s24  ;;  %12179 = vpow2.f32 %v11058_v5  ;;  %v16219_v29 = vld [vmem:[#allocation106_spill] sm:$0xff] }
0x2dc7   :  { %12181 = vpow2.f32 %v11059_v35 }
0x2dc8   :  { %12183 = vpow2.f32 %v11060_v18 }
0x2dc9   :  { %v12172_v39 = vpop.eup %12171 }
0x2dca   :  { %10804 = vrot.lane.b32.xlu1 %v12172_v39, %s12275_s24  ;;  %v16220_v39 = vld [vmem:[#allocation40_spill] sm:$0xff] }
0x2dcd   :  { %v12174_v19 = vpop.eup %12173 }
0x2dce   :  { %10806 = vrot.lane.b32.xlu1 %v12174_v19, %s12275_s24  ;;  %v16221_v19 = vld [vmem:[#allocation38_spill] sm:$0xff] }
0x2dd1   :  { %v12176_v20 = vpop.eup %12175 }
0x2dd2   :  { %10808 = vrot.lane.b32.xlu1 %v12176_v20, %s12275_s24  ;;  %v12178_v23 = vpop.eup %12177  ;;  %v16222_v20 = vld [vmem:[#allocation61_spill] sm:$0xff] }
0x2dd3   :  { %v10778_v22 = vadd.f32 1.0, %v12178_v23  ;;  %v12180_v42 = vpop.eup %12179 }
0x2dd4   :  { %v10779_v1 = vadd.f32 1.0, %v12180_v42  ;;  %v12182_v50 = vpop.eup %12181 }
0x2dd5   :  { %12185 = vrcp.f32 %v10778_v22  ;;  %v10780_v26 = vadd.f32 1.0, %v12182_v50  ;;  %v12184_v62 = vpop.eup %12183 }
0x2dd6   :  { %12187 = vrcp.f32 %v10779_v1  ;;  %v10781_v31 = vadd.f32 1.0, %v12184_v62 }
0x2dd7   :  { %12189 = vrcp.f32 %v10780_v26 }
0x2dd8   :  { %12191 = vrcp.f32 %v10781_v31 }
0x2de2   :  { %v15694_v49 = vpop.eup %12185 }
0x2de3   :  { %v15698_v17 = vpop.eup %12187  ;;  %v10794_v16 = vmul.f32 %v15694_v49, %v15515_v7 }
0x2de4   :  { %v15702_v38 = vpop.eup %12189  ;;  %v10795_v9 = vmul.f32 %v15698_v17, %v15506_v27 }
0x2de5   :  { %v15706_v15 = vpop.eup %12191  ;;  %v10796_v56 = vmul.f32 %v15702_v38, %v15510_v33 }
0x2de6   :  { %v10797_v30 = vmul.f32 %v15706_v15, %v15519_v24  ;;  %v16218_v24 = vld [vmem:[#allocation105_spill] sm:$0xff] }
0x2e38   :  { %v10803_v55 = vpop.permute.xlu0 %10802 }
0x2e39   :  { %v10814_v40 = vmul.f32 %v15694_v49, %v10803_v55 }
0x2e3b   :  { %10822 = vrot.lane.b32.xlu1 %v10814_v40, %s12276_s25 }
0x2e3c   :  { %v10805_v37 = vpop.permute.xlu1 %10804 }
0x2e3d   :  { %v10815_v61 = vmul.f32 %v15698_v17, %v10805_v37 }
0x2e3f   :  { %10824 = vrot.lane.b32.xlu1 %v10815_v61, %s12276_s25 }
0x2e40   :  { %v10807_v28 = vpop.permute.xlu1 %10806 }
0x2e41   :  { %v10816_v32 = vmul.f32 %v15702_v38, %v10807_v28 }
0x2e43   :  { %10826 = vrot.lane.b32.xlu1 %v10816_v32, %s12276_s25 }
0x2e44   :  { %v10809_v47 = vpop.permute.xlu1 %10808 }
0x2e45   :  { %v10817_v60 = vmul.f32 %v15706_v15, %v10809_v47 }
0x2e47   :  { %4649 = vrot.lane.b32.xlu1 %v16216_v59, %s12276_s25  ;;  %10828 = vrot.lane.b32.xlu0 %v10817_v60, %s12276_s25 }
0x2e4b   :  { %4651 = vrot.lane.b32.xlu0 %v16217_v0, %s12276_s25 }
0x2ead   :  { %v10823_v58 = vpop.permute.xlu1 %10822 }
0x2eae   :  { %v10834_v10 = vadd.f32 %v10823_v58, %v10794_v16 }
0x2eb0   :  { %12193 = vtanh.f32 %v10834_v10 }
0x2eb1   :  { %v10825_v53 = vpop.permute.xlu1 %10824 }
0x2eb2   :  { %v10835_v43 = vadd.f32 %v10825_v53, %v10795_v9 }
0x2eb4   :  { %12195 = vtanh.f32 %v10835_v43 }
0x2eb5   :  { %v10827_v63 = vpop.permute.xlu1 %10826 }
0x2eb6   :  { %v10836_v45 = vadd.f32 %v10827_v63, %v10796_v56 }
0x2eb8   :  { %12197 = vtanh.f32 %v10836_v45 }
0x2eb9   :  { %v4650_v7 = vpop.permute.xlu1 %4649  ;;  %v10829_v6 = vpop.permute.xlu0 %10828 }
0x2eba   :  { %4662 = vst.msk [vmem:[#allocation3] sm:$0x1] %vm4661_vm12, %v4650_v7  ;;  %v10837_v12 = vadd.f32 %v10829_v6, %v10797_v30 }
0x2ebc   :  { %12199 = vtanh.f32 %v10837_v12 }
0x2ebd   :  { %v12194_v14 = vpop.eup %12193  ;;  %v4652_v27 = vpop.permute.xlu0 %4651 }
0x2ebe   :  { %10846 = vrot.lane.b32.xlu1 %v12194_v14, %s12275_s24  ;;  %4663 = vst.msk [vmem:[#allocation3 + $0x8] sm:$0x1] %vm4661_vm12, %v4652_v27 }
0x2ec1   :  { %v12196_v33 = vpop.eup %12195 }
0x2ec2   :  { %10848 = vrot.lane.b32.xlu0 %v12196_v33, %s12275_s24 }
0x2ec5   :  { %v12198_v52 = vpop.eup %12197 }
0x2ec6   :  { %10850 = vrot.lane.b32.xlu1 %v12198_v52, %s12275_s24 }
0x2ec9   :  { %v12200_v25 = vpop.eup %12199 }
0x2eca   :  { %4653 = vrot.lane.b32.xlu1 %v16218_v24, %s12276_s25  ;;  %10852 = vrot.lane.b32.xlu0 %v12200_v25, %s12275_s24  ;;  %s10887_s24 = sshll.u32 %s12277_s5, 4  ;;  %s10888_s24 = int_to_ptr.vmem [resolvable:$true] %s10887_s24 }
0x2ecb   :  { %p12253_p1 = scmp.lt.s32.totalorder %s10888_s24, %s10888_s24 }
0x2ece   :  { %5538 = vrot.lane.b32.xlu1 %v14284_v44, %s12276_s25  ;;  %4655 = vrot.lane.b32.xlu0 %v16219_v29, %s12276_s25  ;;  %v16223_v44 = vld [vmem:[#allocation48_spill] sm:$0xff] }
0x2ed2   :  { %5542 = vrot.lane.b32.xlu1 %v14286_v36, %s12276_s25  ;;  %5540 = vrot.lane.b32.xlu0 %v14282_v54, %s12276_s25  ;;  %v16224_v36 = vld [vmem:[#allocation50_spill] sm:$0xff]  ;;  %v16225_v54 = vld [vmem:[#allocation63_spill] sm:$0xff] }
0x2ed6   :  { %6426 = vrot.lane.b32.xlu1 %v16220_v39, %s12276_s25  ;;  %5544 = vrot.lane.b32.xlu0 %v16221_v19, %s12276_s25 }
0x2eda   :  { %6430 = vrot.lane.b32.xlu1 %v16222_v20, %s12276_s25  ;;  %6428 = vrot.lane.b32.xlu0 %v16223_v44, %s12276_s25 }
0x2ede   :  { %7314 = vrot.lane.b32.xlu1 %v14795_v3, %s12276_s25  ;;  %6432 = vrot.lane.b32.xlu0 %v16224_v36, %s12276_s25  ;;  %v16227_v3 = vld [vmem:[#allocation8_spill] sm:$0xff] }
0x2ee2   :  { %7318 = vrot.lane.b32.xlu1 %v14797_v2, %s12276_s25  ;;  %7316 = vrot.lane.b32.xlu0 %v14793_v13, %s12276_s25  ;;  %v16228_v2 = vld [vmem:[#allocation22_spill] sm:$0xff] }
0x2ee6   :  { %8202 = vrot.lane.b32.xlu1 %v15036_v8, %s12276_s25  ;;  %7320 = vrot.lane.b32.xlu0 %v16225_v54, %s12276_s25 }
0x2eea   :  { %8206 = vrot.lane.b32.xlu1 %v16226_v51, %s12276_s25  ;;  %8204 = vrot.lane.b32.xlu0 %v16227_v3, %s12276_s25 }
0x2eee   :  { %9090 = vrot.lane.b32.xlu1 %v15306_v34, %s12276_s25  ;;  %8208 = vrot.lane.b32.xlu0 %v16228_v2, %s12276_s25 }
0x2ef2   :  { %9094 = vrot.lane.b32.xlu1 %v15308_v46, %s12276_s25  ;;  %9092 = vrot.lane.b32.xlu0 %v15304_v11, %s12276_s25 }
0x2ef6   :  { %9978 = vrot.lane.b32.xlu1 %v15527_v57, %s12276_s25  ;;  %9096 = vrot.lane.b32.xlu0 %v15313_v4, %s12276_s25 }
0x2efa   :  { %9982 = vrot.lane.b32.xlu1 %v15529_v48, %s12276_s25  ;;  %9980 = vrot.lane.b32.xlu0 %v15525_v21, %s12276_s25 }
0x2efe   :  { %9984 = vrot.lane.b32.xlu0 %v15534_v41, %s12276_s25 }
0x2f30   :  { %v10847_v13 = vpop.permute.xlu1 %10846 }
0x2f31   :  { %v10858_v8 = vmul.f32 %v15694_v49, %v10847_v13 }
0x2f33   :  { %10866 = vrot.lane.b32.xlu1 %v10858_v8, %s12276_s25 }
0x2f34   :  { %v10849_v11 = vpop.permute.xlu0 %10848 }
0x2f35   :  { %v10859_v34 = vmul.f32 %v15698_v17, %v10849_v11 }
0x2f37   :  { %10868 = vrot.lane.b32.xlu0 %v10859_v34, %s12276_s25 }
0x2f38   :  { %v10851_v46 = vpop.permute.xlu1 %10850 }
0x2f39   :  { %v10860_v4 = vmul.f32 %v15702_v38, %v10851_v46 }
0x2f3b   :  { %10870 = vrot.lane.b32.xlu1 %v10860_v4, %s12276_s25 }
0x2f3c   :  { %v4654_v57 = vpop.permute.xlu1 %4653  ;;  %v10853_v21 = vpop.permute.xlu0 %10852 }
0x2f3d   :  { %4664 = vst.msk [vmem:[#allocation3 + $0x10] sm:$0x1] %vm4661_vm12, %v4654_v57  ;;  %v10861_v48 = vmul.f32 %v15706_v15, %v10853_v21 }
0x2f3f   :  { %10872 = vrot.lane.b32.xlu0 %v10861_v48, %s12276_s25  ;;  %s12248_s25 = scalar_lea.vmem %s10888_s24, 512 }
0x2f40   :  { %v5539_v41 = vpop.permute.xlu1 %5538  ;;  %v4656_v5 = vpop.permute.xlu0 %4655  ;;  %p12249_p0 = scmp.ne.s32.totalorder %s10888_s24, %s12248_s25  ;;  %p12254_p2 = scmp.lt.s32.totalorder %s12248_s25, %s12248_s25 }
0x2f41   :  { %5550 = vst.msk [vmem:[#allocation3 + $0x1] sm:$0x1] %vm4661_vm12, %v5539_v41  ;;  %4665 = vst.msk [vmem:[#allocation3 + $0x18] sm:$0x1] %vm4661_vm12, %v4656_v5 }
0x2f42   :  { %p12255_p3 = por %p12254_p2, %p12253_p1 }
0x2f44   :  { %v5543_v35 = vpop.permute.xlu1 %5542  ;;  %v5541_v18 = vpop.permute.xlu0 %5540  ;;  %p12256_p4 = pnand %p12255_p3, %p12249_p0 }
0x2f45   :  { %5552 = vst.msk [vmem:[#allocation3 + $0x11] sm:$0x1] %vm4661_vm12, %v5543_v35  ;;  %5551 = vst.msk [vmem:[#allocation3 + $0x9] sm:$0x1] %vm4661_vm12, %v5541_v18 }
0x2f48   :  { %v6427_v23 = vpop.permute.xlu1 %6426  ;;  %v5545_v22 = vpop.permute.xlu0 %5544 }
0x2f49   :  { %6438 = vst.msk [vmem:[#allocation3 + $0x2] sm:$0x1] %vm4661_vm12, %v6427_v23  ;;  %5553 = vst.msk [vmem:[#allocation3 + $0x19] sm:$0x1] %vm4661_vm12, %v5545_v22 }
0x2f4c   :  { %v6431_v42 = vpop.permute.xlu1 %6430  ;;  %v6429_v1 = vpop.permute.xlu0 %6428 }
0x2f4d   :  { %6440 = vst.msk [vmem:[#allocation3 + $0x12] sm:$0x1] %vm4661_vm12, %v6431_v42  ;;  %6439 = vst.msk [vmem:[#allocation3 + $0xa] sm:$0x1] %vm4661_vm12, %v6429_v1 }
0x2f50   :  { %v7315_v50 = vpop.permute.xlu1 %7314  ;;  %v6433_v26 = vpop.permute.xlu0 %6432 }
0x2f51   :  { %7326 = vst.msk [vmem:[#allocation3 + $0x3] sm:$0x1] %vm4661_vm12, %v7315_v50  ;;  %6441 = vst.msk [vmem:[#allocation3 + $0x1a] sm:$0x1] %vm4661_vm12, %v6433_v26 }
0x2f54   :  { %v7319_v62 = vpop.permute.xlu1 %7318  ;;  %v7317_v31 = vpop.permute.xlu0 %7316 }
0x2f55   :  { %7328 = vst.msk [vmem:[#allocation3 + $0x13] sm:$0x1] %vm4661_vm12, %v7319_v62  ;;  %7327 = vst.msk [vmem:[#allocation3 + $0xb] sm:$0x1] %vm4661_vm12, %v7317_v31 }
0x2f58   :  { %v8203_v49 = vpop.permute.xlu1 %8202  ;;  %v7321_v55 = vpop.permute.xlu0 %7320 }
0x2f59   :  { %8214 = vst.msk [vmem:[#allocation3 + $0x4] sm:$0x1] %vm4661_vm12, %v8203_v49  ;;  %7329 = vst.msk [vmem:[#allocation3 + $0x1b] sm:$0x1] %vm4661_vm12, %v7321_v55 }
0x2f5c   :  { %v8207_v40 = vpop.permute.xlu1 %8206  ;;  %v8205_v17 = vpop.permute.xlu0 %8204 }
0x2f5d   :  { %8216 = vst.msk [vmem:[#allocation3 + $0x14] sm:$0x1] %vm4661_vm12, %v8207_v40  ;;  %8215 = vst.msk [vmem:[#allocation3 + $0xc] sm:$0x1] %vm4661_vm12, %v8205_v17 }
0x2f60   :  { %v9091_v37 = vpop.permute.xlu1 %9090  ;;  %v8209_v61 = vpop.permute.xlu0 %8208 }
0x2f61   :  { %9102 = vst.msk [vmem:[#allocation3 + $0x5] sm:$0x1] %vm4661_vm12, %v9091_v37  ;;  %8217 = vst.msk [vmem:[#allocation3 + $0x1c] sm:$0x1] %vm4661_vm12, %v8209_v61 }
0x2f64   :  { %v9095_v38 = vpop.permute.xlu1 %9094  ;;  %v9093_v28 = vpop.permute.xlu0 %9092 }
0x2f65   :  { %9104 = vst.msk [vmem:[#allocation3 + $0x15] sm:$0x1] %vm4661_vm12, %v9095_v38  ;;  %9103 = vst.msk [vmem:[#allocation3 + $0xd] sm:$0x1] %vm4661_vm12, %v9093_v28 }
0x2f68   :  { %v9979_v32 = vpop.permute.xlu1 %9978  ;;  %v9097_v15 = vpop.permute.xlu0 %9096 }
0x2f69   :  { %9990 = vst.msk [vmem:[#allocation3 + $0x6] sm:$0x1] %vm4661_vm12, %v9979_v32  ;;  %9105 = vst.msk [vmem:[#allocation3 + $0x1d] sm:$0x1] %vm4661_vm12, %v9097_v15 }
0x2f6c   :  { %v9983_v47 = vpop.permute.xlu1 %9982  ;;  %v9981_v60 = vpop.permute.xlu0 %9980 }
0x2f6d   :  { %9992 = vst.msk [vmem:[#allocation3 + $0x16] sm:$0x1] %vm4661_vm12, %v9983_v47  ;;  %9991 = vst.msk [vmem:[#allocation3 + $0xe] sm:$0x1] %vm4661_vm12, %v9981_v60 }
0x2f70   :  { %v9985_v59 = vpop.permute.xlu0 %9984 }
0x2f71   :  { %9993 = vst.msk [vmem:[#allocation3 + $0x1e] sm:$0x1] %vm4661_vm12, %v9985_v59 }
0x2fa5   :  { %v10867_v0 = vpop.permute.xlu1 %10866 }
0x2fa6   :  { %10878 = vst.msk [vmem:[#allocation3 + $0x7] sm:$0x1] %vm4661_vm12, %v10867_v0 }
0x2fa9   :  { %v10869_v16 = vpop.permute.xlu0 %10868 }
0x2faa   :  { %10879 = vst.msk [vmem:[#allocation3 + $0xf] sm:$0x1] %vm4661_vm12, %v10869_v16 }
0x2fad   :  { %v10871_v58 = vpop.permute.xlu1 %10870 }
0x2fae   :  { %10880 = vst.msk [vmem:[#allocation3 + $0x17] sm:$0x1] %vm4661_vm12, %v10871_v58 }
0x2fb1   :  { %v10873_v10 = vpop.permute.xlu0 %10872 }
0x2fb2   :  { %10881 = vst.msk [vmem:[#allocation3 + $0x1f] sm:$0x1] %vm4661_vm12, %v10873_v10 }
0x2fb3   :  { %12259 = shalt.err (!%p12256_p4)
}
0x2fb4   :  { %s12278_s6 = smov 128   ;;  %s12279_s23 = smov 8  }
0x2fb5   :  { %10893 = dma.vmem_to_hbm [thread:$0]  %s10888_s24, 512, %s15831_s10, [#allocation4], %s12278_s6, %s12278_s6, %s12279_s23  }
0x2fb6   :  { %12268 = dma.done.wait [#allocation4], 512  }
0x2fb7   :  { %12269 = vsyncadd [#allocation4], 4294966784 }
0x2fb8   :  { %10897 = vsyncpa [#allocation4], 1 }

</bundles_post_ra>
